<compile_context>
chip_gen: v7x
topology: tpu7x:2x2x1
jax: 0.10.0
libtpu: 0.0.40
codegen_flags: <defaults>
</compile_context>

<pallas_src>
import functools

import numpy as np

import jax
import jax.numpy as jnp
from jax.experimental import pallas as pl
from jax.experimental.pallas import tpu as pltpu


def _cs_kernel(x_ref, shift_ref,
               wc1_ref, bc1_ref,          # CNNBlock.conv1x1
               w3_ref,                    # CNNBlock.conv3x3 taps (9, Co, Co)
               bns_ref, bnb_ref,          # folded BatchNorm scale / shift
               wce_ref, bce_ref,          # CNNBlock.conv1x1end (0.5 folded)
               wsp_ref, bsp_ref,          # skip_path 1x1 conv
               wdw_ref, bdw_ref,          # FFN.DConv depthwise taps / bias
               gf_ref, bf_ref,            # FFN.norm gamma / beta
               w1_ref, b1_ref,            # FFN.DCex
               w2_ref, b2_ref,            # FFN.DCre (0.5 folded)
               ga_ref, ba_ref,            # attention.norm gamma / beta
               vw_ref, vb_ref,            # attention.v
               awt_ref, abt_ref,          # attention.a weight / bias per channel
               hm_ref,                    # head membership masks (C, heads)
               sw_ref, sb_ref,            # attention.s depthwise taps / bias
               o_ref,
               *, C, heads, hw):
    f32 = jnp.float32
    inv_c = f32(1.0 / C)
    inv_hw = f32(1.0 / hw)
    inv_sqrt2 = f32(0.7071067811865476)
    att_scale = f32(heads ** -0.5)

    def tap(x, k):
        # x[:, src_k(l)] with zero padding at the image border, expressed as a
        # matmul against a precomputed (N, N) shift+mask matrix (lane-dense K/N).
        return jnp.dot(x, shift_ref[k], preferred_element_type=f32)

    def conv3x3_full(x, w_ref):            # w_ref: (9, Co, Ci)
        acc = jnp.dot(w_ref[0], tap(x, 0), preferred_element_type=f32)
        for k in range(1, 9):
            acc = acc + jnp.dot(w_ref[k], tap(x, k), preferred_element_type=f32)
        return acc

    def conv3x3_dw(x, w_ref, b_ref):       # w_ref: (C, 9), b_ref: (C, 1)
        acc = jnp.zeros_like(x)
        for k in range(9):
            acc = acc + tap(x, k) * w_ref[:, k:k + 1]
        return acc + b_ref[...]

    def layernorm(y, g_ref, b_ref):        # LN over the channel (sublane) axis
        s1 = jnp.sum(y, axis=0, keepdims=True)
        s2 = jnp.sum(y * y, axis=0, keepdims=True)
        mean = s1 * inv_c
        var = s2 * inv_c - mean * mean
        inv = jax.lax.rsqrt(var + f32(1e-5))
        return (y - mean) * inv * g_ref[...] + b_ref[...]

    def gelu2x(t):                         # 2*GELU(t); 0.5 folded into next weights
        return t * (f32(1.0) + jax.lax.erf(t * inv_sqrt2))

    # ---------------- CNNBlock + skip_path ----------------
    t = jnp.dot(wc1_ref[...], x_ref[...], preferred_element_type=f32) + bc1_ref[...]
    t = conv3x3_full(t, w3_ref)
    t = t * bns_ref[...] + bnb_ref[...]    # inference BatchNorm (+ conv3x3 bias)
    t = jnp.dot(wce_ref[...], gelu2x(t), preferred_element_type=f32) + bce_ref[...]
    t = t + jnp.dot(wsp_ref[...], x_ref[...], preferred_element_type=f32) + bsp_ref[...]
    o_ref[...] = t                         # stage output doubles as the FFN residual

    # ---------------- FFNModule ----------------
    y = conv3x3_dw(o_ref[...], wdw_ref, bdw_ref)
    y = layernorm(y, gf_ref, bf_ref)
    h = jnp.dot(w1_ref[...], y, preferred_element_type=f32) + b1_ref[...]     # (4C, N)
    z = jnp.dot(w2_ref[...], gelu2x(h), preferred_element_type=f32) + b2_ref[...]
    o_ref[...] = z + o_ref[...]

    # ---------------- SimpleAttention ----------------
    xn = layernorm(o_ref[...], ga_ref, ba_ref)                                # (C, N)
    x_tmp = jnp.sum(xn, axis=1, keepdims=True) * inv_hw                       # (C, 1)
    # Kv = v(x_tmp) computed as (vw @ xn) pooled over lanes (same by linearity).
    kv = jnp.sum(jnp.dot(vw_ref[...], xn, preferred_element_type=f32),
                 axis=1, keepdims=True) * inv_hw + vb_ref[...]                # (C, 1)
    score = jnp.zeros_like(x_tmp)
    for hh in range(heads):                # tiny static per-head loop
        m = hm_ref[:, hh:hh + 1]                                              # (C, 1)
        a_h = jnp.sum(m * kv * awt_ref[...], axis=0, keepdims=True)           # (1, 1)
        b_h = jnp.sum(m * kv * abt_ref[...], axis=0, keepdims=True)           # (1, 1)
        lg = att_scale * (x_tmp * a_h + b_h)
        lg = jnp.where(m > 0, lg, f32(-1e30))
        mx = jnp.max(lg, axis=0, keepdims=True)
        e = jnp.where(m > 0, jnp.exp(lg - mx), f32(0.0))
        score = score + e / jnp.sum(e, axis=0, keepdims=True)
    s_out = conv3x3_dw(xn, sw_ref, sb_ref)
    o_ref[...] = s_out * score + o_ref[...]


def _shift_matrices(H, W):
    """(9, N, N) matrices S_k with (x @ S_k)[c, i*W+j] = x[c, (i+a)*W+(j+b)]
    for tap k = (a+1)*3 + (b+1), zero outside the HxW image."""
    N = H * W
    i = np.arange(N) // W
    j = np.arange(N) % W
    dst = np.arange(N)
    mats = np.zeros((9, N, N), np.float32)
    k = 0
    for a in (-1, 0, 1):
        for b in (-1, 0, 1):
            si, sj = i + a, j + b
            valid = (si >= 0) & (si < H) & (sj >= 0) & (sj < W)
            src = si * W + sj
            mats[k, src[valid], dst[valid]] = 1.0
            k += 1
    return jnp.asarray(mats)


def _col(v):
    return v.reshape(-1, 1).astype(jnp.float32)


def _prep_kernel_args(p, heads):
    co = p["c1_w"].shape[0]
    dh = co // heads
    bn_scale = p["bn_g"] / jnp.sqrt(p["bn_rv"] + 1e-5)
    bn_shift = (p["c3_b"] - p["bn_rm"]) * bn_scale + p["bn_b"]   # conv3x3 bias folded
    head_mask = (jnp.arange(co)[:, None] // dh
                 == jnp.arange(heads)[None, :]).astype(jnp.float32)
    return (
        p["c1_w"].reshape(co, -1), _col(p["c1_b"]),
        jnp.transpose(p["c3_w"], (2, 3, 0, 1)).reshape(9, co, co),
        _col(bn_scale), _col(bn_shift),
        0.5 * p["ce_w"].reshape(co, co), _col(p["ce_b"]),          # GELU 0.5 folded
        p["sp_w"].reshape(co, -1), _col(p["sp_b"]),
        p["dconv_w"].reshape(co, 9), _col(p["dconv_b"]),
        _col(p["ffn_ln_g"]), _col(p["ffn_ln_b"]),
        p["dcex_w"].reshape(4 * co, co), _col(p["dcex_b"]),
        0.5 * p["dcre_w"].reshape(co, 4 * co), _col(p["dcre_b"]),  # GELU 0.5 folded
        _col(p["att_ln_g"]), _col(p["att_ln_b"]),
        p["v_w"].astype(jnp.float32), _col(p["v_b"]),
        _col(jnp.tile(p["a_w"][:, 0], heads)), _col(jnp.tile(p["a_b"], heads)),
        head_mask,
        p["s_w"].reshape(co, 9), _col(p["s_b"]),
    )


@functools.partial(jax.jit, static_argnames=("heads",))
def cs_module(x_nchw, params, *, heads):
    """CSModule forward: (B, Cin, H, W) f32 -> (B, Cout, H, W) f32."""
    B, Cin, H, W = x_nchw.shape
    Cout = params["c1_w"].shape[0]
    N = H * W
    args = (_shift_matrices(H, W),) + _prep_kernel_args(params, heads)

    def const_spec(a):
        return pl.BlockSpec(a.shape, lambda b, _n=a.ndim: (0,) * _n)

    out = pl.pallas_call(
        functools.partial(_cs_kernel, C=Cout, heads=heads, hw=N),
        out_shape=jax.ShapeDtypeStruct((B, Cout, N), jnp.float32),
        grid_spec=pltpu.PrefetchScalarGridSpec(
            num_scalar_prefetch=0,
            grid=(B,),
            in_specs=[pl.BlockSpec((None, Cin, N), lambda b: (b, 0, 0))]
                     + [const_spec(a) for a in args],
            out_specs=pl.BlockSpec((None, Cout, N), lambda b: (b, 0, 0)),
        ),
        compiler_params=pltpu.CompilerParams(
            dimension_semantics=("parallel",),
            vmem_limit_bytes=32 * 1024 * 1024),
    )(x_nchw.reshape(B, Cin, N), *args)
    return out.reshape(B, Cout, H, W)


def _ref_forward(x, p, heads):
    """Pure-JAX reference mirroring the PyTorch CSModule forward."""
    def conv(x, w, b, groups=1):
        y = jax.lax.conv_general_dilated(
            x, w, window_strides=(1, 1), padding="SAME",
            dimension_numbers=("NCHW", "OIHW", "NCHW"),
            feature_group_count=groups)
        return y + b.reshape(1, -1, 1, 1)

    def ln_c(x, g, b):                     # LayerNorm over the channel dim
        xt = jnp.transpose(x, (0, 2, 3, 1))
        mu = jnp.mean(xt, axis=-1, keepdims=True)
        var = jnp.mean((xt - mu) ** 2, axis=-1, keepdims=True)
        xt = (xt - mu) / jnp.sqrt(var + 1e-5) * g + b
        return jnp.transpose(xt, (0, 3, 1, 2))

    gelu = lambda t: jax.nn.gelu(t, approximate=False)
    B = x.shape[0]

    # CNNBlock + skip_path
    t = conv(x, p["c1_w"], p["c1_b"])
    t = conv(t, p["c3_w"], p["c3_b"])
    t = ((t - p["bn_rm"].reshape(1, -1, 1, 1))
         / jnp.sqrt(p["bn_rv"].reshape(1, -1, 1, 1) + 1e-5)
         * p["bn_g"].reshape(1, -1, 1, 1) + p["bn_b"].reshape(1, -1, 1, 1))
    t = conv(gelu(t), p["ce_w"], p["ce_b"])
    y = t + conv(x, p["sp_w"], p["sp_b"])
    C = y.shape[1]

    # FFNModule
    d = conv(y, p["dconv_w"], p["dconv_b"], groups=C)
    d = ln_c(d, p["ffn_ln_g"], p["ffn_ln_b"])
    h = conv(d, p["dcex_w"], p["dcex_b"])
    y = conv(gelu(h), p["dcre_w"], p["dcre_b"]) + y

    # SimpleAttention
    dh = C // heads
    xn = ln_c(y, p["att_ln_g"], p["att_ln_b"])
    x_tmp = jnp.mean(xn, axis=(2, 3), keepdims=True).reshape(B, C, 1)
    ka = (x_tmp @ p["a_w"].T + p["a_b"]).reshape(B, heads, dh, dh)
    kv = jnp.transpose(x_tmp, (0, 2, 1)) @ p["v_w"].T + p["v_b"]
    kv = jnp.transpose(kv.reshape(B, 1, heads, dh), (0, 2, 1, 3))
    logits = (kv @ jnp.swapaxes(ka, -1, -2)) * (heads ** -0.5)
    score = jax.nn.softmax(logits, axis=-1)
    score = jnp.transpose(score, (0, 2, 1, 3)).reshape(B, C, 1, 1)
    s_out = conv(xn, p["s_w"], p["s_b"], groups=C)
    return s_out * score + y


if __name__ == "__main__":
    B, Cin, Cout, H, W, heads = 2, 4, 8, 16, 16, 2

    key = jax.random.PRNGKey(0)
    ks = iter(jax.random.split(key, 32))
    nrm = lambda shape, s=0.1: s * jax.random.normal(next(ks), shape, jnp.float32)

    params = dict(
        c1_w=nrm((Cout, Cin, 1, 1)), c1_b=nrm((Cout,)),
        c3_w=nrm((Cout, Cout, 3, 3)), c3_b=nrm((Cout,)),
        bn_g=1.0 + nrm((Cout,)), bn_b=nrm((Cout,)),
        bn_rm=nrm((Cout,)),
        bn_rv=1.0 + 0.1 * jax.random.uniform(next(ks), (Cout,), jnp.float32),
        ce_w=nrm((Cout, Cout, 1, 1)), ce_b=nrm((Cout,)),
        sp_w=nrm((Cout, Cin, 1, 1)), sp_b=nrm((Cout,)),
        dconv_w=nrm((Cout, 1, 3, 3)), dconv_b=nrm((Cout,)),
        ffn_ln_g=1.0 + nrm((Cout,)), ffn_ln_b=nrm((Cout,)),
        dcex_w=nrm((4 * Cout, Cout, 1, 1)), dcex_b=nrm((4 * Cout,)),
        dcre_w=nrm((Cout, 4 * Cout, 1, 1)), dcre_b=nrm((Cout,)),
        att_ln_g=1.0 + nrm((Cout,)), att_ln_b=nrm((Cout,)),
        v_w=nrm((Cout, Cout)), v_b=nrm((Cout,)),
        a_w=nrm((Cout // heads, 1)), a_b=nrm((Cout // heads,)),
        s_w=nrm((Cout, 1, 3, 3)), s_b=nrm((Cout,)),
    )
    x = jax.random.normal(next(ks), (B, Cin, H, W), jnp.float32)

    out = jax.block_until_ready(cs_module(x, params, heads=heads))
    ref = _ref_forward(x, params, heads)

    assert out.shape == (B, Cout, H, W)
    max_err = float(jnp.max(jnp.abs(out - ref)))
    assert jnp.allclose(out, ref, atol=5e-4, rtol=5e-4), max_err
    print("KERNEL_OK")
</pallas_src>

<mosaic_0001>
module attributes {stable_mosaic.version = 11 : i64} {
  func.func @_cs_kernel(%arg0: i32, %arg1: memref<1x4x256xf32, #tpu.memory_space<vmem>>, %arg2: memref<9x256x256xf32, #tpu.memory_space<vmem>>, %arg3: memref<8x4xf32, #tpu.memory_space<vmem>>, %arg4: memref<8x1xf32, #tpu.memory_space<vmem>>, %arg5: memref<9x8x8xf32, #tpu.memory_space<vmem>>, %arg6: memref<8x1xf32, #tpu.memory_space<vmem>>, %arg7: memref<8x1xf32, #tpu.memory_space<vmem>>, %arg8: memref<8x8xf32, #tpu.memory_space<vmem>>, %arg9: memref<8x1xf32, #tpu.memory_space<vmem>>, %arg10: memref<8x4xf32, #tpu.memory_space<vmem>>, %arg11: memref<8x1xf32, #tpu.memory_space<vmem>>, %arg12: memref<8x9xf32, #tpu.memory_space<vmem>>, %arg13: memref<8x1xf32, #tpu.memory_space<vmem>>, %arg14: memref<8x1xf32, #tpu.memory_space<vmem>>, %arg15: memref<8x1xf32, #tpu.memory_space<vmem>>, %arg16: memref<32x8xf32, #tpu.memory_space<vmem>>, %arg17: memref<32x1xf32, #tpu.memory_space<vmem>>, %arg18: memref<8x32xf32, #tpu.memory_space<vmem>>, %arg19: memref<8x1xf32, #tpu.memory_space<vmem>>, %arg20: memref<8x1xf32, #tpu.memory_space<vmem>>, %arg21: memref<8x1xf32, #tpu.memory_space<vmem>>, %arg22: memref<8x8xf32, #tpu.memory_space<vmem>>, %arg23: memref<8x1xf32, #tpu.memory_space<vmem>>, %arg24: memref<8x1xf32, #tpu.memory_space<vmem>>, %arg25: memref<8x1xf32, #tpu.memory_space<vmem>>, %arg26: memref<8x2xf32, #tpu.memory_space<vmem>>, %arg27: memref<8x9xf32, #tpu.memory_space<vmem>>, %arg28: memref<8x1xf32, #tpu.memory_space<vmem>>, %arg29: memref<1x8x256xf32, #tpu.memory_space<vmem>>) attributes {dimension_semantics = [#tpu.dimension_semantics<parallel>], iteration_bounds = array<i64: 2>, scalar_prefetch = 0 : i64, scratch_operands = 0 : i64, tpu.core_type = #tpu.core_type<tc>, window_params = [{transform_indices = @transform_0, window_bounds = array<i64: 1, 4, 256>}, {pipeline_mode = #tpu.pipeline_mode<synchronous>, transform_indices = @transform_1, window_bounds = array<i64: 9, 256, 256>}, {pipeline_mode = #tpu.pipeline_mode<synchronous>, transform_indices = @transform_2, window_bounds = array<i64: 8, 4>}, {pipeline_mode = #tpu.pipeline_mode<synchronous>, transform_indices = @transform_3, window_bounds = array<i64: 8, 1>}, {pipeline_mode = #tpu.pipeline_mode<synchronous>, transform_indices = @transform_4, window_bounds = array<i64: 9, 8, 8>}, {pipeline_mode = #tpu.pipeline_mode<synchronous>, transform_indices = @transform_5, window_bounds = array<i64: 8, 1>}, {pipeline_mode = #tpu.pipeline_mode<synchronous>, transform_indices = @transform_6, window_bounds = array<i64: 8, 1>}, {pipeline_mode = #tpu.pipeline_mode<synchronous>, transform_indices = @transform_7, window_bounds = array<i64: 8, 8>}, {pipeline_mode = #tpu.pipeline_mode<synchronous>, transform_indices = @transform_8, window_bounds = array<i64: 8, 1>}, {pipeline_mode = #tpu.pipeline_mode<synchronous>, transform_indices = @transform_9, window_bounds = array<i64: 8, 4>}, {pipeline_mode = #tpu.pipeline_mode<synchronous>, transform_indices = @transform_10, window_bounds = array<i64: 8, 1>}, {pipeline_mode = #tpu.pipeline_mode<synchronous>, transform_indices = @transform_11, window_bounds = array<i64: 8, 9>}, {pipeline_mode = #tpu.pipeline_mode<synchronous>, transform_indices = @transform_12, window_bounds = array<i64: 8, 1>}, {pipeline_mode = #tpu.pipeline_mode<synchronous>, transform_indices = @transform_13, window_bounds = array<i64: 8, 1>}, {pipeline_mode = #tpu.pipeline_mode<synchronous>, transform_indices = @transform_14, window_bounds = array<i64: 8, 1>}, {pipeline_mode = #tpu.pipeline_mode<synchronous>, transform_indices = @transform_15, window_bounds = array<i64: 32, 8>}, {pipeline_mode = #tpu.pipeline_mode<synchronous>, transform_indices = @transform_16, window_bounds = array<i64: 32, 1>}, {pipeline_mode = #tpu.pipeline_mode<synchronous>, transform_indices = @transform_17, window_bounds = array<i64: 8, 32>}, {pipeline_mode = #tpu.pipeline_mode<synchronous>, transform_indices = @transform_18, window_bounds = array<i64: 8, 1>}, {pipeline_mode = #tpu.pipeline_mode<synchronous>, transform_indices = @transform_19, window_bounds = array<i64: 8, 1>}, {pipeline_mode = #tpu.pipeline_mode<synchronous>, transform_indices = @transform_20, window_bounds = array<i64: 8, 1>}, {pipeline_mode = #tpu.pipeline_mode<synchronous>, transform_indices = @transform_21, window_bounds = array<i64: 8, 8>}, {pipeline_mode = #tpu.pipeline_mode<synchronous>, transform_indices = @transform_22, window_bounds = array<i64: 8, 1>}, {pipeline_mode = #tpu.pipeline_mode<synchronous>, transform_indices = @transform_23, window_bounds = array<i64: 8, 1>}, {pipeline_mode = #tpu.pipeline_mode<synchronous>, transform_indices = @transform_24, window_bounds = array<i64: 8, 1>}, {pipeline_mode = #tpu.pipeline_mode<synchronous>, transform_indices = @transform_25, window_bounds = array<i64: 8, 2>}, {pipeline_mode = #tpu.pipeline_mode<synchronous>, transform_indices = @transform_26, window_bounds = array<i64: 8, 9>}, {pipeline_mode = #tpu.pipeline_mode<synchronous>, transform_indices = @transform_27, window_bounds = array<i64: 8, 1>}, {transform_indices = @transform_28, window_bounds = array<i64: 1, 8, 256>}]} {
    %c0 = arith.constant 0 : index
    %c0_0 = arith.constant 0 : index
    %0 = vector.load %arg3[%c0, %c0_0] : memref<8x4xf32, #tpu.memory_space<vmem>>, vector<8x4xf32>
    %c0_1 = arith.constant 0 : index
    %c0_2 = arith.constant 0 : index
    %c0_3 = arith.constant 0 : index
    %1 = vector.load %arg1[%c0_1, %c0_2, %c0_3] : memref<1x4x256xf32, #tpu.memory_space<vmem>>, vector<1x4x256xf32>
    %2 = vector.shape_cast %1 : vector<1x4x256xf32> to vector<4x256xf32>
    %cst = arith.constant dense<0.000000e+00> : vector<8x256xf32>
    %3 = tpu.matmul %0, %2, %cst {dimension_numbers = #tpu.dot_dimension_numbers<[1], [0], [0], [1], [0, 0, 1, 1], [], []>} : vector<8x4xf32>, vector<4x256xf32>, vector<8x256xf32> -> vector<8x256xf32>
    %c0_4 = arith.constant 0 : index
    %c0_5 = arith.constant 0 : index
    %4 = vector.load %arg4[%c0_4, %c0_5] : memref<8x1xf32, #tpu.memory_space<vmem>>, vector<8x1xf32>
    %5 = vector.broadcast %4 : vector<8x1xf32> to vector<8x256xf32>
    %6 = arith.addf %3, %5 : vector<8x256xf32>
    %c0_6 = arith.constant 0 : index
    %c0_7 = arith.constant 0 : index
    %c0_8 = arith.constant 0 : index
    %7 = vector.load %arg5[%c0_6, %c0_7, %c0_8] : memref<9x8x8xf32, #tpu.memory_space<vmem>>, vector<1x8x8xf32>
    %8 = vector.shape_cast %7 : vector<1x8x8xf32> to vector<8x8xf32>
    %c0_9 = arith.constant 0 : index
    %c0_10 = arith.constant 0 : index
    %c0_11 = arith.constant 0 : index
    %9 = vector.load %arg2[%c0_9, %c0_10, %c0_11] : memref<9x256x256xf32, #tpu.memory_space<vmem>>, vector<1x256x256xf32>
    %10 = vector.shape_cast %9 : vector<1x256x256xf32> to vector<256x256xf32>
    %cst_12 = arith.constant dense<0.000000e+00> : vector<8x256xf32>
    %11 = tpu.matmul %6, %10, %cst_12 {dimension_numbers = #tpu.dot_dimension_numbers<[1], [0], [0], [1], [0, 0, 1, 1], [], []>} : vector<8x256xf32>, vector<256x256xf32>, vector<8x256xf32> -> vector<8x256xf32>
    %cst_13 = arith.constant dense<0.000000e+00> : vector<8x256xf32>
    %12 = tpu.matmul %8, %11, %cst_13 {dimension_numbers = #tpu.dot_dimension_numbers<[1], [0], [0], [1], [0, 0, 1, 1], [], []>} : vector<8x8xf32>, vector<8x256xf32>, vector<8x256xf32> -> vector<8x256xf32>
    %c1 = arith.constant 1 : index
    %c0_14 = arith.constant 0 : index
    %c0_15 = arith.constant 0 : index
    %13 = vector.load %arg5[%c1, %c0_14, %c0_15] : memref<9x8x8xf32, #tpu.memory_space<vmem>>, vector<1x8x8xf32>
    %14 = vector.shape_cast %13 : vector<1x8x8xf32> to vector<8x8xf32>
    %c1_16 = arith.constant 1 : index
    %c0_17 = arith.constant 0 : index
    %c0_18 = arith.constant 0 : index
    %15 = vector.load %arg2[%c1_16, %c0_17, %c0_18] : memref<9x256x256xf32, #tpu.memory_space<vmem>>, vector<1x256x256xf32>
    %16 = vector.shape_cast %15 : vector<1x256x256xf32> to vector<256x256xf32>
    %cst_19 = arith.constant dense<0.000000e+00> : vector<8x256xf32>
    %17 = tpu.matmul %6, %16, %cst_19 {dimension_numbers = #tpu.dot_dimension_numbers<[1], [0], [0], [1], [0, 0, 1, 1], [], []>} : vector<8x256xf32>, vector<256x256xf32>, vector<8x256xf32> -> vector<8x256xf32>
    %cst_20 = arith.constant dense<0.000000e+00> : vector<8x256xf32>
    %18 = tpu.matmul %14, %17, %cst_20 {dimension_numbers = #tpu.dot_dimension_numbers<[1], [0], [0], [1], [0, 0, 1, 1], [], []>} : vector<8x8xf32>, vector<8x256xf32>, vector<8x256xf32> -> vector<8x256xf32>
    %19 = arith.addf %12, %18 : vector<8x256xf32>
    %c2 = arith.constant 2 : index
    %c0_21 = arith.constant 0 : index
    %c0_22 = arith.constant 0 : index
    %20 = vector.load %arg5[%c2, %c0_21, %c0_22] : memref<9x8x8xf32, #tpu.memory_space<vmem>>, vector<1x8x8xf32>
    %21 = vector.shape_cast %20 : vector<1x8x8xf32> to vector<8x8xf32>
    %c2_23 = arith.constant 2 : index
    %c0_24 = arith.constant 0 : index
    %c0_25 = arith.constant 0 : index
    %22 = vector.load %arg2[%c2_23, %c0_24, %c0_25] : memref<9x256x256xf32, #tpu.memory_space<vmem>>, vector<1x256x256xf32>
    %23 = vector.shape_cast %22 : vector<1x256x256xf32> to vector<256x256xf32>
    %cst_26 = arith.constant dense<0.000000e+00> : vector<8x256xf32>
    %24 = tpu.matmul %6, %23, %cst_26 {dimension_numbers = #tpu.dot_dimension_numbers<[1], [0], [0], [1], [0, 0, 1, 1], [], []>} : vector<8x256xf32>, vector<256x256xf32>, vector<8x256xf32> -> vector<8x256xf32>
    %cst_27 = arith.constant dense<0.000000e+00> : vector<8x256xf32>
    %25 = tpu.matmul %21, %24, %cst_27 {dimension_numbers = #tpu.dot_dimension_numbers<[1], [0], [0], [1], [0, 0, 1, 1], [], []>} : vector<8x8xf32>, vector<8x256xf32>, vector<8x256xf32> -> vector<8x256xf32>
    %26 = arith.addf %19, %25 : vector<8x256xf32>
    %c3 = arith.constant 3 : index
    %c0_28 = arith.constant 0 : index
    %c0_29 = arith.constant 0 : index
    %27 = vector.load %arg5[%c3, %c0_28, %c0_29] : memref<9x8x8xf32, #tpu.memory_space<vmem>>, vector<1x8x8xf32>
    %28 = vector.shape_cast %27 : vector<1x8x8xf32> to vector<8x8xf32>
    %c3_30 = arith.constant 3 : index
    %c0_31 = arith.constant 0 : index
    %c0_32 = arith.constant 0 : index
    %29 = vector.load %arg2[%c3_30, %c0_31, %c0_32] : memref<9x256x256xf32, #tpu.memory_space<vmem>>, vector<1x256x256xf32>
    %30 = vector.shape_cast %29 : vector<1x256x256xf32> to vector<256x256xf32>
    %cst_33 = arith.constant dense<0.000000e+00> : vector<8x256xf32>
    %31 = tpu.matmul %6, %30, %cst_33 {dimension_numbers = #tpu.dot_dimension_numbers<[1], [0], [0], [1], [0, 0, 1, 1], [], []>} : vector<8x256xf32>, vector<256x256xf32>, vector<8x256xf32> -> vector<8x256xf32>
    %cst_34 = arith.constant dense<0.000000e+00> : vector<8x256xf32>
    %32 = tpu.matmul %28, %31, %cst_34 {dimension_numbers = #tpu.dot_dimension_numbers<[1], [0], [0], [1], [0, 0, 1, 1], [], []>} : vector<8x8xf32>, vector<8x256xf32>, vector<8x256xf32> -> vector<8x256xf32>
    %33 = arith.addf %26, %32 : vector<8x256xf32>
    %c4 = arith.constant 4 : index
    %c0_35 = arith.constant 0 : index
    %c0_36 = arith.constant 0 : index
    %34 = vector.load %arg5[%c4, %c0_35, %c0_36] : memref<9x8x8xf32, #tpu.memory_space<vmem>>, vector<1x8x8xf32>
    %35 = vector.shape_cast %34 : vector<1x8x8xf32> to vector<8x8xf32>
    %c4_37 = arith.constant 4 : index
    %c0_38 = arith.constant 0 : index
    %c0_39 = arith.constant 0 : index
    %36 = vector.load %arg2[%c4_37, %c0_38, %c0_39] : memref<9x256x256xf32, #tpu.memory_space<vmem>>, vector<1x256x256xf32>
    %37 = vector.shape_cast %36 : vector<1x256x256xf32> to vector<256x256xf32>
    %cst_40 = arith.constant dense<0.000000e+00> : vector<8x256xf32>
    %38 = tpu.matmul %6, %37, %cst_40 {dimension_numbers = #tpu.dot_dimension_numbers<[1], [0], [0], [1], [0, 0, 1, 1], [], []>} : vector<8x256xf32>, vector<256x256xf32>, vector<8x256xf32> -> vector<8x256xf32>
    %cst_41 = arith.constant dense<0.000000e+00> : vector<8x256xf32>
    %39 = tpu.matmul %35, %38, %cst_41 {dimension_numbers = #tpu.dot_dimension_numbers<[1], [0], [0], [1], [0, 0, 1, 1], [], []>} : vector<8x8xf32>, vector<8x256xf32>, vector<8x256xf32> -> vector<8x256xf32>
    %40 = arith.addf %33, %39 : vector<8x256xf32>
    %c5 = arith.constant 5 : index
    %c0_42 = arith.constant 0 : index
    %c0_43 = arith.constant 0 : index
    %41 = vector.load %arg5[%c5, %c0_42, %c0_43] : memref<9x8x8xf32, #tpu.memory_space<vmem>>, vector<1x8x8xf32>
    %42 = vector.shape_cast %41 : vector<1x8x8xf32> to vector<8x8xf32>
    %c5_44 = arith.constant 5 : index
    %c0_45 = arith.constant 0 : index
    %c0_46 = arith.constant 0 : index
    %43 = vector.load %arg2[%c5_44, %c0_45, %c0_46] : memref<9x256x256xf32, #tpu.memory_space<vmem>>, vector<1x256x256xf32>
    %44 = vector.shape_cast %43 : vector<1x256x256xf32> to vector<256x256xf32>
    %cst_47 = arith.constant dense<0.000000e+00> : vector<8x256xf32>
    %45 = tpu.matmul %6, %44, %cst_47 {dimension_numbers = #tpu.dot_dimension_numbers<[1], [0], [0], [1], [0, 0, 1, 1], [], []>} : vector<8x256xf32>, vector<256x256xf32>, vector<8x256xf32> -> vector<8x256xf32>
    %cst_48 = arith.constant dense<0.000000e+00> : vector<8x256xf32>
    %46 = tpu.matmul %42, %45, %cst_48 {dimension_numbers = #tpu.dot_dimension_numbers<[1], [0], [0], [1], [0, 0, 1, 1], [], []>} : vector<8x8xf32>, vector<8x256xf32>, vector<8x256xf32> -> vector<8x256xf32>
    %47 = arith.addf %40, %46 : vector<8x256xf32>
    %c6 = arith.constant 6 : index
    %c0_49 = arith.constant 0 : index
    %c0_50 = arith.constant 0 : index
    %48 = vector.load %arg5[%c6, %c0_49, %c0_50] : memref<9x8x8xf32, #tpu.memory_space<vmem>>, vector<1x8x8xf32>
    %49 = vector.shape_cast %48 : vector<1x8x8xf32> to vector<8x8xf32>
    %c6_51 = arith.constant 6 : index
    %c0_52 = arith.constant 0 : index
    %c0_53 = arith.constant 0 : index
    %50 = vector.load %arg2[%c6_51, %c0_52, %c0_53] : memref<9x256x256xf32, #tpu.memory_space<vmem>>, vector<1x256x256xf32>
    %51 = vector.shape_cast %50 : vector<1x256x256xf32> to vector<256x256xf32>
    %cst_54 = arith.constant dense<0.000000e+00> : vector<8x256xf32>
    %52 = tpu.matmul %6, %51, %cst_54 {dimension_numbers = #tpu.dot_dimension_numbers<[1], [0], [0], [1], [0, 0, 1, 1], [], []>} : vector<8x256xf32>, vector<256x256xf32>, vector<8x256xf32> -> vector<8x256xf32>
    %cst_55 = arith.constant dense<0.000000e+00> : vector<8x256xf32>
    %53 = tpu.matmul %49, %52, %cst_55 {dimension_numbers = #tpu.dot_dimension_numbers<[1], [0], [0], [1], [0, 0, 1, 1], [], []>} : vector<8x8xf32>, vector<8x256xf32>, vector<8x256xf32> -> vector<8x256xf32>
    %54 = arith.addf %47, %53 : vector<8x256xf32>
    %c7 = arith.constant 7 : index
    %c0_56 = arith.constant 0 : index
    %c0_57 = arith.constant 0 : index
    %55 = vector.load %arg5[%c7, %c0_56, %c0_57] : memref<9x8x8xf32, #tpu.memory_space<vmem>>, vector<1x8x8xf32>
    %56 = vector.shape_cast %55 : vector<1x8x8xf32> to vector<8x8xf32>
    %c7_58 = arith.constant 7 : index
    %c0_59 = arith.constant 0 : index
    %c0_60 = arith.constant 0 : index
    %57 = vector.load %arg2[%c7_58, %c0_59, %c0_60] : memref<9x256x256xf32, #tpu.memory_space<vmem>>, vector<1x256x256xf32>
    %58 = vector.shape_cast %57 : vector<1x256x256xf32> to vector<256x256xf32>
    %cst_61 = arith.constant dense<0.000000e+00> : vector<8x256xf32>
    %59 = tpu.matmul %6, %58, %cst_61 {dimension_numbers = #tpu.dot_dimension_numbers<[1], [0], [0], [1], [0, 0, 1, 1], [], []>} : vector<8x256xf32>, vector<256x256xf32>, vector<8x256xf32> -> vector<8x256xf32>
    %cst_62 = arith.constant dense<0.000000e+00> : vector<8x256xf32>
    %60 = tpu.matmul %56, %59, %cst_62 {dimension_numbers = #tpu.dot_dimension_numbers<[1], [0], [0], [1], [0, 0, 1, 1], [], []>} : vector<8x8xf32>, vector<8x256xf32>, vector<8x256xf32> -> vector<8x256xf32>
    %61 = arith.addf %54, %60 : vector<8x256xf32>
    %c8 = arith.constant 8 : index
    %c0_63 = arith.constant 0 : index
    %c0_64 = arith.constant 0 : index
    %62 = vector.load %arg5[%c8, %c0_63, %c0_64] : memref<9x8x8xf32, #tpu.memory_space<vmem>>, vector<1x8x8xf32>
    %63 = vector.shape_cast %62 : vector<1x8x8xf32> to vector<8x8xf32>
    %c8_65 = arith.constant 8 : index
    %c0_66 = arith.constant 0 : index
    %c0_67 = arith.constant 0 : index
    %64 = vector.load %arg2[%c8_65, %c0_66, %c0_67] : memref<9x256x256xf32, #tpu.memory_space<vmem>>, vector<1x256x256xf32>
    %65 = vector.shape_cast %64 : vector<1x256x256xf32> to vector<256x256xf32>
    %cst_68 = arith.constant dense<0.000000e+00> : vector<8x256xf32>
    %66 = tpu.matmul %6, %65, %cst_68 {dimension_numbers = #tpu.dot_dimension_numbers<[1], [0], [0], [1], [0, 0, 1, 1], [], []>} : vector<8x256xf32>, vector<256x256xf32>, vector<8x256xf32> -> vector<8x256xf32>
    %cst_69 = arith.constant dense<0.000000e+00> : vector<8x256xf32>
    %67 = tpu.matmul %63, %66, %cst_69 {dimension_numbers = #tpu.dot_dimension_numbers<[1], [0], [0], [1], [0, 0, 1, 1], [], []>} : vector<8x8xf32>, vector<8x256xf32>, vector<8x256xf32> -> vector<8x256xf32>
    %68 = arith.addf %61, %67 : vector<8x256xf32>
    %c0_70 = arith.constant 0 : index
    %c0_71 = arith.constant 0 : index
    %69 = vector.load %arg6[%c0_70, %c0_71] : memref<8x1xf32, #tpu.memory_space<vmem>>, vector<8x1xf32>
    %70 = vector.broadcast %69 : vector<8x1xf32> to vector<8x256xf32>
    %71 = arith.mulf %68, %70 : vector<8x256xf32>
    %c0_72 = arith.constant 0 : index
    %c0_73 = arith.constant 0 : index
    %72 = vector.load %arg7[%c0_72, %c0_73] : memref<8x1xf32, #tpu.memory_space<vmem>>, vector<8x1xf32>
    %73 = vector.broadcast %72 : vector<8x1xf32> to vector<8x256xf32>
    %74 = arith.addf %71, %73 : vector<8x256xf32>
    %c0_74 = arith.constant 0 : index
    %c0_75 = arith.constant 0 : index
    %75 = vector.load %arg8[%c0_74, %c0_75] : memref<8x8xf32, #tpu.memory_space<vmem>>, vector<8x8xf32>
    %cst_76 = arith.constant 0.707106769 : f32
    %76 = vector.broadcast %cst_76 : f32 to vector<8x256xf32>
    %77 = arith.mulf %74, %76 : vector<8x256xf32>
    %78 = math.erf %77 : vector<8x256xf32>
    %cst_77 = arith.constant 1.000000e+00 : f32
    %79 = vector.broadcast %cst_77 : f32 to vector<8x256xf32>
    %80 = arith.addf %79, %78 : vector<8x256xf32>
    %81 = arith.mulf %74, %80 : vector<8x256xf32>
    %cst_78 = arith.constant dense<0.000000e+00> : vector<8x256xf32>
    %82 = tpu.matmul %75, %81, %cst_78 {dimension_numbers = #tpu.dot_dimension_numbers<[1], [0], [0], [1], [0, 0, 1, 1], [], []>} : vector<8x8xf32>, vector<8x256xf32>, vector<8x256xf32> -> vector<8x256xf32>
    %c0_79 = arith.constant 0 : index
    %c0_80 = arith.constant 0 : index
    %83 = vector.load %arg9[%c0_79, %c0_80] : memref<8x1xf32, #tpu.memory_space<vmem>>, vector<8x1xf32>
    %84 = vector.broadcast %83 : vector<8x1xf32> to vector<8x256xf32>
    %85 = arith.addf %82, %84 : vector<8x256xf32>
    %c0_81 = arith.constant 0 : index
    %c0_82 = arith.constant 0 : index
    %86 = vector.load %arg10[%c0_81, %c0_82] : memref<8x4xf32, #tpu.memory_space<vmem>>, vector<8x4xf32>
    %c0_83 = arith.constant 0 : index
    %c0_84 = arith.constant 0 : index
    %c0_85 = arith.constant 0 : index
    %87 = vector.load %arg1[%c0_83, %c0_84, %c0_85] : memref<1x4x256xf32, #tpu.memory_space<vmem>>, vector<1x4x256xf32>
    %88 = vector.shape_cast %87 : vector<1x4x256xf32> to vector<4x256xf32>
    %cst_86 = arith.constant dense<0.000000e+00> : vector<8x256xf32>
    %89 = tpu.matmul %86, %88, %cst_86 {dimension_numbers = #tpu.dot_dimension_numbers<[1], [0], [0], [1], [0, 0, 1, 1], [], []>} : vector<8x4xf32>, vector<4x256xf32>, vector<8x256xf32> -> vector<8x256xf32>
    %90 = arith.addf %85, %89 : vector<8x256xf32>
    %c0_87 = arith.constant 0 : index
    %c0_88 = arith.constant 0 : index
    %91 = vector.load %arg11[%c0_87, %c0_88] : memref<8x1xf32, #tpu.memory_space<vmem>>, vector<8x1xf32>
    %92 = vector.broadcast %91 : vector<8x1xf32> to vector<8x256xf32>
    %93 = arith.addf %90, %92 : vector<8x256xf32>
    %c0_89 = arith.constant 0 : index
    %c0_90 = arith.constant 0 : index
    %c0_91 = arith.constant 0 : index
    %94 = vector.load %arg29[%c0_89, %c0_90, %c0_91] : memref<1x8x256xf32, #tpu.memory_space<vmem>>, vector<1x8x256xf32>
    %95 = vector.shape_cast %94 : vector<1x8x256xf32> to vector<8x256xf32>
    %96 = vector.shape_cast %93 : vector<8x256xf32> to vector<1x8x256xf32>
    tpu.vector_store %arg29[%c0_89, %c0_90, %c0_91], %96 {strides = array<i32>} : memref<1x8x256xf32, #tpu.memory_space<vmem>>, vector<1x8x256xf32>,
    %c0_92 = arith.constant 0 : index
    %c0_93 = arith.constant 0 : index
    %c0_94 = arith.constant 0 : index
    %97 = vector.load %arg29[%c0_92, %c0_93, %c0_94] : memref<1x8x256xf32, #tpu.memory_space<vmem>>, vector<1x8x256xf32>
    %98 = vector.shape_cast %97 : vector<1x8x256xf32> to vector<8x256xf32>
    %cst_95 = arith.constant 0.000000e+00 : f32
    %99 = vector.broadcast %cst_95 : f32 to vector<8x256xf32>
    %c0_96 = arith.constant 0 : index
    %c0_97 = arith.constant 0 : index
    %c0_98 = arith.constant 0 : index
    %100 = vector.load %arg2[%c0_96, %c0_97, %c0_98] : memref<9x256x256xf32, #tpu.memory_space<vmem>>, vector<1x256x256xf32>
    %101 = vector.shape_cast %100 : vector<1x256x256xf32> to vector<256x256xf32>
    %cst_99 = arith.constant dense<0.000000e+00> : vector<8x256xf32>
    %102 = tpu.matmul %98, %101, %cst_99 {dimension_numbers = #tpu.dot_dimension_numbers<[1], [0], [0], [1], [0, 0, 1, 1], [], []>} : vector<8x256xf32>, vector<256x256xf32>, vector<8x256xf32> -> vector<8x256xf32>
    %c0_100 = arith.constant 0 : index
    %c0_101 = arith.constant 0 : index
    %103 = vector.load %arg12[%c0_100, %c0_101] : memref<8x9xf32, #tpu.memory_space<vmem>>, vector<8x1xf32>
    %104 = vector.broadcast %103 : vector<8x1xf32> to vector<8x256xf32>
    %105 = arith.mulf %102, %104 : vector<8x256xf32>
    %106 = arith.addf %99, %105 : vector<8x256xf32>
    %c1_102 = arith.constant 1 : index
    %c0_103 = arith.constant 0 : index
    %c0_104 = arith.constant 0 : index
    %107 = vector.load %arg2[%c1_102, %c0_103, %c0_104] : memref<9x256x256xf32, #tpu.memory_space<vmem>>, vector<1x256x256xf32>
    %108 = vector.shape_cast %107 : vector<1x256x256xf32> to vector<256x256xf32>
    %cst_105 = arith.constant dense<0.000000e+00> : vector<8x256xf32>
    %109 = tpu.matmul %98, %108, %cst_105 {dimension_numbers = #tpu.dot_dimension_numbers<[1], [0], [0], [1], [0, 0, 1, 1], [], []>} : vector<8x256xf32>, vector<256x256xf32>, vector<8x256xf32> -> vector<8x256xf32>
    %c0_106 = arith.constant 0 : index
    %c1_107 = arith.constant 1 : index
    %110 = vector.load %arg12[%c0_106, %c1_107] : memref<8x9xf32, #tpu.memory_space<vmem>>, vector<8x1xf32>
    %111 = vector.broadcast %110 : vector<8x1xf32> to vector<8x256xf32>
    %112 = arith.mulf %109, %111 : vector<8x256xf32>
    %113 = arith.addf %106, %112 : vector<8x256xf32>
    %c2_108 = arith.constant 2 : index
    %c0_109 = arith.constant 0 : index
    %c0_110 = arith.constant 0 : index
    %114 = vector.load %arg2[%c2_108, %c0_109, %c0_110] : memref<9x256x256xf32, #tpu.memory_space<vmem>>, vector<1x256x256xf32>
    %115 = vector.shape_cast %114 : vector<1x256x256xf32> to vector<256x256xf32>
    %cst_111 = arith.constant dense<0.000000e+00> : vector<8x256xf32>
    %116 = tpu.matmul %98, %115, %cst_111 {dimension_numbers = #tpu.dot_dimension_numbers<[1], [0], [0], [1], [0, 0, 1, 1], [], []>} : vector<8x256xf32>, vector<256x256xf32>, vector<8x256xf32> -> vector<8x256xf32>
    %c0_112 = arith.constant 0 : index
    %c2_113 = arith.constant 2 : index
    %117 = vector.load %arg12[%c0_112, %c2_113] : memref<8x9xf32, #tpu.memory_space<vmem>>, vector<8x1xf32>
    %118 = vector.broadcast %117 : vector<8x1xf32> to vector<8x256xf32>
    %119 = arith.mulf %116, %118 : vector<8x256xf32>
    %120 = arith.addf %113, %119 : vector<8x256xf32>
    %c3_114 = arith.constant 3 : index
    %c0_115 = arith.constant 0 : index
    %c0_116 = arith.constant 0 : index
    %121 = vector.load %arg2[%c3_114, %c0_115, %c0_116] : memref<9x256x256xf32, #tpu.memory_space<vmem>>, vector<1x256x256xf32>
    %122 = vector.shape_cast %121 : vector<1x256x256xf32> to vector<256x256xf32>
    %cst_117 = arith.constant dense<0.000000e+00> : vector<8x256xf32>
    %123 = tpu.matmul %98, %122, %cst_117 {dimension_numbers = #tpu.dot_dimension_numbers<[1], [0], [0], [1], [0, 0, 1, 1], [], []>} : vector<8x256xf32>, vector<256x256xf32>, vector<8x256xf32> -> vector<8x256xf32>
    %c0_118 = arith.constant 0 : index
    %c3_119 = arith.constant 3 : index
    %124 = vector.load %arg12[%c0_118, %c3_119] : memref<8x9xf32, #tpu.memory_space<vmem>>, vector<8x1xf32>
    %125 = vector.broadcast %124 : vector<8x1xf32> to vector<8x256xf32>
    %126 = arith.mulf %123, %125 : vector<8x256xf32>
    %127 = arith.addf %120, %126 : vector<8x256xf32>
    %c4_120 = arith.constant 4 : index
    %c0_121 = arith.constant 0 : index
    %c0_122 = arith.constant 0 : index
    %128 = vector.load %arg2[%c4_120, %c0_121, %c0_122] : memref<9x256x256xf32, #tpu.memory_space<vmem>>, vector<1x256x256xf32>
    %129 = vector.shape_cast %128 : vector<1x256x256xf32> to vector<256x256xf32>
    %cst_123 = arith.constant dense<0.000000e+00> : vector<8x256xf32>
    %130 = tpu.matmul %98, %129, %cst_123 {dimension_numbers = #tpu.dot_dimension_numbers<[1], [0], [0], [1], [0, 0, 1, 1], [], []>} : vector<8x256xf32>, vector<256x256xf32>, vector<8x256xf32> -> vector<8x256xf32>
    %c0_124 = arith.constant 0 : index
    %c4_125 = arith.constant 4 : index
    %131 = vector.load %arg12[%c0_124, %c4_125] : memref<8x9xf32, #tpu.memory_space<vmem>>, vector<8x1xf32>
    %132 = vector.broadcast %131 : vector<8x1xf32> to vector<8x256xf32>
    %133 = arith.mulf %130, %132 : vector<8x256xf32>
    %134 = arith.addf %127, %133 : vector<8x256xf32>
    %c5_126 = arith.constant 5 : index
    %c0_127 = arith.constant 0 : index
    %c0_128 = arith.constant 0 : index
    %135 = vector.load %arg2[%c5_126, %c0_127, %c0_128] : memref<9x256x256xf32, #tpu.memory_space<vmem>>, vector<1x256x256xf32>
    %136 = vector.shape_cast %135 : vector<1x256x256xf32> to vector<256x256xf32>
    %cst_129 = arith.constant dense<0.000000e+00> : vector<8x256xf32>
    %137 = tpu.matmul %98, %136, %cst_129 {dimension_numbers = #tpu.dot_dimension_numbers<[1], [0], [0], [1], [0, 0, 1, 1], [], []>} : vector<8x256xf32>, vector<256x256xf32>, vector<8x256xf32> -> vector<8x256xf32>
    %c0_130 = arith.constant 0 : index
    %c5_131 = arith.constant 5 : index
    %138 = vector.load %arg12[%c0_130, %c5_131] : memref<8x9xf32, #tpu.memory_space<vmem>>, vector<8x1xf32>
    %139 = vector.broadcast %138 : vector<8x1xf32> to vector<8x256xf32>
    %140 = arith.mulf %137, %139 : vector<8x256xf32>
    %141 = arith.addf %134, %140 : vector<8x256xf32>
    %c6_132 = arith.constant 6 : index
    %c0_133 = arith.constant 0 : index
    %c0_134 = arith.constant 0 : index
    %142 = vector.load %arg2[%c6_132, %c0_133, %c0_134] : memref<9x256x256xf32, #tpu.memory_space<vmem>>, vector<1x256x256xf32>
    %143 = vector.shape_cast %142 : vector<1x256x256xf32> to vector<256x256xf32>
    %cst_135 = arith.constant dense<0.000000e+00> : vector<8x256xf32>
    %144 = tpu.matmul %98, %143, %cst_135 {dimension_numbers = #tpu.dot_dimension_numbers<[1], [0], [0], [1], [0, 0, 1, 1], [], []>} : vector<8x256xf32>, vector<256x256xf32>, vector<8x256xf32> -> vector<8x256xf32>
    %c0_136 = arith.constant 0 : index
    %c6_137 = arith.constant 6 : index
    %145 = vector.load %arg12[%c0_136, %c6_137] : memref<8x9xf32, #tpu.memory_space<vmem>>, vector<8x1xf32>
    %146 = vector.broadcast %145 : vector<8x1xf32> to vector<8x256xf32>
    %147 = arith.mulf %144, %146 : vector<8x256xf32>
    %148 = arith.addf %141, %147 : vector<8x256xf32>
    %c7_138 = arith.constant 7 : index
    %c0_139 = arith.constant 0 : index
    %c0_140 = arith.constant 0 : index
    %149 = vector.load %arg2[%c7_138, %c0_139, %c0_140] : memref<9x256x256xf32, #tpu.memory_space<vmem>>, vector<1x256x256xf32>
    %150 = vector.shape_cast %149 : vector<1x256x256xf32> to vector<256x256xf32>
    %cst_141 = arith.constant dense<0.000000e+00> : vector<8x256xf32>
    %151 = tpu.matmul %98, %150, %cst_141 {dimension_numbers = #tpu.dot_dimension_numbers<[1], [0], [0], [1], [0, 0, 1, 1], [], []>} : vector<8x256xf32>, vector<256x256xf32>, vector<8x256xf32> -> vector<8x256xf32>
    %c0_142 = arith.constant 0 : index
    %c7_143 = arith.constant 7 : index
    %152 = vector.load %arg12[%c0_142, %c7_143] : memref<8x9xf32, #tpu.memory_space<vmem>>, vector<8x1xf32>
    %153 = vector.broadcast %152 : vector<8x1xf32> to vector<8x256xf32>
    %154 = arith.mulf %151, %153 : vector<8x256xf32>
    %155 = arith.addf %148, %154 : vector<8x256xf32>
    %c8_144 = arith.constant 8 : index
    %c0_145 = arith.constant 0 : index
    %c0_146 = arith.constant 0 : index
    %156 = vector.load %arg2[%c8_144, %c0_145, %c0_146] : memref<9x256x256xf32, #tpu.memory_space<vmem>>, vector<1x256x256xf32>
    %157 = vector.shape_cast %156 : vector<1x256x256xf32> to vector<256x256xf32>
    %cst_147 = arith.constant dense<0.000000e+00> : vector<8x256xf32>
    %158 = tpu.matmul %98, %157, %cst_147 {dimension_numbers = #tpu.dot_dimension_numbers<[1], [0], [0], [1], [0, 0, 1, 1], [], []>} : vector<8x256xf32>, vector<256x256xf32>, vector<8x256xf32> -> vector<8x256xf32>
    %c0_148 = arith.constant 0 : index
    %c8_149 = arith.constant 8 : index
    %159 = vector.load %arg12[%c0_148, %c8_149] : memref<8x9xf32, #tpu.memory_space<vmem>>, vector<8x1xf32>
    %160 = vector.broadcast %159 : vector<8x1xf32> to vector<8x256xf32>
    %161 = arith.mulf %158, %160 : vector<8x256xf32>
    %162 = arith.addf %155, %161 : vector<8x256xf32>
    %c0_150 = arith.constant 0 : index
    %c0_151 = arith.constant 0 : index
    %163 = vector.load %arg13[%c0_150, %c0_151] : memref<8x1xf32, #tpu.memory_space<vmem>>, vector<8x1xf32>
    %164 = vector.broadcast %163 : vector<8x1xf32> to vector<8x256xf32>
    %165 = arith.addf %162, %164 : vector<8x256xf32>
    %cst_152 = arith.constant dense<0.000000e+00> : vector<256xf32>
    %166 = vector.multi_reduction <add>, %165, %cst_152 [0] : vector<8x256xf32> to vector<256xf32>
    %167 = vector.shape_cast %166 : vector<256xf32> to vector<1x256xf32>
    %168 = arith.mulf %165, %165 : vector<8x256xf32>
    %cst_153 = arith.constant dense<0.000000e+00> : vector<256xf32>
    %169 = vector.multi_reduction <add>, %168, %cst_153 [0] : vector<8x256xf32> to vector<256xf32>
    %170 = vector.shape_cast %169 : vector<256xf32> to vector<1x256xf32>
    %cst_154 = arith.constant 1.250000e-01 : f32
    %171 = vector.broadcast %cst_154 : f32 to vector<1x256xf32>
    %172 = arith.mulf %167, %171 : vector<1x256xf32>
    %cst_155 = arith.constant 1.250000e-01 : f32
    %173 = vector.broadcast %cst_155 : f32 to vector<1x256xf32>
    %174 = arith.mulf %170, %173 : vector<1x256xf32>
    %175 = arith.mulf %172, %172 : vector<1x256xf32>
    %176 = arith.subf %174, %175 : vector<1x256xf32>
    %cst_156 = arith.constant 9.99999974E-6 : f32
    %177 = vector.broadcast %cst_156 : f32 to vector<1x256xf32>
    %178 = arith.addf %176, %177 : vector<1x256xf32>
    %179 = math.rsqrt %178 : vector<1x256xf32>
    %180 = vector.broadcast %172 : vector<1x256xf32> to vector<8x256xf32>
    %181 = arith.subf %165, %180 : vector<8x256xf32>
    %182 = vector.broadcast %179 : vector<1x256xf32> to vector<8x256xf32>
    %183 = arith.mulf %181, %182 : vector<8x256xf32>
    %c0_157 = arith.constant 0 : index
    %c0_158 = arith.constant 0 : index
    %184 = vector.load %arg14[%c0_157, %c0_158] : memref<8x1xf32, #tpu.memory_space<vmem>>, vector<8x1xf32>
    %185 = vector.broadcast %184 : vector<8x1xf32> to vector<8x256xf32>
    %186 = arith.mulf %183, %185 : vector<8x256xf32>
    %c0_159 = arith.constant 0 : index
    %c0_160 = arith.constant 0 : index
    %187 = vector.load %arg15[%c0_159, %c0_160] : memref<8x1xf32, #tpu.memory_space<vmem>>, vector<8x1xf32>
    %188 = vector.broadcast %187 : vector<8x1xf32> to vector<8x256xf32>
    %189 = arith.addf %186, %188 : vector<8x256xf32>
    %c0_161 = arith.constant 0 : index
    %c0_162 = arith.constant 0 : index
    %190 = vector.load %arg16[%c0_161, %c0_162] : memref<32x8xf32, #tpu.memory_space<vmem>>, vector<32x8xf32>
    %cst_163 = arith.constant dense<0.000000e+00> : vector<32x256xf32>
    %191 = tpu.matmul %190, %189, %cst_163 {dimension_numbers = #tpu.dot_dimension_numbers<[1], [0], [0], [1], [0, 0, 1, 1], [], []>} : vector<32x8xf32>, vector<8x256xf32>, vector<32x256xf32> -> vector<32x256xf32>
    %c0_164 = arith.constant 0 : index
    %c0_165 = arith.constant 0 : index
    %192 = vector.load %arg17[%c0_164, %c0_165] : memref<32x1xf32, #tpu.memory_space<vmem>>, vector<32x1xf32>
    %193 = vector.broadcast %192 : vector<32x1xf32> to vector<32x256xf32>
    %194 = arith.addf %191, %193 : vector<32x256xf32>
    %c0_166 = arith.constant 0 : index
    %c0_167 = arith.constant 0 : index
    %195 = vector.load %arg18[%c0_166, %c0_167] : memref<8x32xf32, #tpu.memory_space<vmem>>, vector<8x32xf32>
    %cst_168 = arith.constant 0.707106769 : f32
    %196 = vector.broadcast %cst_168 : f32 to vector<32x256xf32>
    %197 = arith.mulf %194, %196 : vector<32x256xf32>
    %198 = math.erf %197 : vector<32x256xf32>
    %cst_169 = arith.constant 1.000000e+00 : f32
    %199 = vector.broadcast %cst_169 : f32 to vector<32x256xf32>
    %200 = arith.addf %199, %198 : vector<32x256xf32>
    %201 = arith.mulf %194, %200 : vector<32x256xf32>
    %cst_170 = arith.constant dense<0.000000e+00> : vector<8x256xf32>
    %202 = tpu.matmul %195, %201, %cst_170 {dimension_numbers = #tpu.dot_dimension_numbers<[1], [0], [0], [1], [0, 0, 1, 1], [], []>} : vector<8x32xf32>, vector<32x256xf32>, vector<8x256xf32> -> vector<8x256xf32>
    %c0_171 = arith.constant 0 : index
    %c0_172 = arith.constant 0 : index
    %203 = vector.load %arg19[%c0_171, %c0_172] : memref<8x1xf32, #tpu.memory_space<vmem>>, vector<8x1xf32>
    %204 = vector.broadcast %203 : vector<8x1xf32> to vector<8x256xf32>
    %205 = arith.addf %202, %204 : vector<8x256xf32>
    %c0_173 = arith.constant 0 : index
    %c0_174 = arith.constant 0 : index
    %c0_175 = arith.constant 0 : index
    %206 = vector.load %arg29[%c0_173, %c0_174, %c0_175] : memref<1x8x256xf32, #tpu.memory_space<vmem>>, vector<1x8x256xf32>
    %207 = vector.shape_cast %206 : vector<1x8x256xf32> to vector<8x256xf32>
    %208 = arith.addf %205, %207 : vector<8x256xf32>
    %c0_176 = arith.constant 0 : index
    %c0_177 = arith.constant 0 : index
    %c0_178 = arith.constant 0 : index
    %209 = vector.load %arg29[%c0_176, %c0_177, %c0_178] : memref<1x8x256xf32, #tpu.memory_space<vmem>>, vector<1x8x256xf32>
    %210 = vector.shape_cast %209 : vector<1x8x256xf32> to vector<8x256xf32>
    %211 = vector.shape_cast %208 : vector<8x256xf32> to vector<1x8x256xf32>
    tpu.vector_store %arg29[%c0_176, %c0_177, %c0_178], %211 {strides = array<i32>} : memref<1x8x256xf32, #tpu.memory_space<vmem>>, vector<1x8x256xf32>,
    %c0_179 = arith.constant 0 : index
    %c0_180 = arith.constant 0 : index
    %c0_181 = arith.constant 0 : index
    %212 = vector.load %arg29[%c0_179, %c0_180, %c0_181] : memref<1x8x256xf32, #tpu.memory_space<vmem>>, vector<1x8x256xf32>
    %213 = vector.shape_cast %212 : vector<1x8x256xf32> to vector<8x256xf32>
    %cst_182 = arith.constant dense<0.000000e+00> : vector<256xf32>
    %214 = vector.multi_reduction <add>, %213, %cst_182 [0] : vector<8x256xf32> to vector<256xf32>
    %215 = vector.shape_cast %214 : vector<256xf32> to vector<1x256xf32>
    %216 = arith.mulf %213, %213 : vector<8x256xf32>
    %cst_183 = arith.constant dense<0.000000e+00> : vector<256xf32>
    %217 = vector.multi_reduction <add>, %216, %cst_183 [0] : vector<8x256xf32> to vector<256xf32>
    %218 = vector.shape_cast %217 : vector<256xf32> to vector<1x256xf32>
    %cst_184 = arith.constant 1.250000e-01 : f32
    %219 = vector.broadcast %cst_184 : f32 to vector<1x256xf32>
    %220 = arith.mulf %215, %219 : vector<1x256xf32>
    %cst_185 = arith.constant 1.250000e-01 : f32
    %221 = vector.broadcast %cst_185 : f32 to vector<1x256xf32>
    %222 = arith.mulf %218, %221 : vector<1x256xf32>
    %223 = arith.mulf %220, %220 : vector<1x256xf32>
    %224 = arith.subf %222, %223 : vector<1x256xf32>
    %cst_186 = arith.constant 9.99999974E-6 : f32
    %225 = vector.broadcast %cst_186 : f32 to vector<1x256xf32>
    %226 = arith.addf %224, %225 : vector<1x256xf32>
    %227 = math.rsqrt %226 : vector<1x256xf32>
    %228 = vector.broadcast %220 : vector<1x256xf32> to vector<8x256xf32>
    %229 = arith.subf %213, %228 : vector<8x256xf32>
    %230 = vector.broadcast %227 : vector<1x256xf32> to vector<8x256xf32>
    %231 = arith.mulf %229, %230 : vector<8x256xf32>
    %c0_187 = arith.constant 0 : index
    %c0_188 = arith.constant 0 : index
    %232 = vector.load %arg20[%c0_187, %c0_188] : memref<8x1xf32, #tpu.memory_space<vmem>>, vector<8x1xf32>
    %233 = vector.broadcast %232 : vector<8x1xf32> to vector<8x256xf32>
    %234 = arith.mulf %231, %233 : vector<8x256xf32>
    %c0_189 = arith.constant 0 : index
    %c0_190 = arith.constant 0 : index
    %235 = vector.load %arg21[%c0_189, %c0_190] : memref<8x1xf32, #tpu.memory_space<vmem>>, vector<8x1xf32>
    %236 = vector.broadcast %235 : vector<8x1xf32> to vector<8x256xf32>
    %237 = arith.addf %234, %236 : vector<8x256xf32>
    %cst_191 = arith.constant dense<0.000000e+00> : vector<8xf32>
    %238 = vector.multi_reduction <add>, %237, %cst_191 [1] : vector<8x256xf32> to vector<8xf32>
    %239 = vector.shape_cast %238 : vector<8xf32> to vector<8x1xf32>
    %cst_192 = arith.constant 3.906250e-03 : f32
    %240 = vector.broadcast %cst_192 : f32 to vector<8x1xf32>
    %241 = arith.mulf %239, %240 : vector<8x1xf32>
    %c0_193 = arith.constant 0 : index
    %c0_194 = arith.constant 0 : index
    %242 = vector.load %arg22[%c0_193, %c0_194] : memref<8x8xf32, #tpu.memory_space<vmem>>, vector<8x8xf32>
    %cst_195 = arith.constant dense<0.000000e+00> : vector<8x256xf32>
    %243 = tpu.matmul %242, %237, %cst_195 {dimension_numbers = #tpu.dot_dimension_numbers<[1], [0], [0], [1], [0, 0, 1, 1], [], []>} : vector<8x8xf32>, vector<8x256xf32>, vector<8x256xf32> -> vector<8x256xf32>
    %cst_196 = arith.constant dense<0.000000e+00> : vector<8xf32>
    %244 = vector.multi_reduction <add>, %243, %cst_196 [1] : vector<8x256xf32> to vector<8xf32>
    %245 = vector.shape_cast %244 : vector<8xf32> to vector<8x1xf32>
    %cst_197 = arith.constant 3.906250e-03 : f32
    %246 = vector.broadcast %cst_197 : f32 to vector<8x1xf32>
    %247 = arith.mulf %245, %246 : vector<8x1xf32>
    %c0_198 = arith.constant 0 : index
    %c0_199 = arith.constant 0 : index
    %248 = vector.load %arg23[%c0_198, %c0_199] : memref<8x1xf32, #tpu.memory_space<vmem>>, vector<8x1xf32>
    %249 = arith.addf %247, %248 : vector<8x1xf32>
    %cst_200 = arith.constant 0.000000e+00 : f32
    %250 = vector.broadcast %cst_200 : f32 to vector<8x1xf32>
    %c0_201 = arith.constant 0 : index
    %c0_202 = arith.constant 0 : index
    %251 = vector.load %arg26[%c0_201, %c0_202] : memref<8x2xf32, #tpu.memory_space<vmem>>, vector<8x1xf32>
    %252 = arith.mulf %251, %249 : vector<8x1xf32>
    %c0_203 = arith.constant 0 : index
    %c0_204 = arith.constant 0 : index
    %253 = vector.load %arg24[%c0_203, %c0_204] : memref<8x1xf32, #tpu.memory_space<vmem>>, vector<8x1xf32>
    %254 = arith.mulf %252, %253 : vector<8x1xf32>
    %cst_205 = arith.constant dense<0.000000e+00> : vector<1xf32>
    %255 = vector.multi_reduction <add>, %254, %cst_205 [0] : vector<8x1xf32> to vector<1xf32>
    %256 = vector.shape_cast %255 : vector<1xf32> to vector<1x1xf32>
    %257 = arith.mulf %251, %249 : vector<8x1xf32>
    %c0_206 = arith.constant 0 : index
    %c0_207 = arith.constant 0 : index
    %258 = vector.load %arg25[%c0_206, %c0_207] : memref<8x1xf32, #tpu.memory_space<vmem>>, vector<8x1xf32>
    %259 = arith.mulf %257, %258 : vector<8x1xf32>
    %cst_208 = arith.constant dense<0.000000e+00> : vector<1xf32>
    %260 = vector.multi_reduction <add>, %259, %cst_208 [0] : vector<8x1xf32> to vector<1xf32>
    %261 = vector.shape_cast %260 : vector<1xf32> to vector<1x1xf32>
    %262 = vector.broadcast %256 : vector<1x1xf32> to vector<8x1xf32>
    %263 = arith.mulf %241, %262 : vector<8x1xf32>
    %264 = vector.broadcast %261 : vector<1x1xf32> to vector<8x1xf32>
    %265 = arith.addf %263, %264 : vector<8x1xf32>
    %cst_209 = arith.constant 0.707106769 : f32
    %266 = vector.broadcast %cst_209 : f32 to vector<8x1xf32>
    %267 = arith.mulf %266, %265 : vector<8x1xf32>
    %cst_210 = arith.constant 0.000000e+00 : f32
    %268 = vector.broadcast %cst_210 : f32 to vector<8x1xf32>
    %269 = arith.cmpf ogt, %251, %268 : vector<8x1xf32>
    %cst_211 = arith.constant -1.000000e+30 : f32
    %270 = vector.broadcast %cst_211 : f32 to vector<8x1xf32>
    %271 = arith.select %269, %267, %270 : vector<8x1xi1>, vector<8x1xf32>
    %cst_212 = arith.constant dense<0xFF800000> : vector<1xf32>
    %272 = vector.multi_reduction <maximumf>, %271, %cst_212 [0] : vector<8x1xf32> to vector<1xf32>
    %273 = vector.shape_cast %272 : vector<1xf32> to vector<1x1xf32>
    %cst_213 = arith.constant 0.000000e+00 : f32
    %274 = vector.broadcast %cst_213 : f32 to vector<8x1xf32>
    %275 = arith.cmpf ogt, %251, %274 : vector<8x1xf32>
    %276 = vector.broadcast %273 : vector<1x1xf32> to vector<8x1xf32>
    %277 = arith.subf %271, %276 : vector<8x1xf32>
    %278 = math.exp %277 : vector<8x1xf32>
    %cst_214 = arith.constant 0.000000e+00 : f32
    %279 = vector.broadcast %cst_214 : f32 to vector<8x1xf32>
    %280 = arith.select %275, %278, %279 : vector<8x1xi1>, vector<8x1xf32>
    %cst_215 = arith.constant dense<0.000000e+00> : vector<1xf32>
    %281 = vector.multi_reduction <add>, %280, %cst_215 [0] : vector<8x1xf32> to vector<1xf32>
    %282 = vector.shape_cast %281 : vector<1xf32> to vector<1x1xf32>
    %283 = vector.broadcast %282 : vector<1x1xf32> to vector<8x1xf32>
    %284 = arith.divf %280, %283 : vector<8x1xf32>
    %285 = arith.addf %250, %284 : vector<8x1xf32>
    %c0_216 = arith.constant 0 : index
    %c1_217 = arith.constant 1 : index
    %286 = vector.load %arg26[%c0_216, %c1_217] : memref<8x2xf32, #tpu.memory_space<vmem>>, vector<8x1xf32>
    %287 = arith.mulf %286, %249 : vector<8x1xf32>
    %c0_218 = arith.constant 0 : index
    %c0_219 = arith.constant 0 : index
    %288 = vector.load %arg24[%c0_218, %c0_219] : memref<8x1xf32, #tpu.memory_space<vmem>>, vector<8x1xf32>
    %289 = arith.mulf %287, %288 : vector<8x1xf32>
    %cst_220 = arith.constant dense<0.000000e+00> : vector<1xf32>
    %290 = vector.multi_reduction <add>, %289, %cst_220 [0] : vector<8x1xf32> to vector<1xf32>
    %291 = vector.shape_cast %290 : vector<1xf32> to vector<1x1xf32>
    %292 = arith.mulf %286, %249 : vector<8x1xf32>
    %c0_221 = arith.constant 0 : index
    %c0_222 = arith.constant 0 : index
    %293 = vector.load %arg25[%c0_221, %c0_222] : memref<8x1xf32, #tpu.memory_space<vmem>>, vector<8x1xf32>
    %294 = arith.mulf %292, %293 : vector<8x1xf32>
    %cst_223 = arith.constant dense<0.000000e+00> : vector<1xf32>
    %295 = vector.multi_reduction <add>, %294, %cst_223 [0] : vector<8x1xf32> to vector<1xf32>
    %296 = vector.shape_cast %295 : vector<1xf32> to vector<1x1xf32>
    %297 = vector.broadcast %291 : vector<1x1xf32> to vector<8x1xf32>
    %298 = arith.mulf %241, %297 : vector<8x1xf32>
    %299 = vector.broadcast %296 : vector<1x1xf32> to vector<8x1xf32>
    %300 = arith.addf %298, %299 : vector<8x1xf32>
    %cst_224 = arith.constant 0.707106769 : f32
    %301 = vector.broadcast %cst_224 : f32 to vector<8x1xf32>
    %302 = arith.mulf %301, %300 : vector<8x1xf32>
    %cst_225 = arith.constant 0.000000e+00 : f32
    %303 = vector.broadcast %cst_225 : f32 to vector<8x1xf32>
    %304 = arith.cmpf ogt, %286, %303 : vector<8x1xf32>
    %cst_226 = arith.constant -1.000000e+30 : f32
    %305 = vector.broadcast %cst_226 : f32 to vector<8x1xf32>
    %306 = arith.select %304, %302, %305 : vector<8x1xi1>, vector<8x1xf32>
    %cst_227 = arith.constant dense<0xFF800000> : vector<1xf32>
    %307 = vector.multi_reduction <maximumf>, %306, %cst_227 [0] : vector<8x1xf32> to vector<1xf32>
    %308 = vector.shape_cast %307 : vector<1xf32> to vector<1x1xf32>
    %cst_228 = arith.constant 0.000000e+00 : f32
    %309 = vector.broadcast %cst_228 : f32 to vector<8x1xf32>
    %310 = arith.cmpf ogt, %286, %309 : vector<8x1xf32>
    %311 = vector.broadcast %308 : vector<1x1xf32> to vector<8x1xf32>
    %312 = arith.subf %306, %311 : vector<8x1xf32>
    %313 = math.exp %312 : vector<8x1xf32>
    %cst_229 = arith.constant 0.000000e+00 : f32
    %314 = vector.broadcast %cst_229 : f32 to vector<8x1xf32>
    %315 = arith.select %310, %313, %314 : vector<8x1xi1>, vector<8x1xf32>
    %cst_230 = arith.constant dense<0.000000e+00> : vector<1xf32>
    %316 = vector.multi_reduction <add>, %315, %cst_230 [0] : vector<8x1xf32> to vector<1xf32>
    %317 = vector.shape_cast %316 : vector<1xf32> to vector<1x1xf32>
    %318 = vector.broadcast %317 : vector<1x1xf32> to vector<8x1xf32>
    %319 = arith.divf %315, %318 : vector<8x1xf32>
    %320 = arith.addf %285, %319 : vector<8x1xf32>
    %cst_231 = arith.constant 0.000000e+00 : f32
    %321 = vector.broadcast %cst_231 : f32 to vector<8x256xf32>
    %c0_232 = arith.constant 0 : index
    %c0_233 = arith.constant 0 : index
    %c0_234 = arith.constant 0 : index
    %322 = vector.load %arg2[%c0_232, %c0_233, %c0_234] : memref<9x256x256xf32, #tpu.memory_space<vmem>>, vector<1x256x256xf32>
    %323 = vector.shape_cast %322 : vector<1x256x256xf32> to vector<256x256xf32>
    %cst_235 = arith.constant dense<0.000000e+00> : vector<8x256xf32>
    %324 = tpu.matmul %237, %323, %cst_235 {dimension_numbers = #tpu.dot_dimension_numbers<[1], [0], [0], [1], [0, 0, 1, 1], [], []>} : vector<8x256xf32>, vector<256x256xf32>, vector<8x256xf32> -> vector<8x256xf32>
    %c0_236 = arith.constant 0 : index
    %c0_237 = arith.constant 0 : index
    %325 = vector.load %arg27[%c0_236, %c0_237] : memref<8x9xf32, #tpu.memory_space<vmem>>, vector<8x1xf32>
    %326 = vector.broadcast %325 : vector<8x1xf32> to vector<8x256xf32>
    %327 = arith.mulf %324, %326 : vector<8x256xf32>
    %328 = arith.addf %321, %327 : vector<8x256xf32>
    %c1_238 = arith.constant 1 : index
    %c0_239 = arith.constant 0 : index
    %c0_240 = arith.constant 0 : index
    %329 = vector.load %arg2[%c1_238, %c0_239, %c0_240] : memref<9x256x256xf32, #tpu.memory_space<vmem>>, vector<1x256x256xf32>
    %330 = vector.shape_cast %329 : vector<1x256x256xf32> to vector<256x256xf32>
    %cst_241 = arith.constant dense<0.000000e+00> : vector<8x256xf32>
    %331 = tpu.matmul %237, %330, %cst_241 {dimension_numbers = #tpu.dot_dimension_numbers<[1], [0], [0], [1], [0, 0, 1, 1], [], []>} : vector<8x256xf32>, vector<256x256xf32>, vector<8x256xf32> -> vector<8x256xf32>
    %c0_242 = arith.constant 0 : index
    %c1_243 = arith.constant 1 : index
    %332 = vector.load %arg27[%c0_242, %c1_243] : memref<8x9xf32, #tpu.memory_space<vmem>>, vector<8x1xf32>
    %333 = vector.broadcast %332 : vector<8x1xf32> to vector<8x256xf32>
    %334 = arith.mulf %331, %333 : vector<8x256xf32>
    %335 = arith.addf %328, %334 : vector<8x256xf32>
    %c2_244 = arith.constant 2 : index
    %c0_245 = arith.constant 0 : index
    %c0_246 = arith.constant 0 : index
    %336 = vector.load %arg2[%c2_244, %c0_245, %c0_246] : memref<9x256x256xf32, #tpu.memory_space<vmem>>, vector<1x256x256xf32>
    %337 = vector.shape_cast %336 : vector<1x256x256xf32> to vector<256x256xf32>
    %cst_247 = arith.constant dense<0.000000e+00> : vector<8x256xf32>
    %338 = tpu.matmul %237, %337, %cst_247 {dimension_numbers = #tpu.dot_dimension_numbers<[1], [0], [0], [1], [0, 0, 1, 1], [], []>} : vector<8x256xf32>, vector<256x256xf32>, vector<8x256xf32> -> vector<8x256xf32>
    %c0_248 = arith.constant 0 : index
    %c2_249 = arith.constant 2 : index
    %339 = vector.load %arg27[%c0_248, %c2_249] : memref<8x9xf32, #tpu.memory_space<vmem>>, vector<8x1xf32>
    %340 = vector.broadcast %339 : vector<8x1xf32> to vector<8x256xf32>
    %341 = arith.mulf %338, %340 : vector<8x256xf32>
    %342 = arith.addf %335, %341 : vector<8x256xf32>
    %c3_250 = arith.constant 3 : index
    %c0_251 = arith.constant 0 : index
    %c0_252 = arith.constant 0 : index
    %343 = vector.load %arg2[%c3_250, %c0_251, %c0_252] : memref<9x256x256xf32, #tpu.memory_space<vmem>>, vector<1x256x256xf32>
    %344 = vector.shape_cast %343 : vector<1x256x256xf32> to vector<256x256xf32>
    %cst_253 = arith.constant dense<0.000000e+00> : vector<8x256xf32>
    %345 = tpu.matmul %237, %344, %cst_253 {dimension_numbers = #tpu.dot_dimension_numbers<[1], [0], [0], [1], [0, 0, 1, 1], [], []>} : vector<8x256xf32>, vector<256x256xf32>, vector<8x256xf32> -> vector<8x256xf32>
    %c0_254 = arith.constant 0 : index
    %c3_255 = arith.constant 3 : index
    %346 = vector.load %arg27[%c0_254, %c3_255] : memref<8x9xf32, #tpu.memory_space<vmem>>, vector<8x1xf32>
    %347 = vector.broadcast %346 : vector<8x1xf32> to vector<8x256xf32>
    %348 = arith.mulf %345, %347 : vector<8x256xf32>
    %349 = arith.addf %342, %348 : vector<8x256xf32>
    %c4_256 = arith.constant 4 : index
    %c0_257 = arith.constant 0 : index
    %c0_258 = arith.constant 0 : index
    %350 = vector.load %arg2[%c4_256, %c0_257, %c0_258] : memref<9x256x256xf32, #tpu.memory_space<vmem>>, vector<1x256x256xf32>
    %351 = vector.shape_cast %350 : vector<1x256x256xf32> to vector<256x256xf32>
    %cst_259 = arith.constant dense<0.000000e+00> : vector<8x256xf32>
    %352 = tpu.matmul %237, %351, %cst_259 {dimension_numbers = #tpu.dot_dimension_numbers<[1], [0], [0], [1], [0, 0, 1, 1], [], []>} : vector<8x256xf32>, vector<256x256xf32>, vector<8x256xf32> -> vector<8x256xf32>
    %c0_260 = arith.constant 0 : index
    %c4_261 = arith.constant 4 : index
    %353 = vector.load %arg27[%c0_260, %c4_261] : memref<8x9xf32, #tpu.memory_space<vmem>>, vector<8x1xf32>
    %354 = vector.broadcast %353 : vector<8x1xf32> to vector<8x256xf32>
    %355 = arith.mulf %352, %354 : vector<8x256xf32>
    %356 = arith.addf %349, %355 : vector<8x256xf32>
    %c5_262 = arith.constant 5 : index
    %c0_263 = arith.constant 0 : index
    %c0_264 = arith.constant 0 : index
    %357 = vector.load %arg2[%c5_262, %c0_263, %c0_264] : memref<9x256x256xf32, #tpu.memory_space<vmem>>, vector<1x256x256xf32>
    %358 = vector.shape_cast %357 : vector<1x256x256xf32> to vector<256x256xf32>
    %cst_265 = arith.constant dense<0.000000e+00> : vector<8x256xf32>
    %359 = tpu.matmul %237, %358, %cst_265 {dimension_numbers = #tpu.dot_dimension_numbers<[1], [0], [0], [1], [0, 0, 1, 1], [], []>} : vector<8x256xf32>, vector<256x256xf32>, vector<8x256xf32> -> vector<8x256xf32>
    %c0_266 = arith.constant 0 : index
    %c5_267 = arith.constant 5 : index
    %360 = vector.load %arg27[%c0_266, %c5_267] : memref<8x9xf32, #tpu.memory_space<vmem>>, vector<8x1xf32>
    %361 = vector.broadcast %360 : vector<8x1xf32> to vector<8x256xf32>
    %362 = arith.mulf %359, %361 : vector<8x256xf32>
    %363 = arith.addf %356, %362 : vector<8x256xf32>
    %c6_268 = arith.constant 6 : index
    %c0_269 = arith.constant 0 : index
    %c0_270 = arith.constant 0 : index
    %364 = vector.load %arg2[%c6_268, %c0_269, %c0_270] : memref<9x256x256xf32, #tpu.memory_space<vmem>>, vector<1x256x256xf32>
    %365 = vector.shape_cast %364 : vector<1x256x256xf32> to vector<256x256xf32>
    %cst_271 = arith.constant dense<0.000000e+00> : vector<8x256xf32>
    %366 = tpu.matmul %237, %365, %cst_271 {dimension_numbers = #tpu.dot_dimension_numbers<[1], [0], [0], [1], [0, 0, 1, 1], [], []>} : vector<8x256xf32>, vector<256x256xf32>, vector<8x256xf32> -> vector<8x256xf32>
    %c0_272 = arith.constant 0 : index
    %c6_273 = arith.constant 6 : index
    %367 = vector.load %arg27[%c0_272, %c6_273] : memref<8x9xf32, #tpu.memory_space<vmem>>, vector<8x1xf32>
    %368 = vector.broadcast %367 : vector<8x1xf32> to vector<8x256xf32>
    %369 = arith.mulf %366, %368 : vector<8x256xf32>
    %370 = arith.addf %363, %369 : vector<8x256xf32>
    %c7_274 = arith.constant 7 : index
    %c0_275 = arith.constant 0 : index
    %c0_276 = arith.constant 0 : index
    %371 = vector.load %arg2[%c7_274, %c0_275, %c0_276] : memref<9x256x256xf32, #tpu.memory_space<vmem>>, vector<1x256x256xf32>
    %372 = vector.shape_cast %371 : vector<1x256x256xf32> to vector<256x256xf32>
    %cst_277 = arith.constant dense<0.000000e+00> : vector<8x256xf32>
    %373 = tpu.matmul %237, %372, %cst_277 {dimension_numbers = #tpu.dot_dimension_numbers<[1], [0], [0], [1], [0, 0, 1, 1], [], []>} : vector<8x256xf32>, vector<256x256xf32>, vector<8x256xf32> -> vector<8x256xf32>
    %c0_278 = arith.constant 0 : index
    %c7_279 = arith.constant 7 : index
    %374 = vector.load %arg27[%c0_278, %c7_279] : memref<8x9xf32, #tpu.memory_space<vmem>>, vector<8x1xf32>
    %375 = vector.broadcast %374 : vector<8x1xf32> to vector<8x256xf32>
    %376 = arith.mulf %373, %375 : vector<8x256xf32>
    %377 = arith.addf %370, %376 : vector<8x256xf32>
    %c8_280 = arith.constant 8 : index
    %c0_281 = arith.constant 0 : index
    %c0_282 = arith.constant 0 : index
    %378 = vector.load %arg2[%c8_280, %c0_281, %c0_282] : memref<9x256x256xf32, #tpu.memory_space<vmem>>, vector<1x256x256xf32>
    %379 = vector.shape_cast %378 : vector<1x256x256xf32> to vector<256x256xf32>
    %cst_283 = arith.constant dense<0.000000e+00> : vector<8x256xf32>
    %380 = tpu.matmul %237, %379, %cst_283 {dimension_numbers = #tpu.dot_dimension_numbers<[1], [0], [0], [1], [0, 0, 1, 1], [], []>} : vector<8x256xf32>, vector<256x256xf32>, vector<8x256xf32> -> vector<8x256xf32>
    %c0_284 = arith.constant 0 : index
    %c8_285 = arith.constant 8 : index
    %381 = vector.load %arg27[%c0_284, %c8_285] : memref<8x9xf32, #tpu.memory_space<vmem>>, vector<8x1xf32>
    %382 = vector.broadcast %381 : vector<8x1xf32> to vector<8x256xf32>
    %383 = arith.mulf %380, %382 : vector<8x256xf32>
    %384 = arith.addf %377, %383 : vector<8x256xf32>
    %c0_286 = arith.constant 0 : index
    %c0_287 = arith.constant 0 : index
    %385 = vector.load %arg28[%c0_286, %c0_287] : memref<8x1xf32, #tpu.memory_space<vmem>>, vector<8x1xf32>
    %386 = vector.broadcast %385 : vector<8x1xf32> to vector<8x256xf32>
    %387 = arith.addf %384, %386 : vector<8x256xf32>
    %388 = vector.broadcast %320 : vector<8x1xf32> to vector<8x256xf32>
    %389 = arith.mulf %387, %388 : vector<8x256xf32>
    %c0_288 = arith.constant 0 : index
    %c0_289 = arith.constant 0 : index
    %c0_290 = arith.constant 0 : index
    %390 = vector.load %arg29[%c0_288, %c0_289, %c0_290] : memref<1x8x256xf32, #tpu.memory_space<vmem>>, vector<1x8x256xf32>
    %391 = vector.shape_cast %390 : vector<1x8x256xf32> to vector<8x256xf32>
    %392 = arith.addf %389, %391 : vector<8x256xf32>
    %c0_291 = arith.constant 0 : index
    %c0_292 = arith.constant 0 : index
    %c0_293 = arith.constant 0 : index
    %393 = vector.load %arg29[%c0_291, %c0_292, %c0_293] : memref<1x8x256xf32, #tpu.memory_space<vmem>>, vector<1x8x256xf32>
    %394 = vector.shape_cast %393 : vector<1x8x256xf32> to vector<8x256xf32>
    %395 = vector.shape_cast %392 : vector<8x256xf32> to vector<1x8x256xf32>
    tpu.vector_store %arg29[%c0_291, %c0_292, %c0_293], %395 {strides = array<i32>} : memref<1x8x256xf32, #tpu.memory_space<vmem>>, vector<1x8x256xf32>,
    return
  }
  func.func @transform_0(%arg0: i32) -> (i32, i32, i32) {
    %c0_i32 = arith.constant 0 : i32
    %c0_i32_0 = arith.constant 0 : i32
    %c0_i32_1 = arith.constant 0 : i32
    return %arg0, %c0_i32, %c0_i32_0 : i32, i32, i32
  }
  func.func @transform_1(%arg0: i32) -> (i32, i32, i32) {
    %c0_i32 = arith.constant 0 : i32
    %c0_i32_0 = arith.constant 0 : i32
    %c0_i32_1 = arith.constant 0 : i32
    %c0_i32_2 = arith.constant 0 : i32
    return %c0_i32, %c0_i32_0, %c0_i32_1 : i32, i32, i32
  }
  func.func @transform_2(%arg0: i32) -> (i32, i32) {
    %c0_i32 = arith.constant 0 : i32
    %c0_i32_0 = arith.constant 0 : i32
    %c0_i32_1 = arith.constant 0 : i32
    return %c0_i32, %c0_i32_0 : i32, i32
  }
  func.func @transform_3(%arg0: i32) -> (i32, i32) {
    %c0_i32 = arith.constant 0 : i32
    %c0_i32_0 = arith.constant 0 : i32
    %c0_i32_1 = arith.constant 0 : i32
    return %c0_i32, %c0_i32_0 : i32, i32
  }
  func.func @transform_4(%arg0: i32) -> (i32, i32, i32) {
    %c0_i32 = arith.constant 0 : i32
    %c0_i32_0 = arith.constant 0 : i32
    %c0_i32_1 = arith.constant 0 : i32
    %c0_i32_2 = arith.constant 0 : i32
    return %c0_i32, %c0_i32_0, %c0_i32_1 : i32, i32, i32
  }
  func.func @transform_5(%arg0: i32) -> (i32, i32) {
    %c0_i32 = arith.constant 0 : i32
    %c0_i32_0 = arith.constant 0 : i32
    %c0_i32_1 = arith.constant 0 : i32
    return %c0_i32, %c0_i32_0 : i32, i32
  }
  func.func @transform_6(%arg0: i32) -> (i32, i32) {
    %c0_i32 = arith.constant 0 : i32
    %c0_i32_0 = arith.constant 0 : i32
    %c0_i32_1 = arith.constant 0 : i32
    return %c0_i32, %c0_i32_0 : i32, i32
  }
  func.func @transform_7(%arg0: i32) -> (i32, i32) {
    %c0_i32 = arith.constant 0 : i32
    %c0_i32_0 = arith.constant 0 : i32
    %c0_i32_1 = arith.constant 0 : i32
    return %c0_i32, %c0_i32_0 : i32, i32
  }
  func.func @transform_8(%arg0: i32) -> (i32, i32) {
    %c0_i32 = arith.constant 0 : i32
    %c0_i32_0 = arith.constant 0 : i32
    %c0_i32_1 = arith.constant 0 : i32
    return %c0_i32, %c0_i32_0 : i32, i32
  }
  func.func @transform_9(%arg0: i32) -> (i32, i32) {
    %c0_i32 = arith.constant 0 : i32
    %c0_i32_0 = arith.constant 0 : i32
    %c0_i32_1 = arith.constant 0 : i32
    return %c0_i32, %c0_i32_0 : i32, i32
  }
  func.func @transform_10(%arg0: i32) -> (i32, i32) {
    %c0_i32 = arith.constant 0 : i32
    %c0_i32_0 = arith.constant 0 : i32
    %c0_i32_1 = arith.constant 0 : i32
    return %c0_i32, %c0_i32_0 : i32, i32
  }
  func.func @transform_11(%arg0: i32) -> (i32, i32) {
    %c0_i32 = arith.constant 0 : i32
    %c0_i32_0 = arith.constant 0 : i32
    %c0_i32_1 = arith.constant 0 : i32
    return %c0_i32, %c0_i32_0 : i32, i32
  }
  func.func @transform_12(%arg0: i32) -> (i32, i32) {
    %c0_i32 = arith.constant 0 : i32
    %c0_i32_0 = arith.constant 0 : i32
    %c0_i32_1 = arith.constant 0 : i32
    return %c0_i32, %c0_i32_0 : i32, i32
  }
  func.func @transform_13(%arg0: i32) -> (i32, i32) {
    %c0_i32 = arith.constant 0 : i32
    %c0_i32_0 = arith.constant 0 : i32
    %c0_i32_1 = arith.constant 0 : i32
    return %c0_i32, %c0_i32_0 : i32, i32
  }
  func.func @transform_14(%arg0: i32) -> (i32, i32) {
    %c0_i32 = arith.constant 0 : i32
    %c0_i32_0 = arith.constant 0 : i32
    %c0_i32_1 = arith.constant 0 : i32
    return %c0_i32, %c0_i32_0 : i32, i32
  }
  func.func @transform_15(%arg0: i32) -> (i32, i32) {
    %c0_i32 = arith.constant 0 : i32
    %c0_i32_0 = arith.constant 0 : i32
    %c0_i32_1 = arith.constant 0 : i32
    return %c0_i32, %c0_i32_0 : i32, i32
  }
  func.func @transform_16(%arg0: i32) -> (i32, i32) {
    %c0_i32 = arith.constant 0 : i32
    %c0_i32_0 = arith.constant 0 : i32
    %c0_i32_1 = arith.constant 0 : i32
    return %c0_i32, %c0_i32_0 : i32, i32
  }
  func.func @transform_17(%arg0: i32) -> (i32, i32) {
    %c0_i32 = arith.constant 0 : i32
    %c0_i32_0 = arith.constant 0 : i32
    %c0_i32_1 = arith.constant 0 : i32
    return %c0_i32, %c0_i32_0 : i32, i32
  }
  func.func @transform_18(%arg0: i32) -> (i32, i32) {
    %c0_i32 = arith.constant 0 : i32
    %c0_i32_0 = arith.constant 0 : i32
    %c0_i32_1 = arith.constant 0 : i32
    return %c0_i32, %c0_i32_0 : i32, i32
  }
  func.func @transform_19(%arg0: i32) -> (i32, i32) {
    %c0_i32 = arith.constant 0 : i32
    %c0_i32_0 = arith.constant 0 : i32
    %c0_i32_1 = arith.constant 0 : i32
    return %c0_i32, %c0_i32_0 : i32, i32
  }
  func.func @transform_20(%arg0: i32) -> (i32, i32) {
    %c0_i32 = arith.constant 0 : i32
    %c0_i32_0 = arith.constant 0 : i32
    %c0_i32_1 = arith.constant 0 : i32
    return %c0_i32, %c0_i32_0 : i32, i32
  }
  func.func @transform_21(%arg0: i32) -> (i32, i32) {
    %c0_i32 = arith.constant 0 : i32
    %c0_i32_0 = arith.constant 0 : i32
    %c0_i32_1 = arith.constant 0 : i32
    return %c0_i32, %c0_i32_0 : i32, i32
  }
  func.func @transform_22(%arg0: i32) -> (i32, i32) {
    %c0_i32 = arith.constant 0 : i32
    %c0_i32_0 = arith.constant 0 : i32
    %c0_i32_1 = arith.constant 0 : i32
    return %c0_i32, %c0_i32_0 : i32, i32
  }
  func.func @transform_23(%arg0: i32) -> (i32, i32) {
    %c0_i32 = arith.constant 0 : i32
    %c0_i32_0 = arith.constant 0 : i32
    %c0_i32_1 = arith.constant 0 : i32
    return %c0_i32, %c0_i32_0 : i32, i32
  }
  func.func @transform_24(%arg0: i32) -> (i32, i32) {
    %c0_i32 = arith.constant 0 : i32
    %c0_i32_0 = arith.constant 0 : i32
    %c0_i32_1 = arith.constant 0 : i32
    return %c0_i32, %c0_i32_0 : i32, i32
  }
  func.func @transform_25(%arg0: i32) -> (i32, i32) {
    %c0_i32 = arith.constant 0 : i32
    %c0_i32_0 = arith.constant 0 : i32
    %c0_i32_1 = arith.constant 0 : i32
    return %c0_i32, %c0_i32_0 : i32, i32
  }
  func.func @transform_26(%arg0: i32) -> (i32, i32) {
    %c0_i32 = arith.constant 0 : i32
    %c0_i32_0 = arith.constant 0 : i32
    %c0_i32_1 = arith.constant 0 : i32
    return %c0_i32, %c0_i32_0 : i32, i32
  }
  func.func @transform_27(%arg0: i32) -> (i32, i32) {
    %c0_i32 = arith.constant 0 : i32
    %c0_i32_0 = arith.constant 0 : i32
    %c0_i32_1 = arith.constant 0 : i32
    return %c0_i32, %c0_i32_0 : i32, i32
  }
  func.func @transform_28(%arg0: i32) -> (i32, i32, i32) {
    %c0_i32 = arith.constant 0 : i32
    %c0_i32_0 = arith.constant 0 : i32
    %c0_i32_1 = arith.constant 0 : i32
    return %arg0, %c0_i32, %c0_i32_0 : i32, i32, i32
  }
}

</mosaic_0001>

<bundles_post_ra>
// kernel: tile.0
= control target key start
LH: loop header
LB: loop body
LE: loop exit
PB: predicated region body
PF: predicated region fallthrough
CT: control target
= control target key end

     0   :  { %s34_s8 = smov 125   ;;  %vm7_vm0 = vcmask 7168   ;;  %s35_s11 = smov 126   ;;  %s61_s0 = inlined_call_operand.vmem [shape: f32[2,4], index: 0, kind: input, shape index: {}]   ;;  %s62_s1 = inlined_call_operand.vmem [shape: f32[8,1], index: 1, kind: output, shape index: {}]  }
   0x1   :  { %v4_v0 = vld [vmem:[%s61_s0] sm:$0x3]  ;;  %s33_s0 = smov 127  }
   0x2   :  { %5 = vst [vmem:[#allocation0] sm:$0x3] %v4_v0 }
   0x9   :  { %v9_v1 = vld [vmem:[#allocation0] sm:$0x3]  }
   0xa   :  { %v21_v2 = vld [vmem:[#allocation0] sm:$0x3]   ;;  %10 = vrot.lane.b32.xlu0 %v9_v1, %s33_s0 }
   0xb   :  { %22 = vrot.lane.b32.xlu1 %v21_v2, %s34_s8  ;;  %v6_v3 = vld [vmem:[#allocation0] sm:$0x3]  }
   0xc   :  { %v15_v4 = vld [vmem:[#allocation0] sm:$0x3]   ;;  %8 = vst.msk [vmem:[%s62_s1] ss:$4 sm:$0x3] %vm7_vm0, %v6_v3  }
   0xe   :  { %16 = vrot.lane.b32.xlu0 %v15_v4, %s35_s11 }
  0x7c   :  { %v11_v5 = vpop.permute.xlu0 %10  }
  0x7d   :  { %v23_v6 = vpop.permute.xlu1 %22   ;;  %27 = vst.msk [vmem:[%s62_s1 + $0x1] ss:$4 sm:$0x3] %vm7_vm0, %v11_v5  }
  0x7e   :  { %29 = vst.msk [vmem:[%s62_s1 + $0x3] ss:$4 sm:$0x3] %vm7_vm0, %v23_v6  }
  0x80   :  { %v17_v7 = vpop.permute.xlu0 %16  }
  0x81   :  { %28 = vst.msk [vmem:[%s62_s1 + $0x2] ss:$4 sm:$0x3] %vm7_vm0, %v17_v7  }

// kernel: tile.16
= control target key start
LH: loop header
LB: loop body
LE: loop exit
PB: predicated region body
PF: predicated region fallthrough
CT: control target
= control target key end

     0   :  { %2 = vsyncpa [#allocation1], 0  ;;  %s44_s6 = smov [#allocation0]   ;;  %s70_s0 = inlined_call_operand.hbm [shape: f32[4], index: 0, kind: input, shape index: {}]   ;;  %s71_s1 = inlined_call_operand.vmem [shape: f32[2,4], index: 1, kind: output, shape index: {}]  }
   0x1   :  { %s9_s7 = sshll.u32 %s44_s6, 4  ;;  %s20_s10 = scalar_lea.hbm %s70_s0, 16  ;;  %s10_s7 = int_to_ptr.vmem [resolvable:$true] %s9_s7 }
   0x2   :  { %p21_p0 = scmp.ne.s32.totalorder %s70_s0, %s20_s10  ;;  %p24_p1 = scmp.lt.u32.totalorder %s20_s10, %s70_s0 }
   0x4   :  { %p26_p2 = pnand %p24_p1, %p21_p0 }
   0x6   :  { %29 = shalt.err (!%p26_p2)
}
   0x7   :  { %s30_s15 = scalar_lea.vmem %s10_s7, 16  ;;  %s34_s16 = scalar_lea.vmem %s10_s7, 32 }
   0x8   :  { %p31_p3 = scmp.ne.s32.totalorder %s10_s7, %s30_s15  ;;  %p35_p4 = scmp.lt.s32.totalorder %s10_s7, %s10_s7 }
   0x9   :  { %p36_p5 = scmp.lt.s32.totalorder %s34_s16, %s30_s15 }
   0xb   :  { %p37_p6 = por %p36_p5, %p35_p4 }
   0xd   :  { %p38_p7 = pnand %p37_p6, %p31_p3 }
   0xf   :  { %41 = shalt.err (!%p38_p7)
}
  0x10   :  { %12 = dma.hbm_to_vmem [thread:$0]  %s70_s0, 16, %s10_s7, [#allocation1]  }
  0x11   :  { %42 = dma.done.wait [#allocation1], 16  }
  0x12   :  { %43 = vsyncadd [#allocation1], 4294967280  ;;  %v16_v0 = vld [vmem:[#allocation0] ss:$0 sm:$0xff] }
  0x13   :  { %17 = vst [vmem:[%s71_s1] sm:$0x3] %v16_v0 }
  0x14   :  { %18 = vsyncpa [#allocation1], 1 }

// kernel: cs_module.1
= control target key start
LH: loop header
LB: loop body
LE: loop exit
PB: predicated region body
PF: predicated region fallthrough
CT: control target
= control target key end

     0   :  { %s9019_s0 = inlined_call_operand.vmem [shape: f32[2,4,256], index: 0, kind: input, shape index: {}]   ;;  %s9020_s1 = inlined_call_operand.hbm [shape: f32[9,256,256], index: 1, kind: input, shape index: {}]   ;;  %s9021_s2 = inlined_call_operand.vmem [shape: f32[8,4], index: 2, kind: input, shape index: {}]   ;;  %s9022_s3 = inlined_call_operand.vmem [shape: f32[8,1], index: 3, kind: input, shape index: {}]   ;;  %s9023_s4 = inlined_call_operand.hbm [shape: f32[9,8,8], index: 4, kind: input, shape index: {}]   ;;  %s9024_s5 = inlined_call_operand.vmem [shape: f32[8,1], index: 5, kind: input, shape index: {}]   ;;  %s9025_s6 = inlined_call_operand.vmem [shape: f32[8,1], index: 6, kind: input, shape index: {}]   ;;  %s9026_s7 = inlined_call_operand.vmem [shape: f32[8,8], index: 7, kind: input, shape index: {}]   ;;  %s9027_s8 = inlined_call_operand.vmem [shape: f32[8,1], index: 8, kind: input, shape index: {}]   ;;  %s9028_s9 = inlined_call_operand.vmem [shape: f32[8,4], index: 9, kind: input, shape index: {}]   ;;  %s9029_s10 = inlined_call_operand.vmem [shape: f32[8,1], index: 10, kind: input, shape index: {}]   ;;  %s9030_s11 = inlined_call_operand.vmem [shape: f32[8,9], index: 11, kind: input, shape index: {}]   ;;  %s9031_s12 = inlined_call_operand.vmem [shape: f32[8,1], index: 12, kind: input, shape index: {}]   ;;  %s9032_s13 = inlined_call_operand.vmem [shape: f32[8,1], index: 13, kind: input, shape index: {}]   ;;  %s9033_s14 = inlined_call_operand.vmem [shape: f32[8,1], index: 14, kind: input, shape index: {}]   ;;  %s9034_s15 = inlined_call_operand.vmem [shape: f32[32,8], index: 15, kind: input, shape index: {}]   ;;  %s9035_s16 = inlined_call_operand.vmem [shape: f32[32,1], index: 16, kind: input, shape index: {}]   ;;  %s9036_s17 = inlined_call_operand.vmem [shape: f32[8,32], index: 17, kind: input, shape index: {}]   ;;  %s9037_s18 = inlined_call_operand.vmem [shape: f32[8,1], index: 18, kind: input, shape index: {}]   ;;  %s9038_s19 = inlined_call_operand.vmem [shape: f32[8,1], index: 19, kind: input, shape index: {}]   ;;  %s9039_s20 = inlined_call_operand.vmem [shape: f32[8,1], index: 20, kind: input, shape index: {}]   ;;  %s9040_s21 = inlined_call_operand.hbm [shape: f32[8,8], index: 21, kind: input, shape index: {}]   ;;  %s9041_s22 = inlined_call_operand.vmem [shape: f32[8,1], index: 22, kind: input, shape index: {}]   ;;  %s9042_s23 = inlined_call_operand.vmem [shape: f32[8,1], index: 23, kind: input, shape index: {}]   ;;  %s9043_s24 = inlined_call_operand.vmem [shape: f32[8,1], index: 24, kind: input, shape index: {}]   ;;  %s9044_s25 = inlined_call_operand.vmem [shape: f32[8,2], index: 25, kind: input, shape index: {}]   ;;  %s9045_s26 = inlined_call_operand.vmem [shape: f32[8,9], index: 26, kind: input, shape index: {}]   ;;  %s9046_s27 = inlined_call_operand.vmem [shape: f32[8,1], index: 27, kind: input, shape index: {}]   ;;  %s9047_s28 = inlined_call_operand.vmem [shape: f32[2,8,256], index: 28, kind: output, shape index: {}]  }
   0x1   :  { %9054 = sst [smem:[#allocation10_spill]] %s9019_s0 }
   0x2   :  { %9055 = sst [smem:[#allocation11_spill]] %s9020_s1 }
   0x3   :  { %9056 = sst [smem:[#allocation12_spill]] %s9021_s2 }
   0x4   :  { %9057 = sst [smem:[#allocation13_spill]] %s9022_s3 }
   0x5   :  { %9058 = sst [smem:[#allocation14_spill]] %s9023_s4 }
   0x6   :  { %9059 = sst [smem:[#allocation15_spill]] %s9024_s5 }
   0x7   :  { %9060 = sst [smem:[#allocation16_spill]] %s9025_s6 }
   0x8   :  { %9061 = sst [smem:[#allocation17_spill]] %s9026_s7 }
   0x9   :  { %9062 = sst [smem:[#allocation18_spill]] %s9027_s8 }
   0xa   :  { %9063 = sst [smem:[#allocation19_spill]] %s9028_s9 }
   0xb   :  { %9064 = sst [smem:[#allocation20_spill]] %s9029_s10 }
   0xc   :  { %9065 = sst [smem:[#allocation21_spill]] %s9030_s11 }
   0xd   :  { %9066 = sst [smem:[#allocation22_spill]] %s9031_s12 }
   0xe   :  { %9067 = sst [smem:[#allocation23_spill]] %s9043_s24 }
   0xf   :  { %9068 = sst [smem:[#allocation24_spill]] %s9044_s25 }
  0x10   :  { %9069 = sst [smem:[#allocation25_spill]] %s9045_s26 }
  0x11   :  { %9070 = sst [smem:[#allocation26_spill]] %s9046_s27 }
  0x12   :  { %9071 = sst [smem:[#allocation27_spill]] %s9047_s28 }
  0x13   :  { %33 = vsyncpa [#allocation3], 0 }
  0x14   :  { %34 = vsyncpa [#allocation5], 0  ;;  %s8517_s8 = smov 0  }
  0x15 LB: > { %9072 = sst [smem:[#allocation9_spill]] %s8351_s8  ;;  %s8353_s5 = smov [#allocation4]   ;;  %s8351_s8 = sphi %s8517_s8, %s40_s8  }
  0x16   : > { %s695_s9 = sshll.u32 %s8353_s5, 4  ;;  %s8523_s30 = sadd.s32 4294967295, %s8351_s8   ;;  %s8532_s9 = int_to_ptr.vmem [resolvable:$true] %s695_s9 }
  0x17   : > { %p6342_p0 = scmp.ge.s32.totalorder %s8351_s8, 1  ;;  %p664_p1 = scmp.lt.s32.totalorder %s8351_s8, 3 }
  0x18   : > { %p9052_p2 = scmp.eq.s32.totalorder %s8523_s30, 0  ;;  %s8354_s6 = smov [#allocation2]  }
  0x19   : > { %p8528_p3 = pnand %p6342_p0, %p664_p1  ;;  %s676_s10 = sshll.u32 %s8354_s6, 4  ;;  %s8536_s10 = int_to_ptr.vmem [resolvable:$true] %s676_s10 }
  0x1a   : > { %s8355_s11 = smov [#allocation6]   ;;  %s9075_s12 = sld [smem:[#allocation14_spill]] }
  0x1b   : > { %s9073_s3 = scalar_select %p8528_p3, 1, 0 }
  0x1c   : > { %p8149_p4 = pneg %p8528_p3  ;;  %s8544_s29 = sshll.u32 %s8355_s11, 4  ;;  %s758_s29 = int_to_ptr.vmem [resolvable:$true] %s8544_s29 }
  0x1e   : > { %p8540_p5 = pnand %p9052_p2, %p8149_p4 }
  0x20   : > { %s8253_s1 = scalar_lea.hbm %s9075_s12, 1152  ;;  %p8554_p7 = pneg %p8540_p5 }
  0x21   : > { %p8254_p6 = scmp.ne.s32.totalorder %s9075_s12, %s8253_s1  ;;  %p8260_p10 = scmp.lt.u32.totalorder %s8253_s1, %s9075_s12 }
  0x23   : > { %p8256_p8 = pnand %p8554_p7, %p8254_p6 }
  0x25   : > { %p8257_p9 = pneg %p8256_p8 }
  0x27   : > { %p8262_p11 = pnand %p8260_p10, %p8257_p9 }
  0x29   : > { %8265 = shalt.err (!%p8262_p11)
}
  0x2a   : > { %s8266_s2 = scalar_lea.vmem %s8532_s9, 1152  ;;  %p8274_p1 = scmp.lt.s32.totalorder %s8532_s9, %s8532_s9 }
  0x2b   : > { %p8267_p12 = scmp.ne.s32.totalorder %s8532_s9, %s8266_s2  ;;  %p8275_p4 = scmp.lt.s32.totalorder %s8266_s2, %s8266_s2 }
  0x2d   : > { %p8269_p13 = pnand %p8267_p12, %p8554_p7  ;;  %p8276_p6 = por %p8275_p4, %p8274_p1 }
  0x2f   : > { %p8270_p0 = pneg %p8269_p13 }
  0x31   : > { %p8277_p8 = pnand %p8276_p6, %p8270_p0 }
  0x33   : > { %8280 = shalt.err (!%p8277_p8)
}
  0x34   : > { %s8356_s7 = smov 128   ;;  %s8357_s8 = smov 8  }
  0x35   : > { %8155 = dma.hbm_to_vmem [thread:$0]  (!%p8540_p5), %s9075_s12, 1152, %s8532_s9, [#allocation5], %s8356_s7, %s8356_s7, %s8357_s8  }
  0x36   : > { %s9077_s28 = sld [smem:[#allocation11_spill]] }
  0x3c   : > { %s8281_s27 = scalar_lea.hbm %s9077_s28, 73728 }
  0x3d   : > { %p8282_p9 = scmp.ne.s32.totalorder %s9077_s28, %s8281_s27  ;;  %p8288_p12 = scmp.lt.u32.totalorder %s8281_s27, %s9077_s28 }
  0x3f   : > { %p8284_p10 = pnand %p8282_p9, %p8554_p7 }
  0x41   : > { %p8285_p11 = pneg %p8284_p10 }
  0x43   : > { %p8290_p13 = pnand %p8288_p12, %p8285_p11 }
  0x45   : > { %8293 = shalt.err (!%p8290_p13)
}
  0x46   : > { %s8294_s9 = scalar_lea.vmem %s8536_s10, 73728  ;;  %p8302_p6 = scmp.lt.s32.totalorder %s8536_s10, %s8536_s10 }
  0x47   : > { %p8295_p0 = scmp.ne.s32.totalorder %s8536_s10, %s8294_s9  ;;  %p8303_p8 = scmp.lt.s32.totalorder %s8294_s9, %s8294_s9 }
  0x49   : > { %p8297_p1 = pnand %p8295_p0, %p8554_p7  ;;  %p8304_p9 = por %p8303_p8, %p8302_p6 }
  0x4b   : > { %p8298_p4 = pneg %p8297_p1 }
  0x4d   : > { %p8305_p10 = pnand %p8304_p9, %p8298_p4 }
  0x4f   : > { %8308 = shalt.err (!%p8305_p10)
}
  0x50   : > { %s8358_s24 = smov 256   ;;  %s8359_s25 = smov 16  }
  0x51   : > { %8152 = dma.hbm_to_vmem [thread:$0]  (!%p8540_p5), %s9077_s28, 73728, %s8536_s10, [#allocation3], %s8358_s24, %s8358_s24, %s8359_s25  }
  0x52   : > { %s8309_s1 = scalar_lea.hbm %s9040_s21, 128 }
  0x53   : > { %p8310_p11 = scmp.ne.s32.totalorder %s9040_s21, %s8309_s1  ;;  %p8316_p0 = scmp.lt.u32.totalorder %s8309_s1, %s9040_s21 }
  0x55   : > { %p8312_p12 = pnand %p8310_p11, %p8554_p7 }
  0x57   : > { %p8313_p13 = pneg %p8312_p12 }
  0x59   : > { %p8318_p1 = pnand %p8316_p0, %p8313_p13 }
  0x5b   : > { %8321 = shalt.err (!%p8318_p1)
}
  0x5c   : > { %s8322_s9 = scalar_lea.vmem %s758_s29, 128  ;;  %p8330_p9 = scmp.lt.s32.totalorder %s758_s29, %s758_s29 }
  0x5d   : > { %p8323_p4 = scmp.ne.s32.totalorder %s758_s29, %s8322_s9  ;;  %p8331_p10 = scmp.lt.s32.totalorder %s8322_s9, %s8322_s9 }
  0x5f   : > { %p8325_p6 = pnand %p8323_p4, %p8554_p7  ;;  %p8332_p2 = por %p8331_p10, %p8330_p9 }
  0x61   : > { %p8326_p8 = pneg %p8325_p6 }
  0x63   : > { %p8333_p3 = pnand %p8332_p2, %p8326_p8 }
  0x65   : > { %8336 = shalt.err (!%p8333_p3)
}
  0x66   : > { %8158 = dma.hbm_to_vmem [thread:$0]  (!%p8540_p5), %s9040_s21, 128, %s758_s29, [#allocation5]  }
  0x67   : > { %p9078_p11 = scmp.ne.s32.totalorder %s9073_s3, 0 }
  0x68   : > { %p9079_p12 = scmp.eq.s32.totalorder (!%p9078_p11), %s8523_s30, 0 }
  0x69   : > { %796 = sbr.rel (%p9078_p11) target bundleno = 3772 (0xebc), region = 132 }
  0x70   : > { %8342 = dma.done.wait (%p9079_p12), [#allocation3], 73728   ;;  %p9080_p7 = pmov %p9079_p12 }
  0x72   : > { %8344 = vsyncadd (%p9080_p7), [#allocation3], 4294893568  ;;  %p9081_p13 = pmov %p9080_p7 }
  0x73   : > { %p9082_p2 = pmov %p9080_p7 }
  0x74   : > { %8346 = dma.done.wait (%p9081_p13), [#allocation5], 1280  }
  0x75   : > { %8348 = vsyncadd (%p9082_p2), [#allocation5], 4294966016  ;;  %p878_p3 = scmp.lt.s32.totalorder %s8523_s30, 1  ;;  %v8360_v0 = vmov 0.0   ;;  %v8361_v1 = vmov 0   ;;  %s9083_s6 = sld [smem:[#allocation10_spill]] }
  0x76   : > { %971 = vmatprep.mubr.f32.mxu1 %v8360_v0  ;;  %8192 = vset.pattern.permute.xlu0 %v8361_v1  ;;  %vm902_vm0 = vcmask 1043456   ;;  %s9084_s7 = sld [smem:[#allocation13_spill]]  ;;  %s9085_s4 = sld [smem:[#allocation12_spill]]  ;;  %v1118_v7 = vld [vmem:[#allocation2 + $0x208] sm:$0xff]  ;;  %vm898_vm1 = vcmask 31744   ;;  %v1120_v8 = vld [vmem:[#allocation2 + $0x218] sm:$0xff] }
  0x77   : > { %s9101_s30 = smov (!%p878_p3, %s8523_s30), 1  ;;  %8193 = vset.pattern.permute.xlu1 %v8361_v1  ;;  %s9086_s2 = sld [smem:[#allocation15_spill]]  ;;  %v980_v9 = vld [vmem:[#allocation2 + $0x8] sm:$0xff]  ;;  %v982_v10 = vld [vmem:[#allocation2 + $0x18] sm:$0xff]  ;;  %v6445_v11 = vpack.c.bf16 %v1120_v8, %v1118_v7  ;;  %v1117_v13 = vld [vmem:[#allocation2 + $0x200] sm:$0xff]  ;;  %vm1252_vm2 = vcmask 64512  }
  0x78   : > { %s6379_s3 = sshll.u32 %s9101_s30, 3  ;;  %v6381_v12 = vpack.c.bf16 %v982_v10, %v980_v9  ;;  %v1119_v14 = vld [vmem:[#allocation2 + $0x210] sm:$0xff]  ;;  %v979_v15 = vld [vmem:[#allocation2] sm:$0xff]  ;;  %s9087_s24 = sld [smem:[#allocation20_spill]]  ;;  %v1122_v19 = vld [vmem:[#allocation2 + $0x228] sm:$0xff]  ;;  %vm4616_vm3 = vcmask 261120  }
  0x79   : > { %v6447_v17 = vpack.c.bf16 %v1119_v14, %v1117_v13  ;;  %v981_v18 = vld [vmem:[#allocation2 + $0x10] sm:$0xff]  ;;  %v1124_v20 = vld [vmem:[#allocation2 + $0x238] sm:$0xff]  ;;  %v984_v23 = vld [vmem:[#allocation2 + $0x28] sm:$0xff]  ;;  %6446 = vmatprep.subr.bf16.mxu0 %v6445_v11  ;;  %s9088_s29 = sld [smem:[#allocation16_spill]]  ;;  %s9089_s27 = sld [smem:[#allocation18_spill]]  ;;  %vm4844_vm4 = vcmask 7168  }
  0x7a   : > { %v6383_v21 = vpack.c.bf16 %v981_v18, %v979_v15  ;;  %v6449_v22 = vpack.c.bf16 %v1124_v20, %v1122_v19  ;;  %v986_v24 = vld [vmem:[#allocation2 + $0x38] sm:$0xff]  ;;  %v1121_v25 = vld [vmem:[#allocation2 + $0x220] sm:$0xff]  ;;  %v1123_v27 = vld [vmem:[#allocation2 + $0x230] sm:$0xff]  ;;  %s9090_s1 = sld [smem:[#allocation21_spill]]  ;;  %s9091_s11 = sld [smem:[#allocation17_spill]]  ;;  %vm4897_vm5 = vcmask 15368  }
  0x7b   : > { %s8638_s25 = scalar_lea.vmem %s9083_s6, %s6379_s3  ;;  %v6385_v26 = vpack.c.bf16 %v986_v24, %v984_v23  ;;  %v983_v28 = vld [vmem:[#allocation2 + $0x20] sm:$0xff]  ;;  %v985_v29 = vld [vmem:[#allocation2 + $0x30] sm:$0xff]  ;;  %6448 = vmatpush1.bf16.msra.mxu0 %v6447_v17  ;;  %v6451_v30 = vpack.c.bf16 %v1123_v27, %v1121_v25  ;;  %v1126_v32 = vld [vmem:[#allocation2 + $0x248] sm:$0xff]  ;;  %s9092_s10 = sld [smem:[#allocation19_spill]] }
  0x7c   : > { %v889_v2 = vld [vmem:[%s8638_s25] sm:$0xff]  ;;  %v6387_v31 = vpack.c.bf16 %v985_v29, %v983_v28  ;;  %v1128_v33 = vld [vmem:[#allocation2 + $0x258] sm:$0xff]  ;;  %v988_v34 = vld [vmem:[#allocation2 + $0x48] sm:$0xff]  ;;  %6450 = vmatprep.subr.bf16.mxu0 %v6449_v22  ;;  %s8370_s0 = smov 1   ;;  %s9095_s5 = sld [smem:[#allocation23_spill]] }
  0x7d   : > { %v890_v3 = vld [vmem:[%s9084_s7] sm:$0xff]  ;;  %v8644_v4 = vcombine.high %v889_v2, %v889_v2  ;;  %v6453_v35 = vpack.c.bf16 %v1128_v33, %v1126_v32  ;;  %v990_v36 = vld [vmem:[#allocation2 + $0x58] sm:$0xff]  ;;  %v1127_v38 = vld [vmem:[#allocation2 + $0x250] sm:$0xff]  ;;  %s9094_s7 = sld [smem:[#allocation24_spill]]  ;;  %s9096_s9 = sld [smem:[#allocation25_spill]] }
  0x7e   : > { %v888_v5 = vld [vmem:[%s9085_s4] sm:$0xff]  ;;  %893 = vperm.xlu0 %8192, %v890_v3   ;;  %v6389_v39 = vpack.c.bf16 %v990_v36, %v988_v34  ;;  %v989_v41 = vld [vmem:[#allocation2 + $0x50] sm:$0xff]  ;;  %v1130_v42 = vld [vmem:[#allocation2 + $0x268] sm:$0xff]  ;;  %s8371_s3 = smov 127   ;;  %s9098_s26 = sld [smem:[#allocation27_spill]] }
  0x7f   : > { %v2899_v6 = vld [vmem:[%s9086_s2] sm:$0xff]  ;;  %6355 = vmatprep.subr.msk.mxu1 %vm902_vm0, %v8644_v4  ;;  %v1132_v43 = vld [vmem:[#allocation2 + $0x278] sm:$0xff]  ;;  %v992_v44 = vld [vmem:[#allocation2 + $0x68] sm:$0xff]  ;;  %6452 = vmatpush1.bf16.msra.mxu0 %v6451_v30 }
  0x80   : > { %6356 = vmatpush1.msk.msra.mxu1 %vm902_vm0, %v889_v2  ;;  %v3081_v16 = vld [vmem:[%s9087_s24] sm:$0xff]  ;;  %v994_v45 = vld [vmem:[#allocation2 + $0x78] sm:$0xff]  ;;  %v1131_v49 = vld [vmem:[#allocation2 + $0x270] sm:$0xff]  ;;  %6454 = vmatprep.subr.bf16.mxu0 %v6453_v35  ;;  %v6457_v50 = vpack.c.bf16 %v1132_v43, %v1130_v42  ;;  %s9097_s24 = sld [smem:[#allocation26_spill]] }
  0x81   : > { %6357 = vmatmul.mubr.msk.f32.vlgmr.msra.gmra.mrb[0].mxu1 %vm898_vm1, %v888_v5  ;;  %6382 = vmatprep.subr.bf16.mxu1 %v6381_v12  ;;  %v1125_v37 = vld [vmem:[#allocation2 + $0x240] sm:$0xff]  ;;  %v6393_v51 = vpack.c.bf16 %v994_v45, %v992_v44  ;;  %v993_v53 = vld [vmem:[#allocation2 + $0x70] sm:$0xff]  ;;  %v1134_v54 = vld [vmem:[#allocation2 + $0x288] sm:$0xff] }
  0x82   : > { %2902 = vperm.xlu0 %8192, %v2899_v6   ;;  %6384 = vmatpush1.bf16.msra.mxu1 %v6383_v21  ;;  %v987_v40 = vld [vmem:[#allocation2 + $0x40] sm:$0xff]  ;;  %v6455_v46 = vpack.c.bf16 %v1127_v38, %v1125_v37  ;;  %v1136_v55 = vld [vmem:[#allocation2 + $0x298] sm:$0xff]  ;;  %v996_v56 = vld [vmem:[#allocation2 + $0x88] sm:$0xff] }
  0x83   : > { %6386 = vmatprep.subr.bf16.mxu1 %v6385_v26  ;;  %v6391_v47 = vpack.c.bf16 %v989_v41, %v987_v40  ;;  %v1129_v48 = vld [vmem:[#allocation2 + $0x260] sm:$0xff]  ;;  %v998_v57 = vld [vmem:[#allocation2 + $0x98] sm:$0xff]  ;;  %v1135_v61 = vld [vmem:[#allocation2 + $0x290] sm:$0xff]  ;;  %v6461_v62 = vpack.c.bf16 %v1136_v55, %v1134_v54 }
  0x84   : > { %v991_v52 = vld [vmem:[#allocation2 + $0x60] sm:$0xff]  ;;  %6456 = vmatpush1.bf16.msra.mxu0 %v6455_v46  ;;  %v6459_v58 = vpack.c.bf16 %v1131_v49, %v1129_v48  ;;  %v6397_v63 = vpack.c.bf16 %v998_v57, %v996_v56  ;;  %v997_v3 = vld [vmem:[#allocation2 + $0x90] sm:$0xff]  ;;  %v1138_v5 = vld [vmem:[#allocation2 + $0x2a8] sm:$0xff] }
  0x85   : > { %v6395_v59 = vpack.c.bf16 %v993_v53, %v991_v52  ;;  %v1133_v60 = vld [vmem:[#allocation2 + $0x280] sm:$0xff]  ;;  %6458 = vmatprep.subr.bf16.mxu0 %v6457_v50  ;;  %v1140_v6 = vld [vmem:[#allocation2 + $0x2b8] sm:$0xff]  ;;  %v1000_v7 = vld [vmem:[#allocation2 + $0xa8] sm:$0xff] }
  0x86   : > { %3084 = vperm.xlu0 %8192, %v3081_v16   ;;  %6388 = vmatpush1.bf16.msra.mxu1 %v6387_v31  ;;  %v995_v2 = vld [vmem:[#allocation2 + $0x80] sm:$0xff]  ;;  %v1002_v8 = vld [vmem:[#allocation2 + $0xb8] sm:$0xff]  ;;  %v6463_v9 = vpack.c.bf16 %v1135_v61, %v1133_v60  ;;  %v1139_v12 = vld [vmem:[#allocation2 + $0x2b0] sm:$0xff]  ;;  %v6465_v13 = vpack.c.bf16 %v1140_v6, %v1138_v5 }
  0x87   : > { %6390 = vmatprep.subr.bf16.mxu1 %v6389_v39  ;;  %v6399_v10 = vpack.c.bf16 %v997_v3, %v995_v2  ;;  %v1137_v11 = vld [vmem:[#allocation2 + $0x2a0] sm:$0xff]  ;;  %v6401_v14 = vpack.c.bf16 %v1002_v8, %v1000_v7  ;;  %v1001_v16 = vld [vmem:[#allocation2 + $0xb0] sm:$0xff]  ;;  %v1142_v17 = vld [vmem:[#allocation2 + $0x2c8] sm:$0xff] }
  0x88   : > { %6460 = vmatpush1.bf16.msra.mxu0 %v6459_v58  ;;  %v999_v15 = vld [vmem:[#allocation2 + $0xa0] sm:$0xff]  ;;  %v1144_v18 = vld [vmem:[#allocation2 + $0x2d8] sm:$0xff]  ;;  %v1004_v19 = vld [vmem:[#allocation2 + $0xc8] sm:$0xff]  ;;  %v6467_v21 = vpack.c.bf16 %v1139_v12, %v1137_v11 }
  0x89   : > { %6462 = vmatprep.subr.bf16.mxu0 %v6461_v62  ;;  %v1006_v20 = vld [vmem:[#allocation2 + $0xd8] sm:$0xff]  ;;  %v6403_v22 = vpack.c.bf16 %v1001_v16, %v999_v15  ;;  %v1141_v23 = vld [vmem:[#allocation2 + $0x2c0] sm:$0xff]  ;;  %v1143_v24 = vld [vmem:[#allocation2 + $0x2d0] sm:$0xff]  ;;  %v6469_v25 = vpack.c.bf16 %v1144_v18, %v1142_v17 }
  0x8a   : > { %6392 = vmatpush1.bf16.msra.mxu1 %v6391_v47  ;;  %v6405_v26 = vpack.c.bf16 %v1006_v20, %v1004_v19  ;;  %v1003_v27 = vld [vmem:[#allocation2 + $0xc0] sm:$0xff]  ;;  %v1005_v28 = vld [vmem:[#allocation2 + $0xd0] sm:$0xff]  ;;  %v1146_v29 = vld [vmem:[#allocation2 + $0x2e8] sm:$0xff]  ;;  %v6471_v33 = vpack.c.bf16 %v1143_v24, %v1141_v23 }
  0x8b   : > { %6394 = vmatprep.subr.bf16.mxu1 %v6393_v51  ;;  %v1148_v30 = vld [vmem:[#allocation2 + $0x2f8] sm:$0xff]  ;;  %v1008_v31 = vld [vmem:[#allocation2 + $0xe8] sm:$0xff]  ;;  %v6407_v34 = vpack.c.bf16 %v1005_v28, %v1003_v27  ;;  %v1145_v35 = vld [vmem:[#allocation2 + $0x2e0] sm:$0xff] }
  0x8c   : > { %6464 = vmatpush1.bf16.msra.mxu0 %v6463_v9  ;;  %v1010_v32 = vld [vmem:[#allocation2 + $0xf8] sm:$0xff]  ;;  %v1147_v36 = vld [vmem:[#allocation2 + $0x2f0] sm:$0xff]  ;;  %v6473_v37 = vpack.c.bf16 %v1148_v30, %v1146_v29  ;;  %v1007_v39 = vld [vmem:[#allocation2 + $0xe0] sm:$0xff] }
  0x8d   : > { %6466 = vmatprep.subr.bf16.mxu0 %v6465_v13  ;;  %v6409_v38 = vpack.c.bf16 %v1010_v32, %v1008_v31  ;;  %v1009_v40 = vld [vmem:[#allocation2 + $0xf0] sm:$0xff]  ;;  %v1150_v41 = vld [vmem:[#allocation2 + $0x308] sm:$0xff]  ;;  %v1152_v42 = vld [vmem:[#allocation2 + $0x318] sm:$0xff]  ;;  %v6475_v45 = vpack.c.bf16 %v1147_v36, %v1145_v35 }
  0x8e   : > { %6396 = vmatpush1.bf16.msra.mxu1 %v6395_v59  ;;  %v1012_v43 = vld [vmem:[#allocation2 + $0x108] sm:$0xff]  ;;  %v1014_v44 = vld [vmem:[#allocation2 + $0x118] sm:$0xff]  ;;  %v6411_v46 = vpack.c.bf16 %v1009_v40, %v1007_v39  ;;  %v1149_v47 = vld [vmem:[#allocation2 + $0x300] sm:$0xff]  ;;  %v6477_v49 = vpack.c.bf16 %v1152_v42, %v1150_v41 }
  0x8f   : > { %6398 = vmatprep.subr.bf16.mxu1 %v6397_v63  ;;  %v1151_v48 = vld [vmem:[#allocation2 + $0x310] sm:$0xff]  ;;  %v6413_v50 = vpack.c.bf16 %v1014_v44, %v1012_v43  ;;  %v1011_v51 = vld [vmem:[#allocation2 + $0x100] sm:$0xff]  ;;  %v1154_v53 = vld [vmem:[#allocation2 + $0x328] sm:$0xff] }
  0x90   : > { %6468 = vmatpush1.bf16.msra.mxu0 %v6467_v21  ;;  %v1013_v52 = vld [vmem:[#allocation2 + $0x110] sm:$0xff]  ;;  %v1156_v54 = vld [vmem:[#allocation2 + $0x338] sm:$0xff]  ;;  %v1016_v55 = vld [vmem:[#allocation2 + $0x128] sm:$0xff]  ;;  %v6479_v57 = vpack.c.bf16 %v1151_v48, %v1149_v47 }
  0x91   : > { %6470 = vmatprep.subr.bf16.mxu0 %v6469_v25  ;;  %v1018_v56 = vld [vmem:[#allocation2 + $0x138] sm:$0xff]  ;;  %v6415_v58 = vpack.c.bf16 %v1013_v52, %v1011_v51  ;;  %v1153_v59 = vld [vmem:[#allocation2 + $0x320] sm:$0xff]  ;;  %v1155_v60 = vld [vmem:[#allocation2 + $0x330] sm:$0xff]  ;;  %v6481_v61 = vpack.c.bf16 %v1156_v54, %v1154_v53 }
  0x92   : > { %6400 = vmatpush1.bf16.msra.mxu1 %v6399_v10  ;;  %v6417_v62 = vpack.c.bf16 %v1018_v56, %v1016_v55  ;;  %v1015_v63 = vld [vmem:[#allocation2 + $0x120] sm:$0xff]  ;;  %v1017_v2 = vld [vmem:[#allocation2 + $0x130] sm:$0xff]  ;;  %v1158_v3 = vld [vmem:[#allocation2 + $0x348] sm:$0xff]  ;;  %v6483_v8 = vpack.c.bf16 %v1155_v60, %v1153_v59 }
  0x93   : > { %6402 = vmatprep.subr.bf16.mxu1 %v6401_v14  ;;  %v1160_v5 = vld [vmem:[#allocation2 + $0x358] sm:$0xff]  ;;  %v1020_v6 = vld [vmem:[#allocation2 + $0x148] sm:$0xff]  ;;  %v6419_v9 = vpack.c.bf16 %v1017_v2, %v1015_v63  ;;  %v1157_v10 = vld [vmem:[#allocation2 + $0x340] sm:$0xff] }
  0x94   : > { %6472 = vmatpush1.bf16.msra.mxu0 %v6471_v33  ;;  %v1022_v7 = vld [vmem:[#allocation2 + $0x158] sm:$0xff]  ;;  %v1159_v11 = vld [vmem:[#allocation2 + $0x350] sm:$0xff]  ;;  %v6485_v12 = vpack.c.bf16 %v1160_v5, %v1158_v3  ;;  %v1019_v14 = vld [vmem:[#allocation2 + $0x140] sm:$0xff] }
  0x95   : > { %6474 = vmatprep.subr.bf16.mxu0 %v6473_v37  ;;  %v6421_v13 = vpack.c.bf16 %v1022_v7, %v1020_v6  ;;  %v1021_v15 = vld [vmem:[#allocation2 + $0x150] sm:$0xff]  ;;  %v1162_v16 = vld [vmem:[#allocation2 + $0x368] sm:$0xff]  ;;  %v1164_v17 = vld [vmem:[#allocation2 + $0x378] sm:$0xff]  ;;  %v6487_v20 = vpack.c.bf16 %v1159_v11, %v1157_v10 }
  0x96   : > { %6404 = vmatpush1.bf16.msra.mxu1 %v6403_v22  ;;  %v1024_v18 = vld [vmem:[#allocation2 + $0x168] sm:$0xff]  ;;  %v1026_v19 = vld [vmem:[#allocation2 + $0x178] sm:$0xff]  ;;  %v6423_v21 = vpack.c.bf16 %v1021_v15, %v1019_v14  ;;  %v1161_v22 = vld [vmem:[#allocation2 + $0x360] sm:$0xff]  ;;  %v6489_v24 = vpack.c.bf16 %v1164_v17, %v1162_v16 }
  0x97   : > { %6406 = vmatprep.subr.bf16.mxu1 %v6405_v26  ;;  %v1163_v23 = vld [vmem:[#allocation2 + $0x370] sm:$0xff]  ;;  %v6425_v25 = vpack.c.bf16 %v1026_v19, %v1024_v18  ;;  %v1023_v26 = vld [vmem:[#allocation2 + $0x160] sm:$0xff]  ;;  %v1166_v28 = vld [vmem:[#allocation2 + $0x388] sm:$0xff] }
  0x98   : > { %6476 = vmatpush1.bf16.msra.mxu0 %v6475_v45  ;;  %v1025_v27 = vld [vmem:[#allocation2 + $0x170] sm:$0xff]  ;;  %v1168_v29 = vld [vmem:[#allocation2 + $0x398] sm:$0xff]  ;;  %v1028_v30 = vld [vmem:[#allocation2 + $0x188] sm:$0xff]  ;;  %v6491_v32 = vpack.c.bf16 %v1163_v23, %v1161_v22 }
  0x99   : > { %6478 = vmatprep.subr.bf16.mxu0 %v6477_v49  ;;  %v1030_v31 = vld [vmem:[#allocation2 + $0x198] sm:$0xff]  ;;  %v6427_v33 = vpack.c.bf16 %v1025_v27, %v1023_v26  ;;  %v1167_v35 = vld [vmem:[#allocation2 + $0x390] sm:$0xff]  ;;  %v6493_v36 = vpack.c.bf16 %v1168_v29, %v1166_v28  ;;  %v1170_v40 = vld [vmem:[#allocation2 + $0x3a8] sm:$0xff] }
  0x9a   : > { %6408 = vmatpush1.bf16.msra.mxu1 %v6407_v34  ;;  %v1165_v34 = vld [vmem:[#allocation2 + $0x380] sm:$0xff]  ;;  %v6429_v37 = vpack.c.bf16 %v1030_v31, %v1028_v30  ;;  %v1029_v39 = vld [vmem:[#allocation2 + $0x190] sm:$0xff]  ;;  %v1172_v41 = vld [vmem:[#allocation2 + $0x3b8] sm:$0xff] }
  0x9b   : > { %6410 = vmatprep.subr.bf16.mxu1 %v6409_v38  ;;  %v1027_v38 = vld [vmem:[#allocation2 + $0x180] sm:$0xff]  ;;  %v1032_v42 = vld [vmem:[#allocation2 + $0x1a8] sm:$0xff]  ;;  %v1034_v43 = vld [vmem:[#allocation2 + $0x1b8] sm:$0xff]  ;;  %v6495_v44 = vpack.c.bf16 %v1167_v35, %v1165_v34  ;;  %v6497_v48 = vpack.c.bf16 %v1172_v41, %v1170_v40 }
  0x9c   : > { %6480 = vmatpush1.bf16.msra.mxu0 %v6479_v57  ;;  %v6431_v45 = vpack.c.bf16 %v1029_v39, %v1027_v38  ;;  %v1171_v47 = vld [vmem:[#allocation2 + $0x3b0] sm:$0xff]  ;;  %v6433_v49 = vpack.c.bf16 %v1034_v43, %v1032_v42  ;;  %v1174_v52 = vld [vmem:[#allocation2 + $0x3c8] sm:$0xff]  ;;  %v1176_v53 = vld [vmem:[#allocation2 + $0x3d8] sm:$0xff] }
  0x9d   : > { %6482 = vmatprep.subr.bf16.mxu0 %v6481_v61  ;;  %v1033_v51 = vld [vmem:[#allocation2 + $0x1b0] sm:$0xff]  ;;  %v1036_v54 = vld [vmem:[#allocation2 + $0x1c8] sm:$0xff]  ;;  %v1038_v55 = vld [vmem:[#allocation2 + $0x1d8] sm:$0xff]  ;;  %v6501_v59 = vpack.c.bf16 %v1176_v53, %v1174_v52 }
  0x9e   : > { %6412 = vmatpush1.bf16.msra.mxu1 %v6411_v46  ;;  %v1169_v46 = vld [vmem:[#allocation2 + $0x3a0] sm:$0xff]  ;;  %v1175_v60 = vld [vmem:[#allocation2 + $0x3d0] sm:$0xff]  ;;  %v6437_v61 = vpack.c.bf16 %v1038_v55, %v1036_v54  ;;  %v1178_v5 = vld [vmem:[#allocation2 + $0x3e8] sm:$0xff] }
  0x9f   : > { %6414 = vmatprep.subr.bf16.mxu1 %v6413_v50  ;;  %v1031_v50 = vld [vmem:[#allocation2 + $0x1a0] sm:$0xff]  ;;  %v6499_v56 = vpack.c.bf16 %v1171_v47, %v1169_v46  ;;  %v1037_v63 = vld [vmem:[#allocation2 + $0x1d0] sm:$0xff]  ;;  %v1180_v6 = vld [vmem:[#allocation2 + $0x3f8] sm:$0xff] }
  0xa0   : > { %6484 = vmatpush1.bf16.msra.mxu0 %v6483_v8  ;;  %v6435_v57 = vpack.c.bf16 %v1033_v51, %v1031_v50  ;;  %v6505_v7 = vpack.c.bf16 %v1180_v6, %v1178_v5  ;;  %v1177_v8 = vld [vmem:[#allocation2 + $0x3e0] sm:$0xff]  ;;  %v1040_v10 = vld [vmem:[#allocation2 + $0x1e8] sm:$0xff]  ;;  %v1041_v14 = vld [vmem:[#allocation2 + $0x1f0] sm:$0xff] }
  0xa1   : > { %6486 = vmatprep.subr.bf16.mxu0 %v6485_v12  ;;  %v1042_v12 = vld [vmem:[#allocation2 + $0x1f8] sm:$0xff]  ;;  %v1405_v17 = vld [vmem:[#allocation2 + $0x408] sm:$0xff]  ;;  %v1408_v31 = vld [vmem:[#allocation2 + $0x420] sm:$0xff] }
  0xa2   : > { %6416 = vmatpush1.bf16.msra.mxu1 %v6415_v58  ;;  %v1173_v58 = vld [vmem:[#allocation2 + $0x3c0] sm:$0xff]  ;;  %v6441_v15 = vpack.c.bf16 %v1042_v12, %v1040_v10  ;;  %v1407_v18 = vld [vmem:[#allocation2 + $0x418] sm:$0xff]  ;;  %v1409_v23 = vld [vmem:[#allocation2 + $0x428] sm:$0xff] }
  0xa3   : > { %6418 = vmatprep.subr.bf16.mxu1 %v6417_v62  ;;  %v1035_v62 = vld [vmem:[#allocation2 + $0x1c0] sm:$0xff]  ;;  %v6503_v2 = vpack.c.bf16 %v1175_v60, %v1173_v58  ;;  %v6509_v19 = vpack.c.bf16 %v1407_v18, %v1405_v17  ;;  %v1415_v34 = vld [vmem:[#allocation2 + $0x458] sm:$0xff]  ;;  %v1414_v38 = vld [vmem:[#allocation2 + $0x450] sm:$0xff] }
  0xa4   : > { %6488 = vmatpush1.bf16.msra.mxu0 %v6487_v20  ;;  %v6439_v3 = vpack.c.bf16 %v1037_v63, %v1035_v62  ;;  %v1404_v20 = vld [vmem:[#allocation2 + $0x400] sm:$0xff]  ;;  %v1417_v39 = vld [vmem:[#allocation2 + $0x468] sm:$0xff]  ;;  %v1419_v40 = vld [vmem:[#allocation2 + $0x478] sm:$0xff] }
  0xa5   : > { %6490 = vmatprep.subr.bf16.mxu0 %v6489_v24  ;;  %v1411_v24 = vld [vmem:[#allocation2 + $0x438] sm:$0xff]  ;;  %v6521_v42 = vpack.c.bf16 %v1419_v40, %v1417_v39  ;;  %v1416_v43 = vld [vmem:[#allocation2 + $0x460] sm:$0xff]  ;;  %v1422_v50 = vld [vmem:[#allocation2 + $0x490] sm:$0xff] }
  0xa6   : > { %6420 = vmatpush1.bf16.msra.mxu1 %v6419_v9  ;;  %v1179_v9 = vld [vmem:[#allocation2 + $0x3f0] sm:$0xff]  ;;  %v6513_v30 = vpack.c.bf16 %v1411_v24, %v1409_v23  ;;  %v1423_v46 = vld [vmem:[#allocation2 + $0x498] sm:$0xff]  ;;  %v1425_v51 = vld [vmem:[#allocation2 + $0x4a8] sm:$0xff] }
  0xa7   : > { %6422 = vmatprep.subr.bf16.mxu1 %v6421_v13  ;;  %v6507_v11 = vpack.c.bf16 %v1179_v9, %v1177_v8  ;;  %v1039_v13 = vld [vmem:[#allocation2 + $0x1e0] sm:$0xff]  ;;  %v1427_v52 = vld [vmem:[#allocation2 + $0x4b8] sm:$0xff]  ;;  %v1430_v62 = vld [vmem:[#allocation2 + $0x4d0] sm:$0xff] }
  0xa8   : > { %6492 = vmatpush1.bf16.msra.mxu0 %v6491_v32  ;;  %v6443_v16 = vpack.c.bf16 %v1041_v14, %v1039_v13  ;;  %v1410_v32 = vld [vmem:[#allocation2 + $0x430] sm:$0xff]  ;;  %v6529_v54 = vpack.c.bf16 %v1427_v52, %v1425_v51  ;;  %v1424_v55 = vld [vmem:[#allocation2 + $0x4a0] sm:$0xff]  ;;  %v1431_v58 = vld [vmem:[#allocation2 + $0x4d8] sm:$0xff] }
  0xa9   : > { %6494 = vmatprep.subr.bf16.mxu0 %v6493_v36  ;;  %v6515_v35 = vpack.c.bf16 %v1410_v32, %v1408_v31  ;;  %v1433_v63 = vld [vmem:[#allocation2 + $0x4e8] sm:$0xff]  ;;  %v1432_v6 = vld [vmem:[#allocation2 + $0x4e0] sm:$0xff]  ;;  %v1439_v9 = vld [vmem:[#allocation2 + $0x518] sm:$0xff] }
  0xaa   : > { %6424 = vmatpush1.bf16.msra.mxu1 %v6423_v21  ;;  %v1406_v21 = vld [vmem:[#allocation2 + $0x410] sm:$0xff]  ;;  %v1437_v8 = vld [vmem:[#allocation2 + $0x508] sm:$0xff]  ;;  %v1436_v12 = vld [vmem:[#allocation2 + $0x500] sm:$0xff] }
  0xab   : > { %6426 = vmatprep.subr.bf16.mxu1 %v6425_v25  ;;  %v6511_v28 = vpack.c.bf16 %v1406_v21, %v1404_v20  ;;  %v1438_v13 = vld [vmem:[#allocation2 + $0x510] sm:$0xff]  ;;  %v1441_v14 = vld [vmem:[#allocation2 + $0x528] sm:$0xff]  ;;  %v1440_v18 = vld [vmem:[#allocation2 + $0x520] sm:$0xff] }
  0xac   : > { %6496 = vmatpush1.bf16.msra.mxu0 %v6495_v44  ;;  %v1418_v44 = vld [vmem:[#allocation2 + $0x470] sm:$0xff]  ;;  %v1445_v20 = vld [vmem:[#allocation2 + $0x548] sm:$0xff]  ;;  %v1447_v21 = vld [vmem:[#allocation2 + $0x558] sm:$0xff] }
  0xad   : > { %6498 = vmatprep.subr.bf16.mxu0 %v6497_v48  ;;  %v6523_v47 = vpack.c.bf16 %v1418_v44, %v1416_v43  ;;  %v6549_v23 = vpack.c.bf16 %v1447_v21, %v1445_v20  ;;  %v1444_v24 = vld [vmem:[#allocation2 + $0x540] sm:$0xff]  ;;  %v1454_v39 = vld [vmem:[#allocation2 + $0x590] sm:$0xff]  ;;  %v1457_v40 = vld [vmem:[#allocation2 + $0x5a8] sm:$0xff] }
  0xae   : > { %6428 = vmatpush1.bf16.msra.mxu1 %v6427_v33  ;;  %v1413_v33 = vld [vmem:[#allocation2 + $0x448] sm:$0xff]  ;;  %v1448_v32 = vld [vmem:[#allocation2 + $0x560] sm:$0xff]  ;;  %v1462_v51 = vld [vmem:[#allocation2 + $0x5d0] sm:$0xff] }
  0xaf   : > { %6430 = vmatprep.subr.bf16.mxu1 %v6429_v37  ;;  %v6517_v36 = vpack.c.bf16 %v1415_v34, %v1413_v33  ;;  %v1412_v37 = vld [vmem:[#allocation2 + $0x440] sm:$0xff]  ;;  %v1450_v33 = vld [vmem:[#allocation2 + $0x570] sm:$0xff]  ;;  %v1453_v34 = vld [vmem:[#allocation2 + $0x588] sm:$0xff] }
  0xb0   : > { %6500 = vmatpush1.bf16.msra.mxu0 %v6499_v56  ;;  %v6519_v41 = vpack.c.bf16 %v1414_v38, %v1412_v37  ;;  %v1426_v56 = vld [vmem:[#allocation2 + $0x4b0] sm:$0xff]  ;;  %v1452_v38 = vld [vmem:[#allocation2 + $0x580] sm:$0xff]  ;;  %v1465_v52 = vld [vmem:[#allocation2 + $0x5e8] sm:$0xff] }
  0xb1   : > { %6502 = vmatprep.subr.bf16.mxu0 %v6501_v59  ;;  %v6531_v59 = vpack.c.bf16 %v1426_v56, %v1424_v55  ;;  %v1456_v44 = vld [vmem:[#allocation2 + $0x5a0] sm:$0xff]  ;;  %v1846_v20 = vld [vmem:[#allocation2 + $0x870] sm:$0xff]  ;;  %v1849_v21 = vld [vmem:[#allocation2 + $0x888] sm:$0xff] }
  0xb2   : > { %6432 = vmatpush1.bf16.msra.mxu1 %v6431_v45  ;;  %v1421_v45 = vld [vmem:[#allocation2 + $0x488] sm:$0xff]  ;;  %v1464_v56 = vld [vmem:[#allocation2 + $0x5e0] sm:$0xff] }
  0xb3   : > { %6434 = vmatprep.subr.bf16.mxu1 %v6433_v49  ;;  %v6525_v48 = vpack.c.bf16 %v1423_v46, %v1421_v45  ;;  %v1420_v49 = vld [vmem:[#allocation2 + $0x480] sm:$0xff]  ;;  %v1458_v45 = vld [vmem:[#allocation2 + $0x5b0] sm:$0xff]  ;;  %v1461_v46 = vld [vmem:[#allocation2 + $0x5c8] sm:$0xff] }
  0xb4   : > { %6504 = vmatpush1.bf16.msra.mxu0 %v6503_v2  ;;  %v6527_v53 = vpack.c.bf16 %v1422_v50, %v1420_v49  ;;  %v1435_v2 = vld [vmem:[#allocation2 + $0x4f8] sm:$0xff]  ;;  %v1460_v50 = vld [vmem:[#allocation2 + $0x5c0] sm:$0xff] }
  0xb5   : > { %6506 = vmatprep.subr.bf16.mxu0 %v6505_v7  ;;  %v6537_v5 = vpack.c.bf16 %v1435_v2, %v1433_v63  ;;  %v1434_v7 = vld [vmem:[#allocation2 + $0x4f0] sm:$0xff]  ;;  %v1837_v2 = vld [vmem:[#allocation2 + $0x828] sm:$0xff] }
  0xb6   : > { %6436 = vmatpush1.bf16.msra.mxu1 %v6435_v57  ;;  %v1429_v57 = vld [vmem:[#allocation2 + $0x4c8] sm:$0xff]  ;;  %v6539_v10 = vpack.c.bf16 %v1434_v7, %v1432_v6  ;;  %v1834_v63 = vld [vmem:[#allocation2 + $0x810] sm:$0xff]  ;;  %v1836_v7 = vld [vmem:[#allocation2 + $0x820] sm:$0xff] }
  0xb7   : > { %6438 = vmatprep.subr.bf16.mxu1 %v6437_v61  ;;  %v6533_v60 = vpack.c.bf16 %v1431_v58, %v1429_v57  ;;  %v1428_v61 = vld [vmem:[#allocation2 + $0x4c0] sm:$0xff]  ;;  %v1466_v57 = vld [vmem:[#allocation2 + $0x5f0] sm:$0xff]  ;;  %v1833_v58 = vld [vmem:[#allocation2 + $0x808] sm:$0xff] }
  0xb8   : > { %6508 = vmatpush1.bf16.msra.mxu0 %v6507_v11  ;;  %v6541_v11 = vpack.c.bf16 %v1439_v9, %v1437_v8  ;;  %v1838_v8 = vld [vmem:[#allocation2 + $0x830] sm:$0xff]  ;;  %v1841_v9 = vld [vmem:[#allocation2 + $0x848] sm:$0xff] }
  0xb9   : > { %6510 = vmatprep.subr.bf16.mxu0 %v6509_v19  ;;  %v1442_v19 = vld [vmem:[#allocation2 + $0x530] sm:$0xff] }
  0xba   : > { %6440 = vmatpush1.bf16.msra.mxu1 %v6439_v3  ;;  %v6535_v3 = vpack.c.bf16 %v1430_v62, %v1428_v61  ;;  %v1832_v62 = vld [vmem:[#allocation2 + $0x800] sm:$0xff] }
  0xbb   : > { %6442 = vmatprep.subr.bf16.mxu1 %v6441_v15  ;;  %v1443_v15 = vld [vmem:[#allocation2 + $0x538] sm:$0xff] }
  0xbc   : > { %v6545_v17 = vpack.c.bf16 %v1443_v15, %v1441_v14  ;;  %v1842_v14 = vld [vmem:[#allocation2 + $0x850] sm:$0xff]  ;;  %v1845_v15 = vld [vmem:[#allocation2 + $0x868] sm:$0xff] }
  0xbe   : > { %6444 = vmatpush1.bf16.msra.mxu1 %v6443_v16  ;;  %v6543_v16 = vpack.c.bf16 %v1438_v13, %v1436_v12  ;;  %v1840_v13 = vld [vmem:[#allocation2 + $0x840] sm:$0xff] }
  0xfd   : > { %v894_v25 = vpop.permute.xlu0 %893 }
 0x154   : > { %v973_v22 = vpop.f32.mrb[0].mxu1 }
 0x155   : > { %v975_v26 = vpop.f32.mrb[1].mxu1  ;;  %v8661_v29 = vadd.f32 %v973_v22, %v894_v25  ;;  %v6547_v22 = vpack.c.bf16 %v1442_v19, %v1440_v18  ;;  %v1844_v19 = vld [vmem:[#allocation2 + $0x860] sm:$0xff] }
 0x156   : > { %v8659_v27 = vadd.f32 %v975_v26, %v894_v25  ;;  %v1446_v25 = vld [vmem:[#allocation2 + $0x550] sm:$0xff]  ;;  %v1449_v26 = vld [vmem:[#allocation2 + $0x568] sm:$0xff] }
 0x158   : > { %1107 = vmatprep.mubr.f32.mxu1 %v8659_v27  ;;  %1245 = vmatprep.mubr.f32.mxu0 %v8659_v27 }
 0x159   : > { %1108 = vmatmul.mubr.f32.vlgmr.msra.gmra.mrb[2].mxu1 %v8661_v29  ;;  %1246 = vmatmul.mubr.f32.vlgmr.msra.gmra.mrb[0].mxu0 %v8661_v29 }
 0x15a   : > { %6512 = vmatpush1.bf16.msra.mxu0 %v6511_v28  ;;  %1532 = vmatprep.mubr.f32.mxu0 %v8659_v27  ;;  %v1451_v28 = vld [vmem:[#allocation2 + $0x578] sm:$0xff] }
 0x15b   : > { %6514 = vmatprep.subr.bf16.mxu0 %v6513_v30  ;;  %1320 = vmatprep.mubr.f32.mxu1 %v8360_v0  ;;  %v6551_v30 = vpack.c.bf16 %v1446_v25, %v1444_v24  ;;  %v6553_v31 = vpack.c.bf16 %v1451_v28, %v1449_v26  ;;  %v1848_v25 = vld [vmem:[#allocation2 + $0x880] sm:$0xff]  ;;  %v1850_v26 = vld [vmem:[#allocation2 + $0x890] sm:$0xff]  ;;  %v1853_v28 = vld [vmem:[#allocation2 + $0x8a8] sm:$0xff] }
 0x15e   : > { %6516 = vmatpush1.bf16.msra.mxu0 %v6515_v35  ;;  %v1455_v35 = vld [vmem:[#allocation2 + $0x598] sm:$0xff] }
 0x15f   : > { %6518 = vmatprep.subr.bf16.mxu0 %v6517_v36  ;;  %v6555_v36 = vpack.c.bf16 %v1450_v33, %v1448_v32  ;;  %v6557_v37 = vpack.c.bf16 %v1455_v35, %v1453_v34  ;;  %v1852_v33 = vld [vmem:[#allocation2 + $0x8a0] sm:$0xff]  ;;  %v1854_v34 = vld [vmem:[#allocation2 + $0x8b0] sm:$0xff]  ;;  %v1857_v35 = vld [vmem:[#allocation2 + $0x8c8] sm:$0xff] }
 0x162   : > { %6520 = vmatpush1.bf16.msra.mxu0 %v6519_v41  ;;  %v1459_v41 = vld [vmem:[#allocation2 + $0x5b8] sm:$0xff] }
 0x163   : > { %6522 = vmatprep.subr.bf16.mxu0 %v6521_v42  ;;  %v6559_v42 = vpack.c.bf16 %v1454_v39, %v1452_v38  ;;  %v6561_v43 = vpack.c.bf16 %v1459_v41, %v1457_v40  ;;  %v1856_v39 = vld [vmem:[#allocation2 + $0x8c0] sm:$0xff]  ;;  %v1858_v40 = vld [vmem:[#allocation2 + $0x8d0] sm:$0xff]  ;;  %v1861_v41 = vld [vmem:[#allocation2 + $0x8e8] sm:$0xff] }
 0x166   : > { %6524 = vmatpush1.bf16.msra.mxu0 %v6523_v47  ;;  %v1463_v47 = vld [vmem:[#allocation2 + $0x5d8] sm:$0xff] }
 0x167   : > { %6526 = vmatprep.subr.bf16.mxu0 %v6525_v48  ;;  %v6563_v48 = vpack.c.bf16 %v1458_v45, %v1456_v44  ;;  %v6565_v49 = vpack.c.bf16 %v1463_v47, %v1461_v46  ;;  %v1860_v45 = vld [vmem:[#allocation2 + $0x8e0] sm:$0xff]  ;;  %v1862_v46 = vld [vmem:[#allocation2 + $0x8f0] sm:$0xff]  ;;  %v1865_v47 = vld [vmem:[#allocation2 + $0x908] sm:$0xff] }
 0x16a   : > { %6528 = vmatpush1.bf16.msra.mxu0 %v6527_v53  ;;  %v1467_v53 = vld [vmem:[#allocation2 + $0x5f8] sm:$0xff] }
 0x16b   : > { %6530 = vmatprep.subr.bf16.mxu0 %v6529_v54  ;;  %v6567_v54 = vpack.c.bf16 %v1462_v51, %v1460_v50  ;;  %v6569_v55 = vpack.c.bf16 %v1467_v53, %v1465_v52  ;;  %v1864_v51 = vld [vmem:[#allocation2 + $0x900] sm:$0xff]  ;;  %v1866_v52 = vld [vmem:[#allocation2 + $0x910] sm:$0xff]  ;;  %v1869_v53 = vld [vmem:[#allocation2 + $0x928] sm:$0xff] }
 0x16e   : > { %6532 = vmatpush1.bf16.msra.mxu0 %v6531_v59  ;;  %v1835_v59 = vld [vmem:[#allocation2 + $0x818] sm:$0xff] }
 0x16f   : > { %6534 = vmatprep.subr.bf16.mxu0 %v6533_v60  ;;  %v6571_v60 = vpack.c.bf16 %v1466_v57, %v1464_v56  ;;  %v6637_v61 = vpack.c.bf16 %v1835_v59, %v1833_v58  ;;  %v1868_v57 = vld [vmem:[#allocation2 + $0x920] sm:$0xff]  ;;  %v1870_v58 = vld [vmem:[#allocation2 + $0x930] sm:$0xff]  ;;  %v1873_v59 = vld [vmem:[#allocation2 + $0x948] sm:$0xff] }
 0x172   : > { %6536 = vmatpush1.bf16.msra.mxu0 %v6535_v3  ;;  %v1839_v3 = vld [vmem:[#allocation2 + $0x838] sm:$0xff] }
 0x173   : > { %6538 = vmatprep.subr.bf16.mxu0 %v6537_v5  ;;  %v6639_v5 = vpack.c.bf16 %v1834_v63, %v1832_v62  ;;  %v6641_v6 = vpack.c.bf16 %v1839_v3, %v1837_v2  ;;  %v1872_v63 = vld [vmem:[#allocation2 + $0x940] sm:$0xff]  ;;  %v1874_v2 = vld [vmem:[#allocation2 + $0x950] sm:$0xff]  ;;  %v1877_v3 = vld [vmem:[#allocation2 + $0x968] sm:$0xff] }
 0x176   : > { %6540 = vmatpush1.bf16.msra.mxu0 %v6539_v10  ;;  %v1843_v10 = vld [vmem:[#allocation2 + $0x858] sm:$0xff] }
 0x177   : > { %6542 = vmatprep.subr.bf16.mxu0 %v6541_v11  ;;  %v6643_v11 = vpack.c.bf16 %v1838_v8, %v1836_v7  ;;  %v6645_v12 = vpack.c.bf16 %v1843_v10, %v1841_v9  ;;  %v1876_v8 = vld [vmem:[#allocation2 + $0x960] sm:$0xff]  ;;  %v1878_v9 = vld [vmem:[#allocation2 + $0x970] sm:$0xff]  ;;  %v1881_v10 = vld [vmem:[#allocation2 + $0x988] sm:$0xff] }
 0x17a   : > { %6544 = vmatpush1.bf16.msra.mxu0 %v6543_v16  ;;  %v1847_v16 = vld [vmem:[#allocation2 + $0x878] sm:$0xff] }
 0x17b   : > { %6546 = vmatprep.subr.bf16.mxu0 %v6545_v17  ;;  %v6647_v17 = vpack.c.bf16 %v1842_v14, %v1840_v13  ;;  %v6649_v18 = vpack.c.bf16 %v1847_v16, %v1845_v15  ;;  %v1880_v14 = vld [vmem:[#allocation2 + $0x980] sm:$0xff]  ;;  %v1882_v15 = vld [vmem:[#allocation2 + $0x990] sm:$0xff]  ;;  %v1885_v16 = vld [vmem:[#allocation2 + $0x9a8] sm:$0xff] }
 0x17e   : > { %6548 = vmatpush1.bf16.msra.mxu0 %v6547_v22  ;;  %v1851_v22 = vld [vmem:[#allocation2 + $0x898] sm:$0xff] }
 0x17f   : > { %6550 = vmatprep.subr.bf16.mxu0 %v6549_v23  ;;  %v6651_v23 = vpack.c.bf16 %v1846_v20, %v1844_v19  ;;  %v6653_v24 = vpack.c.bf16 %v1851_v22, %v1849_v21  ;;  %v1884_v20 = vld [vmem:[#allocation2 + $0x9a0] sm:$0xff]  ;;  %v1886_v21 = vld [vmem:[#allocation2 + $0x9b0] sm:$0xff]  ;;  %v1889_v22 = vld [vmem:[#allocation2 + $0x9c8] sm:$0xff] }
 0x182   : > { %6552 = vmatpush1.bf16.msra.mxu0 %v6551_v30  ;;  %v1855_v30 = vld [vmem:[#allocation2 + $0x8b8] sm:$0xff] }
 0x183   : > { %6554 = vmatprep.subr.bf16.mxu0 %v6553_v31  ;;  %v6655_v31 = vpack.c.bf16 %v1850_v26, %v1848_v25  ;;  %v6657_v32 = vpack.c.bf16 %v1855_v30, %v1853_v28  ;;  %v1888_v26 = vld [vmem:[#allocation2 + $0x9c0] sm:$0xff]  ;;  %v1890_v28 = vld [vmem:[#allocation2 + $0x9d0] sm:$0xff]  ;;  %v1893_v30 = vld [vmem:[#allocation2 + $0x9e8] sm:$0xff] }
 0x186   : > { %6556 = vmatpush1.bf16.msra.mxu0 %v6555_v36  ;;  %v1859_v36 = vld [vmem:[#allocation2 + $0x8d8] sm:$0xff] }
 0x187   : > { %6558 = vmatprep.subr.bf16.mxu0 %v6557_v37  ;;  %v6659_v37 = vpack.c.bf16 %v1854_v34, %v1852_v33  ;;  %v6661_v38 = vpack.c.bf16 %v1859_v36, %v1857_v35  ;;  %v1892_v34 = vld [vmem:[#allocation2 + $0x9e0] sm:$0xff]  ;;  %v1894_v35 = vld [vmem:[#allocation2 + $0x9f0] sm:$0xff]  ;;  %v2261_v36 = vld [vmem:[#allocation2 + $0xc08] sm:$0xff] }
 0x18a   : > { %6560 = vmatpush1.bf16.msra.mxu0 %v6559_v42  ;;  %v1863_v42 = vld [vmem:[#allocation2 + $0x8f8] sm:$0xff] }
 0x18b   : > { %6562 = vmatprep.subr.bf16.mxu0 %v6561_v43  ;;  %v6663_v43 = vpack.c.bf16 %v1858_v40, %v1856_v39  ;;  %v6665_v44 = vpack.c.bf16 %v1863_v42, %v1861_v41  ;;  %v2260_v40 = vld [vmem:[#allocation2 + $0xc00] sm:$0xff]  ;;  %v2262_v41 = vld [vmem:[#allocation2 + $0xc10] sm:$0xff]  ;;  %v2265_v42 = vld [vmem:[#allocation2 + $0xc28] sm:$0xff] }
 0x18e   : > { %6564 = vmatpush1.bf16.msra.mxu0 %v6563_v48  ;;  %v1867_v48 = vld [vmem:[#allocation2 + $0x918] sm:$0xff] }
 0x18f   : > { %6566 = vmatprep.subr.bf16.mxu0 %v6565_v49  ;;  %v6667_v49 = vpack.c.bf16 %v1862_v46, %v1860_v45  ;;  %v6669_v50 = vpack.c.bf16 %v1867_v48, %v1865_v47  ;;  %v2264_v46 = vld [vmem:[#allocation2 + $0xc20] sm:$0xff]  ;;  %v2266_v47 = vld [vmem:[#allocation2 + $0xc30] sm:$0xff]  ;;  %v2269_v48 = vld [vmem:[#allocation2 + $0xc48] sm:$0xff] }
 0x192   : > { %6568 = vmatpush1.bf16.msra.mxu0 %v6567_v54  ;;  %v1871_v54 = vld [vmem:[#allocation2 + $0x938] sm:$0xff] }
 0x193   : > { %6570 = vmatprep.subr.bf16.mxu0 %v6569_v55  ;;  %v6671_v55 = vpack.c.bf16 %v1866_v52, %v1864_v51  ;;  %v6673_v56 = vpack.c.bf16 %v1871_v54, %v1869_v53  ;;  %v2268_v52 = vld [vmem:[#allocation2 + $0xc40] sm:$0xff]  ;;  %v2270_v53 = vld [vmem:[#allocation2 + $0xc50] sm:$0xff]  ;;  %v2273_v54 = vld [vmem:[#allocation2 + $0xc68] sm:$0xff] }
 0x196   : > { %6572 = vmatpush1.bf16.msra.mxu0 %v6571_v60  ;;  %v1875_v60 = vld [vmem:[#allocation2 + $0x958] sm:$0xff] }
 0x197   : > { %6638 = vmatprep.subr.bf16.mxu0 %v6637_v61  ;;  %v6675_v61 = vpack.c.bf16 %v1870_v58, %v1868_v57  ;;  %v6677_v62 = vpack.c.bf16 %v1875_v60, %v1873_v59  ;;  %v2272_v58 = vld [vmem:[#allocation2 + $0xc60] sm:$0xff]  ;;  %v2274_v59 = vld [vmem:[#allocation2 + $0xc70] sm:$0xff]  ;;  %v2277_v60 = vld [vmem:[#allocation2 + $0xc88] sm:$0xff] }
 0x199   : > { %1533 = vmatmul.mubr.f32.vlgmr.msra.gmra.mrb[2].mxu0 %v8661_v29 }
 0x19a   : > { %6640 = vmatpush1.bf16.msra.mxu0 %v6639_v5  ;;  %1960 = vmatprep.mubr.f32.mxu0 %v8659_v27  ;;  %v1879_v5 = vld [vmem:[#allocation2 + $0x978] sm:$0xff] }
 0x19b   : > { %6642 = vmatprep.subr.bf16.mxu0 %v6641_v6  ;;  %v6679_v6 = vpack.c.bf16 %v1874_v2, %v1872_v63  ;;  %v6681_v7 = vpack.c.bf16 %v1879_v5, %v1877_v3  ;;  %v2276_v2 = vld [vmem:[#allocation2 + $0xc80] sm:$0xff]  ;;  %v2278_v3 = vld [vmem:[#allocation2 + $0xc90] sm:$0xff]  ;;  %v2281_v5 = vld [vmem:[#allocation2 + $0xca8] sm:$0xff] }
 0x19e   : > { %6644 = vmatpush1.bf16.msra.mxu0 %v6643_v11  ;;  %v1883_v11 = vld [vmem:[#allocation2 + $0x998] sm:$0xff] }
 0x19f   : > { %6646 = vmatprep.subr.bf16.mxu0 %v6645_v12  ;;  %v6683_v12 = vpack.c.bf16 %v1878_v9, %v1876_v8  ;;  %v6685_v13 = vpack.c.bf16 %v1883_v11, %v1881_v10  ;;  %v2280_v9 = vld [vmem:[#allocation2 + $0xca0] sm:$0xff]  ;;  %v2282_v10 = vld [vmem:[#allocation2 + $0xcb0] sm:$0xff]  ;;  %v2285_v11 = vld [vmem:[#allocation2 + $0xcc8] sm:$0xff] }
 0x1a2   : > { %6648 = vmatpush1.bf16.msra.mxu0 %v6647_v17  ;;  %v1887_v17 = vld [vmem:[#allocation2 + $0x9b8] sm:$0xff] }
 0x1a3   : > { %6650 = vmatprep.subr.bf16.mxu0 %v6649_v18  ;;  %v6687_v18 = vpack.c.bf16 %v1882_v15, %v1880_v14  ;;  %v6689_v19 = vpack.c.bf16 %v1887_v17, %v1885_v16  ;;  %v2284_v15 = vld [vmem:[#allocation2 + $0xcc0] sm:$0xff]  ;;  %v2286_v16 = vld [vmem:[#allocation2 + $0xcd0] sm:$0xff]  ;;  %v2289_v17 = vld [vmem:[#allocation2 + $0xce8] sm:$0xff] }
 0x1a6   : > { %6652 = vmatpush1.bf16.msra.mxu0 %v6651_v23  ;;  %v1891_v23 = vld [vmem:[#allocation2 + $0x9d8] sm:$0xff] }
 0x1a7   : > { %6654 = vmatprep.subr.bf16.mxu0 %v6653_v24  ;;  %v6691_v24 = vpack.c.bf16 %v1886_v21, %v1884_v20  ;;  %v6693_v25 = vpack.c.bf16 %v1891_v23, %v1889_v22  ;;  %v2288_v21 = vld [vmem:[#allocation2 + $0xce0] sm:$0xff]  ;;  %v2290_v22 = vld [vmem:[#allocation2 + $0xcf0] sm:$0xff]  ;;  %v2293_v23 = vld [vmem:[#allocation2 + $0xd08] sm:$0xff] }
 0x1aa   : > { %6656 = vmatpush1.bf16.msra.mxu0 %v6655_v31  ;;  %v1895_v31 = vld [vmem:[#allocation2 + $0x9f8] sm:$0xff] }
 0x1ab   : > { %6658 = vmatprep.subr.bf16.mxu0 %v6657_v32  ;;  %v6695_v32 = vpack.c.bf16 %v1890_v28, %v1888_v26  ;;  %v6697_v33 = vpack.c.bf16 %v1895_v31, %v1893_v30  ;;  %v2292_v28 = vld [vmem:[#allocation2 + $0xd00] sm:$0xff]  ;;  %v2294_v30 = vld [vmem:[#allocation2 + $0xd10] sm:$0xff]  ;;  %v2297_v31 = vld [vmem:[#allocation2 + $0xd28] sm:$0xff] }
 0x1ae   : > { %6660 = vmatpush1.bf16.msra.mxu0 %v6659_v37  ;;  %v2263_v37 = vld [vmem:[#allocation2 + $0xc18] sm:$0xff] }
 0x1af   : > { %6662 = vmatprep.subr.bf16.mxu0 %v6661_v38  ;;  %v6699_v38 = vpack.c.bf16 %v1894_v35, %v1892_v34  ;;  %v6765_v39 = vpack.c.bf16 %v2263_v37, %v2261_v36  ;;  %v2296_v35 = vld [vmem:[#allocation2 + $0xd20] sm:$0xff]  ;;  %v2298_v36 = vld [vmem:[#allocation2 + $0xd30] sm:$0xff]  ;;  %v2301_v37 = vld [vmem:[#allocation2 + $0xd48] sm:$0xff] }
 0x1b2   : > { %6664 = vmatpush1.bf16.msra.mxu0 %v6663_v43  ;;  %v2267_v43 = vld [vmem:[#allocation2 + $0xc38] sm:$0xff] }
 0x1b3   : > { %6666 = vmatprep.subr.bf16.mxu0 %v6665_v44  ;;  %v6767_v44 = vpack.c.bf16 %v2262_v41, %v2260_v40  ;;  %v6769_v45 = vpack.c.bf16 %v2267_v43, %v2265_v42  ;;  %v2300_v41 = vld [vmem:[#allocation2 + $0xd40] sm:$0xff]  ;;  %v2302_v42 = vld [vmem:[#allocation2 + $0xd50] sm:$0xff]  ;;  %v2305_v43 = vld [vmem:[#allocation2 + $0xd68] sm:$0xff] }
 0x1b6   : > { %6668 = vmatpush1.bf16.msra.mxu0 %v6667_v49  ;;  %v2271_v49 = vld [vmem:[#allocation2 + $0xc58] sm:$0xff] }
 0x1b7   : > { %6670 = vmatprep.subr.bf16.mxu0 %v6669_v50  ;;  %v6771_v50 = vpack.c.bf16 %v2266_v47, %v2264_v46  ;;  %v6773_v51 = vpack.c.bf16 %v2271_v49, %v2269_v48  ;;  %v2304_v47 = vld [vmem:[#allocation2 + $0xd60] sm:$0xff]  ;;  %v2306_v48 = vld [vmem:[#allocation2 + $0xd70] sm:$0xff]  ;;  %v2309_v49 = vld [vmem:[#allocation2 + $0xd88] sm:$0xff] }
 0x1ba   : > { %6672 = vmatpush1.bf16.msra.mxu0 %v6671_v55  ;;  %v2275_v55 = vld [vmem:[#allocation2 + $0xc78] sm:$0xff] }
 0x1bb   : > { %6674 = vmatprep.subr.bf16.mxu0 %v6673_v56  ;;  %v6775_v56 = vpack.c.bf16 %v2270_v53, %v2268_v52  ;;  %v6777_v57 = vpack.c.bf16 %v2275_v55, %v2273_v54  ;;  %v2308_v53 = vld [vmem:[#allocation2 + $0xd80] sm:$0xff]  ;;  %v2310_v54 = vld [vmem:[#allocation2 + $0xd90] sm:$0xff]  ;;  %v2313_v55 = vld [vmem:[#allocation2 + $0xda8] sm:$0xff] }
 0x1be   : > { %6676 = vmatpush1.bf16.msra.mxu0 %v6675_v61  ;;  %v2279_v61 = vld [vmem:[#allocation2 + $0xc98] sm:$0xff] }
 0x1bf   : > { %6678 = vmatprep.subr.bf16.mxu0 %v6677_v62  ;;  %v6779_v62 = vpack.c.bf16 %v2274_v59, %v2272_v58  ;;  %v6781_v63 = vpack.c.bf16 %v2279_v61, %v2277_v60  ;;  %v2312_v59 = vld [vmem:[#allocation2 + $0xda0] sm:$0xff]  ;;  %v2314_v60 = vld [vmem:[#allocation2 + $0xdb0] sm:$0xff]  ;;  %v2317_v61 = vld [vmem:[#allocation2 + $0xdc8] sm:$0xff] }
 0x1c2   : > { %6680 = vmatpush1.bf16.msra.mxu0 %v6679_v6  ;;  %v2283_v6 = vld [vmem:[#allocation2 + $0xcb8] sm:$0xff] }
 0x1c3   : > { %6682 = vmatprep.subr.bf16.mxu0 %v6681_v7  ;;  %v6783_v7 = vpack.c.bf16 %v2278_v3, %v2276_v2  ;;  %v6785_v8 = vpack.c.bf16 %v2283_v6, %v2281_v5  ;;  %v2316_v3 = vld [vmem:[#allocation2 + $0xdc0] sm:$0xff]  ;;  %v2318_v5 = vld [vmem:[#allocation2 + $0xdd0] sm:$0xff]  ;;  %v2321_v6 = vld [vmem:[#allocation2 + $0xde8] sm:$0xff] }
 0x1c6   : > { %6684 = vmatpush1.bf16.msra.mxu0 %v6683_v12  ;;  %v2287_v12 = vld [vmem:[#allocation2 + $0xcd8] sm:$0xff] }
 0x1c7   : > { %6686 = vmatprep.subr.bf16.mxu0 %v6685_v13  ;;  %v6787_v13 = vpack.c.bf16 %v2282_v10, %v2280_v9  ;;  %v6789_v14 = vpack.c.bf16 %v2287_v12, %v2285_v11  ;;  %v2320_v10 = vld [vmem:[#allocation2 + $0xde0] sm:$0xff]  ;;  %v2322_v11 = vld [vmem:[#allocation2 + $0xdf0] sm:$0xff]  ;;  %v2689_v12 = vld [vmem:[#allocation2 + $0x1008] sm:$0xff] }
 0x1ca   : > { %6688 = vmatpush1.bf16.msra.mxu0 %v6687_v18  ;;  %v2291_v18 = vld [vmem:[#allocation2 + $0xcf8] sm:$0xff] }
 0x1cb   : > { %6690 = vmatprep.subr.bf16.mxu0 %v6689_v19  ;;  %v6791_v19 = vpack.c.bf16 %v2286_v16, %v2284_v15  ;;  %v6793_v20 = vpack.c.bf16 %v2291_v18, %v2289_v17  ;;  %v2688_v16 = vld [vmem:[#allocation2 + $0x1000] sm:$0xff]  ;;  %v2690_v17 = vld [vmem:[#allocation2 + $0x1010] sm:$0xff]  ;;  %v2693_v18 = vld [vmem:[#allocation2 + $0x1028] sm:$0xff] }
 0x1ce   : > { %6692 = vmatpush1.bf16.msra.mxu0 %v6691_v24  ;;  %v2295_v24 = vld [vmem:[#allocation2 + $0xd18] sm:$0xff] }
 0x1cf   : > { %6694 = vmatprep.subr.bf16.mxu0 %v6693_v25  ;;  %v6795_v25 = vpack.c.bf16 %v2290_v22, %v2288_v21  ;;  %v6797_v26 = vpack.c.bf16 %v2295_v24, %v2293_v23  ;;  %v2692_v22 = vld [vmem:[#allocation2 + $0x1020] sm:$0xff]  ;;  %v2694_v23 = vld [vmem:[#allocation2 + $0x1030] sm:$0xff]  ;;  %v2697_v24 = vld [vmem:[#allocation2 + $0x1048] sm:$0xff] }
 0x1d2   : > { %6696 = vmatpush1.bf16.msra.mxu0 %v6695_v32  ;;  %v2299_v32 = vld [vmem:[#allocation2 + $0xd38] sm:$0xff] }
 0x1d3   : > { %6698 = vmatprep.subr.bf16.mxu0 %v6697_v33  ;;  %v6799_v33 = vpack.c.bf16 %v2294_v30, %v2292_v28  ;;  %v6801_v34 = vpack.c.bf16 %v2299_v32, %v2297_v31  ;;  %v2696_v30 = vld [vmem:[#allocation2 + $0x1040] sm:$0xff]  ;;  %v2698_v31 = vld [vmem:[#allocation2 + $0x1050] sm:$0xff]  ;;  %v2701_v32 = vld [vmem:[#allocation2 + $0x1068] sm:$0xff] }
 0x1d6   : > { %6700 = vmatpush1.bf16.msra.mxu0 %v6699_v38  ;;  %v2303_v38 = vld [vmem:[#allocation2 + $0xd58] sm:$0xff] }
 0x1d7   : > { %6766 = vmatprep.subr.bf16.mxu0 %v6765_v39  ;;  %v6803_v39 = vpack.c.bf16 %v2298_v36, %v2296_v35  ;;  %v6805_v40 = vpack.c.bf16 %v2303_v38, %v2301_v37  ;;  %v2700_v36 = vld [vmem:[#allocation2 + $0x1060] sm:$0xff]  ;;  %v2702_v37 = vld [vmem:[#allocation2 + $0x1070] sm:$0xff]  ;;  %v2705_v38 = vld [vmem:[#allocation2 + $0x1088] sm:$0xff] }
 0x1d9   : > { %1961 = vmatmul.mubr.f32.vlgmr.msra.gmra.mrb[4].mxu0 %v8661_v29 }
 0x1da   : > { %6768 = vmatpush1.bf16.msra.mxu0 %v6767_v44  ;;  %2388 = vmatprep.mubr.f32.mxu0 %v8659_v27  ;;  %v2307_v44 = vld [vmem:[#allocation2 + $0xd78] sm:$0xff] }
 0x1db   : > { %6770 = vmatprep.subr.bf16.mxu0 %v6769_v45  ;;  %v6807_v45 = vpack.c.bf16 %v2302_v42, %v2300_v41  ;;  %v6809_v46 = vpack.c.bf16 %v2307_v44, %v2305_v43  ;;  %v2704_v42 = vld [vmem:[#allocation2 + $0x1080] sm:$0xff]  ;;  %v2706_v43 = vld [vmem:[#allocation2 + $0x1090] sm:$0xff]  ;;  %v2709_v44 = vld [vmem:[#allocation2 + $0x10a8] sm:$0xff] }
 0x1de   : > { %6772 = vmatpush1.bf16.msra.mxu0 %v6771_v50  ;;  %v2311_v50 = vld [vmem:[#allocation2 + $0xd98] sm:$0xff] }
 0x1df   : > { %6774 = vmatprep.subr.bf16.mxu0 %v6773_v51  ;;  %v6811_v51 = vpack.c.bf16 %v2306_v48, %v2304_v47  ;;  %v6813_v52 = vpack.c.bf16 %v2311_v50, %v2309_v49  ;;  %v2708_v48 = vld [vmem:[#allocation2 + $0x10a0] sm:$0xff]  ;;  %v2710_v49 = vld [vmem:[#allocation2 + $0x10b0] sm:$0xff]  ;;  %v2713_v50 = vld [vmem:[#allocation2 + $0x10c8] sm:$0xff] }
 0x1e2   : > { %6776 = vmatpush1.bf16.msra.mxu0 %v6775_v56  ;;  %v2315_v56 = vld [vmem:[#allocation2 + $0xdb8] sm:$0xff] }
 0x1e3   : > { %6778 = vmatprep.subr.bf16.mxu0 %v6777_v57  ;;  %v6815_v57 = vpack.c.bf16 %v2310_v54, %v2308_v53  ;;  %v6817_v58 = vpack.c.bf16 %v2315_v56, %v2313_v55  ;;  %v2712_v54 = vld [vmem:[#allocation2 + $0x10c0] sm:$0xff]  ;;  %v2714_v55 = vld [vmem:[#allocation2 + $0x10d0] sm:$0xff] }
 0x1e6   : > { %6780 = vmatpush1.bf16.msra.mxu0 %v6779_v62  ;;  %v2319_v62 = vld [vmem:[#allocation2 + $0xdd8] sm:$0xff] }
 0x1e7   : > { %6782 = vmatprep.subr.bf16.mxu0 %v6781_v63  ;;  %v6819_v63 = vpack.c.bf16 %v2314_v60, %v2312_v59  ;;  %v6821_v2 = vpack.c.bf16 %v2319_v62, %v2317_v61  ;;  %v2719_v59 = vld [vmem:[#allocation2 + $0x10f8] sm:$0xff]  ;;  %v1115_v62 = vld [vmem:[#allocation4 + $0x8] sm:$0xff] }
 0x1ea   : > { %6784 = vmatpush1.bf16.msra.mxu0 %v6783_v7  ;;  %v2323_v7 = vld [vmem:[#allocation2 + $0xdf8] sm:$0xff] }
 0x1eb   : > { %6786 = vmatprep.subr.bf16.mxu0 %v6785_v8  ;;  %v6823_v8 = vpack.c.bf16 %v2318_v5, %v2316_v3  ;;  %v6825_v9 = vpack.c.bf16 %v2323_v7, %v2321_v6  ;;  %v2716_v3 = vld [vmem:[#allocation2 + $0x10e0] sm:$0xff]  ;;  %v2718_v5 = vld [vmem:[#allocation2 + $0x10f0] sm:$0xff]  ;;  %v2721_v6 = vld [vmem:[#allocation2 + $0x1108] sm:$0xff] }
 0x1ec   : > { %v2723_v7 = vld [vmem:[#allocation2 + $0x1118] sm:$0xff] }
 0x1ee   : > { %6788 = vmatpush1.bf16.msra.mxu0 %v6787_v13  ;;  %v2691_v13 = vld [vmem:[#allocation2 + $0x1018] sm:$0xff] }
 0x1ef   : > { %6790 = vmatprep.subr.bf16.mxu0 %v6789_v14  ;;  %v6827_v14 = vpack.c.bf16 %v2322_v11, %v2320_v10  ;;  %v6893_v15 = vpack.c.bf16 %v2691_v13, %v2689_v12  ;;  %v2720_v10 = vld [vmem:[#allocation2 + $0x1100] sm:$0xff]  ;;  %v2722_v11 = vld [vmem:[#allocation2 + $0x1110] sm:$0xff]  ;;  %v2725_v12 = vld [vmem:[#allocation2 + $0x1128] sm:$0xff] }
 0x1f0   : > { %v2727_v13 = vld [vmem:[#allocation2 + $0x1138] sm:$0xff] }
 0x1f2   : > { %6792 = vmatpush1.bf16.msra.mxu0 %v6791_v19  ;;  %v2695_v19 = vld [vmem:[#allocation2 + $0x1038] sm:$0xff] }
 0x1f3   : > { %6794 = vmatprep.subr.bf16.mxu0 %v6793_v20  ;;  %v6895_v20 = vpack.c.bf16 %v2690_v17, %v2688_v16  ;;  %v6897_v21 = vpack.c.bf16 %v2695_v19, %v2693_v18  ;;  %v6929_v16 = vpack.c.bf16 %v2727_v13, %v2725_v12  ;;  %v2724_v17 = vld [vmem:[#allocation2 + $0x1120] sm:$0xff]  ;;  %v2726_v18 = vld [vmem:[#allocation2 + $0x1130] sm:$0xff]  ;;  %v2729_v19 = vld [vmem:[#allocation2 + $0x1148] sm:$0xff] }
 0x1f4   : > { %v1629_v12 = vld [vmem:[#allocation2 + $0x658] sm:$0xff] }
 0x1f6   : > { %6796 = vmatpush1.bf16.msra.mxu0 %v6795_v25  ;;  %v2699_v25 = vld [vmem:[#allocation2 + $0x1058] sm:$0xff] }
 0x1f7   : > { %6798 = vmatprep.subr.bf16.mxu0 %v6797_v26  ;;  %v6899_v26 = vpack.c.bf16 %v2694_v23, %v2692_v22  ;;  %v6901_v28 = vpack.c.bf16 %v2699_v25, %v2697_v24  ;;  %v2728_v23 = vld [vmem:[#allocation2 + $0x1140] sm:$0xff]  ;;  %v2730_v24 = vld [vmem:[#allocation2 + $0x1150] sm:$0xff]  ;;  %v2733_v25 = vld [vmem:[#allocation2 + $0x1168] sm:$0xff] }
 0x1fa   : > { %6800 = vmatpush1.bf16.msra.mxu0 %v6799_v33  ;;  %v2703_v33 = vld [vmem:[#allocation2 + $0x1078] sm:$0xff] }
 0x1fb   : > { %6802 = vmatprep.subr.bf16.mxu0 %v6801_v34  ;;  %v6903_v34 = vpack.c.bf16 %v2698_v31, %v2696_v30  ;;  %v6905_v35 = vpack.c.bf16 %v2703_v33, %v2701_v32  ;;  %v2732_v31 = vld [vmem:[#allocation2 + $0x1160] sm:$0xff]  ;;  %v2734_v32 = vld [vmem:[#allocation2 + $0x1170] sm:$0xff]  ;;  %v2737_v33 = vld [vmem:[#allocation2 + $0x1188] sm:$0xff] }
 0x1fe   : > { %6804 = vmatpush1.bf16.msra.mxu0 %v6803_v39  ;;  %v2707_v39 = vld [vmem:[#allocation2 + $0x1098] sm:$0xff] }
 0x1ff   : > { %6806 = vmatprep.subr.bf16.mxu0 %v6805_v40  ;;  %v6907_v40 = vpack.c.bf16 %v2702_v37, %v2700_v36  ;;  %v6909_v41 = vpack.c.bf16 %v2707_v39, %v2705_v38  ;;  %v2736_v37 = vld [vmem:[#allocation2 + $0x1180] sm:$0xff]  ;;  %v2738_v38 = vld [vmem:[#allocation2 + $0x1190] sm:$0xff]  ;;  %v2741_v39 = vld [vmem:[#allocation2 + $0x11a8] sm:$0xff] }
 0x202   : > { %6808 = vmatpush1.bf16.msra.mxu0 %v6807_v45  ;;  %v2711_v45 = vld [vmem:[#allocation2 + $0x10b8] sm:$0xff] }
 0x203   : > { %6810 = vmatprep.subr.bf16.mxu0 %v6809_v46  ;;  %v6911_v46 = vpack.c.bf16 %v2706_v43, %v2704_v42  ;;  %v6913_v47 = vpack.c.bf16 %v2711_v45, %v2709_v44  ;;  %v2740_v43 = vld [vmem:[#allocation2 + $0x11a0] sm:$0xff]  ;;  %v2742_v44 = vld [vmem:[#allocation2 + $0x11b0] sm:$0xff]  ;;  %v2745_v45 = vld [vmem:[#allocation2 + $0x11c8] sm:$0xff] }
 0x206   : > { %6812 = vmatpush1.bf16.msra.mxu0 %v6811_v51  ;;  %v2715_v51 = vld [vmem:[#allocation2 + $0x10d8] sm:$0xff] }
 0x207   : > { %6814 = vmatprep.subr.bf16.mxu0 %v6813_v52  ;;  %v6915_v52 = vpack.c.bf16 %v2710_v49, %v2708_v48  ;;  %v6917_v53 = vpack.c.bf16 %v2715_v51, %v2713_v50  ;;  %v2744_v49 = vld [vmem:[#allocation2 + $0x11c0] sm:$0xff]  ;;  %v2746_v50 = vld [vmem:[#allocation2 + $0x11d0] sm:$0xff]  ;;  %v2749_v51 = vld [vmem:[#allocation2 + $0x11e8] sm:$0xff] }
 0x20a   : > { %6816 = vmatpush1.bf16.msra.mxu0 %v6815_v57 }
 0x20b   : > { %6818 = vmatprep.subr.bf16.mxu0 %v6817_v58  ;;  %v2717_v58 = vld [vmem:[#allocation2 + $0x10e8] sm:$0xff] }
 0x20e   : > { %6820 = vmatpush1.bf16.msra.mxu0 %v6819_v63  ;;  %v6919_v63 = vpack.c.bf16 %v2714_v55, %v2712_v54  ;;  %v2748_v55 = vld [vmem:[#allocation2 + $0x11e0] sm:$0xff] }
 0x20f   : > { %6822 = vmatprep.subr.bf16.mxu0 %v6821_v2  ;;  %v6921_v2 = vpack.c.bf16 %v2719_v59, %v2717_v58  ;;  %v1619_v58 = vld [vmem:[#allocation2 + $0x608] sm:$0xff]  ;;  %v1621_v59 = vld [vmem:[#allocation2 + $0x618] sm:$0xff] }
 0x212   : > { %6824 = vmatpush1.bf16.msra.mxu0 %v6823_v8  ;;  %v6923_v8 = vpack.c.bf16 %v2718_v5, %v2716_v3  ;;  %v6573_v3 = vpack.c.bf16 %v1621_v59, %v1619_v58  ;;  %v1654_v59 = vld [vmem:[#allocation2 + $0x720] sm:$0xff] }
 0x213   : > { %6826 = vmatprep.subr.bf16.mxu0 %v6825_v9  ;;  %v6925_v9 = vpack.c.bf16 %v2723_v7, %v2721_v6  ;;  %v1402_v6 = vld [vmem:[#allocation4 + $0x10] sm:$0xff] }
 0x216   : > { %6828 = vmatpush1.bf16.msra.mxu0 %v6827_v14  ;;  %v978_v14 = vld [vmem:[#allocation4] sm:$0xff] }
 0x217   : > { %6894 = vmatprep.subr.bf16.mxu0 %v6893_v15  ;;  %v6927_v15 = vpack.c.bf16 %v2722_v11, %v2720_v10  ;;  %v1624_v10 = vld [vmem:[#allocation2 + $0x630] sm:$0xff]  ;;  %v1627_v11 = vld [vmem:[#allocation2 + $0x648] sm:$0xff] }
 0x219   : > { %2389 = vmatmul.mubr.f32.vlgmr.msra.gmra.mrb[6].mxu0 %v8661_v29 }
 0x21a   : > { %6896 = vmatpush1.bf16.msra.mxu0 %v6895_v20  ;;  %2816 = vmatprep.mubr.f32.mxu0 %v8659_v27  ;;  %v2731_v20 = vld [vmem:[#allocation2 + $0x1158] sm:$0xff] }
 0x21b   : > { %6898 = vmatprep.subr.bf16.mxu0 %v6897_v21  ;;  %v6931_v21 = vpack.c.bf16 %v2726_v18, %v2724_v17  ;;  %v6933_v22 = vpack.c.bf16 %v2731_v20, %v2729_v19  ;;  %v1631_v17 = vld [vmem:[#allocation2 + $0x668] sm:$0xff]  ;;  %v1633_v18 = vld [vmem:[#allocation2 + $0x678] sm:$0xff] }
 0x21c   : > { %v6585_v20 = vpack.c.bf16 %v1633_v18, %v1631_v17  ;;  %v1668_v17 = vld [vmem:[#allocation2 + $0x790] sm:$0xff]  ;;  %v1671_v18 = vld [vmem:[#allocation2 + $0x7a8] sm:$0xff] }
 0x21e   : > { %6900 = vmatpush1.bf16.msra.mxu0 %v6899_v26  ;;  %v2735_v26 = vld [vmem:[#allocation2 + $0x1178] sm:$0xff] }
 0x21f   : > { %6902 = vmatprep.subr.bf16.mxu0 %v6901_v28  ;;  %v6935_v28 = vpack.c.bf16 %v2730_v24, %v2728_v23  ;;  %v6937_v30 = vpack.c.bf16 %v2735_v26, %v2733_v25  ;;  %v1635_v23 = vld [vmem:[#allocation2 + $0x688] sm:$0xff]  ;;  %v1637_v24 = vld [vmem:[#allocation2 + $0x698] sm:$0xff] }
 0x220   : > { %v6589_v26 = vpack.c.bf16 %v1637_v24, %v1635_v23  ;;  %v1672_v23 = vld [vmem:[#allocation2 + $0x7b0] sm:$0xff]  ;;  %v1675_v24 = vld [vmem:[#allocation2 + $0x7c8] sm:$0xff] }
 0x222   : > { %6904 = vmatpush1.bf16.msra.mxu0 %v6903_v34  ;;  %v2739_v34 = vld [vmem:[#allocation2 + $0x1198] sm:$0xff] }
 0x223   : > { %6906 = vmatprep.subr.bf16.mxu0 %v6905_v35  ;;  %v6939_v35 = vpack.c.bf16 %v2734_v32, %v2732_v31  ;;  %v6941_v36 = vpack.c.bf16 %v2739_v34, %v2737_v33  ;;  %v1639_v31 = vld [vmem:[#allocation2 + $0x6a8] sm:$0xff]  ;;  %v1641_v32 = vld [vmem:[#allocation2 + $0x6b8] sm:$0xff] }
 0x224   : > { %v6593_v34 = vpack.c.bf16 %v1641_v32, %v1639_v31  ;;  %v1676_v31 = vld [vmem:[#allocation2 + $0x7d0] sm:$0xff]  ;;  %v1679_v32 = vld [vmem:[#allocation2 + $0x7e8] sm:$0xff] }
 0x226   : > { %6908 = vmatpush1.bf16.msra.mxu0 %v6907_v40  ;;  %v2743_v40 = vld [vmem:[#allocation2 + $0x11b8] sm:$0xff] }
 0x227   : > { %6910 = vmatprep.subr.bf16.mxu0 %v6909_v41  ;;  %v6943_v41 = vpack.c.bf16 %v2738_v38, %v2736_v37  ;;  %v6945_v42 = vpack.c.bf16 %v2743_v40, %v2741_v39  ;;  %v1643_v37 = vld [vmem:[#allocation2 + $0x6c8] sm:$0xff]  ;;  %v1645_v38 = vld [vmem:[#allocation2 + $0x6d8] sm:$0xff] }
 0x228   : > { %v6597_v40 = vpack.c.bf16 %v1645_v38, %v1643_v37  ;;  %v1680_v37 = vld [vmem:[#allocation2 + $0x7f0] sm:$0xff] }
 0x22a   : > { %6912 = vmatpush1.bf16.msra.mxu0 %v6911_v46  ;;  %v2747_v46 = vld [vmem:[#allocation2 + $0x11d8] sm:$0xff] }
 0x22b   : > { %6914 = vmatprep.subr.bf16.mxu0 %v6913_v47  ;;  %v6947_v47 = vpack.c.bf16 %v2742_v44, %v2740_v43  ;;  %v6949_v48 = vpack.c.bf16 %v2747_v46, %v2745_v45  ;;  %v1647_v43 = vld [vmem:[#allocation2 + $0x6e8] sm:$0xff]  ;;  %v1649_v44 = vld [vmem:[#allocation2 + $0x6f8] sm:$0xff] }
 0x22c   : > { %v1109_v56 = vpop.f32.mrb[2].mxu1  ;;  %v1247_v57 = vpop.f32.mrb[0].mxu0  ;;  %v6601_v46 = vpack.c.bf16 %v1649_v44, %v1647_v43 }
 0x22d   : > { %v1111_v60 = vpop.f32.mrb[3].mxu1  ;;  %v1249_v61 = vpop.f32.mrb[1].mxu0 }
 0x22e   : > { %6916 = vmatpush1.bf16.msra.mxu0 %v6915_v52  ;;  %1256 = vmatprep.subr.mxu1 %v1249_v61  ;;  %v2751_v52 = vld [vmem:[#allocation2 + $0x11f8] sm:$0xff]  ;;  %v1620_v61 = vld [vmem:[#allocation2 + $0x610] sm:$0xff] }
 0x22f   : > { %1257 = vmatpush1.msra.mxu1 %v1247_v57  ;;  %6918 = vmatprep.subr.bf16.mxu0 %v6917_v53  ;;  %v6951_v53 = vpack.c.bf16 %v2746_v50, %v2744_v49  ;;  %v6953_v54 = vpack.c.bf16 %v2751_v52, %v2749_v51  ;;  %v1651_v49 = vld [vmem:[#allocation2 + $0x708] sm:$0xff]  ;;  %v1653_v50 = vld [vmem:[#allocation2 + $0x718] sm:$0xff] }
 0x230   : > { %1330 = vmatprep.subr.mxu1 %v1111_v60  ;;  %6358 = vmatmul.mubr.msk.f32.vlgmr.msra.gmra.mrb[4].mxu1 %vm1252_vm2, %v1115_v62  ;;  %v1618_v60 = vld [vmem:[#allocation2 + $0x600] sm:$0xff]  ;;  %v1623_v62 = vld [vmem:[#allocation2 + $0x628] sm:$0xff]  ;;  %v6605_v52 = vpack.c.bf16 %v1653_v50, %v1651_v49  ;;  %v1616_v49 = vld [vmem:[#allocation4 + $0x18] sm:$0xff] }
 0x231   : > { %1331 = vmatpush1.msra.mxu1 %v1109_v56  ;;  %1394 = vmatprep.mubr.f32.mxu1 %v8360_v0  ;;  %v2750_v56 = vld [vmem:[#allocation2 + $0x11f0] sm:$0xff]  ;;  %v6575_v7 = vpack.c.bf16 %v1620_v61, %v1618_v60  ;;  %v1659_v61 = vld [vmem:[#allocation2 + $0x748] sm:$0xff] }
 0x232   : > { %6920 = vmatpush1.bf16.msra.mxu0 %v6919_v63  ;;  %v6955_v57 = vpack.c.bf16 %v2750_v56, %v2748_v55  ;;  %v1625_v63 = vld [vmem:[#allocation2 + $0x638] sm:$0xff]  ;;  %v1655_v55 = vld [vmem:[#allocation2 + $0x728] sm:$0xff]  ;;  %v1656_v60 = vld [vmem:[#allocation2 + $0x730] sm:$0xff] }
 0x233   : > { %6922 = vmatprep.subr.bf16.mxu0 %v6921_v2  ;;  %v1657_v56 = vld [vmem:[#allocation2 + $0x738] sm:$0xff] }
 0x234   : > { %v6609_v58 = vpack.c.bf16 %v1657_v56, %v1655_v55  ;;  %v1830_v55 = vld [vmem:[#allocation4 + $0x20] sm:$0xff] }
 0x236   : > { %6924 = vmatpush1.bf16.msra.mxu0 %v6923_v8  ;;  %v6577_v8 = vpack.c.bf16 %v1625_v63, %v1623_v62  ;;  %v1661_v62 = vld [vmem:[#allocation2 + $0x758] sm:$0xff]  ;;  %v6611_v63 = vpack.c.bf16 %v1656_v60, %v1654_v59  ;;  %v2052_v59 = vld [vmem:[#allocation2 + $0xa30] sm:$0xff]  ;;  %v2055_v60 = vld [vmem:[#allocation2 + $0xa48] sm:$0xff] }
 0x237   : > { %6926 = vmatprep.subr.bf16.mxu0 %v6925_v9  ;;  %v1622_v9 = vld [vmem:[#allocation2 + $0x620] sm:$0xff] }
 0x238   : > { %6359 = vmatmul.mubr.msk.f32.vlgmr.msra.gmra.mrb[4].mxu1 %vm1252_vm2, %v978_v14  ;;  %v6579_v13 = vpack.c.bf16 %v1624_v10, %v1622_v9  ;;  %v6581_v14 = vpack.c.bf16 %v1629_v12, %v1627_v11  ;;  %v1662_v10 = vld [vmem:[#allocation2 + $0x760] sm:$0xff]  ;;  %v1664_v11 = vld [vmem:[#allocation2 + $0x770] sm:$0xff]  ;;  %v1667_v12 = vld [vmem:[#allocation2 + $0x788] sm:$0xff] }
 0x239   : > { %1606 = vmatprep.mubr.f32.mxu1 %v8360_v0 }
 0x23a   : > { %6928 = vmatpush1.bf16.msra.mxu0 %v6927_v15  ;;  %v1626_v15 = vld [vmem:[#allocation2 + $0x640] sm:$0xff] }
 0x23b   : > { %6930 = vmatprep.subr.bf16.mxu0 %v6929_v16  ;;  %v1628_v16 = vld [vmem:[#allocation2 + $0x650] sm:$0xff] }
 0x23c   : > { %v6583_v19 = vpack.c.bf16 %v1628_v16, %v1626_v15  ;;  %v1666_v16 = vld [vmem:[#allocation2 + $0x780] sm:$0xff] }
 0x23e   : > { %6932 = vmatpush1.bf16.msra.mxu0 %v6931_v21  ;;  %v1630_v21 = vld [vmem:[#allocation2 + $0x660] sm:$0xff] }
 0x23f   : > { %6934 = vmatprep.subr.bf16.mxu0 %v6933_v22  ;;  %v1632_v22 = vld [vmem:[#allocation2 + $0x670] sm:$0xff] }
 0x240   : > { %v6587_v25 = vpack.c.bf16 %v1632_v22, %v1630_v21  ;;  %v1670_v22 = vld [vmem:[#allocation2 + $0x7a0] sm:$0xff] }
 0x242   : > { %6936 = vmatpush1.bf16.msra.mxu0 %v6935_v28  ;;  %v1634_v28 = vld [vmem:[#allocation2 + $0x680] sm:$0xff] }
 0x243   : > { %6938 = vmatprep.subr.bf16.mxu0 %v6937_v30  ;;  %v1636_v30 = vld [vmem:[#allocation2 + $0x690] sm:$0xff] }
 0x244   : > { %v6591_v33 = vpack.c.bf16 %v1636_v30, %v1634_v28  ;;  %v1674_v30 = vld [vmem:[#allocation2 + $0x7c0] sm:$0xff] }
 0x246   : > { %6940 = vmatpush1.bf16.msra.mxu0 %v6939_v35  ;;  %v1638_v35 = vld [vmem:[#allocation2 + $0x6a0] sm:$0xff] }
 0x247   : > { %6942 = vmatprep.subr.bf16.mxu0 %v6941_v36  ;;  %v1640_v36 = vld [vmem:[#allocation2 + $0x6b0] sm:$0xff] }
 0x248   : > { %v6595_v39 = vpack.c.bf16 %v1640_v36, %v1638_v35  ;;  %v1678_v36 = vld [vmem:[#allocation2 + $0x7e0] sm:$0xff] }
 0x249   : > { %v6635_v38 = vpack.c.bf16 %v1680_v37, %v1678_v36  ;;  %v2076_v36 = vld [vmem:[#allocation2 + $0xaf0] sm:$0xff]  ;;  %v2079_v37 = vld [vmem:[#allocation2 + $0xb08] sm:$0xff] }
 0x24a   : > { %6944 = vmatpush1.bf16.msra.mxu0 %v6943_v41  ;;  %v1642_v41 = vld [vmem:[#allocation2 + $0x6c0] sm:$0xff] }
 0x24b   : > { %6946 = vmatprep.subr.bf16.mxu0 %v6945_v42  ;;  %v1644_v42 = vld [vmem:[#allocation2 + $0x6d0] sm:$0xff] }
 0x24c   : > { %v6599_v45 = vpack.c.bf16 %v1644_v42, %v1642_v41 }
 0x24e   : > { %6948 = vmatpush1.bf16.msra.mxu0 %v6947_v47  ;;  %v1646_v47 = vld [vmem:[#allocation2 + $0x6e0] sm:$0xff] }
 0x24f   : > { %6950 = vmatprep.subr.bf16.mxu0 %v6949_v48  ;;  %v1648_v48 = vld [vmem:[#allocation2 + $0x6f0] sm:$0xff] }
 0x250   : > { %v6603_v51 = vpack.c.bf16 %v1648_v48, %v1646_v47 }
 0x252   : > { %6952 = vmatpush1.bf16.msra.mxu0 %v6951_v53  ;;  %v1650_v53 = vld [vmem:[#allocation2 + $0x700] sm:$0xff] }
 0x253   : > { %6954 = vmatprep.subr.bf16.mxu0 %v6953_v54  ;;  %v1652_v54 = vld [vmem:[#allocation2 + $0x710] sm:$0xff] }
 0x256   : > { %6956 = vmatpush1.bf16.msra.mxu0 %v6955_v57  ;;  %v6607_v57 = vpack.c.bf16 %v1652_v54, %v1650_v53  ;;  %v2051_v53 = vld [vmem:[#allocation2 + $0xa28] sm:$0xff]  ;;  %v2053_v54 = vld [vmem:[#allocation2 + $0xa38] sm:$0xff] }
 0x259   : > { %2817 = vmatmul.mubr.f32.vlgmr.msra.gmra.mrb[8].mxu0 %v8661_v29 }
 0x26c   : > { %v1534_v2 = vpop.f32.mrb[2].mxu0 }
 0x26d   : > { %v1536_v5 = vpop.f32.mrb[3].mxu0 }
 0x26e   : > { %1542 = vmatprep.subr.mxu1 %v1536_v5  ;;  %v1660_v5 = vld [vmem:[#allocation2 + $0x750] sm:$0xff] }
 0x26f   : > { %1543 = vmatpush1.msra.mxu1 %v1534_v2  ;;  %v6613_v2 = vpack.c.bf16 %v1661_v62, %v1659_v61  ;;  %v2057_v61 = vld [vmem:[#allocation2 + $0xa58] sm:$0xff] }
 0x270   : > { %6360 = vmatmul.mubr.msk.f32.vlgmr.msra.gmra.mrb[4].mxu1 %vm1252_vm2, %v1402_v6  ;;  %6574 = vmatprep.subr.bf16.mxu1 %v6573_v3  ;;  %v1658_v3 = vld [vmem:[#allocation2 + $0x740] sm:$0xff]  ;;  %v1663_v6 = vld [vmem:[#allocation2 + $0x768] sm:$0xff] }
 0x271   : > { %6576 = vmatpush1.bf16.msra.mxu1 %v6575_v7  ;;  %1746 = vmatprep.mubr.f32.mxu1 %v8659_v27  ;;  %v1665_v7 = vld [vmem:[#allocation2 + $0x778] sm:$0xff] }
 0x272   : > { %6578 = vmatprep.subr.bf16.mxu1 %v6577_v8  ;;  %v6615_v8 = vpack.c.bf16 %v1660_v5, %v1658_v3  ;;  %v6617_v9 = vpack.c.bf16 %v1665_v7, %v1663_v6  ;;  %v2056_v3 = vld [vmem:[#allocation2 + $0xa50] sm:$0xff]  ;;  %v2059_v5 = vld [vmem:[#allocation2 + $0xa68] sm:$0xff]  ;;  %v2061_v6 = vld [vmem:[#allocation2 + $0xa78] sm:$0xff] }
 0x275   : > { %6580 = vmatpush1.bf16.msra.mxu1 %v6579_v13  ;;  %v1669_v13 = vld [vmem:[#allocation2 + $0x798] sm:$0xff] }
 0x276   : > { %6582 = vmatprep.subr.bf16.mxu1 %v6581_v14  ;;  %v6619_v14 = vpack.c.bf16 %v1664_v11, %v1662_v10  ;;  %v6621_v15 = vpack.c.bf16 %v1669_v13, %v1667_v12  ;;  %v2060_v10 = vld [vmem:[#allocation2 + $0xa70] sm:$0xff]  ;;  %v2063_v11 = vld [vmem:[#allocation2 + $0xa88] sm:$0xff]  ;;  %v2065_v12 = vld [vmem:[#allocation2 + $0xa98] sm:$0xff] }
 0x279   : > { %6584 = vmatpush1.bf16.msra.mxu1 %v6583_v19  ;;  %v1673_v19 = vld [vmem:[#allocation2 + $0x7b8] sm:$0xff] }
 0x27a   : > { %6586 = vmatprep.subr.bf16.mxu1 %v6585_v20  ;;  %v6623_v20 = vpack.c.bf16 %v1668_v17, %v1666_v16  ;;  %v6625_v21 = vpack.c.bf16 %v1673_v19, %v1671_v18  ;;  %v2064_v16 = vld [vmem:[#allocation2 + $0xa90] sm:$0xff]  ;;  %v2067_v17 = vld [vmem:[#allocation2 + $0xaa8] sm:$0xff]  ;;  %v2069_v18 = vld [vmem:[#allocation2 + $0xab8] sm:$0xff] }
 0x27d   : > { %6588 = vmatpush1.bf16.msra.mxu1 %v6587_v25  ;;  %v1677_v25 = vld [vmem:[#allocation2 + $0x7d8] sm:$0xff] }
 0x27e   : > { %6590 = vmatprep.subr.bf16.mxu1 %v6589_v26  ;;  %v6627_v26 = vpack.c.bf16 %v1672_v23, %v1670_v22  ;;  %v6629_v28 = vpack.c.bf16 %v1677_v25, %v1675_v24  ;;  %v2068_v22 = vld [vmem:[#allocation2 + $0xab0] sm:$0xff]  ;;  %v2071_v23 = vld [vmem:[#allocation2 + $0xac8] sm:$0xff]  ;;  %v2073_v24 = vld [vmem:[#allocation2 + $0xad8] sm:$0xff] }
 0x281   : > { %6592 = vmatpush1.bf16.msra.mxu1 %v6591_v33  ;;  %v1681_v33 = vld [vmem:[#allocation2 + $0x7f8] sm:$0xff] }
 0x282   : > { %6594 = vmatprep.subr.bf16.mxu1 %v6593_v34  ;;  %v6631_v34 = vpack.c.bf16 %v1676_v31, %v1674_v30  ;;  %v6633_v35 = vpack.c.bf16 %v1681_v33, %v1679_v32  ;;  %v2072_v30 = vld [vmem:[#allocation2 + $0xad0] sm:$0xff]  ;;  %v2075_v31 = vld [vmem:[#allocation2 + $0xae8] sm:$0xff]  ;;  %v2077_v32 = vld [vmem:[#allocation2 + $0xaf8] sm:$0xff] }
 0x285   : > { %6596 = vmatpush1.bf16.msra.mxu1 %v6595_v39 }
 0x286   : > { %6598 = vmatprep.subr.bf16.mxu1 %v6597_v40 }
 0x289   : > { %6600 = vmatpush1.bf16.msra.mxu1 %v6599_v45  ;;  %v2047_v45 = vld [vmem:[#allocation2 + $0xa08] sm:$0xff] }
 0x28a   : > { %6602 = vmatprep.subr.bf16.mxu1 %v6601_v46  ;;  %v2049_v46 = vld [vmem:[#allocation2 + $0xa18] sm:$0xff] }
 0x28b   : > { %v6701_v50 = vpack.c.bf16 %v2049_v46, %v2047_v45  ;;  %v2078_v45 = vld [vmem:[#allocation2 + $0xb00] sm:$0xff]  ;;  %v2080_v46 = vld [vmem:[#allocation2 + $0xb10] sm:$0xff] }
 0x28d   : > { %6604 = vmatpush1.bf16.msra.mxu1 %v6603_v51  ;;  %v2046_v51 = vld [vmem:[#allocation2 + $0xa00] sm:$0xff] }
 0x28e   : > { %6606 = vmatprep.subr.bf16.mxu1 %v6605_v52  ;;  %v2048_v52 = vld [vmem:[#allocation2 + $0xa10] sm:$0xff] }
 0x28f   : > { %v6703_v56 = vpack.c.bf16 %v2048_v52, %v2046_v51  ;;  %v2082_v51 = vld [vmem:[#allocation2 + $0xb20] sm:$0xff]  ;;  %v2084_v52 = vld [vmem:[#allocation2 + $0xb30] sm:$0xff] }
 0x291   : > { %6608 = vmatpush1.bf16.msra.mxu1 %v6607_v57  ;;  %v6705_v57 = vpack.c.bf16 %v2053_v54, %v2051_v53  ;;  %v2087_v53 = vld [vmem:[#allocation2 + $0xb48] sm:$0xff]  ;;  %v2089_v54 = vld [vmem:[#allocation2 + $0xb58] sm:$0xff] }
 0x292   : > { %6610 = vmatprep.subr.bf16.mxu1 %v6609_v58  ;;  %v2050_v58 = vld [vmem:[#allocation2 + $0xa20] sm:$0xff] }
 0x293   : > { %v6707_v62 = vpack.c.bf16 %v2052_v59, %v2050_v58  ;;  %v2088_v58 = vld [vmem:[#allocation2 + $0xb50] sm:$0xff]  ;;  %v2091_v59 = vld [vmem:[#allocation2 + $0xb68] sm:$0xff] }
 0x295   : > { %6612 = vmatpush1.bf16.msra.mxu1 %v6611_v63  ;;  %v6709_v63 = vpack.c.bf16 %v2057_v61, %v2055_v60  ;;  %v2093_v60 = vld [vmem:[#allocation2 + $0xb78] sm:$0xff] }
 0x296   : > { %6614 = vmatprep.subr.bf16.mxu1 %v6613_v2  ;;  %v2054_v2 = vld [vmem:[#allocation2 + $0xa40] sm:$0xff] }
 0x297   : > { %v6711_v7 = vpack.c.bf16 %v2056_v3, %v2054_v2  ;;  %v2092_v2 = vld [vmem:[#allocation2 + $0xb70] sm:$0xff]  ;;  %v2095_v3 = vld [vmem:[#allocation2 + $0xb88] sm:$0xff] }
 0x299   : > { %6616 = vmatpush1.bf16.msra.mxu1 %v6615_v8  ;;  %v6713_v8 = vpack.c.bf16 %v2061_v6, %v2059_v5  ;;  %v2097_v5 = vld [vmem:[#allocation2 + $0xb98] sm:$0xff] }
 0x29a   : > { %6618 = vmatprep.subr.bf16.mxu1 %v6617_v9  ;;  %v2058_v9 = vld [vmem:[#allocation2 + $0xa60] sm:$0xff] }
 0x29b   : > { %v6715_v13 = vpack.c.bf16 %v2060_v10, %v2058_v9  ;;  %v2096_v9 = vld [vmem:[#allocation2 + $0xb90] sm:$0xff]  ;;  %v2099_v10 = vld [vmem:[#allocation2 + $0xba8] sm:$0xff] }
 0x29d   : > { %6620 = vmatpush1.bf16.msra.mxu1 %v6619_v14  ;;  %v6717_v14 = vpack.c.bf16 %v2065_v12, %v2063_v11  ;;  %v2101_v11 = vld [vmem:[#allocation2 + $0xbb8] sm:$0xff] }
 0x29e   : > { %6622 = vmatprep.subr.bf16.mxu1 %v6621_v15  ;;  %v2062_v15 = vld [vmem:[#allocation2 + $0xa80] sm:$0xff] }
 0x29f   : > { %v6719_v19 = vpack.c.bf16 %v2064_v16, %v2062_v15  ;;  %v2100_v15 = vld [vmem:[#allocation2 + $0xbb0] sm:$0xff]  ;;  %v2103_v16 = vld [vmem:[#allocation2 + $0xbc8] sm:$0xff] }
 0x2a1   : > { %6624 = vmatpush1.bf16.msra.mxu1 %v6623_v20  ;;  %v6721_v20 = vpack.c.bf16 %v2069_v18, %v2067_v17  ;;  %v2105_v17 = vld [vmem:[#allocation2 + $0xbd8] sm:$0xff] }
 0x2a2   : > { %6626 = vmatprep.subr.bf16.mxu1 %v6625_v21  ;;  %v2066_v21 = vld [vmem:[#allocation2 + $0xaa0] sm:$0xff] }
 0x2a3   : > { %v6723_v25 = vpack.c.bf16 %v2068_v22, %v2066_v21  ;;  %v2104_v21 = vld [vmem:[#allocation2 + $0xbd0] sm:$0xff]  ;;  %v2107_v22 = vld [vmem:[#allocation2 + $0xbe8] sm:$0xff] }
 0x2a5   : > { %6628 = vmatpush1.bf16.msra.mxu1 %v6627_v26  ;;  %v6725_v26 = vpack.c.bf16 %v2073_v24, %v2071_v23  ;;  %v2109_v23 = vld [vmem:[#allocation2 + $0xbf8] sm:$0xff] }
 0x2a6   : > { %6630 = vmatprep.subr.bf16.mxu1 %v6629_v28  ;;  %v2070_v28 = vld [vmem:[#allocation2 + $0xac0] sm:$0xff] }
 0x2a7   : > { %v6727_v33 = vpack.c.bf16 %v2072_v30, %v2070_v28  ;;  %v2108_v28 = vld [vmem:[#allocation2 + $0xbf0] sm:$0xff] }
 0x2a9   : > { %6632 = vmatpush1.bf16.msra.mxu1 %v6631_v34  ;;  %v6729_v34 = vpack.c.bf16 %v2077_v32, %v2075_v31  ;;  %v2475_v31 = vld [vmem:[#allocation2 + $0xe08] sm:$0xff]  ;;  %v2477_v32 = vld [vmem:[#allocation2 + $0xe18] sm:$0xff] }
 0x2aa   : > { %6634 = vmatprep.subr.bf16.mxu1 %v6633_v35  ;;  %v2074_v35 = vld [vmem:[#allocation2 + $0xae0] sm:$0xff] }
 0x2ac   : > { %v1962_v39 = vpop.f32.mrb[4].mxu0 }
 0x2ad   : > { %6636 = vmatpush1.bf16.msra.mxu1 %v6635_v38  ;;  %v1964_v40 = vpop.f32.mrb[5].mxu0  ;;  %v2081_v38 = vld [vmem:[#allocation2 + $0xb18] sm:$0xff] }
 0x2b0   : > { %1747 = vmatmul.mubr.f32.vlgmr.msra.gmra.mrb[6].mxu1 %v8661_v29 }
 0x2b1   : > { %1820 = vmatprep.mubr.f32.mxu1 %v8360_v0 }
 0x2ec   : > { %v8684_v41 = vpop.f32.mrb[6].mxu0 }
 0x2ed   : > { %v8686_v42 = vpop.f32.mrb[7].mxu0 }
 0x32c   : > { %v8688_v43 = vpop.f32.mrb[8].mxu0 }
 0x32d   : > { %v8690_v44 = vpop.f32.mrb[9].mxu0 }
 0x383   : > { %v1748_v47 = vpop.f32.mrb[6].mxu1 }
 0x384   : > { %v1750_v48 = vpop.f32.mrb[7].mxu1 }
 0x385   : > { %1756 = vmatprep.subr.mxu1 %v1750_v48  ;;  %v2085_v48 = vld [vmem:[#allocation2 + $0xb38] sm:$0xff] }
 0x386   : > { %1757 = vmatpush1.msra.mxu1 %v1748_v47  ;;  %v2083_v47 = vld [vmem:[#allocation2 + $0xb28] sm:$0xff] }
 0x387   : > { %6361 = vmatmul.mubr.msk.f32.vlgmr.msra.gmra.mrb[4].mxu1 %vm1252_vm2, %v1616_v49  ;;  %1970 = vmatprep.subr.mxu1 %v1964_v40  ;;  %v6733_v40 = vpack.c.bf16 %v2081_v38, %v2079_v37  ;;  %v6735_v49 = vpack.c.bf16 %v2080_v46, %v2078_v45  ;;  %v2474_v37 = vld [vmem:[#allocation2 + $0xe00] sm:$0xff]  ;;  %v2476_v38 = vld [vmem:[#allocation2 + $0xe10] sm:$0xff] }
 0x388   : > { %1971 = vmatpush1.msra.mxu1 %v1962_v39  ;;  %2034 = vmatprep.mubr.f32.mxu1 %v8360_v0  ;;  %v6731_v39 = vpack.c.bf16 %v2076_v36, %v2074_v35  ;;  %v2044_v35 = vld [vmem:[#allocation4 + $0x28] sm:$0xff]  ;;  %v6829_v36 = vpack.c.bf16 %v2477_v32, %v2475_v31  ;;  %v2258_v45 = vld [vmem:[#allocation4 + $0x30] sm:$0xff]  ;;  %v6831_v46 = vpack.c.bf16 %v2476_v38, %v2474_v37  ;;  %v2513_v31 = vld [vmem:[#allocation2 + $0xf38] sm:$0xff] }
 0x389   : > { %6702 = vmatprep.subr.bf16.mxu1 %v6701_v50  ;;  %v6737_v50 = vpack.c.bf16 %v2085_v48, %v2083_v47  ;;  %v2478_v48 = vld [vmem:[#allocation2 + $0xe20] sm:$0xff]  ;;  %v2517_v37 = vld [vmem:[#allocation2 + $0xf58] sm:$0xff] }
 0x38f   : > { %6362 = vmatmul.mubr.msk.f32.vlgmr.msra.gmra.mrb[4].mxu1 %vm1252_vm2, %v1830_v55  ;;  %v6739_v55 = vpack.c.bf16 %v2084_v52, %v2082_v51  ;;  %v2485_v51 = vld [vmem:[#allocation2 + $0xe58] sm:$0xff]  ;;  %v2482_v52 = vld [vmem:[#allocation2 + $0xe40] sm:$0xff] }
 0x390   : > { %6704 = vmatpush1.bf16.msra.mxu1 %v6703_v56  ;;  %2174 = vmatprep.mubr.f32.mxu1 %v8659_v27  ;;  %v6741_v56 = vpack.c.bf16 %v2089_v54, %v2087_v53  ;;  %v2484_v53 = vld [vmem:[#allocation2 + $0xe50] sm:$0xff]  ;;  %v2487_v54 = vld [vmem:[#allocation2 + $0xe68] sm:$0xff] }
 0x391   : > { %6706 = vmatprep.subr.bf16.mxu1 %v6705_v57  ;;  %v2086_v57 = vld [vmem:[#allocation2 + $0xb40] sm:$0xff] }
 0x392   : > { %v6743_v61 = vpack.c.bf16 %v2088_v58, %v2086_v57  ;;  %v2486_v58 = vld [vmem:[#allocation2 + $0xe60] sm:$0xff] }
 0x394   : > { %6708 = vmatpush1.bf16.msra.mxu1 %v6707_v62  ;;  %v6745_v62 = vpack.c.bf16 %v2093_v60, %v2091_v59  ;;  %v2488_v59 = vld [vmem:[#allocation2 + $0xe70] sm:$0xff]  ;;  %v2491_v60 = vld [vmem:[#allocation2 + $0xe88] sm:$0xff] }
 0x395   : > { %6710 = vmatprep.subr.bf16.mxu1 %v6709_v63  ;;  %v2090_v63 = vld [vmem:[#allocation2 + $0xb60] sm:$0xff] }
 0x396   : > { %v6747_v6 = vpack.c.bf16 %v2092_v2, %v2090_v63  ;;  %v2492_v2 = vld [vmem:[#allocation2 + $0xe90] sm:$0xff] }
 0x398   : > { %6712 = vmatpush1.bf16.msra.mxu1 %v6711_v7  ;;  %v6749_v7 = vpack.c.bf16 %v2097_v5, %v2095_v3  ;;  %v2495_v3 = vld [vmem:[#allocation2 + $0xea8] sm:$0xff]  ;;  %v2497_v5 = vld [vmem:[#allocation2 + $0xeb8] sm:$0xff] }
 0x399   : > { %6714 = vmatprep.subr.bf16.mxu1 %v6713_v8  ;;  %v2094_v8 = vld [vmem:[#allocation2 + $0xb80] sm:$0xff] }
 0x39a   : > { %v6751_v12 = vpack.c.bf16 %v2096_v9, %v2094_v8  ;;  %v2494_v8 = vld [vmem:[#allocation2 + $0xea0] sm:$0xff]  ;;  %v2496_v9 = vld [vmem:[#allocation2 + $0xeb0] sm:$0xff] }
 0x39c   : > { %6716 = vmatpush1.bf16.msra.mxu1 %v6715_v13  ;;  %v6753_v13 = vpack.c.bf16 %v2101_v11, %v2099_v10  ;;  %v2499_v10 = vld [vmem:[#allocation2 + $0xec8] sm:$0xff]  ;;  %v2501_v11 = vld [vmem:[#allocation2 + $0xed8] sm:$0xff] }
 0x39d   : > { %6718 = vmatprep.subr.bf16.mxu1 %v6717_v14  ;;  %v2098_v14 = vld [vmem:[#allocation2 + $0xba0] sm:$0xff] }
 0x39e   : > { %v6755_v18 = vpack.c.bf16 %v2100_v15, %v2098_v14  ;;  %v2498_v14 = vld [vmem:[#allocation2 + $0xec0] sm:$0xff]  ;;  %v2500_v15 = vld [vmem:[#allocation2 + $0xed0] sm:$0xff] }
 0x3a0   : > { %6720 = vmatpush1.bf16.msra.mxu1 %v6719_v19  ;;  %v6757_v19 = vpack.c.bf16 %v2105_v17, %v2103_v16  ;;  %v2503_v16 = vld [vmem:[#allocation2 + $0xee8] sm:$0xff]  ;;  %v2505_v17 = vld [vmem:[#allocation2 + $0xef8] sm:$0xff] }
 0x3a1   : > { %6722 = vmatprep.subr.bf16.mxu1 %v6721_v20  ;;  %v2102_v20 = vld [vmem:[#allocation2 + $0xbc0] sm:$0xff] }
 0x3a2   : > { %v6759_v24 = vpack.c.bf16 %v2104_v21, %v2102_v20  ;;  %v2502_v20 = vld [vmem:[#allocation2 + $0xee0] sm:$0xff]  ;;  %v2504_v21 = vld [vmem:[#allocation2 + $0xef0] sm:$0xff] }
 0x3a4   : > { %6724 = vmatpush1.bf16.msra.mxu1 %v6723_v25  ;;  %v6761_v25 = vpack.c.bf16 %v2109_v23, %v2107_v22  ;;  %v2507_v22 = vld [vmem:[#allocation2 + $0xf08] sm:$0xff]  ;;  %v2509_v23 = vld [vmem:[#allocation2 + $0xf18] sm:$0xff] }
 0x3a5   : > { %6726 = vmatprep.subr.bf16.mxu1 %v6725_v26  ;;  %v2106_v26 = vld [vmem:[#allocation2 + $0xbe0] sm:$0xff] }
 0x3a6   : > { %v6763_v30 = vpack.c.bf16 %v2108_v28, %v2106_v26  ;;  %v2506_v26 = vld [vmem:[#allocation2 + $0xf00] sm:$0xff]  ;;  %v2508_v28 = vld [vmem:[#allocation2 + $0xf10] sm:$0xff] }
 0x3a7   : > { %v6863_v32 = vpack.c.bf16 %v2508_v28, %v2506_v26  ;;  %v3245_v26 = vld [vmem:[#allocation2 + $0x238] sm:$0xff] }
 0x3a8   : > { %6728 = vmatpush1.bf16.msra.mxu1 %v6727_v33 }
 0x3a9   : > { %6730 = vmatprep.subr.bf16.mxu1 %v6729_v34 }
 0x3ac   : > { %6732 = vmatpush1.bf16.msra.mxu1 %v6731_v39  ;;  %v2479_v39 = vld [vmem:[#allocation2 + $0xe28] sm:$0xff] }
 0x3ad   : > { %6734 = vmatprep.subr.bf16.mxu1 %v6733_v40  ;;  %v2481_v40 = vld [vmem:[#allocation2 + $0xe38] sm:$0xff] }
 0x3ae   : > { %v6833_v47 = vpack.c.bf16 %v2481_v40, %v2479_v39  ;;  %v2514_v40 = vld [vmem:[#allocation2 + $0xf40] sm:$0xff] }
 0x3b0   : > { %6736 = vmatpush1.bf16.msra.mxu1 %v6735_v49  ;;  %v2480_v49 = vld [vmem:[#allocation2 + $0xe30] sm:$0xff] }
 0x3b1   : > { %6738 = vmatprep.subr.bf16.mxu1 %v6737_v50  ;;  %v2483_v50 = vld [vmem:[#allocation2 + $0xe48] sm:$0xff] }
 0x3b4   : > { %6740 = vmatpush1.bf16.msra.mxu1 %v6739_v55  ;;  %v2489_v55 = vld [vmem:[#allocation2 + $0xe78] sm:$0xff] }
 0x3b5   : > { %6742 = vmatprep.subr.bf16.mxu1 %v6741_v56  ;;  %v6839_v56 = vpack.c.bf16 %v2484_v53, %v2482_v52  ;;  %v6841_v57 = vpack.c.bf16 %v2489_v55, %v2487_v54  ;;  %v2522_v54 = vld [vmem:[#allocation2 + $0xf80] sm:$0xff]  ;;  %v2524_v55 = vld [vmem:[#allocation2 + $0xf90] sm:$0xff] }
 0x3b8   : > { %6744 = vmatpush1.bf16.msra.mxu1 %v6743_v61  ;;  %v2493_v61 = vld [vmem:[#allocation2 + $0xe98] sm:$0xff] }
 0x3b9   : > { %6746 = vmatprep.subr.bf16.mxu1 %v6745_v62  ;;  %v6843_v62 = vpack.c.bf16 %v2488_v59, %v2486_v58  ;;  %v6845_v63 = vpack.c.bf16 %v2493_v61, %v2491_v60  ;;  %v6879_v58 = vpack.c.bf16 %v2524_v55, %v2522_v54  ;;  %v2526_v60 = vld [vmem:[#allocation2 + $0xfa0] sm:$0xff]  ;;  %v2528_v61 = vld [vmem:[#allocation2 + $0xfb0] sm:$0xff] }
 0x3ba   : > { %v3258_v54 = vld [vmem:[#allocation2 + $0x2a0] sm:$0xff]  ;;  %v3260_v55 = vld [vmem:[#allocation2 + $0x2b0] sm:$0xff] }
 0x3bc   : > { %6748 = vmatpush1.bf16.msra.mxu1 %v6747_v6 }
 0x3bd   : > { %6750 = vmatprep.subr.bf16.mxu1 %v6749_v7  ;;  %v6849_v7 = vpack.c.bf16 %v2497_v5, %v2495_v3  ;;  %v2530_v3 = vld [vmem:[#allocation2 + $0xfc0] sm:$0xff]  ;;  %v2532_v5 = vld [vmem:[#allocation2 + $0xfd0] sm:$0xff] }
 0x3c0   : > { %6752 = vmatpush1.bf16.msra.mxu1 %v6751_v12  ;;  %v6851_v12 = vpack.c.bf16 %v2496_v9, %v2494_v8  ;;  %v6887_v8 = vpack.c.bf16 %v2532_v5, %v2530_v3  ;;  %v3266_v3 = vld [vmem:[#allocation2 + $0x2e0] sm:$0xff]  ;;  %v3268_v5 = vld [vmem:[#allocation2 + $0x2f0] sm:$0xff] }
 0x3c1   : > { %6754 = vmatprep.subr.bf16.mxu1 %v6753_v13  ;;  %v6853_v13 = vpack.c.bf16 %v2501_v11, %v2499_v10  ;;  %v2534_v10 = vld [vmem:[#allocation2 + $0xfe0] sm:$0xff]  ;;  %v2536_v11 = vld [vmem:[#allocation2 + $0xff0] sm:$0xff] }
 0x3c4   : > { %6756 = vmatpush1.bf16.msra.mxu1 %v6755_v18  ;;  %v6855_v18 = vpack.c.bf16 %v2500_v15, %v2498_v14  ;;  %v2924_v14 = vld [vmem:[%s9089_s27] sm:$0xff] }
 0x3c5   : > { %6758 = vmatprep.subr.bf16.mxu1 %v6757_v19  ;;  %v6857_v19 = vpack.c.bf16 %v2505_v17, %v2503_v16  ;;  %v8715_v15 = vld [vmem:[%s9090_s1] sm:$0xff]  ;;  %v2472_v17 = vld [vmem:[#allocation4 + $0x38] sm:$0xff] }
 0x3c8   : > { %6760 = vmatpush1.bf16.msra.mxu1 %v6759_v24  ;;  %v6859_v24 = vpack.c.bf16 %v2504_v21, %v2502_v20  ;;  %v3241_v20 = vld [vmem:[#allocation2 + $0x218] sm:$0xff] }
 0x3c9   : > { %6762 = vmatprep.subr.bf16.mxu1 %v6761_v25  ;;  %v6861_v25 = vpack.c.bf16 %v2509_v23, %v2507_v22  ;;  %v3238_v22 = vld [vmem:[#allocation2 + $0x200] sm:$0xff]  ;;  %v3240_v23 = vld [vmem:[#allocation2 + $0x210] sm:$0xff] }
 0x3cc   : > { %6764 = vmatpush1.bf16.msra.mxu1 %v6763_v30  ;;  %v2511_v30 = vld [vmem:[#allocation2 + $0xf28] sm:$0xff] }
 0x3cf   : > { %2175 = vmatmul.mubr.f32.vlgmr.msra.gmra.mrb[8].mxu1 %v8661_v29 }
 0x3d0   : > { %2248 = vmatprep.mubr.f32.mxu1 %v8360_v0 }
 0x4a2   : > { %v2176_v33 = vpop.f32.mrb[8].mxu1 }
 0x4a3   : > { %v2178_v34 = vpop.f32.mrb[9].mxu1 }
 0x4a4   : > { %2184 = vmatprep.subr.mxu1 %v2178_v34  ;;  %v2510_v34 = vld [vmem:[#allocation2 + $0xf20] sm:$0xff] }
 0x4a5   : > { %2185 = vmatpush1.msra.mxu1 %v2176_v33  ;;  %v6865_v33 = vpack.c.bf16 %v2513_v31, %v2511_v30  ;;  %v3247_v31 = vld [vmem:[#allocation2 + $0x248] sm:$0xff] }
 0x4a6   : > { %6363 = vmatmul.mubr.msk.f32.vlgmr.msra.gmra.mrb[4].mxu1 %vm1252_vm2, %v2044_v35  ;;  %2398 = vmatprep.subr.mxu1 %v8686_v42  ;;  %v6837_v42 = vpack.c.bf16 %v2485_v51, %v2483_v50  ;;  %v2512_v35 = vld [vmem:[#allocation2 + $0xf30] sm:$0xff]  ;;  %v2518_v50 = vld [vmem:[#allocation2 + $0xf60] sm:$0xff] }
 0x4a7   : > { %2399 = vmatpush1.msra.mxu1 %v8684_v41  ;;  %2462 = vmatprep.mubr.f32.mxu1 %v8360_v0  ;;  %v6835_v41 = vpack.c.bf16 %v2480_v49, %v2478_v48  ;;  %v6867_v38 = vpack.c.bf16 %v2512_v35, %v2510_v34  ;;  %v2520_v51 = vld [vmem:[#allocation2 + $0xf70] sm:$0xff]  ;;  %v3246_v34 = vld [vmem:[#allocation2 + $0x240] sm:$0xff] }
 0x4a8   : > { %6830 = vmatprep.subr.bf16.mxu1 %v6829_v36  ;;  %v2515_v36 = vld [vmem:[#allocation2 + $0xf48] sm:$0xff]  ;;  %v6875_v52 = vpack.c.bf16 %v2520_v51, %v2518_v50  ;;  %v3248_v35 = vld [vmem:[#allocation2 + $0x250] sm:$0xff]  ;;  %v3254_v50 = vld [vmem:[#allocation2 + $0x280] sm:$0xff] }
 0x4a9   : > { %v6869_v39 = vpack.c.bf16 %v2517_v37, %v2515_v36  ;;  %v7031_v36 = vpack.c.bf16 %v3248_v35, %v3246_v34  ;;  %v3251_v37 = vld [vmem:[#allocation2 + $0x268] sm:$0xff]  ;;  %v3256_v51 = vld [vmem:[#allocation2 + $0x290] sm:$0xff]  ;;  %v3286_v34 = vld [vmem:[#allocation2 + $0x380] sm:$0xff] }
 0x4aa   : > { %v3288_v35 = vld [vmem:[#allocation2 + $0x390] sm:$0xff] }
 0x4ae   : > { %6364 = vmatmul.mubr.msk.f32.vlgmr.msra.gmra.mrb[4].mxu1 %vm1252_vm2, %v2258_v45  ;;  %v2516_v45 = vld [vmem:[#allocation2 + $0xf50] sm:$0xff] }
 0x4af   : > { %6832 = vmatpush1.bf16.msra.mxu1 %v6831_v46  ;;  %2602 = vmatprep.mubr.f32.mxu1 %v8659_v27  ;;  %v2490_v27 = vld [vmem:[#allocation2 + $0xe80] sm:$0xff]  ;;  %v2519_v46 = vld [vmem:[#allocation2 + $0xf68] sm:$0xff]  ;;  %v6871_v48 = vpack.c.bf16 %v2516_v45, %v2514_v40  ;;  %v3252_v45 = vld [vmem:[#allocation2 + $0x270] sm:$0xff] }
 0x4b0   : > { %6834 = vmatprep.subr.bf16.mxu1 %v6833_v47  ;;  %v6847_v6 = vpack.c.bf16 %v2492_v2, %v2490_v27  ;;  %v2521_v47 = vld [vmem:[#allocation2 + $0xf78] sm:$0xff]  ;;  %v6883_v27 = vpack.c.bf16 %v2528_v61, %v2526_v60  ;;  %v3250_v40 = vld [vmem:[#allocation2 + $0x260] sm:$0xff]  ;;  %v3264_v61 = vld [vmem:[#allocation2 + $0x2d0] sm:$0xff] }
 0x4b1   : > { %v6873_v49 = vpack.c.bf16 %v2521_v47, %v2519_v46  ;;  %v7035_v46 = vpack.c.bf16 %v3252_v45, %v3250_v40  ;;  %v3255_v47 = vld [vmem:[#allocation2 + $0x288] sm:$0xff]  ;;  %v3262_v60 = vld [vmem:[#allocation2 + $0x2c0] sm:$0xff] }
 0x4b3   : > { %6836 = vmatpush1.bf16.msra.mxu1 %v6835_v41  ;;  %v2523_v41 = vld [vmem:[#allocation2 + $0xf88] sm:$0xff] }
 0x4b4   : > { %6838 = vmatprep.subr.bf16.mxu1 %v6837_v42  ;;  %v2525_v42 = vld [vmem:[#allocation2 + $0xf98] sm:$0xff] }
 0x4b5   : > { %v6877_v53 = vpack.c.bf16 %v2525_v42, %v2523_v41  ;;  %v7039_v41 = vpack.c.bf16 %v3256_v51, %v3254_v50  ;;  %v3259_v42 = vld [vmem:[#allocation2 + $0x2a8] sm:$0xff] }
 0x4b7   : > { %6840 = vmatpush1.bf16.msra.mxu1 %v6839_v56  ;;  %v2527_v56 = vld [vmem:[#allocation2 + $0xfa8] sm:$0xff] }
 0x4b8   : > { %6842 = vmatprep.subr.bf16.mxu1 %v6841_v57  ;;  %v2529_v57 = vld [vmem:[#allocation2 + $0xfb8] sm:$0xff] }
 0x4b9   : > { %v6881_v59 = vpack.c.bf16 %v2529_v57, %v2527_v56  ;;  %v7043_v56 = vpack.c.bf16 %v3260_v55, %v3258_v54  ;;  %v3263_v57 = vld [vmem:[#allocation2 + $0x2c8] sm:$0xff]  ;;  %v3096_v54 = vld [vmem:[#allocation2 + $0x18] sm:$0xff] }
 0x4bb   : > { %6844 = vmatpush1.bf16.msra.mxu1 %v6843_v62  ;;  %v2531_v62 = vld [vmem:[#allocation2 + $0xfc8] sm:$0xff] }
 0x4bc   : > { %6846 = vmatprep.subr.bf16.mxu1 %v6845_v63  ;;  %v2533_v63 = vld [vmem:[#allocation2 + $0xfd8] sm:$0xff] }
 0x4bd   : > { %v6885_v2 = vpack.c.bf16 %v2533_v63, %v2531_v62  ;;  %v7047_v62 = vpack.c.bf16 %v3264_v61, %v3262_v60  ;;  %v3267_v63 = vld [vmem:[#allocation2 + $0x2e8] sm:$0xff]  ;;  %v3093_v60 = vld [vmem:[#allocation2] sm:$0xff]  ;;  %v3095_v61 = vld [vmem:[#allocation2 + $0x10] sm:$0xff] }
 0x4bf   : > { %6848 = vmatpush1.bf16.msra.mxu1 %v6847_v6  ;;  %v2535_v6 = vld [vmem:[#allocation2 + $0xfe8] sm:$0xff] }
 0x4c0   : > { %6850 = vmatprep.subr.bf16.mxu1 %v6849_v7  ;;  %v2537_v7 = vld [vmem:[#allocation2 + $0xff8] sm:$0xff] }
 0x4c1   : > { %v6889_v9 = vpack.c.bf16 %v2537_v7, %v2535_v6  ;;  %v7051_v6 = vpack.c.bf16 %v3268_v5, %v3266_v3  ;;  %v3271_v7 = vld [vmem:[#allocation2 + $0x308] sm:$0xff]  ;;  %v3097_v5 = vld [vmem:[#allocation2 + $0x20] sm:$0xff] }
 0x4c3   : > { %6852 = vmatpush1.bf16.msra.mxu1 %v6851_v12  ;;  %v6891_v12 = vpack.c.bf16 %v2536_v11, %v2534_v10  ;;  %v3270_v10 = vld [vmem:[#allocation2 + $0x300] sm:$0xff]  ;;  %v3272_v11 = vld [vmem:[#allocation2 + $0x310] sm:$0xff] }
 0x4c4   : > { %6854 = vmatprep.subr.bf16.mxu1 %v6853_v13  ;;  %v2907_v13 = vld [vmem:[%s9088_s29] sm:$0xff]  ;;  %s9093_s29 = sld [smem:[#allocation22_spill]] }
 0x4c5   : > { %2910 = vperm.xlu1 %8193, %v2907_v13   ;;  %v3275_v13 = vld [vmem:[#allocation2 + $0x328] sm:$0xff] }
 0x4c7   : > { %6856 = vmatpush1.bf16.msra.mxu1 %v6855_v18  ;;  %v2686_v18 = vld [vmem:[#allocation4 + $0x40] sm:$0xff] }
 0x4c8   : > { %6858 = vmatprep.subr.bf16.mxu1 %v6857_v19  ;;  %v3239_v19 = vld [vmem:[#allocation2 + $0x208] sm:$0xff] }
 0x4c9   : > { %2927 = vperm.xlu1 %8193, %v2924_v14   ;;  %v7021_v21 = vpack.c.bf16 %v3241_v20, %v3239_v19  ;;  %v3277_v14 = vld [vmem:[#allocation2 + $0x338] sm:$0xff]  ;;  %v3279_v19 = vld [vmem:[#allocation2 + $0x348] sm:$0xff] }
 0x4ca   : > { %v3281_v20 = vld [vmem:[#allocation2 + $0x358] sm:$0xff] }
 0x4cb   : > { %6860 = vmatpush1.bf16.msra.mxu1 %v6859_v24  ;;  %v7023_v24 = vpack.c.bf16 %v3240_v23, %v3238_v22  ;;  %7022 = vmatprep.subr.bf16.mxu0 %v7021_v21  ;;  %v7061_v21 = vpack.c.bf16 %v3281_v20, %v3279_v19  ;;  %v3278_v22 = vld [vmem:[#allocation2 + $0x340] sm:$0xff]  ;;  %v3280_v23 = vld [vmem:[#allocation2 + $0x350] sm:$0xff]  ;;  %v3112_v19 = vld [vmem:[#allocation2 + $0x98] sm:$0xff] }
 0x4cc   : > { %6862 = vmatprep.subr.bf16.mxu1 %v6861_v25  ;;  %v3243_v25 = vld [vmem:[#allocation2 + $0x228] sm:$0xff] }
 0x4cd   : > { %3231 = vperm.xlu1 %8193, %v8715_v15   ;;  %v7025_v28 = vpack.c.bf16 %v3245_v26, %v3243_v25  ;;  %7024 = vmatpush1.bf16.msra.mxu0 %v7023_v24  ;;  %v7063_v24 = vpack.c.bf16 %v3280_v23, %v3278_v22  ;;  %v3283_v25 = vld [vmem:[#allocation2 + $0x368] sm:$0xff]  ;;  %v3285_v26 = vld [vmem:[#allocation2 + $0x378] sm:$0xff]  ;;  %v3109_v22 = vld [vmem:[#allocation2 + $0x80] sm:$0xff] }
 0x4ce   : > { %v3111_v23 = vld [vmem:[#allocation2 + $0x90] sm:$0xff] }
 0x4cf   : > { %6864 = vmatpush1.bf16.msra.mxu1 %v6863_v32  ;;  %7026 = vmatprep.subr.bf16.mxu0 %v7025_v28  ;;  %v3249_v32 = vld [vmem:[#allocation2 + $0x258] sm:$0xff]  ;;  %v7065_v28 = vpack.c.bf16 %v3285_v26, %v3283_v25  ;;  %v6975_v26 = vpack.c.bf16 %v3111_v23, %v3109_v22  ;;  %v3292_v22 = vld [vmem:[#allocation2 + $0x3b0] sm:$0xff] }
 0x4d0   : > { %6866 = vmatprep.subr.bf16.mxu1 %v6865_v33  ;;  %v7029_v33 = vpack.c.bf16 %v3249_v32, %v3247_v31  ;;  %v3287_v31 = vld [vmem:[#allocation2 + $0x388] sm:$0xff]  ;;  %v3289_v32 = vld [vmem:[#allocation2 + $0x398] sm:$0xff] }
 0x4d1   : > { %v3116_v25 = vld [vmem:[#allocation2 + $0xb8] sm:$0xff] }
 0x4d3   : > { %6868 = vmatpush1.bf16.msra.mxu1 %v6867_v38  ;;  %v3253_v38 = vld [vmem:[#allocation2 + $0x278] sm:$0xff] }
 0x4d4   : > { %6870 = vmatprep.subr.bf16.mxu1 %v6869_v39  ;;  %v7033_v39 = vpack.c.bf16 %v3253_v38, %v3251_v37  ;;  %v2903_v37 = vpop.permute.xlu0 %2902 }
 0x4d7   : > { %6872 = vmatpush1.bf16.msra.mxu1 %v6871_v48  ;;  %v3257_v48 = vld [vmem:[#allocation2 + $0x298] sm:$0xff] }
 0x4d8   : > { %6874 = vmatprep.subr.bf16.mxu1 %v6873_v49  ;;  %v7037_v49 = vpack.c.bf16 %v3257_v48, %v3255_v47 }
 0x4db   : > { %6876 = vmatpush1.bf16.msra.mxu1 %v6875_v52  ;;  %v3261_v52 = vld [vmem:[#allocation2 + $0x2b8] sm:$0xff] }
 0x4dc   : > { %6878 = vmatprep.subr.bf16.mxu1 %v6877_v53  ;;  %v7041_v53 = vpack.c.bf16 %v3261_v52, %v3259_v42 }
 0x4df   : > { %6880 = vmatpush1.bf16.msra.mxu1 %v6879_v58  ;;  %v3265_v58 = vld [vmem:[#allocation2 + $0x2d8] sm:$0xff] }
 0x4e0   : > { %6882 = vmatprep.subr.bf16.mxu1 %v6881_v59  ;;  %v7045_v59 = vpack.c.bf16 %v3265_v58, %v3263_v57  ;;  %v2915_v57 = vld [vmem:[%s9091_s11] sm:$0xff] }
 0x4e3   : > { %6884 = vmatpush1.bf16.msra.mxu1 %v6883_v27  ;;  %v3269_v27 = vld [vmem:[#allocation2 + $0x2f8] sm:$0xff] }
 0x4e4   : > { %6886 = vmatprep.subr.bf16.mxu1 %v6885_v2  ;;  %v7049_v2 = vpack.c.bf16 %v3269_v27, %v3267_v63  ;;  %v3100_v63 = vld [vmem:[#allocation2 + $0x38] sm:$0xff]  ;;  %v3004_v27 = vld [vmem:[%s9092_s10] sm:$0xff] }
 0x4e7   : > { %6888 = vmatpush1.bf16.msra.mxu1 %v6887_v8  ;;  %v3273_v8 = vld [vmem:[#allocation2 + $0x318] sm:$0xff] }
 0x4e8   : > { %6890 = vmatprep.subr.bf16.mxu1 %v6889_v9  ;;  %v7053_v9 = vpack.c.bf16 %v3273_v8, %v3271_v7  ;;  %v3102_v7 = vld [vmem:[#allocation2 + $0x48] sm:$0xff] }
 0x4eb   : > { %6892 = vmatpush1.bf16.msra.mxu1 %v6891_v12  ;;  %v7055_v12 = vpack.c.bf16 %v3272_v11, %v3270_v10  ;;  %v3101_v10 = vld [vmem:[#allocation2 + $0x40] sm:$0xff]  ;;  %v3103_v11 = vld [vmem:[#allocation2 + $0x50] sm:$0xff] }
 0x4ee   : > { %2603 = vmatmul.mubr.f32.vlgmr.msra.gmra.mrb[10].mxu1 %v8661_v29 }
 0x4ef   : > { %2676 = vmatprep.mubr.f32.mxu1 %v8360_v0 }
 0x544   : > { %v2911_v45 = vpop.permute.xlu1 %2910 }
 0x5c1   : > { %v2604_v29 = vpop.f32.mrb[10].mxu1 }
 0x5c2   : > { %v2606_v16 = vpop.f32.mrb[11].mxu1 }
 0x5c3   : > { %2612 = vmatprep.subr.mxu1 %v2606_v16  ;;  %v3274_v16 = vld [vmem:[#allocation2 + $0x320] sm:$0xff] }
 0x5c4   : > { %2613 = vmatpush1.msra.mxu1 %v2604_v29  ;;  %v7057_v29 = vpack.c.bf16 %v3277_v14, %v3275_v13  ;;  %v3108_v13 = vld [vmem:[#allocation2 + $0x78] sm:$0xff]  ;;  %v6967_v14 = vpack.c.bf16 %v3103_v11, %v3101_v10  ;;  %v3143_v10 = vld [vmem:[#allocation2 + $0x190] sm:$0xff] }
 0x5c5   : > { %6365 = vmatmul.mubr.msk.f32.vlgmr.msra.gmra.mrb[4].mxu1 %vm1252_vm2, %v2472_v17  ;;  %2826 = vmatprep.subr.mxu1 %v8690_v44  ;;  %v3242_v44 = vld [vmem:[#allocation2 + $0x220] sm:$0xff]  ;;  %v3276_v17 = vld [vmem:[#allocation2 + $0x330] sm:$0xff] }
 0x5c6   : > { %2827 = vmatpush1.msra.mxu1 %v8688_v43  ;;  %2890 = vmatprep.mubr.f32.mxu1 %v8360_v0  ;;  %v3244_v43 = vld [vmem:[#allocation2 + $0x230] sm:$0xff] }
 0x5c7   : > { %v7027_v30 = vpack.c.bf16 %v3244_v43, %v3242_v44  ;;  %v3282_v44 = vld [vmem:[#allocation2 + $0x360] sm:$0xff]  ;;  %v3284_v43 = vld [vmem:[#allocation2 + $0x370] sm:$0xff] }
 0x5c9   : > { %7028 = vmatpush1.bf16.msra.mxu0 %v7027_v30  ;;  %v7067_v30 = vpack.c.bf16 %v3284_v43, %v3282_v44  ;;  %v3113_v44 = vld [vmem:[#allocation2 + $0xa0] sm:$0xff]  ;;  %v3115_v43 = vld [vmem:[#allocation2 + $0xb0] sm:$0xff] }
 0x5ca   : > { %7030 = vmatprep.subr.bf16.mxu0 %v7029_v33  ;;  %v7069_v33 = vpack.c.bf16 %v3289_v32, %v3287_v31  ;;  %v3120_v31 = vld [vmem:[#allocation2 + $0xd8] sm:$0xff]  ;;  %v6979_v32 = vpack.c.bf16 %v3115_v43, %v3113_v44  ;;  %v3149_v43 = vld [vmem:[#allocation2 + $0x1c0] sm:$0xff] }
 0x5cb   : > { %v3297_v44 = vld [vmem:[#allocation2 + $0x3d8] sm:$0xff] }
 0x5cd   : > { %6366 = vmatmul.mubr.msk.f32.vlgmr.msra.gmra.mrb[4].mxu1 %vm1252_vm2, %v2686_v18  ;;  %7032 = vmatpush1.bf16.msra.mxu0 %v7031_v36  ;;  %v7059_v18 = vpack.c.bf16 %v3276_v17, %v3274_v16  ;;  %v7071_v36 = vpack.c.bf16 %v3288_v35, %v3286_v34  ;;  %v3105_v16 = vld [vmem:[#allocation2 + $0x60] sm:$0xff]  ;;  %v3107_v17 = vld [vmem:[#allocation2 + $0x70] sm:$0xff] }
 0x5ce   : > { %2997 = vmatprep.mubr.f32.mxu1 %v8360_v0  ;;  %7034 = vmatprep.subr.bf16.mxu0 %v7033_v39  ;;  %v6971_v20 = vpack.c.bf16 %v3107_v17, %v3105_v16  ;;  %v3117_v34 = vld [vmem:[#allocation2 + $0xc0] sm:$0xff]  ;;  %v3119_v35 = vld [vmem:[#allocation2 + $0xd0] sm:$0xff]  ;;  %v3293_v16 = vld [vmem:[#allocation2 + $0x3b8] sm:$0xff] }
 0x5cf   : > { %v3145_v17 = vld [vmem:[#allocation2 + $0x1a0] sm:$0xff] }
 0x5d1   : > { %7036 = vmatpush1.bf16.msra.mxu0 %v7035_v46 }
 0x5d2   : > { %7038 = vmatprep.subr.bf16.mxu0 %v7037_v49 }
 0x5d5   : > { %7040 = vmatpush1.bf16.msra.mxu0 %v7039_v41 }
 0x5d6   : > { %7042 = vmatprep.subr.bf16.mxu0 %v7041_v53  ;;  %v3094_v53 = vld [vmem:[#allocation2 + $0x8] sm:$0xff] }
 0x5d7   : > { %v6957_v58 = vpack.c.bf16 %v3096_v54, %v3094_v53  ;;  %v3129_v54 = vld [vmem:[#allocation2 + $0x120] sm:$0xff] }
 0x5d9   : > { %7044 = vmatpush1.bf16.msra.mxu0 %v7043_v56 }
 0x5da   : > { %7046 = vmatprep.subr.bf16.mxu0 %v7045_v59  ;;  %v8251_v59 = vld [vmem:[%s8638_s25] sm:$0xff] }
 0x5dd   : > { %7048 = vmatpush1.bf16.msra.mxu0 %v7047_v62  ;;  %v3098_v62 = vld [vmem:[#allocation2 + $0x28] sm:$0xff] }
 0x5de   : > { %7050 = vmatprep.subr.bf16.mxu0 %v7049_v2  ;;  %v6959_v2 = vpack.c.bf16 %v3095_v61, %v3093_v60  ;;  %v6961_v3 = vpack.c.bf16 %v3100_v63, %v3098_v62  ;;  %v3133_v60 = vld [vmem:[#allocation2 + $0x140] sm:$0xff]  ;;  %v3135_v61 = vld [vmem:[#allocation2 + $0x150] sm:$0xff]  ;;  %v3138_v62 = vld [vmem:[#allocation2 + $0x168] sm:$0xff] }
 0x5df   : > { %v3140_v63 = vld [vmem:[#allocation2 + $0x178] sm:$0xff] }
 0x5e1   : > { %7052 = vmatpush1.bf16.msra.mxu0 %v7051_v6  ;;  %v3099_v6 = vld [vmem:[#allocation2 + $0x30] sm:$0xff] }
 0x5e2   : > { %7054 = vmatprep.subr.bf16.mxu0 %v7053_v9  ;;  %v6963_v8 = vpack.c.bf16 %v3099_v6, %v3097_v5  ;;  %v3139_v5 = vld [vmem:[#allocation2 + $0x170] sm:$0xff]  ;;  %v3142_v6 = vld [vmem:[#allocation2 + $0x188] sm:$0xff] }
 0x5e5   : > { %7056 = vmatpush1.bf16.msra.mxu0 %v7055_v12  ;;  %v3106_v12 = vld [vmem:[#allocation2 + $0x68] sm:$0xff] }
 0x5e6   : > { %7058 = vmatprep.subr.bf16.mxu0 %v7057_v29  ;;  %v6969_v29 = vpack.c.bf16 %v3108_v13, %v3106_v12  ;;  %v3146_v12 = vld [vmem:[#allocation2 + $0x1a8] sm:$0xff]  ;;  %v3148_v13 = vld [vmem:[#allocation2 + $0x1b8] sm:$0xff] }
 0x5e9   : > { %7060 = vmatpush1.bf16.msra.mxu0 %v7059_v18  ;;  %v3110_v18 = vld [vmem:[#allocation2 + $0x88] sm:$0xff] }
 0x5ea   : > { %7062 = vmatprep.subr.bf16.mxu0 %v7061_v21  ;;  %v6973_v21 = vpack.c.bf16 %v3112_v19, %v3110_v18  ;;  %v3147_v18 = vld [vmem:[#allocation2 + $0x1b0] sm:$0xff] }
 0x5ed   : > { %7064 = vmatpush1.bf16.msra.mxu0 %v7063_v24  ;;  %v3114_v24 = vld [vmem:[#allocation2 + $0xa8] sm:$0xff] }
 0x5ee   : > { %7066 = vmatprep.subr.bf16.mxu0 %v7065_v28  ;;  %v6977_v28 = vpack.c.bf16 %v3116_v25, %v3114_v24  ;;  %v3150_v24 = vld [vmem:[#allocation2 + $0x1c8] sm:$0xff]  ;;  %v3152_v25 = vld [vmem:[#allocation2 + $0x1d8] sm:$0xff] }
 0x5f1   : > { %7068 = vmatpush1.bf16.msra.mxu0 %v7067_v30  ;;  %v3118_v30 = vld [vmem:[#allocation2 + $0xc8] sm:$0xff] }
 0x5f2   : > { %7070 = vmatprep.subr.bf16.mxu0 %v7069_v33  ;;  %v6981_v33 = vpack.c.bf16 %v3120_v31, %v3118_v30  ;;  %v3151_v30 = vld [vmem:[#allocation2 + $0x1d0] sm:$0xff] }
 0x5f5   : > { %7072 = vmatpush1.bf16.msra.mxu0 %v7071_v36  ;;  %v3122_v36 = vld [vmem:[#allocation2 + $0xe8] sm:$0xff] }
 0x6a0   : > { %v2892_v38 = vpop.f32.mrb[4].mxu1 }
 0x6a1   : > { %v2905_v39 = vmul.f32 %v2903_v37, %v2892_v38  ;;  %v2894_v40 = vpop.f32.mrb[5].mxu1  ;;  %v6983_v38 = vpack.c.bf16 %v3119_v35, %v3117_v34  ;;  %v3296_v34 = vld [vmem:[#allocation2 + $0x3d0] sm:$0xff] }
 0x6a2   : > { %v2906_v46 = vmul.f32 %v2903_v37, %v2894_v40  ;;  %v3124_v37 = vld [vmem:[#allocation2 + $0xf8] sm:$0xff]  ;;  %v3121_v40 = vld [vmem:[#allocation2 + $0xe0] sm:$0xff] }
 0x6a3   : > { %v2913_v47 = vadd.f32 %v2911_v45, %v2905_v39  ;;  %v6985_v39 = vpack.c.bf16 %v3124_v37, %v3122_v36  ;;  %v3154_v36 = vld [vmem:[#allocation2 + $0x1e8] sm:$0xff]  ;;  %v3156_v37 = vld [vmem:[#allocation2 + $0x1f8] sm:$0xff] }
 0x6a4   : > { %v2914_v48 = vadd.f32 %v2911_v45, %v2906_v46  ;;  %v3123_v45 = vld [vmem:[#allocation2 + $0xf0] sm:$0xff]  ;;  %v3126_v46 = vld [vmem:[#allocation2 + $0x108] sm:$0xff] }
 0x6a5   : > { %v2916_v49 = vmul.f32 0.70710677, %v2913_v47 }
 0x6a6   : > { %v2917_v50 = vmul.f32 0.70710677, %v2914_v48 }
 0x6a7   : > { %8215 = verf.f32 %v2916_v49 }
 0x6a8   : > { %8217 = verf.f32 %v2917_v50  ;;  %v3125_v50 = vld [vmem:[#allocation2 + $0x100] sm:$0xff] }
 0x6b1   : > { %v8216_v51 = vpop.eup %8215 }
 0x6b2   : > { %v8218_v41 = vpop.eup %8217  ;;  %v2920_v42 = vadd.f32 1.0, %v8216_v51  ;;  %v3127_v51 = vld [vmem:[#allocation2 + $0x110] sm:$0xff] }
 0x6b3   : > { %v2921_v52 = vadd.f32 1.0, %v8218_v41  ;;  %v3130_v41 = vld [vmem:[#allocation2 + $0x128] sm:$0xff] }
 0x6b4   : > { %v2922_v56 = vmul.f32 %v2920_v42, %v2913_v47  ;;  %v3128_v47 = vld [vmem:[#allocation2 + $0x118] sm:$0xff] }
 0x6b5   : > { %v2923_v55 = vmul.f32 %v2921_v52, %v2914_v48  ;;  %v6987_v48 = vpack.c.bf16 %v3123_v45, %v3121_v40  ;;  %v6989_v49 = vpack.c.bf16 %v3128_v47, %v3126_v46  ;;  %v3132_v42 = vld [vmem:[#allocation2 + $0x138] sm:$0xff]  ;;  %v6991_v52 = vpack.c.bf16 %v3127_v51, %v3125_v50  ;;  %v3153_v45 = vld [vmem:[#allocation2 + $0x1e0] sm:$0xff]  ;;  %v3155_v46 = vld [vmem:[#allocation2 + $0x1f0] sm:$0xff] }
 0x6b6   : > { %v6993_v53 = vpack.c.bf16 %v3132_v42, %v3130_v41  ;;  %v3301_v40 = vld [vmem:[#allocation2 + $0x3f8] sm:$0xff]  ;;  %v3300_v50 = vld [vmem:[#allocation2 + $0x3f0] sm:$0xff]  ;;  %v3382_v41 = vld [vmem:[#allocation2 + $0x408] sm:$0xff] }
 0x6b7   : > { %2933 = vmatprep.subr.mxu1 %v2923_v55  ;;  %v3131_v55 = vld [vmem:[#allocation2 + $0x130] sm:$0xff]  ;;  %v3384_v42 = vld [vmem:[#allocation2 + $0x418] sm:$0xff] }
 0x6b8   : > { %2934 = vmatpush1.msra.mxu1 %v2922_v56  ;;  %v3134_v56 = vld [vmem:[#allocation2 + $0x148] sm:$0xff] }
 0x6b9   : > { %6367 = vmatmul.mubr.msk.f32.vlgmr.msra.gmra.mrb[12].mxu1 %vm1252_vm2, %v2915_v57  ;;  %6368 = vmatprep.subr.msk.mxu1 %vm902_vm0, %v8644_v4  ;;  %v3104_v4 = vld [vmem:[#allocation2 + $0x58] sm:$0xff] }
 0x6ba   : > { %6369 = vmatpush1.msk.msra.mxu1 %vm902_vm0, %v8251_v59  ;;  %3072 = vmatprep.mubr.f32.mxu1 %v8360_v0  ;;  %v6965_v9 = vpack.c.bf16 %v3104_v4, %v3102_v7  ;;  %v3136_v57 = vld [vmem:[#allocation2 + $0x158] sm:$0xff] }
 0x6bb   : > { %6958 = vmatprep.subr.bf16.mxu1 %v6957_v58  ;;  %v6995_v58 = vpack.c.bf16 %v3131_v55, %v3129_v54  ;;  %v6997_v59 = vpack.c.bf16 %v3136_v57, %v3134_v56  ;;  %v3144_v7 = vld [vmem:[#allocation2 + $0x198] sm:$0xff]  ;;  %v8362_v56 = vmov 1   ;;  %v2928_v57 = vpop.permute.xlu1 %2927 }
 0x6bc   : > { %v3527_v54 = vld [vmem:[#allocation2 + $0x618] sm:$0xff]  ;;  %8194 = vset.pattern.permute.xlu0 %v8362_v56 }
 0x6bd   : > { %3374 = vperm.xlu0 %8194, %v8715_v15  }
 0x6c1   : > { %6370 = vmatmul.mubr.msk.f32.vlgmr.msra.gmra.mrb[12].mxu1 %vm898_vm1, %v3004_v27  ;;  %v6999_v27 = vpack.c.bf16 %v3135_v61, %v3133_v60 }
 0x6c2   : > { %6960 = vmatpush1.bf16.msra.mxu1 %v6959_v2  ;;  %v7001_v2 = vpack.c.bf16 %v3140_v63, %v3138_v62  ;;  %v3383_v62 = vld [vmem:[#allocation2 + $0x410] sm:$0xff]  ;;  %v3524_v63 = vld [vmem:[#allocation2 + $0x600] sm:$0xff] }
 0x6c3   : > { %6962 = vmatprep.subr.bf16.mxu1 %v6961_v3  ;;  %v3137_v3 = vld [vmem:[#allocation2 + $0x160] sm:$0xff] }
 0x6c4   : > { %v7003_v4 = vpack.c.bf16 %v3139_v5, %v3137_v3  ;;  %v3386_v3 = vld [vmem:[#allocation2 + $0x428] sm:$0xff]  ;;  %v3085_v5 = vpop.permute.xlu0 %3084 }
 0x6c6   : > { %6964 = vmatpush1.bf16.msra.mxu1 %v6963_v8  ;;  %v7005_v8 = vpack.c.bf16 %v3144_v7, %v3142_v6  ;;  %v3388_v6 = vld [vmem:[#allocation2 + $0x438] sm:$0xff]  ;;  %v3529_v7 = vld [vmem:[#allocation2 + $0x628] sm:$0xff] }
 0x6c7   : > { %6966 = vmatprep.subr.bf16.mxu1 %v6965_v9  ;;  %v3141_v9 = vld [vmem:[#allocation2 + $0x180] sm:$0xff] }
 0x6c8   : > { %v7007_v11 = vpack.c.bf16 %v3143_v10, %v3141_v9 }
 0x6ca   : > { %6968 = vmatpush1.bf16.msra.mxu1 %v6967_v14  ;;  %v3291_v14 = vld [vmem:[#allocation2 + $0x3a8] sm:$0xff] }
 0x6cb   : > { %6970 = vmatprep.subr.bf16.mxu1 %v6969_v29  ;;  %v7009_v29 = vpack.c.bf16 %v3148_v13, %v3146_v12  ;;  %v7073_v19 = vpack.c.bf16 %v3293_v16, %v3291_v14  ;;  %v3387_v12 = vld [vmem:[#allocation2 + $0x430] sm:$0xff]  ;;  %v3528_v14 = vld [vmem:[#allocation2 + $0x620] sm:$0xff]  ;;  %v3390_v16 = vld [vmem:[#allocation2 + $0x448] sm:$0xff] }
 0x6cd   : > { %7074 = vmatprep.subr.bf16.mxu0 %v7073_v19  ;;  %v3392_v19 = vld [vmem:[#allocation2 + $0x458] sm:$0xff] }
 0x6ce   : > { %6972 = vmatpush1.bf16.msra.mxu1 %v6971_v20  ;;  %v7011_v20 = vpack.c.bf16 %v3147_v18, %v3145_v17  ;;  %v7089_v17 = vpack.c.bf16 %v3388_v6, %v3386_v3  ;;  %v3546_v6 = vld [vmem:[#allocation2 + $0x6b0] sm:$0xff] }
 0x6cf   : > { %6974 = vmatprep.subr.bf16.mxu1 %v6973_v21  ;;  %v3290_v21 = vld [vmem:[#allocation2 + $0x3a0] sm:$0xff] }
 0x6d0   : > { %v7075_v23 = vpack.c.bf16 %v3292_v22, %v3290_v21  ;;  %v3535_v21 = vld [vmem:[#allocation2 + $0x658] sm:$0xff] }
 0x6d2   : > { %6976 = vmatpush1.bf16.msra.mxu1 %v6975_v26  ;;  %v3295_v26 = vld [vmem:[#allocation2 + $0x3c8] sm:$0xff]  ;;  %7076 = vmatpush1.bf16.msra.mxu0 %v7075_v23 }
 0x6d3   : > { %6978 = vmatprep.subr.bf16.mxu1 %v6977_v28  ;;  %v7013_v28 = vpack.c.bf16 %v3152_v25, %v3150_v24  ;;  %v7077_v31 = vpack.c.bf16 %v3297_v44, %v3295_v26  ;;  %v3389_v24 = vld [vmem:[#allocation2 + $0x440] sm:$0xff]  ;;  %v3391_v25 = vld [vmem:[#allocation2 + $0x450] sm:$0xff]  ;;  %v7093_v26 = vpack.c.bf16 %v3392_v19, %v3390_v16 }
 0x6d4   : > { %v3532_v44 = vld [vmem:[#allocation2 + $0x640] sm:$0xff]  ;;  %v3407_v16 = vld [vmem:[#allocation2 + $0x4d0] sm:$0xff] }
 0x6d5   : > { %7078 = vmatprep.subr.bf16.mxu0 %v7077_v31  ;;  %v3396_v31 = vld [vmem:[#allocation2 + $0x478] sm:$0xff]  ;;  %v3548_v19 = vld [vmem:[#allocation2 + $0x6c0] sm:$0xff] }
 0x6d6   : > { %6980 = vmatpush1.bf16.msra.mxu1 %v6979_v32  ;;  %v7015_v32 = vpack.c.bf16 %v3151_v30, %v3149_v43  ;;  %v3534_v43 = vld [vmem:[#allocation2 + $0x650] sm:$0xff]  ;;  %v3394_v30 = vld [vmem:[#allocation2 + $0x468] sm:$0xff] }
 0x6d7   : > { %6982 = vmatprep.subr.bf16.mxu1 %v6981_v33  ;;  %v3294_v33 = vld [vmem:[#allocation2 + $0x3c0] sm:$0xff] }
 0x6d8   : > { %v7079_v35 = vpack.c.bf16 %v3296_v34, %v3294_v33  ;;  %v3539_v33 = vld [vmem:[#allocation2 + $0x678] sm:$0xff]  ;;  %v7095_v34 = vpack.c.bf16 %v3391_v25, %v3389_v24  ;;  %v8364_v25 = vmov 3  }
 0x6d9   : > { %v3555_v24 = vld [vmem:[#allocation2 + $0x6f8] sm:$0xff] }
 0x6da   : > { %6984 = vmatpush1.bf16.msra.mxu1 %v6983_v38  ;;  %v3299_v38 = vld [vmem:[#allocation2 + $0x3e8] sm:$0xff]  ;;  %7080 = vmatpush1.bf16.msra.mxu0 %v7079_v35  ;;  %v7159_v35 = vpack.c.bf16 %v3534_v43, %v3532_v44  ;;  %v3409_v44 = vld [vmem:[#allocation2 + $0x4e0] sm:$0xff]  ;;  %v3411_v43 = vld [vmem:[#allocation2 + $0x4f0] sm:$0xff] }
 0x6db   : > { %6986 = vmatprep.subr.bf16.mxu1 %v6985_v39  ;;  %v7017_v39 = vpack.c.bf16 %v3156_v37, %v3154_v36  ;;  %v7081_v47 = vpack.c.bf16 %v3301_v40, %v3299_v38  ;;  %v3393_v36 = vld [vmem:[#allocation2 + $0x460] sm:$0xff]  ;;  %v3395_v37 = vld [vmem:[#allocation2 + $0x470] sm:$0xff]  ;;  %v7097_v38 = vpack.c.bf16 %v3396_v31, %v3394_v30 }
 0x6dc   : > { %v3536_v40 = vld [vmem:[#allocation2 + $0x660] sm:$0xff] }
 0x6dd   : > { %7082 = vmatprep.subr.bf16.mxu0 %v7081_v47  ;;  %v3400_v47 = vld [vmem:[#allocation2 + $0x498] sm:$0xff] }
 0x6de   : > { %6988 = vmatpush1.bf16.msra.mxu1 %v6987_v48  ;;  %v7019_v48 = vpack.c.bf16 %v3155_v46, %v3153_v45  ;;  %v3538_v45 = vld [vmem:[#allocation2 + $0x670] sm:$0xff]  ;;  %v3398_v46 = vld [vmem:[#allocation2 + $0x488] sm:$0xff] }
 0x6df   : > { %6990 = vmatprep.subr.bf16.mxu1 %v6989_v49  ;;  %v3298_v49 = vld [vmem:[#allocation2 + $0x3e0] sm:$0xff] }
 0x6e0   : > { %v7083_v51 = vpack.c.bf16 %v3300_v50, %v3298_v49  ;;  %v3543_v49 = vld [vmem:[#allocation2 + $0x698] sm:$0xff]  ;;  %v7099_v50 = vpack.c.bf16 %v3395_v37, %v3393_v36  ;;  %v3557_v36 = vld [vmem:[#allocation2 + $0x708] sm:$0xff] }
 0x6e1   : > { %v3559_v37 = vld [vmem:[#allocation2 + $0x718] sm:$0xff] }
 0x6e2   : > { %6992 = vmatpush1.bf16.msra.mxu1 %v6991_v52  ;;  %v3525_v52 = vld [vmem:[#allocation2 + $0x608] sm:$0xff]  ;;  %7084 = vmatpush1.bf16.msra.mxu0 %v7083_v51  ;;  %v7163_v51 = vpack.c.bf16 %v3538_v45, %v3536_v40  ;;  %v3413_v40 = vld [vmem:[#allocation2 + $0x500] sm:$0xff]  ;;  %v3415_v45 = vld [vmem:[#allocation2 + $0x510] sm:$0xff] }
 0x6e3   : > { %6994 = vmatprep.subr.bf16.mxu1 %v6993_v53  ;;  %v7085_v53 = vpack.c.bf16 %v3384_v42, %v3382_v41  ;;  %v7149_v55 = vpack.c.bf16 %v3527_v54, %v3525_v52  ;;  %v3397_v41 = vld [vmem:[#allocation2 + $0x480] sm:$0xff]  ;;  %v3399_v42 = vld [vmem:[#allocation2 + $0x490] sm:$0xff]  ;;  %v7101_v52 = vpack.c.bf16 %v3400_v47, %v3398_v46  ;;  %v7181_v47 = vpack.c.bf16 %v3559_v37, %v3557_v36  ;;  %v3434_v37 = vld [vmem:[#allocation2 + $0x5a8] sm:$0xff] }
 0x6e4   : > { %v3540_v54 = vld [vmem:[#allocation2 + $0x680] sm:$0xff]  ;;  %v3574_v36 = vld [vmem:[#allocation2 + $0x790] sm:$0xff] }
 0x6e5   : > { %7150 = vmatprep.subr.bf16.mxu0 %v7149_v55  ;;  %v3542_v55 = vld [vmem:[#allocation2 + $0x690] sm:$0xff] }
 0x6e6   : > { %6996 = vmatpush1.bf16.msra.mxu1 %v6995_v58 }
 0x6e7   : > { %6998 = vmatprep.subr.bf16.mxu1 %v6997_v59  ;;  %v3381_v59 = vld [vmem:[#allocation2 + $0x400] sm:$0xff] }
 0x6e8   : > { %v7087_v9 = vpack.c.bf16 %v3383_v62, %v3381_v59  ;;  %v3545_v59 = vld [vmem:[#allocation2 + $0x6a8] sm:$0xff]  ;;  %v7167_v62 = vpack.c.bf16 %v3542_v55, %v3540_v54  ;;  %v3419_v54 = vld [vmem:[#allocation2 + $0x530] sm:$0xff] }
 0x6ea   : > { %7000 = vmatpush1.bf16.msra.mxu1 %v6999_v27  ;;  %v3526_v27 = vld [vmem:[#allocation2 + $0x610] sm:$0xff] }
 0x6eb   : > { %7002 = vmatprep.subr.bf16.mxu1 %v7001_v2  ;;  %v7151_v10 = vpack.c.bf16 %v3526_v27, %v3524_v63  ;;  %v3401_v63 = vld [vmem:[#allocation2 + $0x4a0] sm:$0xff]  ;;  %v3403_v27 = vld [vmem:[#allocation2 + $0x4b0] sm:$0xff] }
 0x6ee   : > { %7004 = vmatpush1.bf16.msra.mxu1 %v7003_v4  ;;  %v3531_v4 = vld [vmem:[#allocation2 + $0x638] sm:$0xff] }
 0x6ef   : > { %7006 = vmatprep.subr.bf16.mxu1 %v7005_v8  ;;  %v7153_v18 = vpack.c.bf16 %v3531_v4, %v3529_v7  ;;  %v3406_v7 = vld [vmem:[#allocation2 + $0x4c8] sm:$0xff]  ;;  %v3408_v4 = vld [vmem:[#allocation2 + $0x4d8] sm:$0xff] }
 0x6f2   : > { %7008 = vmatpush1.bf16.msra.mxu1 %v7007_v11  ;;  %v3385_v11 = vld [vmem:[#allocation2 + $0x420] sm:$0xff] }
 0x6f3   : > { %7010 = vmatprep.subr.bf16.mxu1 %v7009_v29  ;;  %v3530_v29 = vld [vmem:[#allocation2 + $0x630] sm:$0xff]  ;;  %v7091_v22 = vpack.c.bf16 %v3387_v12, %v3385_v11  ;;  %v8363_v11 = vmov 2   ;;  %v7107_v12 = vpack.c.bf16 %v3403_v27, %v3401_v63  ;;  %v3567_v63 = vld [vmem:[#allocation2 + $0x758] sm:$0xff] }
 0x6f4   : > { %v7155_v23 = vpack.c.bf16 %v3530_v29, %v3528_v14  ;;  %8195 = vset.pattern.permute.xlu1 %v8363_v11  ;;  %v3405_v29 = vld [vmem:[#allocation2 + $0x4c0] sm:$0xff] }
 0x6f5   : > { %3517 = vperm.xlu1 %8195, %v8715_v15  }
 0x6f6   : > { %7012 = vmatpush1.bf16.msra.mxu1 %v7011_v20  ;;  %v3533_v20 = vld [vmem:[#allocation2 + $0x648] sm:$0xff] }
 0x6f7   : > { %7014 = vmatprep.subr.bf16.mxu1 %v7013_v28  ;;  %v7157_v28 = vpack.c.bf16 %v3535_v21, %v3533_v20  ;;  %v3550_v20 = vld [vmem:[#allocation2 + $0x6d0] sm:$0xff]  ;;  %v3410_v21 = vld [vmem:[#allocation2 + $0x4e8] sm:$0xff] }
 0x6f9   : > { %8196 = vset.pattern.permute.xlu1 %v8364_v25 }
 0x6fa   : > { %7016 = vmatpush1.bf16.msra.mxu1 %v7015_v32  ;;  %v3537_v32 = vld [vmem:[#allocation2 + $0x668] sm:$0xff]  ;;  %3660 = vperm.xlu1 %8196, %v8715_v15  }
 0x6fb   : > { %7018 = vmatprep.subr.bf16.mxu1 %v7017_v39  ;;  %v7161_v39 = vpack.c.bf16 %v3539_v33, %v3537_v32  ;;  %v3552_v32 = vld [vmem:[#allocation2 + $0x6e0] sm:$0xff]  ;;  %v3554_v33 = vld [vmem:[#allocation2 + $0x6f0] sm:$0xff] }
 0x6fe   : > { %7020 = vmatpush1.bf16.msra.mxu1 %v7019_v48  ;;  %v3541_v48 = vld [vmem:[#allocation2 + $0x688] sm:$0xff] }
 0x6ff   : > { %7086 = vmatprep.subr.bf16.mxu1 %v7085_v53  ;;  %v7165_v53 = vpack.c.bf16 %v3543_v49, %v3541_v48  ;;  %v3556_v48 = vld [vmem:[#allocation2 + $0x700] sm:$0xff]  ;;  %v3558_v49 = vld [vmem:[#allocation2 + $0x710] sm:$0xff] }
 0x700   : > { %v7183_v15 = vpack.c.bf16 %v3558_v49, %v3556_v48  ;;  %v3435_v48 = vld [vmem:[#allocation2 + $0x5b0] sm:$0xff] }
 0x794   : > { %v3074_v58 = vpop.f32.mrb[12].mxu1 }
 0x795   : > { %v8117_v60 = vadd.f32 %v3074_v58, %v2928_v57  ;;  %v3076_v61 = vpop.f32.mrb[13].mxu1  ;;  %v3404_v58 = vld [vmem:[#allocation2 + $0x4b8] sm:$0xff] }
 0x796   : > { %v8118_v2 = vadd.f32 %v3076_v61, %v2928_v57  ;;  %v3402_v57 = vld [vmem:[#allocation2 + $0x4a8] sm:$0xff]  ;;  %v7103_v61 = vpack.c.bf16 %v3399_v42, %v3397_v41  ;;  %v3563_v42 = vld [vmem:[#allocation2 + $0x738] sm:$0xff] }
 0x797   : > { %v8741_v13 = vadd.f32 %v8117_v60, %v3085_v5  ;;  %v3547_v60 = vld [vmem:[#allocation2 + $0x6b8] sm:$0xff]  ;;  %v3561_v41 = vld [vmem:[#allocation2 + $0x728] sm:$0xff] }
 0x798   : > { %v8739_v8 = vadd.f32 %v8118_v2, %v3085_v5  ;;  %v7105_v2 = vpack.c.bf16 %v3404_v58, %v3402_v57  ;;  %v7169_v3 = vpack.c.bf16 %v3547_v60, %v3545_v59  ;;  %v3544_v5 = vld [vmem:[#allocation2 + $0x6a0] sm:$0xff]  ;;  %v7185_v57 = vpack.c.bf16 %v3563_v42, %v3561_v41  ;;  %v3562_v59 = vld [vmem:[#allocation2 + $0x730] sm:$0xff]  ;;  %v3422_v60 = vld [vmem:[#allocation2 + $0x548] sm:$0xff] }
 0x799   : > { %v7171_v14 = vpack.c.bf16 %v3546_v6, %v3544_v5  ;;  %v3560_v58 = vld [vmem:[#allocation2 + $0x720] sm:$0xff]  ;;  %v3423_v5 = vld [vmem:[#allocation2 + $0x550] sm:$0xff]  ;;  %v3438_v42 = vld [vmem:[#allocation2 + $0x5c8] sm:$0xff] }
 0x79a   : > { %3221 = vmatprep.mubr.f32.mxu1 %v8739_v8  ;;  %3366 = vmatprep.mubr.f32.mxu0 %v8739_v8  ;;  %v3578_v41 = vld [vmem:[#allocation2 + $0x7b0] sm:$0xff] }
 0x79b   : > { %3222 = vmatmul.mubr.f32.vlgmr.msra.gmra.mrb[14].mxu1 %v8741_v13  ;;  %3367 = vmatmul.mubr.f32.vlgmr.msra.gmra.mrb[10].mxu0 %v8741_v13 }
 0x79c   : > { %7088 = vmatpush1.bf16.msra.mxu1 %v7087_v9  ;;  %7152 = vmatpush1.bf16.msra.mxu0 %v7151_v10  ;;  %v3549_v9 = vld [vmem:[#allocation2 + $0x6c8] sm:$0xff]  ;;  %v3551_v10 = vld [vmem:[#allocation2 + $0x6d8] sm:$0xff] }
 0x79d   : > { %3509 = vmatprep.mubr.f32.mxu1 %v8739_v8  ;;  %3652 = vmatprep.mubr.f32.mxu0 %v8739_v8 }
 0x79e   : > { %7090 = vmatprep.subr.bf16.mxu1 %v7089_v17  ;;  %7154 = vmatprep.subr.bf16.mxu0 %v7153_v18  ;;  %v7109_v17 = vpack.c.bf16 %v3408_v4, %v3406_v7  ;;  %v7173_v18 = vpack.c.bf16 %v3551_v10, %v3549_v9  ;;  %v3564_v4 = vld [vmem:[#allocation2 + $0x740] sm:$0xff]  ;;  %v3566_v9 = vld [vmem:[#allocation2 + $0x750] sm:$0xff]  ;;  %v3426_v10 = vld [vmem:[#allocation2 + $0x568] sm:$0xff] }
 0x7a0   : > { %7092 = vmatpush1.bf16.msra.mxu1 %v7091_v22  ;;  %7156 = vmatpush1.bf16.msra.mxu0 %v7155_v23  ;;  %v3412_v22 = vld [vmem:[#allocation2 + $0x4f8] sm:$0xff]  ;;  %v3553_v23 = vld [vmem:[#allocation2 + $0x6e8] sm:$0xff] }
 0x7a1   : > { %7094 = vmatprep.subr.bf16.mxu1 %v7093_v26  ;;  %7158 = vmatprep.subr.bf16.mxu0 %v7157_v28  ;;  %v7111_v26 = vpack.c.bf16 %v3407_v16, %v3405_v29  ;;  %v7175_v28 = vpack.c.bf16 %v3550_v20, %v3548_v19  ;;  %v7113_v30 = vpack.c.bf16 %v3412_v22, %v3410_v21  ;;  %v3571_v29 = vld [vmem:[#allocation2 + $0x778] sm:$0xff]  ;;  %v3427_v19 = vld [vmem:[#allocation2 + $0x570] sm:$0xff]  ;;  %v3568_v22 = vld [vmem:[#allocation2 + $0x760] sm:$0xff] }
 0x7a2   : > { %v7177_v31 = vpack.c.bf16 %v3555_v24, %v3553_v23  ;;  %v3570_v23 = vld [vmem:[#allocation2 + $0x770] sm:$0xff]  ;;  %v3430_v24 = vld [vmem:[#allocation2 + $0x588] sm:$0xff] }
 0x7a4   : > { %7096 = vmatpush1.bf16.msra.mxu1 %v7095_v34  ;;  %7160 = vmatpush1.bf16.msra.mxu0 %v7159_v35  ;;  %v3414_v34 = vld [vmem:[#allocation2 + $0x508] sm:$0xff]  ;;  %v3416_v35 = vld [vmem:[#allocation2 + $0x518] sm:$0xff] }
 0x7a5   : > { %7098 = vmatprep.subr.bf16.mxu1 %v7097_v38  ;;  %7162 = vmatprep.subr.bf16.mxu0 %v7161_v39  ;;  %v7115_v38 = vpack.c.bf16 %v3411_v43, %v3409_v44  ;;  %v7179_v39 = vpack.c.bf16 %v3554_v33, %v3552_v32  ;;  %v7117_v46 = vpack.c.bf16 %v3416_v35, %v3414_v34  ;;  %v3575_v44 = vld [vmem:[#allocation2 + $0x798] sm:$0xff]  ;;  %v3431_v32 = vld [vmem:[#allocation2 + $0x590] sm:$0xff]  ;;  %v3572_v35 = vld [vmem:[#allocation2 + $0x780] sm:$0xff] }
 0x7a8   : > { %7100 = vmatpush1.bf16.msra.mxu1 %v7099_v50  ;;  %7164 = vmatpush1.bf16.msra.mxu0 %v7163_v51  ;;  %v3418_v50 = vld [vmem:[#allocation2 + $0x528] sm:$0xff]  ;;  %v3420_v51 = vld [vmem:[#allocation2 + $0x538] sm:$0xff] }
 0x7a9   : > { %7102 = vmatprep.subr.bf16.mxu1 %v7101_v52  ;;  %7166 = vmatprep.subr.bf16.mxu0 %v7165_v53  ;;  %v7119_v52 = vpack.c.bf16 %v3415_v45, %v3413_v40  ;;  %v3417_v53 = vld [vmem:[#allocation2 + $0x520] sm:$0xff]  ;;  %v7121_v55 = vpack.c.bf16 %v3420_v51, %v3418_v50  ;;  %v3579_v40 = vld [vmem:[#allocation2 + $0x7b8] sm:$0xff] }
 0x7aa   : > { %v7123_v27 = vpack.c.bf16 %v3419_v54, %v3417_v53  ;;  %v3576_v51 = vld [vmem:[#allocation2 + $0x7a0] sm:$0xff]  ;;  %v3583_v53 = vld [vmem:[#allocation2 + $0x7d8] sm:$0xff] }
 0x7ac   : > { %7104 = vmatpush1.bf16.msra.mxu1 %v7103_v61  ;;  %7168 = vmatpush1.bf16.msra.mxu0 %v7167_v62  ;;  %v3424_v61 = vld [vmem:[#allocation2 + $0x558] sm:$0xff]  ;;  %v3565_v62 = vld [vmem:[#allocation2 + $0x748] sm:$0xff] }
 0x7ad   : > { %7106 = vmatprep.subr.bf16.mxu1 %v7105_v2  ;;  %7170 = vmatprep.subr.bf16.mxu0 %v7169_v3  ;;  %v7187_v2 = vpack.c.bf16 %v3562_v59, %v3560_v58  ;;  %v3421_v3 = vld [vmem:[#allocation2 + $0x540] sm:$0xff]  ;;  %v7125_v6 = vpack.c.bf16 %v3424_v61, %v3422_v60  ;;  %v7189_v7 = vpack.c.bf16 %v3567_v63, %v3565_v62  ;;  %v3439_v58 = vld [vmem:[#allocation2 + $0x5d0] sm:$0xff]  ;;  %v3442_v63 = vld [vmem:[#allocation2 + $0x5e8] sm:$0xff] }
 0x7ae   : > { %v7127_v16 = vpack.c.bf16 %v3423_v5, %v3421_v3  ;;  %v3580_v61 = vld [vmem:[#allocation2 + $0x7c0] sm:$0xff]  ;;  %v3582_v62 = vld [vmem:[#allocation2 + $0x7d0] sm:$0xff]  ;;  %v3587_v3 = vld [vmem:[#allocation2 + $0x7f8] sm:$0xff] }
 0x7b0   : > { %7108 = vmatpush1.bf16.msra.mxu1 %v7107_v12  ;;  %7172 = vmatpush1.bf16.msra.mxu0 %v7171_v14  ;;  %v3428_v12 = vld [vmem:[#allocation2 + $0x578] sm:$0xff]  ;;  %v3569_v14 = vld [vmem:[#allocation2 + $0x768] sm:$0xff] }
 0x7b1   : > { %7110 = vmatprep.subr.bf16.mxu1 %v7109_v17  ;;  %7174 = vmatprep.subr.bf16.mxu0 %v7173_v18  ;;  %v7191_v17 = vpack.c.bf16 %v3566_v9, %v3564_v4  ;;  %v3425_v18 = vld [vmem:[#allocation2 + $0x560] sm:$0xff]  ;;  %v7129_v20 = vpack.c.bf16 %v3428_v12, %v3426_v10  ;;  %v7193_v21 = vpack.c.bf16 %v3571_v29, %v3569_v14  ;;  %v3443_v4 = vld [vmem:[#allocation2 + $0x5f0] sm:$0xff]  ;;  %v3668_v29 = vld [vmem:[#allocation2 + $0x808] sm:$0xff] }
 0x7b2   : > { %v7131_v43 = vpack.c.bf16 %v3427_v19, %v3425_v18  ;;  %v3584_v12 = vld [vmem:[#allocation2 + $0x7e0] sm:$0xff]  ;;  %v3586_v14 = vld [vmem:[#allocation2 + $0x7f0] sm:$0xff]  ;;  %v3813_v18 = vld [vmem:[#allocation2 + $0xa18] sm:$0xff] }
 0x7b4   : > { %7112 = vmatpush1.bf16.msra.mxu1 %v7111_v26  ;;  %7176 = vmatpush1.bf16.msra.mxu0 %v7175_v28  ;;  %v3432_v26 = vld [vmem:[#allocation2 + $0x598] sm:$0xff]  ;;  %v3573_v28 = vld [vmem:[#allocation2 + $0x788] sm:$0xff] }
 0x7b5   : > { %7114 = vmatprep.subr.bf16.mxu1 %v7113_v30  ;;  %7178 = vmatprep.subr.bf16.mxu0 %v7177_v31  ;;  %v7195_v30 = vpack.c.bf16 %v3570_v23, %v3568_v22  ;;  %v3429_v31 = vld [vmem:[#allocation2 + $0x580] sm:$0xff]  ;;  %v7133_v33 = vpack.c.bf16 %v3432_v26, %v3430_v24  ;;  %v7197_v34 = vpack.c.bf16 %v3575_v44, %v3573_v28  ;;  %v3669_v24 = vld [vmem:[#allocation2 + $0x810] sm:$0xff]  ;;  %v3672_v44 = vld [vmem:[#allocation2 + $0x828] sm:$0xff] }
 0x7b6   : > { %v7135_v45 = vpack.c.bf16 %v3431_v32, %v3429_v31  ;;  %v3667_v23 = vld [vmem:[#allocation2 + $0x800] sm:$0xff]  ;;  %v3812_v28 = vld [vmem:[#allocation2 + $0xa10] sm:$0xff]  ;;  %v3817_v31 = vld [vmem:[#allocation2 + $0xa38] sm:$0xff] }
 0x7b7   : > { %v3810_v26 = vld [vmem:[#allocation2 + $0xa00] sm:$0xff]  ;;  %v7215_v32 = vpack.c.bf16 %v3669_v24, %v3667_v23 }
 0x7b8   : > { %7116 = vmatpush1.bf16.msra.mxu1 %v7115_v38  ;;  %7180 = vmatpush1.bf16.msra.mxu0 %v7179_v39  ;;  %v3436_v38 = vld [vmem:[#allocation2 + $0x5b8] sm:$0xff]  ;;  %v3577_v39 = vld [vmem:[#allocation2 + $0x7a8] sm:$0xff] }
 0x7b9   : > { %7118 = vmatprep.subr.bf16.mxu1 %v7117_v46  ;;  %7182 = vmatprep.subr.bf16.mxu0 %v7181_v47  ;;  %v7199_v46 = vpack.c.bf16 %v3574_v36, %v3572_v35  ;;  %v3433_v47 = vld [vmem:[#allocation2 + $0x5a0] sm:$0xff]  ;;  %v7137_v49 = vpack.c.bf16 %v3436_v38, %v3434_v37  ;;  %v7201_v50 = vpack.c.bf16 %v3579_v40, %v3577_v39  ;;  %v3673_v35 = vld [vmem:[#allocation2 + $0x830] sm:$0xff]  ;;  %v3676_v40 = vld [vmem:[#allocation2 + $0x848] sm:$0xff] }
 0x7ba   : > { %v7139_v54 = vpack.c.bf16 %v3435_v48, %v3433_v47  ;;  %v3814_v36 = vld [vmem:[#allocation2 + $0xa20] sm:$0xff]  ;;  %v3816_v39 = vld [vmem:[#allocation2 + $0xa30] sm:$0xff]  ;;  %v3821_v47 = vld [vmem:[#allocation2 + $0xa58] sm:$0xff] }
 0x7bc   : > { %7120 = vmatpush1.bf16.msra.mxu1 %v7119_v52  ;;  %7184 = vmatpush1.bf16.msra.mxu0 %v7183_v15  ;;  %v3440_v52 = vld [vmem:[#allocation2 + $0x5d8] sm:$0xff]  ;;  %v3581_v15 = vld [vmem:[#allocation2 + $0x7c8] sm:$0xff] }
 0x7bd   : > { %7122 = vmatprep.subr.bf16.mxu1 %v7121_v55  ;;  %7186 = vmatprep.subr.bf16.mxu0 %v7185_v57  ;;  %v7203_v55 = vpack.c.bf16 %v3578_v41, %v3576_v51  ;;  %v3437_v57 = vld [vmem:[#allocation2 + $0x5c0] sm:$0xff]  ;;  %v7141_v59 = vpack.c.bf16 %v3440_v52, %v3438_v42  ;;  %v7205_v60 = vpack.c.bf16 %v3583_v53, %v3581_v15  ;;  %v3677_v41 = vld [vmem:[#allocation2 + $0x850] sm:$0xff]  ;;  %v3680_v53 = vld [vmem:[#allocation2 + $0x868] sm:$0xff] }
 0x7be   : > { %v7143_v5 = vpack.c.bf16 %v3439_v58, %v3437_v57  ;;  %v3675_v51 = vld [vmem:[#allocation2 + $0x840] sm:$0xff]  ;;  %v3820_v15 = vld [vmem:[#allocation2 + $0xa50] sm:$0xff]  ;;  %v3825_v57 = vld [vmem:[#allocation2 + $0xa78] sm:$0xff] }
 0x7bf   : > { %v3818_v42 = vld [vmem:[#allocation2 + $0xa40] sm:$0xff]  ;;  %v7223_v58 = vpack.c.bf16 %v3677_v41, %v3675_v51  ;;  %v3841_v51 = vld [vmem:[#allocation2 + $0xaf8] sm:$0xff]  ;;  %v8366_v41 = vmov 4  }
 0x7c0   : > { %7124 = vmatpush1.bf16.msra.mxu1 %v7123_v27  ;;  %7188 = vmatpush1.bf16.msra.mxu0 %v7187_v2  ;;  %v3444_v27 = vld [vmem:[#allocation2 + $0x5f8] sm:$0xff]  ;;  %v3585_v2 = vld [vmem:[#allocation2 + $0x7e8] sm:$0xff] }
 0x7c1   : > { %7126 = vmatprep.subr.bf16.mxu1 %v7125_v6  ;;  %7190 = vmatprep.subr.bf16.mxu0 %v7189_v7  ;;  %v7207_v6 = vpack.c.bf16 %v3582_v62, %v3580_v61  ;;  %v3441_v7 = vld [vmem:[#allocation2 + $0x5e0] sm:$0xff]  ;;  %v7145_v9 = vpack.c.bf16 %v3444_v27, %v3442_v63  ;;  %v7209_v10 = vpack.c.bf16 %v3587_v3, %v3585_v2  ;;  %v3681_v62 = vld [vmem:[#allocation2 + $0x870] sm:$0xff]  ;;  %v3684_v3 = vld [vmem:[#allocation2 + $0x888] sm:$0xff] }
 0x7c2   : > { %v7147_v19 = vpack.c.bf16 %v3443_v4, %v3441_v7  ;;  %v3679_v61 = vld [vmem:[#allocation2 + $0x860] sm:$0xff]  ;;  %v3824_v2 = vld [vmem:[#allocation2 + $0xa70] sm:$0xff]  ;;  %v3829_v7 = vld [vmem:[#allocation2 + $0xa98] sm:$0xff]  ;;  %8197 = vset.pattern.permute.xlu0 %v8366_v41 }
 0x7c3   : > { %v3822_v63 = vld [vmem:[#allocation2 + $0xa60] sm:$0xff]  ;;  %v7227_v4 = vpack.c.bf16 %v3681_v62, %v3679_v61  ;;  %v3702_v61 = vld [vmem:[#allocation2 + $0x918] sm:$0xff]  ;;  %v3843_v62 = vld [vmem:[#allocation2 + $0xb08] sm:$0xff] }
 0x7c4   : > { %7128 = vmatpush1.bf16.msra.mxu1 %v7127_v16  ;;  %7192 = vmatpush1.bf16.msra.mxu0 %v7191_v17  ;;  %v3670_v16 = vld [vmem:[#allocation2 + $0x818] sm:$0xff]  ;;  %v3811_v17 = vld [vmem:[#allocation2 + $0xa08] sm:$0xff] }
 0x7c5   : > { %7130 = vmatprep.subr.bf16.mxu1 %v7129_v20  ;;  %7194 = vmatprep.subr.bf16.mxu0 %v7193_v21  ;;  %v7211_v20 = vpack.c.bf16 %v3586_v14, %v3584_v12  ;;  %v7213_v21 = vpack.c.bf16 %v3670_v16, %v3668_v29  ;;  %v7277_v22 = vpack.c.bf16 %v3813_v18, %v3811_v17  ;;  %v3683_v12 = vld [vmem:[#allocation2 + $0x880] sm:$0xff]  ;;  %v3685_v14 = vld [vmem:[#allocation2 + $0x890] sm:$0xff]  ;;  %v3688_v18 = vld [vmem:[#allocation2 + $0x8a8] sm:$0xff] }
 0x7c6   : > { %v3826_v29 = vld [vmem:[#allocation2 + $0xa80] sm:$0xff]  ;;  %v3828_v17 = vld [vmem:[#allocation2 + $0xa90] sm:$0xff] }
 0x7c7   : > { %v7295_v23 = vpack.c.bf16 %v3828_v17, %v3826_v29  ;;  %v3849_v29 = vld [vmem:[#allocation2 + $0xb38] sm:$0xff] }
 0x7c8   : > { %7132 = vmatpush1.bf16.msra.mxu1 %v7131_v43  ;;  %7196 = vmatpush1.bf16.msra.mxu0 %v7195_v30  ;;  %v3674_v43 = vld [vmem:[#allocation2 + $0x838] sm:$0xff]  ;;  %v3815_v30 = vld [vmem:[#allocation2 + $0xa28] sm:$0xff] }
 0x7c9   : > { %7134 = vmatprep.subr.bf16.mxu1 %v7133_v33  ;;  %7198 = vmatprep.subr.bf16.mxu0 %v7197_v34  ;;  %v7279_v33 = vpack.c.bf16 %v3812_v28, %v3810_v26  ;;  %v3671_v34 = vld [vmem:[#allocation2 + $0x820] sm:$0xff]  ;;  %v7217_v37 = vpack.c.bf16 %v3674_v43, %v3672_v44  ;;  %v7281_v38 = vpack.c.bf16 %v3817_v31, %v3815_v30  ;;  %v3689_v28 = vld [vmem:[#allocation2 + $0x8b0] sm:$0xff]  ;;  %v3692_v31 = vld [vmem:[#allocation2 + $0x8c8] sm:$0xff] }
 0x7ca   : > { %v7219_v48 = vpack.c.bf16 %v3673_v35, %v3671_v34  ;;  %v3687_v26 = vld [vmem:[#allocation2 + $0x8a0] sm:$0xff]  ;;  %v3832_v30 = vld [vmem:[#allocation2 + $0xab0] sm:$0xff]  ;;  %v3837_v34 = vld [vmem:[#allocation2 + $0xad8] sm:$0xff] }
 0x7cb   : > { %v3830_v44 = vld [vmem:[#allocation2 + $0xaa0] sm:$0xff]  ;;  %v7235_v35 = vpack.c.bf16 %v3689_v28, %v3687_v26  ;;  %v3710_v26 = vld [vmem:[#allocation2 + $0x958] sm:$0xff]  ;;  %v3851_v28 = vld [vmem:[#allocation2 + $0xb48] sm:$0xff] }
 0x7cc   : > { %7136 = vmatpush1.bf16.msra.mxu1 %v7135_v45  ;;  %7200 = vmatpush1.bf16.msra.mxu0 %v7199_v46  ;;  %v3678_v45 = vld [vmem:[#allocation2 + $0x858] sm:$0xff]  ;;  %v3819_v46 = vld [vmem:[#allocation2 + $0xa48] sm:$0xff] }
 0x7cd   : > { %7138 = vmatprep.subr.bf16.mxu1 %v7137_v49  ;;  %7202 = vmatprep.subr.bf16.mxu0 %v7201_v50  ;;  %v7283_v49 = vpack.c.bf16 %v3816_v39, %v3814_v36  ;;  %v7221_v50 = vpack.c.bf16 %v3678_v45, %v3676_v40  ;;  %v7285_v52 = vpack.c.bf16 %v3821_v47, %v3819_v46  ;;  %v3693_v39 = vld [vmem:[#allocation2 + $0x8d0] sm:$0xff]  ;;  %v3834_v40 = vld [vmem:[#allocation2 + $0xac0] sm:$0xff]  ;;  %v3696_v47 = vld [vmem:[#allocation2 + $0x8e8] sm:$0xff] }
 0x7ce   : > { %v7299_v36 = vpack.c.bf16 %v3832_v30, %v3830_v44  ;;  %v3836_v46 = vld [vmem:[#allocation2 + $0xad0] sm:$0xff]  ;;  %v3853_v44 = vld [vmem:[#allocation2 + $0xb58] sm:$0xff] }
 0x7d0   : > { %7140 = vmatpush1.bf16.msra.mxu1 %v7139_v54  ;;  %7204 = vmatpush1.bf16.msra.mxu0 %v7203_v55  ;;  %v3682_v54 = vld [vmem:[#allocation2 + $0x878] sm:$0xff]  ;;  %v3823_v55 = vld [vmem:[#allocation2 + $0xa68] sm:$0xff] }
 0x7d1   : > { %7142 = vmatprep.subr.bf16.mxu1 %v7141_v59  ;;  %7206 = vmatprep.subr.bf16.mxu0 %v7205_v60  ;;  %v7287_v59 = vpack.c.bf16 %v3820_v15, %v3818_v42  ;;  %v7225_v60 = vpack.c.bf16 %v3682_v54, %v3680_v53  ;;  %v7289_v27 = vpack.c.bf16 %v3825_v57, %v3823_v55  ;;  %v8762_v42 = vld [vmem:[%s9090_s1] sm:$0xff]  ;;  %v3697_v55 = vld [vmem:[#allocation2 + $0x8f0] sm:$0xff] }
 0x7d2   : > { %3803 = vperm.xlu0 %8197, %v8762_v42   ;;  %v7303_v15 = vpack.c.bf16 %v3836_v46, %v3834_v40  ;;  %v3695_v54 = vld [vmem:[#allocation2 + $0x8e0] sm:$0xff]  ;;  %v3857_v40 = vld [vmem:[#allocation2 + $0xb78] sm:$0xff] }
 0x7d3   : > { %v3838_v57 = vld [vmem:[#allocation2 + $0xae0] sm:$0xff] }
 0x7d4   : > { %7144 = vmatpush1.bf16.msra.mxu1 %v7143_v5  ;;  %7208 = vmatpush1.bf16.msra.mxu0 %v7207_v6  ;;  %v3686_v5 = vld [vmem:[#allocation2 + $0x898] sm:$0xff]  ;;  %v3827_v6 = vld [vmem:[#allocation2 + $0xa88] sm:$0xff] }
 0x7d5   : > { %7146 = vmatprep.subr.bf16.mxu1 %v7145_v9  ;;  %7210 = vmatprep.subr.bf16.mxu0 %v7209_v10  ;;  %v7291_v9 = vpack.c.bf16 %v3824_v2, %v3822_v63  ;;  %v7229_v10 = vpack.c.bf16 %v3686_v5, %v3684_v3  ;;  %v7293_v16 = vpack.c.bf16 %v3829_v7, %v3827_v6  ;;  %v3845_v63 = vld [vmem:[#allocation2 + $0xb18] sm:$0xff]  ;;  %v3699_v5 = vld [vmem:[#allocation2 + $0x900] sm:$0xff]  ;;  %v3701_v6 = vld [vmem:[#allocation2 + $0x910] sm:$0xff] }
 0x7d6   : > { %v3842_v7 = vld [vmem:[#allocation2 + $0xb00] sm:$0xff] }
 0x7d8   : > { %7148 = vmatpush1.bf16.msra.mxu1 %v7147_v19  ;;  %7212 = vmatpush1.bf16.msra.mxu0 %v7211_v20  ;;  %v3690_v19 = vld [vmem:[#allocation2 + $0x8b8] sm:$0xff]  ;;  %v3831_v20 = vld [vmem:[#allocation2 + $0xaa8] sm:$0xff] }
 0x7d9   : > { %7214 = vmatprep.subr.bf16.mxu1 %v7213_v21  ;;  %7278 = vmatprep.subr.bf16.mxu0 %v7277_v22  ;;  %v3833_v21 = vld [vmem:[#allocation2 + $0xab8] sm:$0xff]  ;;  %v7231_v22 = vpack.c.bf16 %v3685_v14, %v3683_v12  ;;  %v7233_v24 = vpack.c.bf16 %v3690_v19, %v3688_v18  ;;  %v3847_v14 = vld [vmem:[#allocation2 + $0xb28] sm:$0xff]  ;;  %v3703_v19 = vld [vmem:[#allocation2 + $0x920] sm:$0xff] }
 0x7da   : > { %v7297_v43 = vpack.c.bf16 %v3833_v21, %v3831_v20  ;;  %v3706_v12 = vld [vmem:[#allocation2 + $0x938] sm:$0xff]  ;;  %v3705_v20 = vld [vmem:[#allocation2 + $0x930] sm:$0xff]  ;;  %v3846_v21 = vld [vmem:[#allocation2 + $0xb20] sm:$0xff] }
 0x7db   : > { %3510 = vmatmul.mubr.f32.vlgmr.msra.gmra.mrb[16].mxu1 %v8741_v13  ;;  %3653 = vmatmul.mubr.f32.vlgmr.msra.gmra.mrb[12].mxu0 %v8741_v13 }
 0x7dc   : > { %7216 = vmatpush1.bf16.msra.mxu1 %v7215_v32  ;;  %3795 = vmatprep.mubr.f32.mxu1 %v8739_v8  ;;  %v3694_v32 = vld [vmem:[#allocation2 + $0x8d8] sm:$0xff] }
 0x7dd   : > { %7280 = vmatpush1.bf16.msra.mxu0 %v7279_v33  ;;  %3938 = vmatprep.mubr.f32.mxu0 %v8739_v8  ;;  %v3835_v33 = vld [vmem:[#allocation2 + $0xac8] sm:$0xff] }
 0x7de   : > { %7218 = vmatprep.subr.bf16.mxu1 %v7217_v37  ;;  %7282 = vmatprep.subr.bf16.mxu0 %v7281_v38  ;;  %v7237_v37 = vpack.c.bf16 %v3694_v32, %v3692_v31  ;;  %v3691_v38 = vld [vmem:[#allocation2 + $0x8c0] sm:$0xff]  ;;  %v7301_v45 = vpack.c.bf16 %v3837_v34, %v3835_v33  ;;  %v3709_v33 = vld [vmem:[#allocation2 + $0x950] sm:$0xff] }
 0x7df   : > { %v3707_v32 = vld [vmem:[#allocation2 + $0x940] sm:$0xff] }
 0x7e0   : > { %7220 = vmatpush1.bf16.msra.mxu1 %v7219_v48  ;;  %v3698_v48 = vld [vmem:[#allocation2 + $0x8f8] sm:$0xff]  ;;  %v3850_v34 = vld [vmem:[#allocation2 + $0xb40] sm:$0xff] }
 0x7e1   : > { %7284 = vmatpush1.bf16.msra.mxu0 %v7283_v49  ;;  %7222 = vmatprep.subr.bf16.mxu1 %v7221_v50  ;;  %v8365_v49 = vmov 5   ;;  %v3839_v50 = vld [vmem:[#allocation2 + $0xae8] sm:$0xff]  ;;  %v7241_v53 = vpack.c.bf16 %v3698_v48, %v3696_v47  ;;  %v3711_v48 = vld [vmem:[#allocation2 + $0x960] sm:$0xff] }
 0x7e2   : > { %7286 = vmatprep.subr.bf16.mxu0 %v7285_v52  ;;  %8198 = vset.pattern.permute.xlu1 %v8365_v49  ;;  %v7239_v52 = vpack.c.bf16 %v3693_v39, %v3691_v38  ;;  %v3714_v38 = vld [vmem:[#allocation2 + $0x978] sm:$0xff]  ;;  %v3855_v39 = vld [vmem:[#allocation2 + $0xb68] sm:$0xff] }
 0x7e3   : > { %3946 = vperm.xlu1 %8198, %v8762_v42  }
 0x7e4   : > { %7224 = vmatpush1.bf16.msra.mxu1 %v7223_v58  ;;  %v7305_v58 = vpack.c.bf16 %v3841_v51, %v3839_v50  ;;  %v3713_v50 = vld [vmem:[#allocation2 + $0x970] sm:$0xff]  ;;  %v3854_v51 = vld [vmem:[#allocation2 + $0xb60] sm:$0xff] }
 0x7e5   : > { %7288 = vmatpush1.bf16.msra.mxu0 %v7287_v59  ;;  %7226 = vmatprep.subr.bf16.mxu1 %v7225_v60  ;;  %v3840_v59 = vld [vmem:[#allocation2 + $0xaf0] sm:$0xff]  ;;  %v3700_v60 = vld [vmem:[#allocation2 + $0x908] sm:$0xff] }
 0x7e6   : > { %7290 = vmatprep.subr.bf16.mxu0 %v7289_v27  ;;  %v7243_v27 = vpack.c.bf16 %v3697_v55, %v3695_v54  ;;  %v7307_v2 = vpack.c.bf16 %v3840_v59, %v3838_v57  ;;  %v7245_v3 = vpack.c.bf16 %v3702_v61, %v3700_v60  ;;  %v3718_v54 = vld [vmem:[#allocation2 + $0x998] sm:$0xff]  ;;  %v3859_v55 = vld [vmem:[#allocation2 + $0xb88] sm:$0xff]  ;;  %v3715_v61 = vld [vmem:[#allocation2 + $0x980] sm:$0xff] }
 0x7e7   : > { %v3861_v57 = vld [vmem:[#allocation2 + $0xb98] sm:$0xff] }
 0x7e8   : > { %7228 = vmatpush1.bf16.msra.mxu1 %v7227_v4  ;;  %v7309_v4 = vpack.c.bf16 %v3845_v63, %v3843_v62  ;;  %v3717_v62 = vld [vmem:[#allocation2 + $0x990] sm:$0xff]  ;;  %v3858_v63 = vld [vmem:[#allocation2 + $0xb80] sm:$0xff] }
 0x7e9   : > { %7292 = vmatpush1.bf16.msra.mxu0 %v7291_v9  ;;  %7230 = vmatprep.subr.bf16.mxu1 %v7229_v10  ;;  %v3844_v9 = vld [vmem:[#allocation2 + $0xb10] sm:$0xff]  ;;  %v3704_v10 = vld [vmem:[#allocation2 + $0x928] sm:$0xff] }
 0x7ea   : > { %7294 = vmatprep.subr.bf16.mxu0 %v7293_v16  ;;  %v7247_v16 = vpack.c.bf16 %v3701_v6, %v3699_v5  ;;  %v7311_v17 = vpack.c.bf16 %v3844_v9, %v3842_v7  ;;  %v7249_v18 = vpack.c.bf16 %v3706_v12, %v3704_v10  ;;  %v3722_v5 = vld [vmem:[#allocation2 + $0x9b8] sm:$0xff]  ;;  %v3863_v6 = vld [vmem:[#allocation2 + $0xba8] sm:$0xff]  ;;  %v3719_v12 = vld [vmem:[#allocation2 + $0x9a0] sm:$0xff] }
 0x7eb   : > { %v3865_v7 = vld [vmem:[#allocation2 + $0xbb8] sm:$0xff] }
 0x7ec   : > { %7232 = vmatpush1.bf16.msra.mxu1 %v7231_v22  ;;  %v7313_v22 = vpack.c.bf16 %v3849_v29, %v3847_v14  ;;  %v3721_v14 = vld [vmem:[#allocation2 + $0x9b0] sm:$0xff]  ;;  %v3862_v29 = vld [vmem:[#allocation2 + $0xba0] sm:$0xff] }
 0x7ed   : > { %7296 = vmatpush1.bf16.msra.mxu0 %v7295_v23  ;;  %7234 = vmatprep.subr.bf16.mxu1 %v7233_v24  ;;  %v3848_v23 = vld [vmem:[#allocation2 + $0xb30] sm:$0xff]  ;;  %v3708_v24 = vld [vmem:[#allocation2 + $0x948] sm:$0xff] }
 0x7ee   : > { %7298 = vmatprep.subr.bf16.mxu0 %v7297_v43  ;;  %v7251_v43 = vpack.c.bf16 %v3705_v20, %v3703_v19  ;;  %v7315_v30 = vpack.c.bf16 %v3848_v23, %v3846_v21  ;;  %v7253_v31 = vpack.c.bf16 %v3710_v26, %v3708_v24  ;;  %v3726_v19 = vld [vmem:[#allocation2 + $0x9d8] sm:$0xff]  ;;  %v3867_v20 = vld [vmem:[#allocation2 + $0xbc8] sm:$0xff]  ;;  %v3723_v26 = vld [vmem:[#allocation2 + $0x9c0] sm:$0xff] }
 0x7ef   : > { %v3869_v21 = vld [vmem:[#allocation2 + $0xbd8] sm:$0xff] }
 0x7f0   : > { %7236 = vmatpush1.bf16.msra.mxu1 %v7235_v35  ;;  %v7317_v35 = vpack.c.bf16 %v3853_v44, %v3851_v28  ;;  %v3725_v28 = vld [vmem:[#allocation2 + $0x9d0] sm:$0xff]  ;;  %v3866_v44 = vld [vmem:[#allocation2 + $0xbc0] sm:$0xff] }
 0x7f1   : > { %7300 = vmatpush1.bf16.msra.mxu0 %v7299_v36  ;;  %7238 = vmatprep.subr.bf16.mxu1 %v7237_v37  ;;  %v3852_v36 = vld [vmem:[#allocation2 + $0xb50] sm:$0xff]  ;;  %v3712_v37 = vld [vmem:[#allocation2 + $0x968] sm:$0xff] }
 0x7f2   : > { %7302 = vmatprep.subr.bf16.mxu0 %v7301_v45  ;;  %v7255_v45 = vpack.c.bf16 %v3709_v33, %v3707_v32  ;;  %v7319_v46 = vpack.c.bf16 %v3852_v36, %v3850_v34  ;;  %v7257_v47 = vpack.c.bf16 %v3714_v38, %v3712_v37  ;;  %v3730_v32 = vld [vmem:[#allocation2 + $0x9f8] sm:$0xff]  ;;  %v3871_v33 = vld [vmem:[#allocation2 + $0xbe8] sm:$0xff]  ;;  %v3727_v38 = vld [vmem:[#allocation2 + $0x9e0] sm:$0xff] }
 0x7f3   : > { %v3873_v34 = vld [vmem:[#allocation2 + $0xbf8] sm:$0xff] }
 0x7f4   : > { %7240 = vmatpush1.bf16.msra.mxu1 %v7239_v52  ;;  %v7321_v52 = vpack.c.bf16 %v3857_v40, %v3855_v39  ;;  %v3729_v39 = vld [vmem:[#allocation2 + $0x9f0] sm:$0xff]  ;;  %v3870_v40 = vld [vmem:[#allocation2 + $0xbe0] sm:$0xff] }
 0x7f5   : > { %7304 = vmatpush1.bf16.msra.mxu0 %v7303_v15  ;;  %7242 = vmatprep.subr.bf16.mxu1 %v7241_v53  ;;  %v3856_v15 = vld [vmem:[#allocation2 + $0xb70] sm:$0xff]  ;;  %v3716_v53 = vld [vmem:[#allocation2 + $0x988] sm:$0xff] }
 0x7f6   : > { %7306 = vmatprep.subr.bf16.mxu0 %v7305_v58  ;;  %v7259_v58 = vpack.c.bf16 %v3713_v50, %v3711_v48  ;;  %v7323_v59 = vpack.c.bf16 %v3856_v15, %v3854_v51  ;;  %v7261_v60 = vpack.c.bf16 %v3718_v54, %v3716_v53  ;;  %v3956_v48 = vld [vmem:[#allocation2 + $0xc18] sm:$0xff]  ;;  %v4097_v50 = vld [vmem:[#allocation2 + $0xe08] sm:$0xff]  ;;  %v3953_v54 = vld [vmem:[#allocation2 + $0xc00] sm:$0xff] }
 0x7f7   : > { %v4099_v51 = vld [vmem:[#allocation2 + $0xe18] sm:$0xff] }
 0x7f8   : > { %7244 = vmatpush1.bf16.msra.mxu1 %v7243_v27  ;;  %v7325_v27 = vpack.c.bf16 %v3861_v57, %v3859_v55  ;;  %v3955_v55 = vld [vmem:[#allocation2 + $0xc10] sm:$0xff]  ;;  %v7405_v57 = vpack.c.bf16 %v4099_v51, %v4097_v50  ;;  %v3969_v51 = vld [vmem:[#allocation2 + $0xc80] sm:$0xff] }
 0x7f9   : > { %7308 = vmatpush1.bf16.msra.mxu0 %v7307_v2  ;;  %7246 = vmatprep.subr.bf16.mxu1 %v7245_v3  ;;  %v3860_v2 = vld [vmem:[#allocation2 + $0xb90] sm:$0xff]  ;;  %v3720_v3 = vld [vmem:[#allocation2 + $0x9a8] sm:$0xff] }
 0x7fa   : > { %7310 = vmatprep.subr.bf16.mxu0 %v7309_v4  ;;  %v7263_v4 = vpack.c.bf16 %v3717_v62, %v3715_v61  ;;  %v7327_v9 = vpack.c.bf16 %v3860_v2, %v3858_v63  ;;  %v7265_v10 = vpack.c.bf16 %v3722_v5, %v3720_v3  ;;  %v3960_v61 = vld [vmem:[#allocation2 + $0xc38] sm:$0xff]  ;;  %v7343_v62 = vpack.c.bf16 %v3955_v55, %v3953_v54  ;;  %v4101_v63 = vld [vmem:[#allocation2 + $0xe28] sm:$0xff]  ;;  %v3957_v3 = vld [vmem:[#allocation2 + $0xc20] sm:$0xff] }
 0x7fb   : > { %v3959_v5 = vld [vmem:[#allocation2 + $0xc30] sm:$0xff]  ;;  %v3974_v55 = vld [vmem:[#allocation2 + $0xca8] sm:$0xff] }
 0x7fc   : > { %7248 = vmatpush1.bf16.msra.mxu1 %v7247_v16  ;;  %v7329_v16 = vpack.c.bf16 %v3865_v7, %v3863_v6  ;;  %v4100_v6 = vld [vmem:[#allocation2 + $0xe20] sm:$0xff]  ;;  %v4114_v54 = vld [vmem:[#allocation2 + $0xe90] sm:$0xff] }
 0x7fd   : > { %7312 = vmatpush1.bf16.msra.mxu0 %v7311_v17  ;;  %7250 = vmatprep.subr.bf16.mxu1 %v7249_v18  ;;  %v3864_v17 = vld [vmem:[#allocation2 + $0xbb0] sm:$0xff]  ;;  %v3724_v18 = vld [vmem:[#allocation2 + $0x9c8] sm:$0xff] }
 0x7fe   : > { %7314 = vmatprep.subr.bf16.mxu0 %v7313_v22  ;;  %v7267_v22 = vpack.c.bf16 %v3721_v14, %v3719_v12  ;;  %v7331_v23 = vpack.c.bf16 %v3864_v17, %v3862_v29  ;;  %v7269_v24 = vpack.c.bf16 %v3726_v19, %v3724_v18  ;;  %v4105_v14 = vld [vmem:[#allocation2 + $0xe48] sm:$0xff]  ;;  %v4107_v29 = vld [vmem:[#allocation2 + $0xe58] sm:$0xff]  ;;  %v3961_v19 = vld [vmem:[#allocation2 + $0xc40] sm:$0xff] }
 0x800   : > { %7252 = vmatpush1.bf16.msra.mxu1 %v7251_v43  ;;  %v7333_v43 = vpack.c.bf16 %v3869_v21, %v3867_v20  ;;  %v3963_v20 = vld [vmem:[#allocation2 + $0xc50] sm:$0xff]  ;;  %v4104_v21 = vld [vmem:[#allocation2 + $0xe40] sm:$0xff] }
 0x801   : > { %7316 = vmatpush1.bf16.msra.mxu0 %v7315_v30  ;;  %7254 = vmatprep.subr.bf16.mxu1 %v7253_v31  ;;  %v3868_v30 = vld [vmem:[#allocation2 + $0xbd0] sm:$0xff]  ;;  %v3728_v31 = vld [vmem:[#allocation2 + $0x9e8] sm:$0xff] }
 0x802   : > { %7318 = vmatprep.subr.bf16.mxu0 %v7317_v35  ;;  %v7271_v35 = vpack.c.bf16 %v3725_v28, %v3723_v26  ;;  %v7335_v36 = vpack.c.bf16 %v3868_v30, %v3866_v44  ;;  %v7273_v37 = vpack.c.bf16 %v3730_v32, %v3728_v31  ;;  %v3968_v26 = vld [vmem:[#allocation2 + $0xc78] sm:$0xff]  ;;  %v4109_v28 = vld [vmem:[#allocation2 + $0xe68] sm:$0xff]  ;;  %v7351_v30 = vpack.c.bf16 %v3963_v20, %v3961_v19  ;;  %v4122_v19 = vld [vmem:[#allocation2 + $0xed0] sm:$0xff] }
 0x803   : > { %v4111_v44 = vld [vmem:[#allocation2 + $0xe78] sm:$0xff]  ;;  %v8368_v31 = vmov 7   ;;  %v3982_v20 = vld [vmem:[#allocation2 + $0xce8] sm:$0xff] }
 0x804   : > { %7256 = vmatpush1.bf16.msra.mxu1 %v7255_v45  ;;  %v7337_v45 = vpack.c.bf16 %v3873_v34, %v3871_v33  ;;  %8200 = vset.pattern.permute.xlu0 %v8368_v31  ;;  %v3965_v34 = vld [vmem:[#allocation2 + $0xc60] sm:$0xff] }
 0x805   : > { %7320 = vmatpush1.bf16.msra.mxu0 %v7319_v46  ;;  %7258 = vmatprep.subr.bf16.mxu1 %v7257_v47  ;;  %v3872_v46 = vld [vmem:[#allocation2 + $0xbf0] sm:$0xff]  ;;  %v3954_v47 = vld [vmem:[#allocation2 + $0xc08] sm:$0xff] }
 0x806   : > { %7322 = vmatprep.subr.bf16.mxu0 %v7321_v52  ;;  %v7275_v52 = vpack.c.bf16 %v3729_v39, %v3727_v38  ;;  %v7339_v15 = vpack.c.bf16 %v3872_v46, %v3870_v40  ;;  %v7341_v53 = vpack.c.bf16 %v3956_v48, %v3954_v47  ;;  %v4110_v38 = vld [vmem:[#allocation2 + $0xe70] sm:$0xff]  ;;  %v3970_v39 = vld [vmem:[#allocation2 + $0xc88] sm:$0xff]  ;;  %v3972_v40 = vld [vmem:[#allocation2 + $0xc98] sm:$0xff]  ;;  %4232 = vperm.xlu0 %8200, %v8762_v42  }
 0x807   : > { %v4115_v46 = vld [vmem:[#allocation2 + $0xe98] sm:$0xff]  ;;  %v7357_v50 = vpack.c.bf16 %v3972_v40, %v3970_v39 }
 0x808   : > { %7260 = vmatpush1.bf16.msra.mxu1 %v7259_v58  ;;  %v4096_v58 = vld [vmem:[#allocation2 + $0xe00] sm:$0xff] }
 0x809   : > { %7324 = vmatpush1.bf16.msra.mxu0 %v7323_v59  ;;  %7262 = vmatprep.subr.bf16.mxu1 %v7261_v60  ;;  %v4098_v59 = vld [vmem:[#allocation2 + $0xe10] sm:$0xff]  ;;  %v3958_v60 = vld [vmem:[#allocation2 + $0xc28] sm:$0xff] }
 0x80a   : > { %7326 = vmatprep.subr.bf16.mxu0 %v7325_v27  ;;  %v4103_v27 = vld [vmem:[#allocation2 + $0xe38] sm:$0xff]  ;;  %v7407_v2 = vpack.c.bf16 %v4098_v59, %v4096_v58  ;;  %v7345_v7 = vpack.c.bf16 %v3960_v61, %v3958_v60  ;;  %v4117_v58 = vld [vmem:[#allocation2 + $0xea8] sm:$0xff]  ;;  %8203 = vset.pattern.permute.xlu0 %v8361_v1 }
 0x80b   : > { %v7409_v12 = vpack.c.bf16 %v4103_v27, %v4101_v63  ;;  %v4119_v59 = vld [vmem:[#allocation2 + $0xeb8] sm:$0xff]  ;;  %v3973_v63 = vld [vmem:[#allocation2 + $0xca0] sm:$0xff]  ;;  %v3975_v27 = vld [vmem:[#allocation2 + $0xcb0] sm:$0xff] }
 0x80c   : > { %7264 = vmatpush1.bf16.msra.mxu1 %v7263_v4  ;;  %v4102_v4 = vld [vmem:[#allocation2 + $0xe30] sm:$0xff] }
 0x80d   : > { %7328 = vmatpush1.bf16.msra.mxu0 %v7327_v9  ;;  %7266 = vmatprep.subr.bf16.mxu1 %v7265_v10  ;;  %v3962_v9 = vld [vmem:[#allocation2 + $0xc48] sm:$0xff]  ;;  %v3964_v10 = vld [vmem:[#allocation2 + $0xc58] sm:$0xff]  ;;  %v7411_v17 = vpack.c.bf16 %v4102_v4, %v4100_v6 }
 0x80e   : > { %7330 = vmatprep.subr.bf16.mxu0 %v7329_v16  ;;  %v7347_v16 = vpack.c.bf16 %v3959_v5, %v3957_v3  ;;  %v7349_v18 = vpack.c.bf16 %v3964_v10, %v3962_v9  ;;  %v7425_v3 = vpack.c.bf16 %v4119_v59, %v4117_v58  ;;  %v4118_v5 = vld [vmem:[#allocation2 + $0xeb0] sm:$0xff]  ;;  %v3978_v6 = vld [vmem:[#allocation2 + $0xcc8] sm:$0xff]  ;;  %v4123_v9 = vld [vmem:[#allocation2 + $0xed8] sm:$0xff]  ;;  %v7363_v10 = vpack.c.bf16 %v3975_v27, %v3973_v63 }
 0x80f   : > { %v4121_v4 = vld [vmem:[#allocation2 + $0xec8] sm:$0xff]  ;;  %v3989_v58 = vld [vmem:[#allocation2 + $0xd20] sm:$0xff] }
 0x810   : > { %7268 = vmatpush1.bf16.msra.mxu1 %v7267_v22  ;;  %v7413_v22 = vpack.c.bf16 %v4107_v29, %v4105_v14  ;;  %v3977_v29 = vld [vmem:[#allocation2 + $0xcc0] sm:$0xff] }
 0x811   : > { %7332 = vmatpush1.bf16.msra.mxu0 %v7331_v23  ;;  %7270 = vmatprep.subr.bf16.mxu1 %v7269_v24  ;;  %v4106_v23 = vld [vmem:[#allocation2 + $0xe50] sm:$0xff]  ;;  %v3966_v24 = vld [vmem:[#allocation2 + $0xc68] sm:$0xff]  ;;  %v4382_v63 = vld [vmem:[%s9093_s29] sm:$0xff] }
 0x812   : > { %7334 = vmatprep.subr.bf16.mxu0 %v7333_v43  ;;  %v8367_v43 = vmov 6   ;;  %v7415_v32 = vpack.c.bf16 %v4106_v23, %v4104_v21  ;;  %v7353_v33 = vpack.c.bf16 %v3968_v26, %v3966_v24  ;;  %v3984_v21 = vld [vmem:[#allocation2 + $0xcf8] sm:$0xff] }
 0x813   : > { %8199 = vset.pattern.permute.xlu1 %v8367_v43  ;;  %v4127_v23 = vld [vmem:[#allocation2 + $0xef8] sm:$0xff] }
 0x814   : > { %7272 = vmatpush1.bf16.msra.mxu1 %v7271_v35  ;;  %v3967_v35 = vld [vmem:[#allocation2 + $0xc70] sm:$0xff]  ;;  %4089 = vperm.xlu1 %8199, %v8762_v42  }
 0x815   : > { %7336 = vmatpush1.bf16.msra.mxu0 %v7335_v36  ;;  %7274 = vmatprep.subr.bf16.mxu1 %v7273_v37  ;;  %v4108_v36 = vld [vmem:[#allocation2 + $0xe60] sm:$0xff]  ;;  %v7417_v37 = vpack.c.bf16 %v4111_v44, %v4109_v28  ;;  %v7355_v47 = vpack.c.bf16 %v3967_v35, %v3965_v34  ;;  %v7369_v28 = vpack.c.bf16 %v3984_v21, %v3982_v20  ;;  %v4126_v34 = vld [vmem:[#allocation2 + $0xef0] sm:$0xff]  ;;  %v3986_v35 = vld [vmem:[#allocation2 + $0xd08] sm:$0xff] }
 0x816   : > { %7338 = vmatprep.subr.bf16.mxu0 %v7337_v45  ;;  %v4113_v45 = vld [vmem:[#allocation2 + $0xe88] sm:$0xff]  ;;  %v7419_v48 = vpack.c.bf16 %v4110_v38, %v4108_v36  ;;  %v3981_v44 = vld [vmem:[#allocation2 + $0xce0] sm:$0xff]  ;;  %v3988_v36 = vld [vmem:[#allocation2 + $0xd18] sm:$0xff] }
 0x817   : > { %v4131_v38 = vld [vmem:[#allocation2 + $0xf18] sm:$0xff]  ;;  %v4141_v20 = vld [vmem:[#allocation2 + $0xf68] sm:$0xff] }
 0x818   : > { %7276 = vmatpush1.bf16.msra.mxu1 %v7275_v52  ;;  %v3971_v52 = vld [vmem:[#allocation2 + $0xc90] sm:$0xff]  ;;  %v4143_v21 = vld [vmem:[#allocation2 + $0xf78] sm:$0xff] }
 0x819   : > { %7340 = vmatpush1.bf16.msra.mxu0 %v7339_v15  ;;  %7342 = vmatprep.subr.bf16.mxu1 %v7341_v53  ;;  %v4112_v15 = vld [vmem:[#allocation2 + $0xe80] sm:$0xff]  ;;  %v7421_v53 = vpack.c.bf16 %v4115_v46, %v4113_v45  ;;  %v7359_v60 = vpack.c.bf16 %v3971_v52, %v3969_v51  ;;  %v7373_v45 = vpack.c.bf16 %v3988_v36, %v3986_v35  ;;  %v4130_v51 = vld [vmem:[#allocation2 + $0xf10] sm:$0xff]  ;;  %v3990_v52 = vld [vmem:[#allocation2 + $0xd28] sm:$0xff] }
 0x81a   : > { %7406 = vmatprep.subr.bf16.mxu0 %v7405_v57  ;;  %v3976_v57 = vld [vmem:[#allocation2 + $0xcb8] sm:$0xff]  ;;  %v7423_v61 = vpack.c.bf16 %v4114_v54, %v4112_v15  ;;  %v3985_v46 = vld [vmem:[#allocation2 + $0xd00] sm:$0xff]  ;;  %v4133_v54 = vld [vmem:[#allocation2 + $0xf28] sm:$0xff] }
 0x81b   : > { %3796 = vmatmul.mubr.f32.vlgmr.msra.gmra.mrb[18].mxu1 %v8741_v13  ;;  %v3992_v15 = vld [vmem:[#allocation2 + $0xd38] sm:$0xff]  ;;  %v4145_v36 = vld [vmem:[#allocation2 + $0xf88] sm:$0xff] }
 0x81c   : > { %3939 = vmatmul.mubr.f32.vlgmr.msra.gmra.mrb[14].mxu0 %v8741_v13  ;;  %7344 = vmatpush1.bf16.msra.mxu1 %v7343_v62  ;;  %v7361_v62 = vpack.c.bf16 %v3976_v57, %v3974_v55  ;;  %v4135_v55 = vld [vmem:[#allocation2 + $0xf38] sm:$0xff] }
 0x81d   : > { %4081 = vmatprep.mubr.f32.mxu1 %v8739_v8  ;;  %7408 = vmatpush1.bf16.msra.mxu0 %v7407_v2  ;;  %v4116_v2 = vld [vmem:[#allocation2 + $0xea0] sm:$0xff]  ;;  %v7441_v27 = vpack.c.bf16 %v4135_v55, %v4133_v54  ;;  %v4004_v35 = vld [vmem:[#allocation2 + $0xd98] sm:$0xff]  ;;  %v4149_v54 = vld [vmem:[#allocation2 + $0xfa8] sm:$0xff] }
 0x81e   : > { %4224 = vmatprep.mubr.f32.mxu0 %v8739_v8  ;;  %7346 = vmatprep.subr.bf16.mxu1 %v7345_v7  ;;  %v3980_v7 = vld [vmem:[#allocation2 + $0xcd8] sm:$0xff] }
 0x81f   : > { %7410 = vmatprep.subr.bf16.mxu0 %v7409_v12  ;;  %v7427_v12 = vpack.c.bf16 %v4118_v5, %v4116_v2  ;;  %v7365_v14 = vpack.c.bf16 %v3980_v7, %v3978_v6  ;;  %v4134_v2 = vld [vmem:[#allocation2 + $0xf30] sm:$0xff]  ;;  %v3996_v5 = vld [vmem:[#allocation2 + $0xd58] sm:$0xff]  ;;  %v4137_v6 = vld [vmem:[#allocation2 + $0xf48] sm:$0xff] }
 0x820   : > { %7348 = vmatpush1.bf16.msra.mxu1 %v7347_v16  ;;  %v3979_v16 = vld [vmem:[#allocation2 + $0xcd0] sm:$0xff]  ;;  %v4151_v55 = vld [vmem:[#allocation2 + $0xfb8] sm:$0xff] }
 0x821   : > { %7412 = vmatpush1.bf16.msra.mxu0 %v7411_v17  ;;  %7350 = vmatprep.subr.bf16.mxu1 %v7349_v18  ;;  %v4120_v17 = vld [vmem:[#allocation2 + $0xec0] sm:$0xff]  ;;  %v7429_v18 = vpack.c.bf16 %v4123_v9, %v4121_v4  ;;  %v7367_v24 = vpack.c.bf16 %v3979_v16, %v3977_v29 }
 0x822   : > { %7414 = vmatprep.subr.bf16.mxu0 %v7413_v22  ;;  %v4125_v22 = vld [vmem:[#allocation2 + $0xee8] sm:$0xff]  ;;  %v7431_v26 = vpack.c.bf16 %v4122_v19, %v4120_v17  ;;  %v3993_v4 = vld [vmem:[#allocation2 + $0xd40] sm:$0xff]  ;;  %v4138_v17 = vld [vmem:[#allocation2 + $0xf50] sm:$0xff] }
 0x823   : > { %v4440_v29 = vld [vmem:[%s9033_s14] sm:$0xff]  ;;  %v4000_v19 = vld [vmem:[#allocation2 + $0xd78] sm:$0xff] }
 0x824   : > { %7352 = vmatpush1.bf16.msra.mxu1 %v7351_v30  ;;  %v3983_v30 = vld [vmem:[#allocation2 + $0xcf0] sm:$0xff] }
 0x825   : > { %7416 = vmatpush1.bf16.msra.mxu0 %v7415_v32  ;;  %7354 = vmatprep.subr.bf16.mxu1 %v7353_v33  ;;  %v4124_v32 = vld [vmem:[#allocation2 + $0xee0] sm:$0xff]  ;;  %v7433_v33 = vpack.c.bf16 %v4127_v23, %v4125_v22  ;;  %v7371_v39 = vpack.c.bf16 %v3983_v30, %v3981_v44 }
 0x826   : > { %7418 = vmatprep.subr.bf16.mxu0 %v7417_v37  ;;  %v4129_v37 = vld [vmem:[#allocation2 + $0xf08] sm:$0xff]  ;;  %v7435_v40 = vpack.c.bf16 %v4126_v34, %v4124_v32  ;;  %v3997_v23 = vld [vmem:[#allocation2 + $0xd60] sm:$0xff]  ;;  %v7449_v32 = vpack.c.bf16 %v4143_v21, %v4141_v20 }
 0x827   : > { %v4140_v44 = vld [vmem:[#allocation2 + $0xf60] sm:$0xff]  ;;  %v4002_v34 = vld [vmem:[#allocation2 + $0xd88] sm:$0xff] }
 0x828   : > { %7356 = vmatpush1.bf16.msra.mxu1 %v7355_v47  ;;  %v3987_v47 = vld [vmem:[#allocation2 + $0xd10] sm:$0xff]  ;;  %v4452_v30 = vld [vmem:[%s9035_s16] sm:$0xff] }
 0x829   : > { %7420 = vmatpush1.bf16.msra.mxu0 %v7419_v48  ;;  %7358 = vmatprep.subr.bf16.mxu1 %v7357_v50  ;;  %v4128_v48 = vld [vmem:[#allocation2 + $0xf00] sm:$0xff]  ;;  %v7437_v50 = vpack.c.bf16 %v4131_v38, %v4129_v37  ;;  %v7375_v57 = vpack.c.bf16 %v3987_v47, %v3985_v46  ;;  %v4147_v37 = vld [vmem:[#allocation2 + $0xf98] sm:$0xff]  ;;  %v4003_v46 = vld [vmem:[#allocation2 + $0xd90] sm:$0xff] }
 0x82a   : > { %7422 = vmatprep.subr.bf16.mxu0 %v7421_v53  ;;  %v8369_v53 = vmov 8   ;;  %v7439_v59 = vpack.c.bf16 %v4130_v51, %v4128_v48  ;;  %v4144_v47 = vld [vmem:[#allocation2 + $0xf80] sm:$0xff]  ;;  %v4454_v48 = vld [vmem:[%s9035_s16 + $0x10] sm:$0xff] }
 0x82b   : > { %8201 = vset.pattern.permute.xlu1 %v8369_v53  ;;  %v4146_v51 = vld [vmem:[#allocation2 + $0xf90] sm:$0xff] }
 0x82c   : > { %7360 = vmatpush1.bf16.msra.mxu1 %v7359_v60  ;;  %4375 = vperm.xlu1 %8201, %v8762_v42   ;;  %v7377_v60 = vpack.c.bf16 %v3992_v15, %v3990_v52  ;;  %v4139_v42 = vld [vmem:[#allocation2 + $0xf58] sm:$0xff]  ;;  %v4006_v52 = vld [vmem:[#allocation2 + $0xda8] sm:$0xff] }
 0x82d   : > { %7424 = vmatpush1.bf16.msra.mxu0 %v7423_v61  ;;  %7362 = vmatprep.subr.bf16.mxu1 %v7361_v62  ;;  %v3991_v61 = vld [vmem:[#allocation2 + $0xd30] sm:$0xff]  ;;  %v4132_v62 = vld [vmem:[#allocation2 + $0xf20] sm:$0xff]  ;;  %v7445_v16 = vpack.c.bf16 %v4139_v42, %v4137_v6  ;;  %v4008_v15 = vld [vmem:[#allocation2 + $0xdb8] sm:$0xff] }
 0x82e   : > { %7426 = vmatprep.subr.bf16.mxu0 %v7425_v3  ;;  %v3994_v3 = vld [vmem:[#allocation2 + $0xd48] sm:$0xff]  ;;  %v7379_v7 = vpack.c.bf16 %v3991_v61, %v3989_v58  ;;  %v7443_v9 = vpack.c.bf16 %v4134_v2, %v4132_v62  ;;  %v7455_v58 = vpack.c.bf16 %v4146_v51, %v4144_v47  ;;  %v4007_v61 = vld [vmem:[#allocation2 + $0xdb0] sm:$0xff]  ;;  %v4148_v62 = vld [vmem:[#allocation2 + $0xfa0] sm:$0xff] }
 0x82f   : > { %v4010_v2 = vld [vmem:[#allocation2 + $0xdc8] sm:$0xff]  ;;  %v4155_v6 = vld [vmem:[#allocation2 + $0xfd8] sm:$0xff]  ;;  %v4245_v47 = vld [vmem:[#allocation2 + $0x1030] sm:$0xff] }
 0x830   : > { %7364 = vmatpush1.bf16.msra.mxu1 %v7363_v10  ;;  %8202 = vset.pattern.permute.xlu1 %v8361_v1  ;;  %v7381_v10 = vpack.c.bf16 %v3996_v5, %v3994_v3  ;;  %v4012_v3 = vld [vmem:[#allocation2 + $0xdd8] sm:$0xff]  ;;  %v4153_v5 = vld [vmem:[#allocation2 + $0xfc8] sm:$0xff] }
 0x831   : > { %7428 = vmatpush1.bf16.msra.mxu0 %v7427_v12  ;;  %7366 = vmatprep.subr.bf16.mxu1 %v7365_v14  ;;  %v3995_v12 = vld [vmem:[#allocation2 + $0xd50] sm:$0xff]  ;;  %v4136_v14 = vld [vmem:[#allocation2 + $0xf40] sm:$0xff] }
 0x832   : > { %7430 = vmatprep.subr.bf16.mxu0 %v7429_v18  ;;  %4385 = vperm.xlu1 %8202, %v4382_v63   ;;  %v3998_v18 = vld [vmem:[#allocation2 + $0xd68] sm:$0xff]  ;;  %v7383_v22 = vpack.c.bf16 %v3995_v12, %v3993_v4  ;;  %v7457_v63 = vpack.c.bf16 %v4151_v55, %v4149_v54  ;;  %v7397_v4 = vpack.c.bf16 %v4012_v3, %v4010_v2  ;;  %v4152_v12 = vld [vmem:[#allocation2 + $0xfc0] sm:$0xff]  ;;  %v4249_v54 = vld [vmem:[#allocation2 + $0x1050] sm:$0xff] }
 0x833   : > { %v4252_v55 = vld [vmem:[#allocation2 + $0x1068] sm:$0xff]  ;;  %v4255_v3 = vld [vmem:[#allocation2 + $0x1080] sm:$0xff] }
 0x834   : > { %7368 = vmatpush1.bf16.msra.mxu1 %v7367_v24  ;;  %v7447_v24 = vpack.c.bf16 %v4138_v17, %v4136_v14  ;;  %v7461_v14 = vpack.c.bf16 %v4155_v6, %v4153_v5  ;;  %v4016_v17 = vld [vmem:[#allocation2 + $0xdf8] sm:$0xff]  ;;  %v4257_v5 = vld [vmem:[#allocation2 + $0x1090] sm:$0xff]  ;;  %v4260_v6 = vld [vmem:[#allocation2 + $0x10a8] sm:$0xff] }
 0x835   : > { %7432 = vmatpush1.bf16.msra.mxu0 %v7431_v26  ;;  %7370 = vmatprep.subr.bf16.mxu1 %v7369_v28  ;;  %v7385_v26 = vpack.c.bf16 %v4000_v19, %v3998_v18  ;;  %v3999_v28 = vld [vmem:[#allocation2 + $0xd70] sm:$0xff]  ;;  %v4157_v18 = vld [vmem:[#allocation2 + $0xfe8] sm:$0xff]  ;;  %v4159_v19 = vld [vmem:[#allocation2 + $0xff8] sm:$0xff] }
 0x836   : > { %7434 = vmatprep.subr.bf16.mxu0 %v7433_v33  ;;  %4443 = vperm.xlu1 %8202, %v4440_v29   ;;  %v4142_v33 = vld [vmem:[#allocation2 + $0xf70] sm:$0xff]  ;;  %v7387_v38 = vpack.c.bf16 %v3999_v28, %v3997_v23  ;;  %v4013_v23 = vld [vmem:[#allocation2 + $0xde0] sm:$0xff]  ;;  %v7465_v28 = vpack.c.bf16 %v4159_v19, %v4157_v18 }
 0x837   : > { %v4154_v29 = vld [vmem:[#allocation2 + $0xfd0] sm:$0xff]  ;;  %v4263_v19 = vld [vmem:[#allocation2 + $0x10c0] sm:$0xff] }
 0x838   : > { %7372 = vmatpush1.bf16.msra.mxu1 %v7371_v39  ;;  %v4001_v39 = vld [vmem:[#allocation2 + $0xd80] sm:$0xff]  ;;  %v7463_v21 = vpack.c.bf16 %v4154_v29, %v4152_v12  ;;  %v4264_v12 = vld [vmem:[#allocation2 + $0x10c8] sm:$0xff]  ;;  %v3375_v29 = vpop.permute.xlu0 %3374 }
 0x839   : > { %7436 = vmatpush1.bf16.msra.mxu0 %v7435_v40  ;;  %7374 = vmatprep.subr.bf16.mxu1 %v7373_v45  ;;  %v7451_v40 = vpack.c.bf16 %v4142_v33, %v4140_v44  ;;  %v7389_v45 = vpack.c.bf16 %v4004_v35, %v4002_v34  ;;  %v4158_v44 = vld [vmem:[#allocation2 + $0xff0] sm:$0xff] }
 0x83a   : > { %7438 = vmatprep.subr.bf16.mxu0 %v7437_v50  ;;  %4458 = vperm.xlu1 %8202, %v4452_v30   ;;  %v7453_v50 = vpack.c.bf16 %v4147_v37, %v4145_v36  ;;  %v4240_v30 = vld [vmem:[#allocation2 + $0x1008] sm:$0xff]  ;;  %v4239_v36 = vld [vmem:[#allocation2 + $0x1000] sm:$0xff]  ;;  %v4241_v37 = vld [vmem:[#allocation2 + $0x1010] sm:$0xff] }
 0x83c   : > { %7376 = vmatpush1.bf16.msra.mxu1 %v7375_v57  ;;  %v7391_v57 = vpack.c.bf16 %v4003_v46, %v4001_v39  ;;  %v4246_v39 = vld [vmem:[#allocation2 + $0x1038] sm:$0xff]  ;;  %v4243_v46 = vld [vmem:[#allocation2 + $0x1020] sm:$0xff] }
 0x83d   : > { %7440 = vmatpush1.bf16.msra.mxu0 %v7439_v59  ;;  %7378 = vmatprep.subr.bf16.mxu1 %v7377_v60  ;;  %v7393_v59 = vpack.c.bf16 %v4008_v15, %v4006_v52  ;;  %v4005_v60 = vld [vmem:[#allocation2 + $0xda0] sm:$0xff]  ;;  %v7475_v51 = vpack.c.bf16 %v4245_v47, %v4243_v46  ;;  %v4274_v46 = vld [vmem:[#allocation2 + $0x1118] sm:$0xff] }
 0x83e   : > { %7442 = vmatprep.subr.bf16.mxu0 %v7441_v27  ;;  %4468 = vperm.xlu1 %8202, %v4454_v48   ;;  %v4150_v27 = vld [vmem:[#allocation2 + $0xfb0] sm:$0xff]  ;;  %v7395_v42 = vpack.c.bf16 %v4007_v61, %v4005_v60  ;;  %v4248_v48 = vld [vmem:[#allocation2 + $0x1048] sm:$0xff]  ;;  %v4247_v15 = vld [vmem:[#allocation2 + $0x1040] sm:$0xff] }
 0x83f   : > { %v4251_v60 = vld [vmem:[#allocation2 + $0x1060] sm:$0xff]  ;;  %v4253_v61 = vld [vmem:[#allocation2 + $0x1070] sm:$0xff] }
 0x840   : > { %7380 = vmatpush1.bf16.msra.mxu1 %v7379_v7  ;;  %v7459_v7 = vpack.c.bf16 %v4150_v27, %v4148_v62  ;;  %v4256_v62 = vld [vmem:[#allocation2 + $0x1088] sm:$0xff]  ;;  %v7483_v27 = vpack.c.bf16 %v4253_v61, %v4251_v60  ;;  %v4275_v60 = vld [vmem:[#allocation2 + $0x1120] sm:$0xff]  ;;  %v4277_v61 = vld [vmem:[#allocation2 + $0x1130] sm:$0xff] }
 0x841   : > { %7444 = vmatpush1.bf16.msra.mxu0 %v7443_v9  ;;  %7382 = vmatprep.subr.bf16.mxu1 %v7381_v10  ;;  %v4009_v9 = vld [vmem:[#allocation2 + $0xdc0] sm:$0xff]  ;;  %v4011_v10 = vld [vmem:[#allocation2 + $0xdd0] sm:$0xff] }
 0x842   : > { %7446 = vmatprep.subr.bf16.mxu0 %v7445_v16  ;;  %v4014_v16 = vld [vmem:[#allocation2 + $0xde8] sm:$0xff]  ;;  %v7399_v20 = vpack.c.bf16 %v4011_v10, %v4009_v9  ;;  %v4259_v9 = vld [vmem:[#allocation2 + $0x10a0] sm:$0xff]  ;;  %v4261_v10 = vld [vmem:[#allocation2 + $0x10b0] sm:$0xff] }
 0x844   : > { %7384 = vmatpush1.bf16.msra.mxu1 %v7383_v22  ;;  %v7401_v22 = vpack.c.bf16 %v4016_v17, %v4014_v16  ;;  %v7491_v16 = vpack.c.bf16 %v4261_v10, %v4259_v9  ;;  %v3232_v17 = vpop.permute.xlu1 %3231 }
 0x845   : > { %7448 = vmatpush1.bf16.msra.mxu0 %v7447_v24  ;;  %7386 = vmatprep.subr.bf16.mxu1 %v7385_v26  ;;  %v4015_v24 = vld [vmem:[#allocation2 + $0xdf0] sm:$0xff]  ;;  %v4156_v26 = vld [vmem:[#allocation2 + $0xfe0] sm:$0xff] }
 0x846   : > { %7450 = vmatprep.subr.bf16.mxu0 %v7449_v32  ;;  %v4242_v32 = vld [vmem:[#allocation2 + $0x1018] sm:$0xff]  ;;  %v7403_v33 = vpack.c.bf16 %v4015_v24, %v4013_v23  ;;  %v7467_v34 = vpack.c.bf16 %v4158_v44, %v4156_v26  ;;  %v4268_v23 = vld [vmem:[#allocation2 + $0x10e8] sm:$0xff] }
 0x847   : > { %v7469_v35 = vpack.c.bf16 %v4242_v32, %v4240_v30  ;;  %v4270_v24 = vld [vmem:[#allocation2 + $0x10f8] sm:$0xff] }
 0x848   : > { %7388 = vmatpush1.bf16.msra.mxu1 %v7387_v38  ;;  %v4244_v38 = vld [vmem:[#allocation2 + $0x1028] sm:$0xff] }
 0x849   : > { %7452 = vmatpush1.bf16.msra.mxu0 %v7451_v40  ;;  %7390 = vmatprep.subr.bf16.mxu1 %v7389_v45  ;;  %v7471_v40 = vpack.c.bf16 %v4241_v37, %v4239_v36  ;;  %v7473_v45 = vpack.c.bf16 %v4246_v39, %v4244_v38  ;;  %v7497_v36 = vpack.c.bf16 %v4270_v24, %v4268_v23  ;;  %v4267_v37 = vld [vmem:[#allocation2 + $0x10e0] sm:$0xff]  ;;  %v4269_v38 = vld [vmem:[#allocation2 + $0x10f0] sm:$0xff] }
 0x84a   : > { %7454 = vmatprep.subr.bf16.mxu0 %v7453_v50  ;;  %v4250_v50 = vld [vmem:[#allocation2 + $0x1058] sm:$0xff]  ;;  %v4610_v39 = vld [vmem:[%s9037_s18] sm:$0xff]  ;;  %v7499_v47 = vpack.c.bf16 %v4269_v38, %v4267_v37 }
 0x84b   : > { %v7477_v52 = vpack.c.bf16 %v4250_v50, %v4248_v48  ;;  %4613 = vperm.xlu1 %8202, %v4610_v39   ;;  %v4747_v48 = vld [vmem:[%s9039_s20] sm:$0xff]  ;;  %v4302_v37 = vld [vmem:[#allocation2 + $0x11f8] sm:$0xff] }
 0x84c   : > { %7392 = vmatpush1.bf16.msra.mxu1 %v7391_v57  ;;  %v4254_v57 = vld [vmem:[#allocation2 + $0x1078] sm:$0xff]  ;;  %v4432_v50 = vld [vmem:[%s9032_s13] sm:$0xff] }
 0x84d   : > { %7456 = vmatpush1.bf16.msra.mxu0 %v7455_v58  ;;  %7394 = vmatprep.subr.bf16.mxu1 %v7393_v59  ;;  %v7479_v58 = vpack.c.bf16 %v4249_v54, %v4247_v15  ;;  %v7481_v59 = vpack.c.bf16 %v4254_v57, %v4252_v55  ;;  %v4273_v15 = vld [vmem:[#allocation2 + $0x1110] sm:$0xff]  ;;  %v4276_v54 = vld [vmem:[#allocation2 + $0x1128] sm:$0xff]  ;;  %v4278_v55 = vld [vmem:[#allocation2 + $0x1138] sm:$0xff] }
 0x84e   : > { %7458 = vmatprep.subr.bf16.mxu0 %v7457_v63  ;;  %v4258_v63 = vld [vmem:[#allocation2 + $0x1098] sm:$0xff]  ;;  %4435 = vperm.xlu0 %8203, %v4432_v50   ;;  %v4453_v57 = vld [vmem:[%s9035_s16 + $0x8] sm:$0xff]  ;;  %v4291_v24 = vld [vmem:[#allocation2 + $0x11a0] sm:$0xff] }
 0x84f   : > { %v7485_v2 = vpack.c.bf16 %v4258_v63, %v4256_v62  ;;  %4750 = vperm.xlu1 %8202, %v4747_v48   ;;  %v4280_v62 = vld [vmem:[#allocation2 + $0x1148] sm:$0xff]  ;;  %v4282_v63 = vld [vmem:[#allocation2 + $0x1158] sm:$0xff]  ;;  %v3518_v48 = vpop.permute.xlu1 %3517 }
 0x850   : > { %7396 = vmatpush1.bf16.msra.mxu1 %v7395_v42  ;;  %v4262_v42 = vld [vmem:[#allocation2 + $0x10b8] sm:$0xff] }
 0x851   : > { %7460 = vmatpush1.bf16.msra.mxu0 %v7459_v7  ;;  %7398 = vmatprep.subr.bf16.mxu1 %v7397_v4  ;;  %v7487_v7 = vpack.c.bf16 %v4257_v5, %v4255_v3  ;;  %v7489_v4 = vpack.c.bf16 %v4262_v42, %v4260_v6  ;;  %v7509_v3 = vpack.c.bf16 %v4282_v63, %v4280_v62  ;;  %v4279_v5 = vld [vmem:[#allocation2 + $0x1140] sm:$0xff]  ;;  %v4281_v6 = vld [vmem:[#allocation2 + $0x1150] sm:$0xff]  ;;  %v4284_v42 = vld [vmem:[#allocation2 + $0x1168] sm:$0xff] }
 0x852   : > { %7462 = vmatprep.subr.bf16.mxu0 %v7461_v14  ;;  %v4266_v14 = vld [vmem:[#allocation2 + $0x10d8] sm:$0xff]  ;;  %4463 = vperm.xlu0 %8203, %v4453_v57   ;;  %v7511_v9 = vpack.c.bf16 %v4281_v6, %v4279_v5 }
 0x853   : > { %v7493_v18 = vpack.c.bf16 %v4266_v14, %v4264_v12  ;;  %8204 = vset.pattern.permute.xlu1 %v8362_v56  ;;  %v4283_v12 = vld [vmem:[#allocation2 + $0x1160] sm:$0xff]  ;;  %v4285_v14 = vld [vmem:[#allocation2 + $0x1170] sm:$0xff]  ;;  %v4288_v56 = vld [vmem:[#allocation2 + $0x1188] sm:$0xff]  ;;  %v3661_v50 = vpop.permute.xlu1 %3660 }
 0x854   : > { %7400 = vmatpush1.bf16.msra.mxu1 %v7399_v20  ;;  %v4265_v20 = vld [vmem:[#allocation2 + $0x10d0] sm:$0xff] }
 0x855   : > { %7464 = vmatpush1.bf16.msra.mxu0 %v7463_v21  ;;  %7402 = vmatprep.subr.bf16.mxu1 %v7401_v22 }
 0x856   : > { %7466 = vmatprep.subr.bf16.mxu0 %v7465_v28 }
 0x858   : > { %7404 = vmatpush1.bf16.msra.mxu1 %v7403_v33 }
 0x859   : > { %7468 = vmatpush1.bf16.msra.mxu0 %v7467_v34  ;;  %7470 = vmatprep.subr.bf16.mxu1 %v7469_v35  ;;  %v7495_v34 = vpack.c.bf16 %v4265_v20, %v4263_v19  ;;  %v4289_v19 = vld [vmem:[#allocation2 + $0x1190] sm:$0xff]  ;;  %v4292_v20 = vld [vmem:[#allocation2 + $0x11a8] sm:$0xff] }
 0x85b   : > { %4082 = vmatmul.mubr.f32.vlgmr.msra.gmra.mrb[20].mxu1 %v8741_v13 }
 0x85c   : > { %4225 = vmatmul.mubr.f32.vlgmr.msra.gmra.mrb[16].mxu0 %v8741_v13  ;;  %7472 = vmatpush1.bf16.msra.mxu1 %v7471_v40 }
 0x85d   : > { %4367 = vmatprep.mubr.f32.mxu1 %v8739_v8  ;;  %7474 = vmatprep.subr.bf16.mxu1 %v7473_v45  ;;  %v4272_v45 = vld [vmem:[#allocation2 + $0x1108] sm:$0xff] }
 0x85e   : > { %4827 = vmatprep.mubr.f32.mxu0 %v8360_v0 }
 0x860   : > { %7476 = vmatpush1.bf16.msra.mxu1 %v7475_v51  ;;  %v7501_v51 = vpack.c.bf16 %v4274_v46, %v4272_v45  ;;  %v4299_v45 = vld [vmem:[#allocation2 + $0x11e0] sm:$0xff]  ;;  %v4301_v46 = vld [vmem:[#allocation2 + $0x11f0] sm:$0xff] }
 0x861   : > { %7478 = vmatprep.subr.bf16.mxu1 %v7477_v52  ;;  %v4271_v52 = vld [vmem:[#allocation2 + $0x1100] sm:$0xff] }
 0x864   : > { %7480 = vmatpush1.bf16.msra.mxu1 %v7479_v58  ;;  %v7503_v58 = vpack.c.bf16 %v4273_v15, %v4271_v52 }
 0x865   : > { %7482 = vmatprep.subr.bf16.mxu1 %v7481_v59  ;;  %v7505_v59 = vpack.c.bf16 %v4278_v55, %v4276_v54 }
 0x868   : > { %7484 = vmatpush1.bf16.msra.mxu1 %v7483_v27  ;;  %v4455_v27 = vld [vmem:[%s9035_s16 + $0x18] sm:$0xff] }
 0x869   : > { %7486 = vmatprep.subr.bf16.mxu1 %v7485_v2  ;;  %v7507_v2 = vpack.c.bf16 %v4277_v61, %v4275_v60  ;;  %4473 = vperm.xlu0 %8203, %v4455_v27   ;;  %v3804_v27 = vpop.permute.xlu0 %3803 }
 0x86c   : > { %7488 = vmatpush1.bf16.msra.mxu1 %v7487_v7  ;;  %v4286_v7 = vld [vmem:[#allocation2 + $0x1178] sm:$0xff] }
 0x86d   : > { %7490 = vmatprep.subr.bf16.mxu1 %v7489_v4  ;;  %v4739_v4 = vld [vmem:[%s9038_s19] sm:$0xff]  ;;  %v7513_v10 = vpack.c.bf16 %v4286_v7, %v4284_v42 }
 0x86e   : > { %v3223_v21 = vpop.f32.mrb[14].mxu1  ;;  %v3368_v22 = vpop.f32.mrb[10].mxu0  ;;  %4742 = vperm.xlu0 %8203, %v4739_v4  }
 0x86f   : > { %v3234_v26 = vmul.f32 %v3232_v17, %v3223_v21  ;;  %v3377_v28 = vmul.f32 %v3375_v29, %v3368_v22  ;;  %v3225_v44 = vpop.f32.mrb[15].mxu1  ;;  %v3370_v30 = vpop.f32.mrb[11].mxu0  ;;  %v4294_v21 = vld [vmem:[#allocation2 + $0x11b8] sm:$0xff] }
 0x870   : > { %v3235_v32 = vmul.f32 %v3232_v17, %v3225_v44  ;;  %v3378_v33 = vmul.f32 %v3375_v29, %v3370_v30  ;;  %7492 = vmatpush1.bf16.msra.mxu1 %v7491_v16  ;;  %v4290_v29 = vld [vmem:[#allocation2 + $0x1198] sm:$0xff]  ;;  %v7515_v16 = vpack.c.bf16 %v4285_v14, %v4283_v12  ;;  %v7521_v23 = vpack.c.bf16 %v4294_v21, %v4292_v20 }
 0x871   : > { %v8794_v35 = vadd.f32 %v3377_v28, %v3234_v26  ;;  %7494 = vmatprep.subr.bf16.mxu1 %v7493_v18  ;;  %v7517_v17 = vpack.c.bf16 %v4290_v29, %v4288_v56  ;;  %v4287_v18 = vld [vmem:[#allocation2 + $0x1180] sm:$0xff]  ;;  %v4293_v26 = vld [vmem:[#allocation2 + $0x11b0] sm:$0xff]  ;;  %v4296_v28 = vld [vmem:[#allocation2 + $0x11c8] sm:$0xff] }
 0x872   : > { %v8799_v40 = vadd.f32 %v3378_v33, %v3235_v32  ;;  %v7519_v22 = vpack.c.bf16 %v4289_v19, %v4287_v18  ;;  %v4298_v44 = vld [vmem:[#allocation2 + $0x11d8] sm:$0xff]  ;;  %v7523_v30 = vpack.c.bf16 %v4293_v26, %v4291_v24  ;;  %v4295_v33 = vld [vmem:[#allocation2 + $0x11c0] sm:$0xff] }
 0x873   : > { %v7525_v32 = vpack.c.bf16 %v4298_v44, %v4296_v28 }
 0x874   : > { %7496 = vmatpush1.bf16.msra.mxu1 %v7495_v34  ;;  %v4297_v34 = vld [vmem:[#allocation2 + $0x11d0] sm:$0xff] }
 0x875   : > { %7498 = vmatprep.subr.bf16.mxu1 %v7497_v36  ;;  %v4300_v36 = vld [vmem:[#allocation2 + $0x11e8] sm:$0xff]  ;;  %v7527_v38 = vpack.c.bf16 %v4297_v34, %v4295_v33 }
 0x876   : > { %v7529_v39 = vpack.c.bf16 %v4302_v37, %v4300_v36 }
 0x878   : > { %7500 = vmatpush1.bf16.msra.mxu1 %v7499_v47  ;;  %v7531_v47 = vpack.c.bf16 %v4301_v46, %v4299_v45 }
 0x879   : > { %7502 = vmatprep.subr.bf16.mxu1 %v7501_v51 }
 0x87c   : > { %7504 = vmatpush1.bf16.msra.mxu1 %v7503_v58 }
 0x87d   : > { %7506 = vmatprep.subr.bf16.mxu1 %v7505_v59 }
 0x880   : > { %7508 = vmatpush1.bf16.msra.mxu1 %v7507_v2  ;;  %v3947_v2 = vpop.permute.xlu1 %3946 }
 0x881   : > { %7510 = vmatprep.subr.bf16.mxu1 %v7509_v3 }
 0x884   : > { %7512 = vmatpush1.bf16.msra.mxu1 %v7511_v9 }
 0x885   : > { %7514 = vmatprep.subr.bf16.mxu1 %v7513_v10 }
 0x888   : > { %7516 = vmatpush1.bf16.msra.mxu1 %v7515_v16  ;;  %v4233_v16 = vpop.permute.xlu0 %4232 }
 0x889   : > { %7518 = vmatprep.subr.bf16.mxu1 %v7517_v17 }
 0x88c   : > { %7520 = vmatpush1.bf16.msra.mxu1 %v7519_v22 }
 0x88d   : > { %7522 = vmatprep.subr.bf16.mxu1 %v7521_v23 }
 0x890   : > { %7524 = vmatpush1.bf16.msra.mxu1 %v7523_v30 }
 0x891   : > { %7526 = vmatprep.subr.bf16.mxu1 %v7525_v32 }
 0x893   : > { %v4090_v29 = vpop.permute.xlu1 %4089 }
 0x894   : > { %7528 = vmatpush1.bf16.msra.mxu1 %v7527_v38 }
 0x895   : > { %7530 = vmatprep.subr.bf16.mxu1 %v7529_v39 }
 0x898   : > { %7532 = vmatpush1.bf16.msra.mxu1 %v7531_v47 }
 0x89b   : > { %4368 = vmatmul.mubr.f32.vlgmr.msra.gmra.mrb[22].mxu1 %v8741_v13 }
 0x89c   : > { %4552 = vmatprep.mubr.f32.mxu1 %v8360_v0 }
 0x8ab   : > { %v4376_v30 = vpop.permute.xlu1 %4375 }
 0x8ae   : > { %v3511_v51 = vpop.f32.mrb[16].mxu1  ;;  %v3654_v52 = vpop.f32.mrb[12].mxu0 }
 0x8af   : > { %v3520_v15 = vmul.f32 %v3518_v48, %v3511_v51  ;;  %v3513_v54 = vpop.f32.mrb[17].mxu1  ;;  %v3656_v55 = vpop.f32.mrb[13].mxu0  ;;  %v3663_v59 = vmul.f32 %v3661_v50, %v3654_v52 }
 0x8b0   : > { %v3521_v57 = vmul.f32 %v3518_v48, %v3513_v54  ;;  %v3664_v61 = vmul.f32 %v3661_v50, %v3656_v55 }
 0x8b1   : > { %v3522_v58 = vadd.f32 %v3520_v15, %v8794_v35  ;;  %v4386_v38 = vpop.permute.xlu1 %4385 }
 0x8b2   : > { %v3523_v60 = vadd.f32 %v3521_v57, %v8799_v40 }
 0x8b3   : > { %v3665_v62 = vadd.f32 %v3663_v59, %v3522_v58 }
 0x8b4   : > { %v3666_v63 = vadd.f32 %v3664_v61, %v3523_v60 }
 0x8ee   : > { %v3797_v3 = vpop.f32.mrb[18].mxu1 }
 0x8ef   : > { %v3806_v5 = vmul.f32 %v3804_v27, %v3797_v3  ;;  %v3940_v6 = vpop.f32.mrb[14].mxu0  ;;  %v3799_v42 = vpop.f32.mrb[19].mxu1 }
 0x8f0   : > { %v3807_v7 = vmul.f32 %v3804_v27, %v3799_v42  ;;  %v3942_v4 = vpop.f32.mrb[15].mxu0  ;;  %v3949_v10 = vmul.f32 %v3947_v2, %v3940_v6 }
 0x8f1   : > { %v3808_v9 = vadd.f32 %v3806_v5, %v3665_v62  ;;  %v3950_v14 = vmul.f32 %v3947_v2, %v3942_v4 }
 0x8f2   : > { %v3809_v12 = vadd.f32 %v3807_v7, %v3666_v63 }
 0x8f3   : > { %v3951_v56 = vadd.f32 %v3949_v10, %v3808_v9 }
 0x8f4   : > { %v3952_v35 = vadd.f32 %v3950_v14, %v3809_v12 }
 0x92e   : > { %v4083_v40 = vpop.f32.mrb[20].mxu1 }
 0x92f   : > { %v4092_v17 = vmul.f32 %v4090_v29, %v4083_v40  ;;  %v4226_v18 = vpop.f32.mrb[16].mxu0  ;;  %v4085_v19 = vpop.f32.mrb[21].mxu1 }
 0x930   : > { %v4093_v20 = vmul.f32 %v4090_v29, %v4085_v19  ;;  %v4228_v21 = vpop.f32.mrb[17].mxu0  ;;  %v4235_v23 = vmul.f32 %v4233_v16, %v4226_v18 }
 0x931   : > { %v4094_v22 = vadd.f32 %v4092_v17, %v3951_v56  ;;  %v4236_v26 = vmul.f32 %v4233_v16, %v4228_v21 }
 0x932   : > { %v4095_v24 = vadd.f32 %v4093_v20, %v3952_v35 }
 0x933   : > { %v4237_v28 = vadd.f32 %v4235_v23, %v4094_v22 }
 0x934   : > { %v4238_v44 = vadd.f32 %v4236_v26, %v4095_v24 }
 0x96e   : > { %v4369_v32 = vpop.f32.mrb[22].mxu1 }
 0x96f   : > { %v4378_v33 = vmul.f32 %v4376_v30, %v4369_v32  ;;  %v4371_v34 = vpop.f32.mrb[23].mxu1 }
 0x970   : > { %v4379_v36 = vmul.f32 %v4376_v30, %v4371_v34 }
 0x971   : > { %v4380_v37 = vadd.f32 %v4378_v33, %v4237_v28  ;;  %v4436_v28 = vpop.permute.xlu0 %4435  ;;  %v4444_v33 = vpop.permute.xlu1 %4443 }
 0x972   : > { %v4381_v39 = vadd.f32 %v4379_v36, %v4238_v44 }
 0x973   : > { %v4388_v45 = vadd.f32 %v4386_v38, %v4380_v37  ;;  %v4448_v37 = vld [vmem:[%s9034_s15] sm:$0xff] }
 0x974   : > { %v4389_v46 = vadd.f32 %v4386_v38, %v4381_v39  ;;  %v4449_v38 = vld [vmem:[%s9034_s15 + $0x8] sm:$0xff]  ;;  %v4450_v39 = vld [vmem:[%s9034_s15 + $0x10] sm:$0xff] }
 0x975   : > { %v4390_v47 = vrot.slane %v4388_v45, 4  ;;  %v4402_v48 = vmul.f32 %v4388_v45, %v4388_v45 }
 0x976   : > { %v4396_v50 = vrot.slane %v4389_v46, 4  ;;  %v4403_v51 = vmul.f32 %v4389_v46, %v4389_v46 }
 0x977   : > { %v4404_v52 = vrot.slane %v4402_v48, 4  ;;  %v4391_v15 = vadd.f32 %v4390_v47, %v4388_v45 }
 0x978   : > { %v4410_v54 = vrot.slane %v4403_v51, 4  ;;  %v4397_v55 = vadd.f32 %v4396_v50, %v4389_v46 }
 0x979   : > { %v4405_v57 = vadd.f32 %v4404_v52, %v4402_v48  ;;  %v4392_v58 = vrot.slane %v4391_v15, 2 }
 0x97a   : > { %v4411_v59 = vadd.f32 %v4410_v54, %v4403_v51  ;;  %v4398_v60 = vrot.slane %v4397_v55, 2 }
 0x97b   : > { %v4406_v61 = vrot.slane %v4405_v57, 2  ;;  %v4393_v62 = vadd.f32 %v4392_v58, %v4391_v15  ;;  %v4464_v15 = vpop.permute.xlu0 %4463 }
 0x97c   : > { %v4412_v63 = vrot.slane %v4411_v59, 2  ;;  %v4399_v27 = vadd.f32 %v4398_v60, %v4397_v55 }
 0x97d   : > { %v4394_v2 = vrot.slane %v4393_v62, 1  ;;  %v4407_v3 = vadd.f32 %v4406_v61, %v4405_v57 }
 0x97e   : > { %v4400_v5 = vrot.slane %v4399_v27, 1  ;;  %v4413_v6 = vadd.f32 %v4412_v63, %v4411_v59 }
 0x97f   : > { %v4395_v42 = vadd.f32 %v4394_v2, %v4393_v62  ;;  %v4408_v7 = vrot.slane %v4407_v3, 1 }
 0x980   : > { %v4401_v4 = vadd.f32 %v4400_v5, %v4399_v27  ;;  %v4414_v9 = vrot.slane %v4413_v6, 1  ;;  %v4474_v5 = vpop.permute.xlu0 %4473 }
 0x981   : > { %v4409_v10 = vadd.f32 %v4408_v7, %v4407_v3  ;;  %v4416_v12 = vmul.f32 0.125, %v4395_v42 }
 0x982   : > { %v4415_v14 = vadd.f32 %v4414_v9, %v4413_v6  ;;  %v4417_v56 = vmul.f32 0.125, %v4401_v4 }
 0x983   : > { %v4418_v35 = vmul.f32 0.125, %v4409_v10  ;;  %v4420_v29 = vmul.f32 %v4416_v12, %v4416_v12  ;;  %v4428_v21 = vsub.f32 %v4388_v45, %v4416_v12  ;;  %v4451_v45 = vld [vmem:[%s9034_s15 + $0x18] sm:$0xff] }
 0x984   : > { %v4419_v16 = vmul.f32 0.125, %v4415_v14  ;;  %v4421_v40 = vmul.f32 %v4417_v56, %v4417_v56  ;;  %v4429_v23 = vsub.f32 %v4389_v46, %v4417_v56  ;;  %v4459_v46 = vpop.permute.xlu1 %4458 }
 0x985   : > { %v4422_v17 = vsub.f32 %v4418_v35, %v4420_v29 }
 0x986   : > { %v4423_v18 = vsub.f32 %v4419_v16, %v4421_v40 }
 0x987   : > { %v4424_v19 = vadd.f32 1e-05, %v4422_v17 }
 0x988   : > { %v4425_v20 = vadd.f32 1e-05, %v4423_v18  ;;  %v4469_v61 = vpop.permute.xlu1 %4468 }
 0x989   : > { %8219 = vrsqrt.f32 %v4424_v19 }
 0x98a   : > { %8221 = vrsqrt.f32 %v4425_v20 }
 0x993   : > { %v8220_v22 = vpop.eup %8219 }
 0x994   : > { %v8222_v24 = vpop.eup %8221  ;;  %v4430_v26 = vmul.f32 %v8220_v22, %v4428_v21 }
 0x995   : > { %v4431_v44 = vmul.f32 %v8222_v24, %v4429_v23 }
 0x996   : > { %v4438_v30 = vmul.f32 %v4436_v28, %v4430_v26 }
 0x997   : > { %v4439_v32 = vmul.f32 %v4436_v28, %v4431_v44 }
 0x998   : > { %v4446_v36 = vadd.f32 %v4444_v33, %v4438_v30 }
 0x999   : > { %v4447_v34 = vadd.f32 %v4444_v33, %v4439_v32 }
 0x99b   : > { %4488 = vmatprep.subr.mxu1 %v4447_v34 }
 0x99c   : > { %4489 = vmatpush1.msra.mxu1 %v4446_v36 }
 0x99d   : > { %6371 = vmatmul.mubr.msk.f32.vlgmr.msra.gmra.mrb[24].mxu1 %vm1252_vm2, %v4448_v37 }
 0x99e   : > { %4558 = vmatprep.mubr.f32.mxu1 %v8360_v0 }
 0x9a1   : > { %6372 = vmatmul.mubr.msk.f32.gmra.mrb[26].mxu1 %vm1252_vm2, %v4449_v38 }
 0x9a2   : > { %4564 = vmatprep.mubr.f32.mxu1 %v8360_v0 }
 0x9a5   : > { %6373 = vmatmul.mubr.msk.f32.gmra.mrb[28].mxu1 %vm1252_vm2, %v4450_v39  ;;  %v5092_v39 = vld [vmem:[#allocation2 + $0x208] sm:$0xff] }
 0x9a6   : > { %4570 = vmatprep.mubr.f32.mxu1 %v8360_v0 }
 0x9a9   : > { %6374 = vmatmul.mubr.msk.f32.gmra.mrb[30].mxu1 %vm1252_vm2, %v4451_v45  ;;  %v5094_v45 = vld [vmem:[#allocation2 + $0x218] sm:$0xff] }
 0x9aa   : > { %4684 = vmatprep.mubr.f32.mxu1 %v8360_v0 }
 0xa70   : > { %v4554_v47 = vpop.f32.mrb[24].mxu1 }
 0xa71   : > { %v4555_v48 = vadd.f32 %v4554_v47, %v4459_v46  ;;  %v4556_v50 = vpop.f32.mrb[25].mxu1 }
 0xa72   : > { %v4557_v51 = vadd.f32 %v4556_v50, %v4459_v46 }
 0xa73   : > { %v4578_v52 = vmul.f32 0.70710677, %v4555_v48 }
 0xa74   : > { %v4579_v54 = vmul.f32 0.70710677, %v4557_v51  ;;  %v4560_v55 = vpop.f32.mrb[26].mxu1 }
 0xa75   : > { %8223 = verf.f32 %v4578_v52  ;;  %v4561_v57 = vadd.f32 %v4560_v55, %v4464_v15  ;;  %v4562_v58 = vpop.f32.mrb[27].mxu1  ;;  %v5091_v52 = vld [vmem:[#allocation2 + $0x200] sm:$0xff]  ;;  %v5098_v55 = vld [vmem:[#allocation2 + $0x238] sm:$0xff] }
 0xa76   : > { %8225 = verf.f32 %v4579_v54  ;;  %v4563_v59 = vadd.f32 %v4562_v58, %v4464_v15  ;;  %v5093_v15 = vld [vmem:[#allocation2 + $0x210] sm:$0xff]  ;;  %v5096_v54 = vld [vmem:[#allocation2 + $0x228] sm:$0xff] }
 0xa77   : > { %v4580_v60 = vmul.f32 0.70710677, %v4561_v57  ;;  %v7607_v58 = vpack.c.bf16 %v5093_v15, %v5091_v52  ;;  %v5127_v15 = vld [vmem:[#allocation2 + $0x320] sm:$0xff] }
 0xa78   : > { %v4581_v62 = vmul.f32 0.70710677, %v4563_v59  ;;  %v4566_v63 = vpop.f32.mrb[28].mxu1 }
 0xa79   : > { %8227 = verf.f32 %v4580_v60  ;;  %v4567_v0 = vadd.f32 %v4566_v63, %v4469_v61  ;;  %v4568_v27 = vpop.f32.mrb[29].mxu1  ;;  %v5095_v60 = vld [vmem:[#allocation2 + $0x220] sm:$0xff]  ;;  %v5102_v63 = vld [vmem:[#allocation2 + $0x258] sm:$0xff] }
 0xa7a   : > { %8229 = verf.f32 %v4581_v62  ;;  %v4569_v2 = vadd.f32 %v4568_v27, %v4469_v61  ;;  %v5097_v61 = vld [vmem:[#allocation2 + $0x230] sm:$0xff]  ;;  %v5100_v62 = vld [vmem:[#allocation2 + $0x248] sm:$0xff] }
 0xa7b   : > { %v4582_v3 = vmul.f32 0.70710677, %v4567_v0  ;;  %v7613_v27 = vpack.c.bf16 %v5102_v63, %v5100_v62  ;;  %v5136_v63 = vld [vmem:[#allocation2 + $0x368] sm:$0xff] }
 0xa7c   : > { %v4583_v6 = vmul.f32 0.70710677, %v4569_v2  ;;  %v4572_v42 = vpop.f32.mrb[30].mxu1 }
 0xa7d   : > { %8231 = verf.f32 %v4582_v3  ;;  %v4573_v7 = vadd.f32 %v4572_v42, %v4474_v5  ;;  %v4574_v4 = vpop.f32.mrb[31].mxu1  ;;  %v5101_v3 = vld [vmem:[#allocation2 + $0x250] sm:$0xff] }
 0xa7e   : > { %8233 = verf.f32 %v4583_v6  ;;  %v4575_v9 = vadd.f32 %v4574_v4, %v4474_v5  ;;  %v5104_v5 = vld [vmem:[#allocation2 + $0x268] sm:$0xff]  ;;  %v5106_v6 = vld [vmem:[#allocation2 + $0x278] sm:$0xff]  ;;  %v5103_v4 = vld [vmem:[#allocation2 + $0x260] sm:$0xff] }
 0xa7f   : > { %v8224_v10 = vpop.eup %8223  ;;  %v4584_v12 = vmul.f32 0.70710677, %v4573_v7 }
 0xa80   : > { %v8226_v14 = vpop.eup %8225  ;;  %v4585_v56 = vmul.f32 0.70710677, %v4575_v9  ;;  %v4594_v35 = vadd.f32 1.0, %v8224_v10 }
 0xa81   : > { %8235 = verf.f32 %v4584_v12  ;;  %v4595_v16 = vadd.f32 1.0, %v8226_v14  ;;  %v5108_v12 = vld [vmem:[#allocation2 + $0x288] sm:$0xff]  ;;  %v5110_v14 = vld [vmem:[#allocation2 + $0x298] sm:$0xff] }
 0xa82   : > { %8237 = verf.f32 %v4585_v56  ;;  %v4602_v19 = vmul.f32 %v4594_v35, %v4555_v48  ;;  %v7621_v56 = vpack.c.bf16 %v5110_v14, %v5108_v12  ;;  %v5107_v35 = vld [vmem:[#allocation2 + $0x280] sm:$0xff]  ;;  %v5144_v12 = vld [vmem:[#allocation2 + $0x3a8] sm:$0xff]  ;;  %v5146_v14 = vld [vmem:[#allocation2 + $0x3b8] sm:$0xff] }
 0xa83   : > { %v8228_v29 = vpop.eup %8227  ;;  %v4603_v22 = vmul.f32 %v4595_v16, %v4557_v51  ;;  %v7605_v51 = vpack.c.bf16 %v5094_v45, %v5092_v39  ;;  %v5126_v39 = vld [vmem:[#allocation2 + $0x318] sm:$0xff] }
 0xa84   : > { %v8230_v40 = vpop.eup %8229  ;;  %v4596_v17 = vadd.f32 1.0, %v8228_v29  ;;  %v5109_v29 = vld [vmem:[#allocation2 + $0x290] sm:$0xff] }
 0xa85   : > { %v4597_v18 = vadd.f32 1.0, %v8230_v40  ;;  %v7623_v16 = vpack.c.bf16 %v5109_v29, %v5107_v35  ;;  %v5112_v40 = vld [vmem:[#allocation2 + $0x2a8] sm:$0xff]  ;;  %v5143_v35 = vld [vmem:[#allocation2 + $0x3a0] sm:$0xff]  ;;  %v5145_v29 = vld [vmem:[#allocation2 + $0x3b0] sm:$0xff] }
 0xa86   : > { %v4604_v20 = vmul.f32 %v4596_v17, %v4561_v57  ;;  %v4577_v57 = vld [vmem:[%s9036_s17] sm:$0xff]  ;;  %v5114_v17 = vld [vmem:[#allocation2 + $0x2b8] sm:$0xff] }
 0xa87   : > { %v8232_v21 = vpop.eup %8231  ;;  %v4605_v23 = vmul.f32 %v4597_v18, %v4563_v59  ;;  %v7609_v59 = vpack.c.bf16 %v5098_v55, %v5096_v54  ;;  %v7625_v18 = vpack.c.bf16 %v5114_v17, %v5112_v40  ;;  %v5129_v54 = vld [vmem:[#allocation2 + $0x330] sm:$0xff]  ;;  %v5148_v40 = vld [vmem:[#allocation2 + $0x3c8] sm:$0xff]  ;;  %v5150_v17 = vld [vmem:[#allocation2 + $0x3d8] sm:$0xff] }
 0xa88   : > { %v8234_v24 = vpop.eup %8233  ;;  %v7535_v26 = vpack.c.bf16 %v4604_v20, %v4602_v19  ;;  %v4598_v44 = vadd.f32 1.0, %v8232_v21  ;;  %v5111_v19 = vld [vmem:[#allocation2 + $0x2a0] sm:$0xff]  ;;  %v5113_v20 = vld [vmem:[#allocation2 + $0x2b0] sm:$0xff]  ;;  %v7643_v55 = vpack.c.bf16 %v5129_v54, %v5127_v15 }
 0xa89   : > { %v7533_v28 = vpack.c.bf16 %v4605_v23, %v4603_v22  ;;  %v4599_v32 = vadd.f32 1.0, %v8234_v24  ;;  %v7627_v21 = vpack.c.bf16 %v5113_v20, %v5111_v19  ;;  %v5116_v22 = vld [vmem:[#allocation2 + $0x2c8] sm:$0xff]  ;;  %v5118_v23 = vld [vmem:[#allocation2 + $0x2d8] sm:$0xff]  ;;  %v5147_v19 = vld [vmem:[#allocation2 + $0x3c0] sm:$0xff] }
 0xa8a   : > { %v4606_v37 = vmul.f32 %v4598_v44, %v4567_v0  ;;  %v7611_v0 = vpack.c.bf16 %v5097_v61, %v5095_v60  ;;  %v7629_v24 = vpack.c.bf16 %v5118_v23, %v5116_v22  ;;  %v5131_v60 = vld [vmem:[#allocation2 + $0x340] sm:$0xff]  ;;  %v5133_v61 = vld [vmem:[#allocation2 + $0x350] sm:$0xff]  ;;  %v5152_v22 = vld [vmem:[#allocation2 + $0x3e8] sm:$0xff] }
 0xa8b   : > { %v8236_v30 = vpop.eup %8235  ;;  %7534 = vmatprep.subr.bf16.mxu1 %v7533_v28  ;;  %v4607_v46 = vmul.f32 %v4599_v32, %v4569_v2  ;;  %v5099_v2 = vld [vmem:[#allocation2 + $0x240] sm:$0xff]  ;;  %v5117_v28 = vld [vmem:[#allocation2 + $0x2d0] sm:$0xff]  ;;  %v5122_v32 = vld [vmem:[#allocation2 + $0x2f8] sm:$0xff]  ;;  %v7647_v62 = vpack.c.bf16 %v5133_v61, %v5131_v60 }
 0xa8c   : > { %v8238_v33 = vpop.eup %8237  ;;  %v4600_v34 = vadd.f32 1.0, %v8236_v30  ;;  %7536 = vmatpush1.bf16.msra.mxu1 %v7535_v26  ;;  %v7615_v42 = vpack.c.bf16 %v5101_v3, %v5099_v2  ;;  %v5115_v26 = vld [vmem:[#allocation2 + $0x2c0] sm:$0xff]  ;;  %v5120_v30 = vld [vmem:[#allocation2 + $0x2e8] sm:$0xff]  ;;  %v5137_v3 = vld [vmem:[#allocation2 + $0x370] sm:$0xff] }
 0xa8d   : > { %v4601_v36 = vadd.f32 1.0, %v8238_v33  ;;  %v7631_v44 = vpack.c.bf16 %v5117_v28, %v5115_v26  ;;  %v7633_v33 = vpack.c.bf16 %v5122_v32, %v5120_v30  ;;  %v5135_v2 = vld [vmem:[#allocation2 + $0x360] sm:$0xff]  ;;  %v5149_v20 = vld [vmem:[#allocation2 + $0x3d0] sm:$0xff]  ;;  %v5154_v23 = vld [vmem:[#allocation2 + $0x3f8] sm:$0xff] }
 0xa8e   : > { %v4608_v38 = vmul.f32 %v4600_v34, %v4573_v7  ;;  %v7617_v7 = vpack.c.bf16 %v5106_v6, %v5104_v5  ;;  %v5119_v34 = vld [vmem:[#allocation2 + $0x2e0] sm:$0xff]  ;;  %v7651_v5 = vpack.c.bf16 %v5137_v3, %v5135_v2  ;;  %v5140_v6 = vld [vmem:[#allocation2 + $0x388] sm:$0xff]  ;;  %v5153_v28 = vld [vmem:[#allocation2 + $0x3f0] sm:$0xff] }
 0xa8f   : > { %v4609_v47 = vmul.f32 %v4601_v36, %v4575_v9  ;;  %v5105_v9 = vld [vmem:[#allocation2 + $0x270] sm:$0xff]  ;;  %v5151_v26 = vld [vmem:[#allocation2 + $0x3e0] sm:$0xff]  ;;  %v5378_v30 = vld [vmem:[#allocation2 + $0x608] sm:$0xff] }
 0xa90   : > { %v7539_v48 = vpack.c.bf16 %v4608_v38, %v4606_v37  ;;  %v7619_v10 = vpack.c.bf16 %v5105_v9, %v5103_v4  ;;  %v5121_v36 = vld [vmem:[#allocation2 + $0x2f0] sm:$0xff]  ;;  %v5124_v38 = vld [vmem:[#allocation2 + $0x308] sm:$0xff]  ;;  %v5139_v4 = vld [vmem:[#allocation2 + $0x380] sm:$0xff] }
 0xa91   : > { %v7537_v50 = vpack.c.bf16 %v4609_v47, %v4607_v46  ;;  %v7635_v37 = vpack.c.bf16 %v5121_v36, %v5119_v34  ;;  %v7637_v45 = vpack.c.bf16 %v5126_v39, %v5124_v38  ;;  %v5123_v46 = vld [vmem:[#allocation2 + $0x300] sm:$0xff]  ;;  %v5125_v47 = vld [vmem:[#allocation2 + $0x310] sm:$0xff]  ;;  %v5380_v32 = vld [vmem:[#allocation2 + $0x618] sm:$0xff]  ;;  %v4614_v34 = vpop.permute.xlu1 %4613 }
 0xa92   : > { %v5141_v9 = vld [vmem:[#allocation2 + $0x390] sm:$0xff] }
 0xa93   : > { %7538 = vmatprep.subr.bf16.mxu1 %v7537_v50  ;;  %v5128_v50 = vld [vmem:[#allocation2 + $0x328] sm:$0xff] }
 0xa94   : > { %7540 = vmatpush1.bf16.msra.mxu1 %v7539_v48  ;;  %v7639_v48 = vpack.c.bf16 %v5125_v47, %v5123_v46 }
 0xa95   : > { %7606 = vmatprep.subr.bf16.mxu1 %v7605_v51  ;;  %v5130_v51 = vld [vmem:[#allocation2 + $0x338] sm:$0xff] }
 0xa96   : > { %v7641_v52 = vpack.c.bf16 %v5130_v51, %v5128_v50 }
 0xa97   : > { %6375 = vmatmul.mubr.msk.f32.vlgmr.msra.gmra.mrb[32].mxu1 %vm4616_vm3, %v4577_v57  ;;  %v5132_v57 = vld [vmem:[#allocation2 + $0x348] sm:$0xff] }
 0xa98   : > { %7608 = vmatpush1.bf16.msra.mxu1 %v7607_v58  ;;  %v5134_v58 = vld [vmem:[#allocation2 + $0x358] sm:$0xff] }
 0xa99   : > { %7610 = vmatprep.subr.bf16.mxu1 %v7609_v59  ;;  %v7645_v59 = vpack.c.bf16 %v5134_v58, %v5132_v57 }
 0xa9c   : > { %7612 = vmatpush1.bf16.msra.mxu1 %v7611_v0  ;;  %v5138_v0 = vld [vmem:[#allocation2 + $0x378] sm:$0xff] }
 0xa9d   : > { %7614 = vmatprep.subr.bf16.mxu1 %v7613_v27  ;;  %v7649_v27 = vpack.c.bf16 %v5138_v0, %v5136_v63 }
 0xaa0   : > { %7616 = vmatpush1.bf16.msra.mxu1 %v7615_v42  ;;  %v5142_v42 = vld [vmem:[#allocation2 + $0x398] sm:$0xff] }
 0xaa1   : > { %7618 = vmatprep.subr.bf16.mxu1 %v7617_v7  ;;  %v7653_v7 = vpack.c.bf16 %v5142_v42, %v5140_v6 }
 0xaa4   : > { %7620 = vmatpush1.bf16.msra.mxu1 %v7619_v10  ;;  %v7655_v10 = vpack.c.bf16 %v5141_v9, %v5139_v4 }
 0xaa5   : > { %7622 = vmatprep.subr.bf16.mxu1 %v7621_v56  ;;  %v7657_v56 = vpack.c.bf16 %v5146_v14, %v5144_v12 }
 0xaa8   : > { %7624 = vmatpush1.bf16.msra.mxu1 %v7623_v16  ;;  %v7659_v16 = vpack.c.bf16 %v5145_v29, %v5143_v35 }
 0xaa9   : > { %7626 = vmatprep.subr.bf16.mxu1 %v7625_v18  ;;  %v7661_v18 = vpack.c.bf16 %v5150_v17, %v5148_v40 }
 0xaac   : > { %7628 = vmatpush1.bf16.msra.mxu1 %v7627_v21  ;;  %v7663_v21 = vpack.c.bf16 %v5149_v20, %v5147_v19 }
 0xaad   : > { %7630 = vmatprep.subr.bf16.mxu1 %v7629_v24  ;;  %v7665_v24 = vpack.c.bf16 %v5154_v23, %v5152_v22  ;;  %v4743_v23 = vpop.permute.xlu0 %4742 }
 0xab0   : > { %7632 = vmatpush1.bf16.msra.mxu1 %v7631_v44  ;;  %v7667_v44 = vpack.c.bf16 %v5153_v28, %v5151_v26  ;;  %v5377_v28 = vld [vmem:[#allocation2 + $0x600] sm:$0xff] }
 0xab1   : > { %7634 = vmatprep.subr.bf16.mxu1 %v7633_v33  ;;  %v7733_v33 = vpack.c.bf16 %v5380_v32, %v5378_v30  ;;  %v4751_v30 = vpop.permute.xlu1 %4750 }
 0xab4   : > { %7636 = vmatpush1.bf16.msra.mxu1 %v7635_v37 }
 0xab5   : > { %7638 = vmatprep.subr.bf16.mxu1 %v7637_v45 }
 0xab8   : > { %7640 = vmatpush1.bf16.msra.mxu1 %v7639_v48 }
 0xab9   : > { %7642 = vmatprep.subr.bf16.mxu1 %v7641_v52 }
 0xabc   : > { %7644 = vmatpush1.bf16.msra.mxu1 %v7643_v55 }
 0xabd   : > { %7646 = vmatprep.subr.bf16.mxu1 %v7645_v59 }
 0xac0   : > { %7648 = vmatpush1.bf16.msra.mxu1 %v7647_v62 }
 0xac1   : > { %7650 = vmatprep.subr.bf16.mxu1 %v7649_v27 }
 0xac4   : > { %7652 = vmatpush1.bf16.msra.mxu1 %v7651_v5 }
 0xac5   : > { %7654 = vmatprep.subr.bf16.mxu1 %v7653_v7 }
 0xac8   : > { %7656 = vmatpush1.bf16.msra.mxu1 %v7655_v10 }
 0xac9   : > { %7658 = vmatprep.subr.bf16.mxu1 %v7657_v56 }
 0xacc   : > { %7660 = vmatpush1.bf16.msra.mxu1 %v7659_v16 }
 0xacd   : > { %7662 = vmatprep.subr.bf16.mxu1 %v7661_v18 }
 0xad0   : > { %7664 = vmatpush1.bf16.msra.mxu1 %v7663_v21 }
 0xad1   : > { %7666 = vmatprep.subr.bf16.mxu1 %v7665_v24 }
 0xad4   : > { %7668 = vmatpush1.bf16.msra.mxu1 %v7667_v44  ;;  %v5379_v44 = vld [vmem:[#allocation2 + $0x610] sm:$0xff] }
 0xad5   : > { %7734 = vmatprep.subr.bf16.mxu1 %v7733_v33  ;;  %v4947_v33 = vld [vmem:[#allocation2 + $0x8] sm:$0xff] }
 0xb6a   : > { %v4686_v36 = vpop.f32.mrb[32].mxu1 }
 0xb6b   : > { %v4687_v37 = vadd.f32 %v4686_v36, %v4614_v34  ;;  %v4688_v38 = vpop.f32.mrb[33].mxu1 }
 0xb6c   : > { %v4689_v39 = vadd.f32 %v4688_v38, %v4614_v34  ;;  %v4949_v34 = vld [vmem:[#allocation2 + $0x18] sm:$0xff]  ;;  %v4946_v38 = vld [vmem:[#allocation2] sm:$0xff] }
 0xb6d   : > { %v8845_v45 = vadd.f32 %v4687_v37, %v8741_v13  ;;  %v4759_v37 = vld [vmem:[#allocation6] sm:$0xff] }
 0xb6e   : > { %v8848_v46 = vadd.f32 %v4689_v39, %v8739_v8  ;;  %v4948_v39 = vld [vmem:[#allocation2 + $0x10] sm:$0xff] }
 0xb6f   : > { %v4697_v47 = vrot.slane %v8845_v45, 4  ;;  %v4709_v48 = vmul.f32 %v8845_v45, %v8845_v45 }
 0xb70   : > { %v4703_v50 = vrot.slane %v8848_v46, 4  ;;  %v4710_v51 = vmul.f32 %v8848_v46, %v8848_v46 }
 0xb71   : > { %v4698_v52 = vadd.f32 %v4697_v47, %v8845_v45  ;;  %v4711_v15 = vrot.slane %v4709_v48, 4 }
 0xb72   : > { %v4704_v54 = vadd.f32 %v4703_v50, %v8848_v46  ;;  %v4717_v13 = vrot.slane %v4710_v51, 4  ;;  %v5382_v50 = vld [vmem:[#allocation2 + $0x628] sm:$0xff] }
 0xb73   : > { %v4699_v55 = vrot.slane %v4698_v52, 2  ;;  %v4712_v57 = vadd.f32 %v4711_v15, %v4709_v48  ;;  %v7735_v48 = vpack.c.bf16 %v5379_v44, %v5377_v28  ;;  %v7541_v15 = vpack.c.bf16 %v4949_v34, %v4947_v33  ;;  %v5393_v44 = vld [vmem:[#allocation2 + $0x680] sm:$0xff]  ;;  %v5398_v33 = vld [vmem:[#allocation2 + $0x6a8] sm:$0xff]  ;;  %v5400_v34 = vld [vmem:[#allocation2 + $0x6b8] sm:$0xff] }
 0xb74   : > { %v4705_v8 = vrot.slane %v4704_v54, 2  ;;  %v4718_v58 = vadd.f32 %v4717_v13, %v4710_v51  ;;  %v5384_v51 = vld [vmem:[#allocation2 + $0x638] sm:$0xff]  ;;  %v4951_v13 = vld [vmem:[#allocation2 + $0x28] sm:$0xff] }
 0xb75   : > { %v4700_v59 = vadd.f32 %v4699_v55, %v4698_v52  ;;  %v4713_v60 = vrot.slane %v4712_v57, 2  ;;  %v5381_v52 = vld [vmem:[#allocation2 + $0x620] sm:$0xff]  ;;  %v4953_v55 = vld [vmem:[#allocation2 + $0x38] sm:$0xff] }
 0xb76   : > { %v4706_v61 = vadd.f32 %v4705_v8, %v4704_v54  ;;  %v4719_v62 = vrot.slane %v4718_v58, 2  ;;  %v5383_v54 = vld [vmem:[#allocation2 + $0x630] sm:$0xff]  ;;  %v7543_v8 = vpack.c.bf16 %v4948_v39, %v4946_v38  ;;  %v4962_v38 = vld [vmem:[#allocation2 + $0x80] sm:$0xff] }
 0xb77   : > { %v4701_v63 = vrot.slane %v4700_v59, 1  ;;  %v4714_v0 = vadd.f32 %v4713_v60, %v4712_v57  ;;  %v7737_v60 = vpack.c.bf16 %v5384_v51, %v5382_v50  ;;  %v4964_v39 = vld [vmem:[#allocation2 + $0x90] sm:$0xff]  ;;  %v4967_v50 = vld [vmem:[#allocation2 + $0xa8] sm:$0xff]  ;;  %v4969_v51 = vld [vmem:[#allocation2 + $0xb8] sm:$0xff] }
 0xb78   : > { %v4707_v27 = vrot.slane %v4706_v61, 1  ;;  %v4720_v2 = vadd.f32 %v4719_v62, %v4718_v58  ;;  %v5386_v58 = vld [vmem:[#allocation2 + $0x648] sm:$0xff]  ;;  %v4952_v62 = vld [vmem:[#allocation2 + $0x30] sm:$0xff] }
 0xb79   : > { %v4702_v3 = vadd.f32 %v4701_v63, %v4700_v59  ;;  %v4715_v5 = vrot.slane %v4714_v0, 1  ;;  %v5388_v59 = vld [vmem:[#allocation2 + $0x658] sm:$0xff]  ;;  %v7739_v63 = vpack.c.bf16 %v5383_v54, %v5381_v52  ;;  %v7753_v52 = vpack.c.bf16 %v5400_v34, %v5398_v33  ;;  %v5399_v54 = vld [vmem:[#allocation2 + $0x6b0] sm:$0xff] }
 0xb7a   : > { %v4708_v6 = vadd.f32 %v4707_v27, %v4706_v61  ;;  %v4721_v42 = vrot.slane %v4720_v2, 1  ;;  %v4950_v61 = vld [vmem:[#allocation2 + $0x20] sm:$0xff]  ;;  %v4955_v27 = vld [vmem:[#allocation2 + $0x48] sm:$0xff]  ;;  %v4980_v33 = vld [vmem:[#allocation2 + $0x110] sm:$0xff] }
 0xb7b   : > { %v4716_v7 = vadd.f32 %v4715_v5, %v4714_v0  ;;  %v4723_v4 = vmul.f32 0.125, %v4702_v3  ;;  %v7545_v0 = vpack.c.bf16 %v4953_v55, %v4951_v13  ;;  %v7741_v3 = vpack.c.bf16 %v5388_v59, %v5386_v58  ;;  %v5385_v5 = vld [vmem:[#allocation2 + $0x640] sm:$0xff]  ;;  %v5402_v55 = vld [vmem:[#allocation2 + $0x6c8] sm:$0xff]  ;;  %v4968_v59 = vld [vmem:[#allocation2 + $0xb0] sm:$0xff] }
 0xb7c   : > { %v4722_v9 = vadd.f32 %v4721_v42, %v4720_v2  ;;  %v4724_v10 = vmul.f32 0.125, %v4708_v6  ;;  %v4957_v2 = vld [vmem:[#allocation2 + $0x58] sm:$0xff]  ;;  %v5387_v6 = vld [vmem:[#allocation2 + $0x650] sm:$0xff]  ;;  %v7547_v42 = vpack.c.bf16 %v4952_v62, %v4950_v61  ;;  %v7559_v13 = vpack.c.bf16 %v4964_v39, %v4962_v38  ;;  %v4966_v58 = vld [vmem:[#allocation2 + $0xa0] sm:$0xff] }
 0xb7d   : > { %v4725_v12 = vmul.f32 0.125, %v4716_v7  ;;  %v4727_v14 = vmul.f32 %v4723_v4, %v4723_v4  ;;  %v4735_v18 = vsub.f32 %v8845_v45, %v4723_v4  ;;  %v5390_v7 = vld [vmem:[#allocation2 + $0x668] sm:$0xff]  ;;  %v5392_v4 = vld [vmem:[#allocation2 + $0x678] sm:$0xff] }
 0xb7e   : > { %v4726_v56 = vmul.f32 0.125, %v4722_v9  ;;  %v4728_v35 = vmul.f32 %v4724_v10, %v4724_v10  ;;  %v4736_v20 = vsub.f32 %v8848_v46, %v4724_v10  ;;  %v7549_v9 = vpack.c.bf16 %v4957_v2, %v4955_v27  ;;  %v4954_v10 = vld [vmem:[#allocation2 + $0x40] sm:$0xff]  ;;  %v4971_v61 = vld [vmem:[#allocation2 + $0xc8] sm:$0xff]  ;;  %v4973_v62 = vld [vmem:[#allocation2 + $0xd8] sm:$0xff] }
 0xb7f   : > { %v4729_v29 = vsub.f32 %v4725_v12, %v4727_v14  ;;  %v4956_v12 = vld [vmem:[#allocation2 + $0x50] sm:$0xff]  ;;  %v7743_v14 = vpack.c.bf16 %v5387_v6, %v5385_v5  ;;  %v7563_v2 = vpack.c.bf16 %v4968_v59, %v4966_v58  ;;  %v5408_v5 = vld [vmem:[#allocation2 + $0x6f8] sm:$0xff]  ;;  %v7565_v6 = vpack.c.bf16 %v4973_v62, %v4971_v61 }
 0xb80   : > { %v4730_v16 = vsub.f32 %v4726_v56, %v4728_v35  ;;  %v4959_v56 = vld [vmem:[#allocation2 + $0x68] sm:$0xff]  ;;  %v4961_v35 = vld [vmem:[#allocation2 + $0x78] sm:$0xff]  ;;  %v5403_v27 = vld [vmem:[#allocation2 + $0x6d0] sm:$0xff] }
 0xb81   : > { %v4731_v40 = vadd.f32 1e-05, %v4729_v29  ;;  %v7745_v29 = vpack.c.bf16 %v5392_v4, %v5390_v7  ;;  %v4972_v7 = vld [vmem:[#allocation2 + $0xd0] sm:$0xff]  ;;  %v4985_v38 = vld [vmem:[#allocation2 + $0x138] sm:$0xff] }
 0xb82   : > { %v4732_v17 = vadd.f32 1e-05, %v4730_v16  ;;  %v5389_v16 = vld [vmem:[#allocation2 + $0x660] sm:$0xff]  ;;  %v4989_v58 = vld [vmem:[#allocation2 + $0x158] sm:$0xff]  ;;  %v5419_v61 = vld [vmem:[#allocation2 + $0x750] sm:$0xff] }
 0xb83   : > { %8239 = vrsqrt.f32 %v4731_v40  ;;  %v5391_v40 = vld [vmem:[#allocation2 + $0x670] sm:$0xff] }
 0xb84   : > { %8241 = vrsqrt.f32 %v4732_v17  ;;  %v7551_v17 = vpack.c.bf16 %v4956_v12, %v4954_v10  ;;  %v4977_v10 = vld [vmem:[#allocation2 + $0xf8] sm:$0xff] }
 0xb8d   : > { %v8240_v19 = vpop.eup %8239 }
 0xb8e   : > { %v8242_v21 = vpop.eup %8241  ;;  %v4737_v22 = vmul.f32 %v8240_v19, %v4735_v18  ;;  %v5394_v18 = vld [vmem:[#allocation2 + $0x688] sm:$0xff]  ;;  %v5396_v19 = vld [vmem:[#allocation2 + $0x698] sm:$0xff] }
 0xb8f   : > { %v4738_v24 = vmul.f32 %v8242_v21, %v4736_v20  ;;  %v7553_v20 = vpack.c.bf16 %v4961_v35, %v4959_v56  ;;  %v4958_v21 = vld [vmem:[#allocation2 + $0x60] sm:$0xff]  ;;  %v7749_v28 = vpack.c.bf16 %v5396_v19, %v5394_v18  ;;  %v5407_v56 = vld [vmem:[#allocation2 + $0x6f0] sm:$0xff] }
 0xb90   : > { %v4745_v26 = vmul.f32 %v4743_v23, %v4737_v22  ;;  %v4960_v22 = vld [vmem:[#allocation2 + $0x70] sm:$0xff] }
 0xb91   : > { %v4746_v32 = vmul.f32 %v4743_v23, %v4738_v24  ;;  %v7747_v23 = vpack.c.bf16 %v5391_v40, %v5389_v16  ;;  %v4963_v24 = vld [vmem:[#allocation2 + $0x88] sm:$0xff]  ;;  %v5412_v16 = vld [vmem:[#allocation2 + $0x718] sm:$0xff]  ;;  %v4976_v18 = vld [vmem:[#allocation2 + $0xf0] sm:$0xff] }
 0xb92   : > { %v8860_v36 = vadd.f32 %v4751_v30, %v4745_v26  ;;  %v4965_v26 = vld [vmem:[#allocation2 + $0x98] sm:$0xff] }
 0xb93   : > { %v8862_v47 = vadd.f32 %v4751_v30, %v4746_v32  ;;  %v5395_v30 = vld [vmem:[#allocation2 + $0x690] sm:$0xff]  ;;  %v7555_v32 = vpack.c.bf16 %v4960_v22, %v4958_v21  ;;  %v4981_v21 = vld [vmem:[#allocation2 + $0x118] sm:$0xff] }
 0xb95   : > { %4763 = vmatprep.subr.mxu0 %v8862_v47  ;;  %5219 = vmatprep.mubr.f32.mxu1 %v8862_v47  ;;  %v4755_v57 = vadd.f32 %v8862_v47, %v8860_v36 }
 0xb96   : > { %4764 = vmatpush1.msra.mxu0 %v8860_v36  ;;  %5220 = vmatmul.mubr.f32.vlgmr.msra.gmra.mrb[34].mxu1 %v8860_v36 }
 0xb97   : > { %7736 = vmatpush1.bf16.msra.mxu1 %v7735_v48  ;;  %6376 = vmatmul.mubr.msk.f32.vlgmr.msra.gmra.mrb[18].mxu0 %vm1252_vm2, %v4759_v37  ;;  %v7557_v37 = vpack.c.bf16 %v4965_v26, %v4963_v24  ;;  %v7751_v48 = vpack.c.bf16 %v5395_v30, %v5393_v44  ;;  %v5411_v24 = vld [vmem:[#allocation2 + $0x710] sm:$0xff]  ;;  %v5416_v44 = vld [vmem:[#allocation2 + $0x738] sm:$0xff] }
 0xb98   : > { %7542 = vmatprep.subr.bf16.mxu0 %v7541_v15  ;;  %5505 = vmatprep.mubr.f32.mxu1 %v8862_v47  ;;  %v5397_v15 = vld [vmem:[#allocation2 + $0x6a0] sm:$0xff] }
 0xb99   : > { %4756 = vadd.xlane.f32.xlu1 %v4755_v57  ;;  %7544 = vmatpush1.bf16.msra.mxu0 %v7543_v8  ;;  %v5404_v57 = vld [vmem:[#allocation2 + $0x6d8] sm:$0xff]  ;;  %v7561_v8 = vpack.c.bf16 %v4969_v51, %v4967_v50  ;;  %v5415_v50 = vld [vmem:[#allocation2 + $0x730] sm:$0xff] }
 0xb9a   : > { %5074 = vmatprep.mubr.f32.mxu0 %v8862_v47  ;;  %7738 = vmatprep.subr.bf16.mxu1 %v7737_v60  ;;  %v7755_v60 = vpack.c.bf16 %v5399_v54, %v5397_v15  ;;  %v5420_v15 = vld [vmem:[#allocation2 + $0x758] sm:$0xff] }
 0xb9b   : > { %7740 = vmatpush1.bf16.msra.mxu1 %v7739_v63  ;;  %7546 = vmatprep.subr.bf16.mxu0 %v7545_v0  ;;  %v7757_v63 = vpack.c.bf16 %v5404_v57, %v5402_v55  ;;  %v5401_v0 = vld [vmem:[#allocation2 + $0x6c0] sm:$0xff]  ;;  %v4984_v55 = vld [vmem:[#allocation2 + $0x130] sm:$0xff] }
 0xb9c   : > { %7742 = vmatprep.subr.bf16.mxu1 %v7741_v3  ;;  %v5406_v3 = vld [vmem:[#allocation2 + $0x6e8] sm:$0xff]  ;;  %v7759_v4 = vpack.c.bf16 %v5403_v27, %v5401_v0  ;;  %v5424_v0 = vld [vmem:[#allocation2 + $0x778] sm:$0xff] }
 0xb9d   : > { %7548 = vmatpush1.bf16.msra.mxu0 %v7547_v42  ;;  %v4970_v42 = vld [vmem:[#allocation2 + $0xc0] sm:$0xff]  ;;  %v7761_v12 = vpack.c.bf16 %v5408_v5, %v5406_v3  ;;  %v4988_v3 = vld [vmem:[#allocation2 + $0x150] sm:$0xff] }
 0xb9e   : > { %7550 = vmatprep.subr.bf16.mxu0 %v7549_v9  ;;  %v4975_v9 = vld [vmem:[#allocation2 + $0xe8] sm:$0xff]  ;;  %v7567_v35 = vpack.c.bf16 %v4972_v7, %v4970_v42  ;;  %v4993_v42 = vld [vmem:[#allocation2 + $0x178] sm:$0xff] }
 0xb9f   : > { %7744 = vmatpush1.bf16.msra.mxu1 %v7743_v14  ;;  %v5405_v14 = vld [vmem:[#allocation2 + $0x6e0] sm:$0xff]  ;;  %v7569_v40 = vpack.c.bf16 %v4977_v10, %v4975_v9  ;;  %v5423_v9 = vld [vmem:[#allocation2 + $0x770] sm:$0xff] }
 0xba0   : > { %7746 = vmatprep.subr.bf16.mxu1 %v7745_v29  ;;  %v5410_v29 = vld [vmem:[#allocation2 + $0x708] sm:$0xff]  ;;  %v7763_v19 = vpack.c.bf16 %v5407_v56, %v5405_v14  ;;  %v5428_v14 = vld [vmem:[#allocation2 + $0x798] sm:$0xff] }
 0xba1   : > { %7552 = vmatpush1.bf16.msra.mxu0 %v7551_v17  ;;  %v4974_v17 = vld [vmem:[#allocation2 + $0xe0] sm:$0xff]  ;;  %v7765_v22 = vpack.c.bf16 %v5412_v16, %v5410_v29  ;;  %v4992_v29 = vld [vmem:[#allocation2 + $0x170] sm:$0xff] }
 0xba2   : > { %7554 = vmatprep.subr.bf16.mxu0 %v7553_v20  ;;  %v4979_v20 = vld [vmem:[#allocation2 + $0x108] sm:$0xff]  ;;  %v7571_v26 = vpack.c.bf16 %v4976_v18, %v4974_v17  ;;  %v4997_v17 = vld [vmem:[#allocation2 + $0x198] sm:$0xff] }
 0xba3   : > { %7748 = vmatpush1.bf16.msra.mxu1 %v7747_v23  ;;  %v5409_v23 = vld [vmem:[#allocation2 + $0x700] sm:$0xff]  ;;  %v7573_v30 = vpack.c.bf16 %v4981_v21, %v4979_v20  ;;  %v5427_v20 = vld [vmem:[#allocation2 + $0x790] sm:$0xff] }
 0xba4   : > { %7750 = vmatprep.subr.bf16.mxu1 %v7749_v28  ;;  %v5414_v28 = vld [vmem:[#allocation2 + $0x728] sm:$0xff]  ;;  %v7767_v34 = vpack.c.bf16 %v5411_v24, %v5409_v23  ;;  %v5432_v23 = vld [vmem:[#allocation2 + $0x7b8] sm:$0xff] }
 0xba5   : > { %7556 = vmatpush1.bf16.msra.mxu0 %v7555_v32  ;;  %v4978_v32 = vld [vmem:[#allocation2 + $0x100] sm:$0xff]  ;;  %v7769_v39 = vpack.c.bf16 %v5416_v44, %v5414_v28  ;;  %v4996_v28 = vld [vmem:[#allocation2 + $0x190] sm:$0xff] }
 0xba6   : > { %7558 = vmatprep.subr.bf16.mxu0 %v7557_v37  ;;  %v4983_v37 = vld [vmem:[#allocation2 + $0x128] sm:$0xff]  ;;  %v7575_v51 = vpack.c.bf16 %v4980_v33, %v4978_v32  ;;  %v5001_v32 = vld [vmem:[#allocation2 + $0x1b8] sm:$0xff] }
 0xba7   : > { %7752 = vmatpush1.bf16.msra.mxu1 %v7751_v48  ;;  %v5413_v48 = vld [vmem:[#allocation2 + $0x720] sm:$0xff]  ;;  %v7577_v54 = vpack.c.bf16 %v4985_v38, %v4983_v37  ;;  %v5431_v37 = vld [vmem:[#allocation2 + $0x7b0] sm:$0xff] }
 0xba8   : > { %7754 = vmatprep.subr.bf16.mxu1 %v7753_v52  ;;  %v5418_v52 = vld [vmem:[#allocation2 + $0x748] sm:$0xff]  ;;  %v7771_v57 = vpack.c.bf16 %v5415_v50, %v5413_v48  ;;  %v5436_v48 = vld [vmem:[#allocation2 + $0x7d8] sm:$0xff] }
 0xba9   : > { %7560 = vmatpush1.bf16.msra.mxu0 %v7559_v13  ;;  %v4982_v13 = vld [vmem:[#allocation2 + $0x120] sm:$0xff]  ;;  %v7773_v59 = vpack.c.bf16 %v5420_v15, %v5418_v52  ;;  %v5000_v52 = vld [vmem:[#allocation2 + $0x1b0] sm:$0xff] }
 0xbaa   : > { %7562 = vmatprep.subr.bf16.mxu0 %v7561_v8  ;;  %v4987_v8 = vld [vmem:[#allocation2 + $0x148] sm:$0xff]  ;;  %v7579_v62 = vpack.c.bf16 %v4984_v55, %v4982_v13  ;;  %v5005_v13 = vld [vmem:[#allocation2 + $0x1d8] sm:$0xff] }
 0xbab   : > { %7756 = vmatpush1.bf16.msra.mxu1 %v7755_v60  ;;  %v5417_v60 = vld [vmem:[#allocation2 + $0x740] sm:$0xff]  ;;  %v7581_v27 = vpack.c.bf16 %v4989_v58, %v4987_v8  ;;  %v5435_v8 = vld [vmem:[#allocation2 + $0x7d0] sm:$0xff] }
 0xbac   : > { %7758 = vmatprep.subr.bf16.mxu1 %v7757_v63  ;;  %v5422_v63 = vld [vmem:[#allocation2 + $0x768] sm:$0xff]  ;;  %v7775_v5 = vpack.c.bf16 %v5419_v61, %v5417_v60  ;;  %v5440_v60 = vld [vmem:[#allocation2 + $0x7f8] sm:$0xff] }
 0xbad   : > { %7564 = vmatpush1.bf16.msra.mxu0 %v7563_v2  ;;  %v4986_v2 = vld [vmem:[#allocation2 + $0x140] sm:$0xff]  ;;  %v7777_v7 = vpack.c.bf16 %v5424_v0, %v5422_v63  ;;  %v5004_v63 = vld [vmem:[#allocation2 + $0x1d0] sm:$0xff] }
 0xbae   : > { %7566 = vmatprep.subr.bf16.mxu0 %v7565_v6  ;;  %v4991_v6 = vld [vmem:[#allocation2 + $0x168] sm:$0xff]  ;;  %v7583_v10 = vpack.c.bf16 %v4988_v3, %v4986_v2  ;;  %v5009_v2 = vld [vmem:[#allocation2 + $0x1f8] sm:$0xff] }
 0xbaf   : > { %7760 = vmatpush1.bf16.msra.mxu1 %v7759_v4  ;;  %v5421_v4 = vld [vmem:[#allocation2 + $0x760] sm:$0xff]  ;;  %v7585_v56 = vpack.c.bf16 %v4993_v42, %v4991_v6  ;;  %v5439_v6 = vld [vmem:[#allocation2 + $0x7f0] sm:$0xff] }
 0xbb0   : > { %7762 = vmatprep.subr.bf16.mxu1 %v7761_v12  ;;  %v5426_v12 = vld [vmem:[#allocation2 + $0x788] sm:$0xff]  ;;  %v7779_v16 = vpack.c.bf16 %v5423_v9, %v5421_v4  ;;  %v5666_v4 = vld [vmem:[#allocation2 + $0xa18] sm:$0xff] }
 0xbb1   : > { %7568 = vmatpush1.bf16.msra.mxu0 %v7567_v35  ;;  %v4990_v35 = vld [vmem:[#allocation2 + $0x160] sm:$0xff]  ;;  %v7781_v18 = vpack.c.bf16 %v5428_v14, %v5426_v12  ;;  %v5008_v12 = vld [vmem:[#allocation2 + $0x1f0] sm:$0xff] }
 0xbb2   : > { %7570 = vmatprep.subr.bf16.mxu0 %v7569_v40  ;;  %v4995_v40 = vld [vmem:[#allocation2 + $0x188] sm:$0xff]  ;;  %v7587_v21 = vpack.c.bf16 %v4992_v29, %v4990_v35  ;;  %v5237_v35 = vld [vmem:[#allocation2 + $0x418] sm:$0xff] }
 0xbb3   : > { %7764 = vmatpush1.bf16.msra.mxu1 %v7763_v19  ;;  %v5425_v19 = vld [vmem:[#allocation2 + $0x780] sm:$0xff]  ;;  %v7589_v24 = vpack.c.bf16 %v4997_v17, %v4995_v40  ;;  %v5665_v40 = vld [vmem:[#allocation2 + $0xa10] sm:$0xff] }
 0xbb4   : > { %7766 = vmatprep.subr.bf16.mxu1 %v7765_v22  ;;  %v5430_v22 = vld [vmem:[#allocation2 + $0x7a8] sm:$0xff]  ;;  %v7783_v44 = vpack.c.bf16 %v5427_v20, %v5425_v19  ;;  %v5670_v19 = vld [vmem:[#allocation2 + $0xa38] sm:$0xff] }
 0xbb5   : > { %7572 = vmatpush1.bf16.msra.mxu0 %v7571_v26  ;;  %v4994_v26 = vld [vmem:[#allocation2 + $0x180] sm:$0xff]  ;;  %v7785_v33 = vpack.c.bf16 %v5432_v23, %v5430_v22  ;;  %v5236_v22 = vld [vmem:[#allocation2 + $0x410] sm:$0xff] }
 0xbb6   : > { %7574 = vmatprep.subr.bf16.mxu0 %v7573_v30  ;;  %v4999_v30 = vld [vmem:[#allocation2 + $0x1a8] sm:$0xff]  ;;  %v7591_v38 = vpack.c.bf16 %v4996_v28, %v4994_v26  ;;  %v5241_v26 = vld [vmem:[#allocation2 + $0x438] sm:$0xff] }
 0xbb7   : > { %7768 = vmatpush1.bf16.msra.mxu1 %v7767_v34  ;;  %v5429_v34 = vld [vmem:[#allocation2 + $0x7a0] sm:$0xff]  ;;  %v7593_v50 = vpack.c.bf16 %v5001_v32, %v4999_v30  ;;  %v5669_v30 = vld [vmem:[#allocation2 + $0xa30] sm:$0xff] }
 0xbb8   : > { %7770 = vmatprep.subr.bf16.mxu1 %v7769_v39  ;;  %v5434_v39 = vld [vmem:[#allocation2 + $0x7c8] sm:$0xff]  ;;  %v7787_v15 = vpack.c.bf16 %v5431_v37, %v5429_v34  ;;  %v5674_v34 = vld [vmem:[#allocation2 + $0xa58] sm:$0xff] }
 0xbb9   : > { %7576 = vmatpush1.bf16.msra.mxu0 %v7575_v51  ;;  %v4998_v51 = vld [vmem:[#allocation2 + $0x1a0] sm:$0xff]  ;;  %v7789_v55 = vpack.c.bf16 %v5436_v48, %v5434_v39  ;;  %v5240_v39 = vld [vmem:[#allocation2 + $0x430] sm:$0xff] }
 0xbba   : > { %7578 = vmatprep.subr.bf16.mxu0 %v7577_v54  ;;  %v5003_v54 = vld [vmem:[#allocation2 + $0x1c8] sm:$0xff]  ;;  %v7595_v58 = vpack.c.bf16 %v5000_v52, %v4998_v51  ;;  %v5245_v51 = vld [vmem:[#allocation2 + $0x458] sm:$0xff] }
 0xbbb   : > { %7772 = vmatpush1.bf16.msra.mxu1 %v7771_v57  ;;  %v5433_v57 = vld [vmem:[#allocation2 + $0x7c0] sm:$0xff]  ;;  %v7597_v61 = vpack.c.bf16 %v5005_v13, %v5003_v54  ;;  %v5673_v54 = vld [vmem:[#allocation2 + $0xa50] sm:$0xff] }
 0xbbc   : > { %7774 = vmatprep.subr.bf16.mxu1 %v7773_v59  ;;  %v5438_v59 = vld [vmem:[#allocation2 + $0x7e8] sm:$0xff]  ;;  %v7791_v0 = vpack.c.bf16 %v5435_v8, %v5433_v57  ;;  %v5678_v57 = vld [vmem:[#allocation2 + $0xa78] sm:$0xff] }
 0xbbd   : > { %7580 = vmatpush1.bf16.msra.mxu0 %v7579_v62  ;;  %v5002_v62 = vld [vmem:[#allocation2 + $0x1c0] sm:$0xff]  ;;  %v7793_v3 = vpack.c.bf16 %v5440_v60, %v5438_v59  ;;  %v5244_v59 = vld [vmem:[#allocation2 + $0x450] sm:$0xff] }
 0xbbe   : > { %7582 = vmatprep.subr.bf16.mxu0 %v7581_v27  ;;  %v5007_v27 = vld [vmem:[#allocation2 + $0x1e8] sm:$0xff]  ;;  %v7599_v42 = vpack.c.bf16 %v5004_v63, %v5002_v62  ;;  %v5249_v62 = vld [vmem:[#allocation2 + $0x478] sm:$0xff] }
 0xbbf   : > { %7776 = vmatpush1.bf16.msra.mxu1 %v7775_v5  ;;  %v5437_v5 = vld [vmem:[#allocation2 + $0x7e0] sm:$0xff]  ;;  %v7601_v9 = vpack.c.bf16 %v5009_v2, %v5007_v27  ;;  %v5677_v27 = vld [vmem:[#allocation2 + $0xa70] sm:$0xff] }
 0xbc0   : > { %7778 = vmatprep.subr.bf16.mxu1 %v7777_v7  ;;  %v5664_v7 = vld [vmem:[#allocation2 + $0xa08] sm:$0xff]  ;;  %v7795_v14 = vpack.c.bf16 %v5439_v6, %v5437_v5  ;;  %v5682_v5 = vld [vmem:[#allocation2 + $0xa98] sm:$0xff] }
 0xbc1   : > { %7584 = vmatpush1.bf16.msra.mxu0 %v7583_v10  ;;  %v5006_v10 = vld [vmem:[#allocation2 + $0x1e0] sm:$0xff]  ;;  %v7861_v29 = vpack.c.bf16 %v5666_v4, %v5664_v7  ;;  %v5248_v7 = vld [vmem:[#allocation2 + $0x470] sm:$0xff] }
 0xbc2   : > { %7586 = vmatprep.subr.bf16.mxu0 %v7585_v56  ;;  %v5235_v56 = vld [vmem:[#allocation2 + $0x408] sm:$0xff]  ;;  %v7603_v17 = vpack.c.bf16 %v5008_v12, %v5006_v10  ;;  %v5253_v10 = vld [vmem:[#allocation2 + $0x498] sm:$0xff] }
 0xbc3   : > { %7780 = vmatpush1.bf16.msra.mxu1 %v7779_v16  ;;  %v5663_v16 = vld [vmem:[#allocation2 + $0xa00] sm:$0xff]  ;;  %v7669_v20 = vpack.c.bf16 %v5237_v35, %v5235_v56  ;;  %v5681_v56 = vld [vmem:[#allocation2 + $0xa90] sm:$0xff] }
 0xbc4   : > { %7782 = vmatprep.subr.bf16.mxu1 %v7781_v18  ;;  %v5668_v18 = vld [vmem:[#allocation2 + $0xa28] sm:$0xff]  ;;  %v7863_v23 = vpack.c.bf16 %v5665_v40, %v5663_v16  ;;  %v5686_v16 = vld [vmem:[#allocation2 + $0xab8] sm:$0xff] }
 0xbc5   : > { %7588 = vmatpush1.bf16.msra.mxu0 %v7587_v21  ;;  %v5234_v21 = vld [vmem:[#allocation2 + $0x400] sm:$0xff]  ;;  %v7865_v28 = vpack.c.bf16 %v5670_v19, %v5668_v18  ;;  %v5252_v18 = vld [vmem:[#allocation2 + $0x490] sm:$0xff] }
 0xbc6   : > { %7590 = vmatprep.subr.bf16.mxu0 %v7589_v24  ;;  %v5239_v24 = vld [vmem:[#allocation2 + $0x428] sm:$0xff]  ;;  %v7671_v32 = vpack.c.bf16 %v5236_v22, %v5234_v21  ;;  %v5257_v21 = vld [vmem:[#allocation2 + $0x4b8] sm:$0xff] }
 0xbc7   : > { %7784 = vmatpush1.bf16.msra.mxu1 %v7783_v44  ;;  %v5667_v44 = vld [vmem:[#allocation2 + $0xa20] sm:$0xff]  ;;  %v7673_v37 = vpack.c.bf16 %v5241_v26, %v5239_v24  ;;  %v5685_v24 = vld [vmem:[#allocation2 + $0xab0] sm:$0xff] }
 0xbc8   : > { %7786 = vmatprep.subr.bf16.mxu1 %v7785_v33  ;;  %v5672_v33 = vld [vmem:[#allocation2 + $0xa48] sm:$0xff]  ;;  %v7867_v48 = vpack.c.bf16 %v5669_v30, %v5667_v44  ;;  %v5690_v44 = vld [vmem:[#allocation2 + $0xad8] sm:$0xff] }
 0xbc9   : > { %7592 = vmatpush1.bf16.msra.mxu0 %v7591_v38  ;;  %v5238_v38 = vld [vmem:[#allocation2 + $0x420] sm:$0xff]  ;;  %v7869_v52 = vpack.c.bf16 %v5674_v34, %v5672_v33  ;;  %v5256_v33 = vld [vmem:[#allocation2 + $0x4b0] sm:$0xff] }
 0xbca   : > { %7594 = vmatprep.subr.bf16.mxu0 %v7593_v50  ;;  %v5243_v50 = vld [vmem:[#allocation2 + $0x448] sm:$0xff]  ;;  %v7675_v13 = vpack.c.bf16 %v5240_v39, %v5238_v38  ;;  %v5261_v38 = vld [vmem:[#allocation2 + $0x4d8] sm:$0xff] }
 0xbcb   : > { %7788 = vmatpush1.bf16.msra.mxu1 %v7787_v15  ;;  %v5671_v15 = vld [vmem:[#allocation2 + $0xa40] sm:$0xff]  ;;  %v7677_v8 = vpack.c.bf16 %v5245_v51, %v5243_v50  ;;  %v5689_v50 = vld [vmem:[#allocation2 + $0xad0] sm:$0xff] }
 0xbcc   : > { %7790 = vmatprep.subr.bf16.mxu1 %v7789_v55  ;;  %v5676_v55 = vld [vmem:[#allocation2 + $0xa68] sm:$0xff]  ;;  %v7871_v60 = vpack.c.bf16 %v5673_v54, %v5671_v15  ;;  %v5694_v15 = vld [vmem:[#allocation2 + $0xaf8] sm:$0xff] }
 0xbcd   : > { %7596 = vmatpush1.bf16.msra.mxu0 %v7595_v58  ;;  %v5242_v58 = vld [vmem:[#allocation2 + $0x440] sm:$0xff]  ;;  %v7873_v63 = vpack.c.bf16 %v5678_v57, %v5676_v55  ;;  %v5260_v55 = vld [vmem:[#allocation2 + $0x4d0] sm:$0xff] }
 0xbce   : > { %7598 = vmatprep.subr.bf16.mxu0 %v7597_v61  ;;  %v5247_v61 = vld [vmem:[#allocation2 + $0x468] sm:$0xff]  ;;  %v7679_v2 = vpack.c.bf16 %v5244_v59, %v5242_v58  ;;  %v5265_v58 = vld [vmem:[#allocation2 + $0x4f8] sm:$0xff] }
 0xbcf   : > { %7792 = vmatpush1.bf16.msra.mxu1 %v7791_v0  ;;  %v5675_v0 = vld [vmem:[#allocation2 + $0xa60] sm:$0xff]  ;;  %v7681_v6 = vpack.c.bf16 %v5249_v62, %v5247_v61  ;;  %v5693_v61 = vld [vmem:[#allocation2 + $0xaf0] sm:$0xff] }
 0xbd0   : > { %7794 = vmatprep.subr.bf16.mxu1 %v7793_v3  ;;  %v5680_v3 = vld [vmem:[#allocation2 + $0xa88] sm:$0xff]  ;;  %v7875_v4 = vpack.c.bf16 %v5677_v27, %v5675_v0  ;;  %v5698_v0 = vld [vmem:[#allocation2 + $0xb18] sm:$0xff] }
 0xbd1   : > { %7600 = vmatpush1.bf16.msra.mxu0 %v7599_v42  ;;  %v5246_v42 = vld [vmem:[#allocation2 + $0x460] sm:$0xff]  ;;  %v7877_v12 = vpack.c.bf16 %v5682_v5, %v5680_v3  ;;  %v5264_v3 = vld [vmem:[#allocation2 + $0x4f0] sm:$0xff] }
 0xbd2   : > { %7602 = vmatprep.subr.bf16.mxu0 %v7601_v9  ;;  %v5251_v9 = vld [vmem:[#allocation2 + $0x488] sm:$0xff]  ;;  %v7683_v35 = vpack.c.bf16 %v5248_v7, %v5246_v42  ;;  %v5269_v42 = vld [vmem:[#allocation2 + $0x518] sm:$0xff] }
 0xbd3   : > { %7796 = vmatpush1.bf16.msra.mxu1 %v7795_v14  ;;  %v5679_v14 = vld [vmem:[#allocation2 + $0xa80] sm:$0xff]  ;;  %v7685_v40 = vpack.c.bf16 %v5253_v10, %v5251_v9  ;;  %v5697_v9 = vld [vmem:[#allocation2 + $0xb10] sm:$0xff] }
 0xbd4   : > { %7862 = vmatprep.subr.bf16.mxu1 %v7861_v29  ;;  %v5684_v29 = vld [vmem:[#allocation2 + $0xaa8] sm:$0xff]  ;;  %v7879_v19 = vpack.c.bf16 %v5681_v56, %v5679_v14  ;;  %v5702_v14 = vld [vmem:[#allocation2 + $0xb38] sm:$0xff] }
 0xbd5   : > { %7604 = vmatpush1.bf16.msra.mxu0 %v7603_v17  ;;  %v5250_v17 = vld [vmem:[#allocation2 + $0x480] sm:$0xff]  ;;  %v7881_v22 = vpack.c.bf16 %v5686_v16, %v5684_v29  ;;  %v5268_v29 = vld [vmem:[#allocation2 + $0x510] sm:$0xff] }
 0xbd6   : > { %5506 = vmatmul.mubr.f32.vlgmr.msra.gmra.mrb[36].mxu1 %v8860_v36  ;;  %7670 = vmatprep.subr.bf16.mxu0 %v7669_v20  ;;  %v5255_v20 = vld [vmem:[#allocation2 + $0x4a8] sm:$0xff]  ;;  %v7687_v26 = vpack.c.bf16 %v5252_v18, %v5250_v17  ;;  %v5273_v17 = vld [vmem:[#allocation2 + $0x538] sm:$0xff] }
 0xbd7   : > { %7864 = vmatpush1.bf16.msra.mxu1 %v7863_v23  ;;  %5791 = vmatprep.mubr.f32.mxu1 %v8862_v47  ;;  %v5683_v23 = vld [vmem:[#allocation2 + $0xaa0] sm:$0xff]  ;;  %v7689_v30 = vpack.c.bf16 %v5257_v21, %v5255_v20  ;;  %v5701_v20 = vld [vmem:[#allocation2 + $0xb30] sm:$0xff] }
 0xbd8   : > { %5075 = vmatmul.mubr.f32.vlgmr.msra.gmra.mrb[20].mxu0 %v8860_v36  ;;  %7866 = vmatprep.subr.bf16.mxu1 %v7865_v28  ;;  %v5688_v28 = vld [vmem:[#allocation2 + $0xac8] sm:$0xff]  ;;  %v7883_v34 = vpack.c.bf16 %v5685_v24, %v5683_v23  ;;  %v5706_v23 = vld [vmem:[#allocation2 + $0xb58] sm:$0xff] }
 0xbd9   : > { %7672 = vmatpush1.bf16.msra.mxu0 %v7671_v32  ;;  %5362 = vmatprep.mubr.f32.mxu0 %v8862_v47  ;;  %v5254_v32 = vld [vmem:[#allocation2 + $0x4a0] sm:$0xff]  ;;  %v7885_v39 = vpack.c.bf16 %v5690_v44, %v5688_v28  ;;  %v5272_v28 = vld [vmem:[#allocation2 + $0x530] sm:$0xff] }
 0xbda   : > { %7674 = vmatprep.subr.bf16.mxu0 %v7673_v37  ;;  %v5259_v37 = vld [vmem:[#allocation2 + $0x4c8] sm:$0xff]  ;;  %v7691_v51 = vpack.c.bf16 %v5256_v33, %v5254_v32  ;;  %v5277_v32 = vld [vmem:[#allocation2 + $0x558] sm:$0xff] }
 0xbdb   : > { %7868 = vmatpush1.bf16.msra.mxu1 %v7867_v48  ;;  %v5687_v48 = vld [vmem:[#allocation2 + $0xac0] sm:$0xff]  ;;  %v7693_v54 = vpack.c.bf16 %v5261_v38, %v5259_v37  ;;  %v5705_v37 = vld [vmem:[#allocation2 + $0xb50] sm:$0xff] }
 0xbdc   : > { %7870 = vmatprep.subr.bf16.mxu1 %v7869_v52  ;;  %v5692_v52 = vld [vmem:[#allocation2 + $0xae8] sm:$0xff]  ;;  %v7887_v57 = vpack.c.bf16 %v5689_v50, %v5687_v48  ;;  %v5710_v48 = vld [vmem:[#allocation2 + $0xb78] sm:$0xff] }
 0xbdd   : > { %7676 = vmatpush1.bf16.msra.mxu0 %v7675_v13  ;;  %v5258_v13 = vld [vmem:[#allocation2 + $0x4c0] sm:$0xff]  ;;  %v7889_v59 = vpack.c.bf16 %v5694_v15, %v5692_v52  ;;  %v5276_v52 = vld [vmem:[#allocation2 + $0x550] sm:$0xff] }
 0xbde   : > { %7678 = vmatprep.subr.bf16.mxu0 %v7677_v8  ;;  %v5263_v8 = vld [vmem:[#allocation2 + $0x4e8] sm:$0xff]  ;;  %v7695_v62 = vpack.c.bf16 %v5260_v55, %v5258_v13  ;;  %v5281_v13 = vld [vmem:[#allocation2 + $0x578] sm:$0xff] }
 0xbdf   : > { %7872 = vmatpush1.bf16.msra.mxu1 %v7871_v60  ;;  %v5691_v60 = vld [vmem:[#allocation2 + $0xae0] sm:$0xff]  ;;  %v7697_v27 = vpack.c.bf16 %v5265_v58, %v5263_v8  ;;  %v5709_v8 = vld [vmem:[#allocation2 + $0xb70] sm:$0xff] }
 0xbe0   : > { %7874 = vmatprep.subr.bf16.mxu1 %v7873_v63  ;;  %v5696_v63 = vld [vmem:[#allocation2 + $0xb08] sm:$0xff]  ;;  %v7891_v5 = vpack.c.bf16 %v5693_v61, %v5691_v60  ;;  %v5714_v60 = vld [vmem:[#allocation2 + $0xb98] sm:$0xff] }
 0xbe1   : > { %7680 = vmatpush1.bf16.msra.mxu0 %v7679_v2  ;;  %v5262_v2 = vld [vmem:[#allocation2 + $0x4e0] sm:$0xff]  ;;  %v7893_v7 = vpack.c.bf16 %v5698_v0, %v5696_v63  ;;  %v5280_v63 = vld [vmem:[#allocation2 + $0x570] sm:$0xff] }
 0xbe2   : > { %7682 = vmatprep.subr.bf16.mxu0 %v7681_v6  ;;  %v5267_v6 = vld [vmem:[#allocation2 + $0x508] sm:$0xff]  ;;  %v7699_v10 = vpack.c.bf16 %v5264_v3, %v5262_v2  ;;  %v5285_v2 = vld [vmem:[#allocation2 + $0x598] sm:$0xff] }
 0xbe3   : > { %7876 = vmatpush1.bf16.msra.mxu1 %v7875_v4  ;;  %v5695_v4 = vld [vmem:[#allocation2 + $0xb00] sm:$0xff]  ;;  %v7701_v56 = vpack.c.bf16 %v5269_v42, %v5267_v6  ;;  %v5713_v6 = vld [vmem:[#allocation2 + $0xb90] sm:$0xff] }
 0xbe4   : > { %7878 = vmatprep.subr.bf16.mxu1 %v7877_v12  ;;  %v5700_v12 = vld [vmem:[#allocation2 + $0xb28] sm:$0xff]  ;;  %v7895_v16 = vpack.c.bf16 %v5697_v9, %v5695_v4  ;;  %v5718_v4 = vld [vmem:[#allocation2 + $0xbb8] sm:$0xff] }
 0xbe5   : > { %7684 = vmatpush1.bf16.msra.mxu0 %v7683_v35  ;;  %v5266_v35 = vld [vmem:[#allocation2 + $0x500] sm:$0xff]  ;;  %v7897_v18 = vpack.c.bf16 %v5702_v14, %v5700_v12  ;;  %v5284_v12 = vld [vmem:[#allocation2 + $0x590] sm:$0xff] }
 0xbe6   : > { %7686 = vmatprep.subr.bf16.mxu0 %v7685_v40  ;;  %v5271_v40 = vld [vmem:[#allocation2 + $0x528] sm:$0xff]  ;;  %v7703_v21 = vpack.c.bf16 %v5268_v29, %v5266_v35  ;;  %v5289_v35 = vld [vmem:[#allocation2 + $0x5b8] sm:$0xff] }
 0xbe7   : > { %7880 = vmatpush1.bf16.msra.mxu1 %v7879_v19  ;;  %v5699_v19 = vld [vmem:[#allocation2 + $0xb20] sm:$0xff]  ;;  %v7705_v24 = vpack.c.bf16 %v5273_v17, %v5271_v40  ;;  %v5717_v40 = vld [vmem:[#allocation2 + $0xbb0] sm:$0xff] }
 0xbe8   : > { %7882 = vmatprep.subr.bf16.mxu1 %v7881_v22  ;;  %v5704_v22 = vld [vmem:[#allocation2 + $0xb48] sm:$0xff]  ;;  %v7899_v44 = vpack.c.bf16 %v5701_v20, %v5699_v19  ;;  %v5722_v19 = vld [vmem:[#allocation2 + $0xbd8] sm:$0xff] }
 0xbe9   : > { %7688 = vmatpush1.bf16.msra.mxu0 %v7687_v26  ;;  %v5270_v26 = vld [vmem:[#allocation2 + $0x520] sm:$0xff]  ;;  %v7901_v33 = vpack.c.bf16 %v5706_v23, %v5704_v22  ;;  %v5288_v22 = vld [vmem:[#allocation2 + $0x5b0] sm:$0xff] }
 0xbea   : > { %7690 = vmatprep.subr.bf16.mxu0 %v7689_v30  ;;  %v5275_v30 = vld [vmem:[#allocation2 + $0x548] sm:$0xff]  ;;  %v7707_v38 = vpack.c.bf16 %v5272_v28, %v5270_v26  ;;  %v5293_v26 = vld [vmem:[#allocation2 + $0x5d8] sm:$0xff] }
 0xbeb   : > { %7884 = vmatpush1.bf16.msra.mxu1 %v7883_v34  ;;  %v5703_v34 = vld [vmem:[#allocation2 + $0xb40] sm:$0xff]  ;;  %v7709_v50 = vpack.c.bf16 %v5277_v32, %v5275_v30  ;;  %v5721_v30 = vld [vmem:[#allocation2 + $0xbd0] sm:$0xff] }
 0xbec   : > { %7886 = vmatprep.subr.bf16.mxu1 %v7885_v39  ;;  %v5708_v39 = vld [vmem:[#allocation2 + $0xb68] sm:$0xff]  ;;  %v7903_v15 = vpack.c.bf16 %v5705_v37, %v5703_v34  ;;  %v5726_v34 = vld [vmem:[#allocation2 + $0xbf8] sm:$0xff] }
 0xbed   : > { %7692 = vmatpush1.bf16.msra.mxu0 %v7691_v51  ;;  %v5274_v51 = vld [vmem:[#allocation2 + $0x540] sm:$0xff]  ;;  %v7905_v55 = vpack.c.bf16 %v5710_v48, %v5708_v39  ;;  %v5292_v39 = vld [vmem:[#allocation2 + $0x5d0] sm:$0xff] }
 0xbee   : > { %7694 = vmatprep.subr.bf16.mxu0 %v7693_v54  ;;  %v5279_v54 = vld [vmem:[#allocation2 + $0x568] sm:$0xff]  ;;  %v7711_v58 = vpack.c.bf16 %v5276_v52, %v5274_v51  ;;  %v5297_v51 = vld [vmem:[#allocation2 + $0x5f8] sm:$0xff] }
 0xbef   : > { %7888 = vmatpush1.bf16.msra.mxu1 %v7887_v57  ;;  %v5707_v57 = vld [vmem:[#allocation2 + $0xb60] sm:$0xff]  ;;  %v7713_v61 = vpack.c.bf16 %v5281_v13, %v5279_v54  ;;  %v5725_v54 = vld [vmem:[#allocation2 + $0xbf0] sm:$0xff] }
 0xbf0   : > { %7890 = vmatprep.subr.bf16.mxu1 %v7889_v59  ;;  %v5712_v59 = vld [vmem:[#allocation2 + $0xb88] sm:$0xff]  ;;  %v7907_v0 = vpack.c.bf16 %v5709_v8, %v5707_v57  ;;  %v5952_v57 = vld [vmem:[#allocation2 + $0xe18] sm:$0xff] }
 0xbf1   : > { %7696 = vmatpush1.bf16.msra.mxu0 %v7695_v62  ;;  %v5278_v62 = vld [vmem:[#allocation2 + $0x560] sm:$0xff]  ;;  %v7909_v3 = vpack.c.bf16 %v5714_v60, %v5712_v59  ;;  %v5296_v59 = vld [vmem:[#allocation2 + $0x5f0] sm:$0xff] }
 0xbf2   : > { %7698 = vmatprep.subr.bf16.mxu0 %v7697_v27  ;;  %v5283_v27 = vld [vmem:[#allocation2 + $0x588] sm:$0xff]  ;;  %v7715_v42 = vpack.c.bf16 %v5280_v63, %v5278_v62  ;;  %v5523_v62 = vld [vmem:[#allocation2 + $0x818] sm:$0xff] }
 0xbf3   : > { %7892 = vmatpush1.bf16.msra.mxu1 %v7891_v5  ;;  %v5711_v5 = vld [vmem:[#allocation2 + $0xb80] sm:$0xff]  ;;  %v7717_v9 = vpack.c.bf16 %v5285_v2, %v5283_v27  ;;  %v5951_v27 = vld [vmem:[#allocation2 + $0xe10] sm:$0xff] }
 0xbf4   : > { %7894 = vmatprep.subr.bf16.mxu1 %v7893_v7  ;;  %v5716_v7 = vld [vmem:[#allocation2 + $0xba8] sm:$0xff]  ;;  %v7911_v14 = vpack.c.bf16 %v5713_v6, %v5711_v5  ;;  %v5956_v5 = vld [vmem:[#allocation2 + $0xe38] sm:$0xff] }
 0xbf5   : > { %7700 = vmatpush1.bf16.msra.mxu0 %v7699_v10  ;;  %v5282_v10 = vld [vmem:[#allocation2 + $0x580] sm:$0xff]  ;;  %v7913_v29 = vpack.c.bf16 %v5718_v4, %v5716_v7  ;;  %v5522_v7 = vld [vmem:[#allocation2 + $0x810] sm:$0xff] }
 0xbf6   : > { %7702 = vmatprep.subr.bf16.mxu0 %v7701_v56  ;;  %v5287_v56 = vld [vmem:[#allocation2 + $0x5a8] sm:$0xff]  ;;  %v7719_v17 = vpack.c.bf16 %v5284_v12, %v5282_v10  ;;  %v5527_v10 = vld [vmem:[#allocation2 + $0x838] sm:$0xff] }
 0xbf7   : > { %7896 = vmatpush1.bf16.msra.mxu1 %v7895_v16  ;;  %v5715_v16 = vld [vmem:[#allocation2 + $0xba0] sm:$0xff]  ;;  %v7721_v20 = vpack.c.bf16 %v5289_v35, %v5287_v56  ;;  %v5955_v56 = vld [vmem:[#allocation2 + $0xe30] sm:$0xff] }
 0xbf8   : > { %7898 = vmatprep.subr.bf16.mxu1 %v7897_v18  ;;  %v5720_v18 = vld [vmem:[#allocation2 + $0xbc8] sm:$0xff]  ;;  %v7915_v23 = vpack.c.bf16 %v5717_v40, %v5715_v16  ;;  %v5960_v16 = vld [vmem:[#allocation2 + $0xe58] sm:$0xff] }
 0xbf9   : > { %7704 = vmatpush1.bf16.msra.mxu0 %v7703_v21  ;;  %v5286_v21 = vld [vmem:[#allocation2 + $0x5a0] sm:$0xff]  ;;  %v7917_v28 = vpack.c.bf16 %v5722_v19, %v5720_v18  ;;  %v5526_v18 = vld [vmem:[#allocation2 + $0x830] sm:$0xff] }
 0xbfa   : > { %7706 = vmatprep.subr.bf16.mxu0 %v7705_v24  ;;  %v5291_v24 = vld [vmem:[#allocation2 + $0x5c8] sm:$0xff]  ;;  %v7723_v32 = vpack.c.bf16 %v5288_v22, %v5286_v21  ;;  %v5531_v21 = vld [vmem:[#allocation2 + $0x858] sm:$0xff] }
 0xbfb   : > { %7900 = vmatpush1.bf16.msra.mxu1 %v7899_v44  ;;  %v5719_v44 = vld [vmem:[#allocation2 + $0xbc0] sm:$0xff]  ;;  %v7725_v37 = vpack.c.bf16 %v5293_v26, %v5291_v24  ;;  %v5959_v24 = vld [vmem:[#allocation2 + $0xe50] sm:$0xff] }
 0xbfc   : > { %7902 = vmatprep.subr.bf16.mxu1 %v7901_v33  ;;  %v5724_v33 = vld [vmem:[#allocation2 + $0xbe8] sm:$0xff]  ;;  %v7919_v48 = vpack.c.bf16 %v5721_v30, %v5719_v44  ;;  %v5964_v44 = vld [vmem:[#allocation2 + $0xe78] sm:$0xff] }
 0xbfd   : > { %7708 = vmatpush1.bf16.msra.mxu0 %v7707_v38  ;;  %v5290_v38 = vld [vmem:[#allocation2 + $0x5c0] sm:$0xff]  ;;  %v7921_v52 = vpack.c.bf16 %v5726_v34, %v5724_v33  ;;  %v5530_v33 = vld [vmem:[#allocation2 + $0x850] sm:$0xff] }
 0xbfe   : > { %7710 = vmatprep.subr.bf16.mxu0 %v7709_v50  ;;  %v5295_v50 = vld [vmem:[#allocation2 + $0x5e8] sm:$0xff]  ;;  %v7727_v13 = vpack.c.bf16 %v5292_v39, %v5290_v38  ;;  %v5535_v38 = vld [vmem:[#allocation2 + $0x878] sm:$0xff] }
 0xbff   : > { %7904 = vmatpush1.bf16.msra.mxu1 %v7903_v15  ;;  %v5723_v15 = vld [vmem:[#allocation2 + $0xbe0] sm:$0xff]  ;;  %v7729_v8 = vpack.c.bf16 %v5297_v51, %v5295_v50  ;;  %v5963_v50 = vld [vmem:[#allocation2 + $0xe70] sm:$0xff] }
 0xc00   : > { %7906 = vmatprep.subr.bf16.mxu1 %v7905_v55  ;;  %v5950_v55 = vld [vmem:[#allocation2 + $0xe08] sm:$0xff]  ;;  %v7923_v60 = vpack.c.bf16 %v5725_v54, %v5723_v15  ;;  %v5968_v15 = vld [vmem:[#allocation2 + $0xe98] sm:$0xff] }
 0xc01   : > { %7712 = vmatpush1.bf16.msra.mxu0 %v7711_v58  ;;  %v5294_v58 = vld [vmem:[#allocation2 + $0x5e0] sm:$0xff]  ;;  %v7989_v63 = vpack.c.bf16 %v5952_v57, %v5950_v55  ;;  %v5534_v55 = vld [vmem:[#allocation2 + $0x870] sm:$0xff] }
 0xc02   : > { %7714 = vmatprep.subr.bf16.mxu0 %v7713_v61  ;;  %v5521_v61 = vld [vmem:[#allocation2 + $0x808] sm:$0xff]  ;;  %v7731_v2 = vpack.c.bf16 %v5296_v59, %v5294_v58  ;;  %v5539_v58 = vld [vmem:[#allocation2 + $0x898] sm:$0xff] }
 0xc03   : > { %7908 = vmatpush1.bf16.msra.mxu1 %v7907_v0  ;;  %v5949_v0 = vld [vmem:[#allocation2 + $0xe00] sm:$0xff]  ;;  %v7797_v6 = vpack.c.bf16 %v5523_v62, %v5521_v61  ;;  %v5967_v61 = vld [vmem:[#allocation2 + $0xe90] sm:$0xff] }
 0xc04   : > { %7910 = vmatprep.subr.bf16.mxu1 %v7909_v3  ;;  %v5954_v3 = vld [vmem:[#allocation2 + $0xe28] sm:$0xff]  ;;  %v7991_v4 = vpack.c.bf16 %v5951_v27, %v5949_v0  ;;  %v5972_v0 = vld [vmem:[#allocation2 + $0xeb8] sm:$0xff] }
 0xc05   : > { %7716 = vmatpush1.bf16.msra.mxu0 %v7715_v42  ;;  %v5520_v42 = vld [vmem:[#allocation2 + $0x800] sm:$0xff]  ;;  %v7993_v12 = vpack.c.bf16 %v5956_v5, %v5954_v3  ;;  %v5538_v3 = vld [vmem:[#allocation2 + $0x890] sm:$0xff] }
 0xc06   : > { %7718 = vmatprep.subr.bf16.mxu0 %v7717_v9  ;;  %v5525_v9 = vld [vmem:[#allocation2 + $0x828] sm:$0xff]  ;;  %v7799_v35 = vpack.c.bf16 %v5522_v7, %v5520_v42  ;;  %v5543_v42 = vld [vmem:[#allocation2 + $0x8b8] sm:$0xff] }
 0xc07   : > { %7912 = vmatpush1.bf16.msra.mxu1 %v7911_v14  ;;  %v5953_v14 = vld [vmem:[#allocation2 + $0xe20] sm:$0xff]  ;;  %v7801_v40 = vpack.c.bf16 %v5527_v10, %v5525_v9  ;;  %v5971_v9 = vld [vmem:[#allocation2 + $0xeb0] sm:$0xff] }
 0xc08   : > { %7914 = vmatprep.subr.bf16.mxu1 %v7913_v29  ;;  %v5958_v29 = vld [vmem:[#allocation2 + $0xe48] sm:$0xff]  ;;  %v7995_v19 = vpack.c.bf16 %v5955_v56, %v5953_v14  ;;  %v5976_v14 = vld [vmem:[#allocation2 + $0xed8] sm:$0xff] }
 0xc09   : > { %7720 = vmatpush1.bf16.msra.mxu0 %v7719_v17  ;;  %v5524_v17 = vld [vmem:[#allocation2 + $0x820] sm:$0xff]  ;;  %v7997_v22 = vpack.c.bf16 %v5960_v16, %v5958_v29  ;;  %v5542_v29 = vld [vmem:[#allocation2 + $0x8b0] sm:$0xff] }
 0xc0a   : > { %7722 = vmatprep.subr.bf16.mxu0 %v7721_v20  ;;  %v5529_v20 = vld [vmem:[#allocation2 + $0x848] sm:$0xff]  ;;  %v7803_v26 = vpack.c.bf16 %v5526_v18, %v5524_v17  ;;  %v5547_v17 = vld [vmem:[#allocation2 + $0x8d8] sm:$0xff] }
 0xc0b   : > { %7916 = vmatpush1.bf16.msra.mxu1 %v7915_v23  ;;  %v5957_v23 = vld [vmem:[#allocation2 + $0xe40] sm:$0xff]  ;;  %v7805_v30 = vpack.c.bf16 %v5531_v21, %v5529_v20  ;;  %v5975_v20 = vld [vmem:[#allocation2 + $0xed0] sm:$0xff] }
 0xc0c   : > { %7918 = vmatprep.subr.bf16.mxu1 %v7917_v28  ;;  %v5962_v28 = vld [vmem:[#allocation2 + $0xe68] sm:$0xff]  ;;  %v7999_v34 = vpack.c.bf16 %v5959_v24, %v5957_v23  ;;  %v5980_v23 = vld [vmem:[#allocation2 + $0xef8] sm:$0xff] }
 0xc0d   : > { %7724 = vmatpush1.bf16.msra.mxu0 %v7723_v32  ;;  %v5528_v32 = vld [vmem:[#allocation2 + $0x840] sm:$0xff]  ;;  %v8001_v39 = vpack.c.bf16 %v5964_v44, %v5962_v28  ;;  %v5546_v28 = vld [vmem:[#allocation2 + $0x8d0] sm:$0xff] }
 0xc0e   : > { %7726 = vmatprep.subr.bf16.mxu0 %v7725_v37  ;;  %v5533_v37 = vld [vmem:[#allocation2 + $0x868] sm:$0xff]  ;;  %v7807_v51 = vpack.c.bf16 %v5530_v33, %v5528_v32  ;;  %v5551_v32 = vld [vmem:[#allocation2 + $0x8f8] sm:$0xff] }
 0xc0f   : > { %7920 = vmatpush1.bf16.msra.mxu1 %v7919_v48  ;;  %v5961_v48 = vld [vmem:[#allocation2 + $0xe60] sm:$0xff]  ;;  %v7809_v54 = vpack.c.bf16 %v5535_v38, %v5533_v37  ;;  %v5979_v37 = vld [vmem:[#allocation2 + $0xef0] sm:$0xff] }
 0xc10   : > { %7922 = vmatprep.subr.bf16.mxu1 %v7921_v52  ;;  %v5966_v52 = vld [vmem:[#allocation2 + $0xe88] sm:$0xff]  ;;  %v8003_v57 = vpack.c.bf16 %v5963_v50, %v5961_v48  ;;  %v5984_v48 = vld [vmem:[#allocation2 + $0xf18] sm:$0xff] }
 0xc11   : > { %7728 = vmatpush1.bf16.msra.mxu0 %v7727_v13  ;;  %v5532_v13 = vld [vmem:[#allocation2 + $0x860] sm:$0xff]  ;;  %v8005_v59 = vpack.c.bf16 %v5968_v15, %v5966_v52  ;;  %v5550_v52 = vld [vmem:[#allocation2 + $0x8f0] sm:$0xff] }
 0xc12   : > { %7730 = vmatprep.subr.bf16.mxu0 %v7729_v8  ;;  %v5537_v8 = vld [vmem:[#allocation2 + $0x888] sm:$0xff]  ;;  %v7811_v62 = vpack.c.bf16 %v5534_v55, %v5532_v13  ;;  %v5555_v13 = vld [vmem:[#allocation2 + $0x918] sm:$0xff] }
 0xc13   : > { %7924 = vmatpush1.bf16.msra.mxu1 %v7923_v60  ;;  %v5965_v60 = vld [vmem:[#allocation2 + $0xe80] sm:$0xff]  ;;  %v7813_v27 = vpack.c.bf16 %v5539_v58, %v5537_v8  ;;  %v5983_v8 = vld [vmem:[#allocation2 + $0xf10] sm:$0xff] }
 0xc14   : > { %7990 = vmatprep.subr.bf16.mxu1 %v7989_v63  ;;  %v5970_v63 = vld [vmem:[#allocation2 + $0xea8] sm:$0xff]  ;;  %v8007_v5 = vpack.c.bf16 %v5967_v61, %v5965_v60  ;;  %v5988_v60 = vld [vmem:[#allocation2 + $0xf38] sm:$0xff] }
 0xc15   : > { %7732 = vmatpush1.bf16.msra.mxu0 %v7731_v2  ;;  %v5536_v2 = vld [vmem:[#allocation2 + $0x880] sm:$0xff]  ;;  %v8009_v7 = vpack.c.bf16 %v5972_v0, %v5970_v63  ;;  %v5554_v63 = vld [vmem:[#allocation2 + $0x910] sm:$0xff] }
 0xc16   : > { %5792 = vmatmul.mubr.f32.vlgmr.msra.gmra.mrb[38].mxu1 %v8860_v36  ;;  %7798 = vmatprep.subr.bf16.mxu0 %v7797_v6  ;;  %v5541_v6 = vld [vmem:[#allocation2 + $0x8a8] sm:$0xff]  ;;  %v7815_v10 = vpack.c.bf16 %v5538_v3, %v5536_v2  ;;  %v5559_v2 = vld [vmem:[#allocation2 + $0x938] sm:$0xff] }
 0xc17   : > { %7992 = vmatpush1.bf16.msra.mxu1 %v7991_v4  ;;  %6077 = vmatprep.mubr.f32.mxu1 %v8862_v47  ;;  %v5969_v4 = vld [vmem:[#allocation2 + $0xea0] sm:$0xff]  ;;  %v7817_v56 = vpack.c.bf16 %v5543_v42, %v5541_v6  ;;  %v5987_v6 = vld [vmem:[#allocation2 + $0xf30] sm:$0xff] }
 0xc18   : > { %5363 = vmatmul.mubr.f32.vlgmr.msra.gmra.mrb[22].mxu0 %v8860_v36  ;;  %7994 = vmatprep.subr.bf16.mxu1 %v7993_v12  ;;  %v5974_v12 = vld [vmem:[#allocation2 + $0xec8] sm:$0xff]  ;;  %v8011_v16 = vpack.c.bf16 %v5971_v9, %v5969_v4  ;;  %v5992_v4 = vld [vmem:[#allocation2 + $0xf58] sm:$0xff] }
 0xc19   : > { %7800 = vmatpush1.bf16.msra.mxu0 %v7799_v35  ;;  %5648 = vmatprep.mubr.f32.mxu0 %v8862_v47  ;;  %v5540_v35 = vld [vmem:[#allocation2 + $0x8a0] sm:$0xff]  ;;  %v8013_v18 = vpack.c.bf16 %v5976_v14, %v5974_v12  ;;  %v5558_v12 = vld [vmem:[#allocation2 + $0x930] sm:$0xff] }
 0xc1a   : > { %7802 = vmatprep.subr.bf16.mxu0 %v7801_v40  ;;  %v5545_v40 = vld [vmem:[#allocation2 + $0x8c8] sm:$0xff]  ;;  %v7819_v21 = vpack.c.bf16 %v5542_v29, %v5540_v35  ;;  %v5563_v35 = vld [vmem:[#allocation2 + $0x958] sm:$0xff] }
 0xc1b   : > { %7996 = vmatpush1.bf16.msra.mxu1 %v7995_v19  ;;  %v5973_v19 = vld [vmem:[#allocation2 + $0xec0] sm:$0xff]  ;;  %v7821_v24 = vpack.c.bf16 %v5547_v17, %v5545_v40  ;;  %v5991_v40 = vld [vmem:[#allocation2 + $0xf50] sm:$0xff] }
 0xc1c   : > { %7998 = vmatprep.subr.bf16.mxu1 %v7997_v22  ;;  %v5978_v22 = vld [vmem:[#allocation2 + $0xee8] sm:$0xff]  ;;  %v8015_v44 = vpack.c.bf16 %v5975_v20, %v5973_v19  ;;  %v5996_v19 = vld [vmem:[#allocation2 + $0xf78] sm:$0xff] }
 0xc1d   : > { %7804 = vmatpush1.bf16.msra.mxu0 %v7803_v26  ;;  %v5544_v26 = vld [vmem:[#allocation2 + $0x8c0] sm:$0xff]  ;;  %v8017_v33 = vpack.c.bf16 %v5980_v23, %v5978_v22  ;;  %v5562_v22 = vld [vmem:[#allocation2 + $0x950] sm:$0xff] }
 0xc1e   : > { %7806 = vmatprep.subr.bf16.mxu0 %v7805_v30  ;;  %v5549_v30 = vld [vmem:[#allocation2 + $0x8e8] sm:$0xff]  ;;  %v7823_v38 = vpack.c.bf16 %v5546_v28, %v5544_v26  ;;  %v5567_v26 = vld [vmem:[#allocation2 + $0x978] sm:$0xff] }
 0xc1f   : > { %8000 = vmatpush1.bf16.msra.mxu1 %v7999_v34  ;;  %v5977_v34 = vld [vmem:[#allocation2 + $0xee0] sm:$0xff]  ;;  %v7825_v50 = vpack.c.bf16 %v5551_v32, %v5549_v30  ;;  %v5995_v30 = vld [vmem:[#allocation2 + $0xf70] sm:$0xff] }
 0xc20   : > { %8002 = vmatprep.subr.bf16.mxu1 %v8001_v39  ;;  %v5982_v39 = vld [vmem:[#allocation2 + $0xf08] sm:$0xff]  ;;  %v8019_v15 = vpack.c.bf16 %v5979_v37, %v5977_v34  ;;  %v6000_v34 = vld [vmem:[#allocation2 + $0xf98] sm:$0xff] }
 0xc21   : > { %7808 = vmatpush1.bf16.msra.mxu0 %v7807_v51  ;;  %v5548_v51 = vld [vmem:[#allocation2 + $0x8e0] sm:$0xff]  ;;  %v8021_v55 = vpack.c.bf16 %v5984_v48, %v5982_v39  ;;  %v5566_v39 = vld [vmem:[#allocation2 + $0x970] sm:$0xff] }
 0xc22   : > { %7810 = vmatprep.subr.bf16.mxu0 %v7809_v54  ;;  %v5553_v54 = vld [vmem:[#allocation2 + $0x908] sm:$0xff]  ;;  %v7827_v58 = vpack.c.bf16 %v5550_v52, %v5548_v51  ;;  %v5571_v51 = vld [vmem:[#allocation2 + $0x998] sm:$0xff] }
 0xc23   : > { %8004 = vmatpush1.bf16.msra.mxu1 %v8003_v57  ;;  %v5981_v57 = vld [vmem:[#allocation2 + $0xf00] sm:$0xff]  ;;  %v7829_v61 = vpack.c.bf16 %v5555_v13, %v5553_v54  ;;  %v5999_v54 = vld [vmem:[#allocation2 + $0xf90] sm:$0xff] }
 0xc24   : > { %8006 = vmatprep.subr.bf16.mxu1 %v8005_v59  ;;  %v5986_v59 = vld [vmem:[#allocation2 + $0xf28] sm:$0xff]  ;;  %v8023_v0 = vpack.c.bf16 %v5983_v8, %v5981_v57  ;;  %v6004_v57 = vld [vmem:[#allocation2 + $0xfb8] sm:$0xff] }
 0xc25   : > { %7812 = vmatpush1.bf16.msra.mxu0 %v7811_v62  ;;  %v5552_v62 = vld [vmem:[#allocation2 + $0x900] sm:$0xff]  ;;  %v8025_v3 = vpack.c.bf16 %v5988_v60, %v5986_v59  ;;  %v5570_v59 = vld [vmem:[#allocation2 + $0x990] sm:$0xff] }
 0xc26   : > { %7814 = vmatprep.subr.bf16.mxu0 %v7813_v27  ;;  %v5557_v27 = vld [vmem:[#allocation2 + $0x928] sm:$0xff]  ;;  %v7831_v42 = vpack.c.bf16 %v5554_v63, %v5552_v62  ;;  %v5575_v62 = vld [vmem:[#allocation2 + $0x9b8] sm:$0xff] }
 0xc27   : > { %8008 = vmatpush1.bf16.msra.mxu1 %v8007_v5  ;;  %v5985_v5 = vld [vmem:[#allocation2 + $0xf20] sm:$0xff]  ;;  %v7833_v9 = vpack.c.bf16 %v5559_v2, %v5557_v27  ;;  %v6003_v27 = vld [vmem:[#allocation2 + $0xfb0] sm:$0xff] }
 0xc28   : > { %8010 = vmatprep.subr.bf16.mxu1 %v8009_v7  ;;  %v5990_v7 = vld [vmem:[#allocation2 + $0xf48] sm:$0xff]  ;;  %v8027_v14 = vpack.c.bf16 %v5987_v6, %v5985_v5  ;;  %v6008_v5 = vld [vmem:[#allocation2 + $0xfd8] sm:$0xff] }
 0xc29   : > { %7816 = vmatpush1.bf16.msra.mxu0 %v7815_v10  ;;  %v5556_v10 = vld [vmem:[#allocation2 + $0x920] sm:$0xff]  ;;  %v8029_v29 = vpack.c.bf16 %v5992_v4, %v5990_v7  ;;  %v5574_v7 = vld [vmem:[#allocation2 + $0x9b0] sm:$0xff] }
 0xc2a   : > { %7818 = vmatprep.subr.bf16.mxu0 %v7817_v56  ;;  %v5561_v56 = vld [vmem:[#allocation2 + $0x948] sm:$0xff]  ;;  %v7835_v17 = vpack.c.bf16 %v5558_v12, %v5556_v10  ;;  %v5579_v10 = vld [vmem:[#allocation2 + $0x9d8] sm:$0xff] }
 0xc2b   : > { %8012 = vmatpush1.bf16.msra.mxu1 %v8011_v16  ;;  %v5989_v16 = vld [vmem:[#allocation2 + $0xf40] sm:$0xff]  ;;  %v7837_v20 = vpack.c.bf16 %v5563_v35, %v5561_v56  ;;  %v6007_v56 = vld [vmem:[#allocation2 + $0xfd0] sm:$0xff] }
 0xc2c   : > { %8014 = vmatprep.subr.bf16.mxu1 %v8013_v18  ;;  %v5994_v18 = vld [vmem:[#allocation2 + $0xf68] sm:$0xff]  ;;  %v8031_v23 = vpack.c.bf16 %v5991_v40, %v5989_v16  ;;  %v6012_v16 = vld [vmem:[#allocation2 + $0xff8] sm:$0xff] }
 0xc2d   : > { %7820 = vmatpush1.bf16.msra.mxu0 %v7819_v21  ;;  %v5560_v21 = vld [vmem:[#allocation2 + $0x940] sm:$0xff]  ;;  %v8033_v28 = vpack.c.bf16 %v5996_v19, %v5994_v18  ;;  %v5578_v18 = vld [vmem:[#allocation2 + $0x9d0] sm:$0xff] }
 0xc2e   : > { %7822 = vmatprep.subr.bf16.mxu0 %v7821_v24  ;;  %v5565_v24 = vld [vmem:[#allocation2 + $0x968] sm:$0xff]  ;;  %v7839_v32 = vpack.c.bf16 %v5562_v22, %v5560_v21  ;;  %v5583_v21 = vld [vmem:[#allocation2 + $0x9f8] sm:$0xff] }
 0xc2f   : > { %8016 = vmatpush1.bf16.msra.mxu1 %v8015_v44  ;;  %v5993_v44 = vld [vmem:[#allocation2 + $0xf60] sm:$0xff]  ;;  %v7841_v37 = vpack.c.bf16 %v5567_v26, %v5565_v24  ;;  %v6011_v24 = vld [vmem:[#allocation2 + $0xff0] sm:$0xff] }
 0xc30   : > { %8018 = vmatprep.subr.bf16.mxu1 %v8017_v33  ;;  %v5998_v33 = vld [vmem:[#allocation2 + $0xf88] sm:$0xff]  ;;  %v8035_v48 = vpack.c.bf16 %v5995_v30, %v5993_v44  ;;  %v5580_v44 = vld [vmem:[#allocation2 + $0x9e0] sm:$0xff]  ;;  %v5582_v30 = vld [vmem:[#allocation2 + $0x9f0] sm:$0xff] }
 0xc31   : > { %7824 = vmatpush1.bf16.msra.mxu0 %v7823_v38  ;;  %v5564_v38 = vld [vmem:[#allocation2 + $0x960] sm:$0xff]  ;;  %v8037_v52 = vpack.c.bf16 %v6000_v34, %v5998_v33  ;;  %v5807_v33 = vld [vmem:[#allocation2 + $0xc08] sm:$0xff]  ;;  %v5809_v34 = vld [vmem:[#allocation2 + $0xc18] sm:$0xff] }
 0xc32   : > { %7826 = vmatprep.subr.bf16.mxu0 %v7825_v50  ;;  %v5569_v50 = vld [vmem:[#allocation2 + $0x988] sm:$0xff]  ;;  %v7843_v13 = vpack.c.bf16 %v5566_v39, %v5564_v38  ;;  %v7925_v38 = vpack.c.bf16 %v5809_v34, %v5807_v33  ;;  %v5806_v39 = vld [vmem:[#allocation2 + $0xc00] sm:$0xff]  ;;  %v5836_v33 = vld [vmem:[#allocation2 + $0xcf0] sm:$0xff] }
 0xc33   : > { %8020 = vmatpush1.bf16.msra.mxu1 %v8019_v15  ;;  %v5997_v15 = vld [vmem:[#allocation2 + $0xf80] sm:$0xff]  ;;  %v7845_v8 = vpack.c.bf16 %v5571_v51, %v5569_v50  ;;  %v5811_v50 = vld [vmem:[#allocation2 + $0xc28] sm:$0xff]  ;;  %v5813_v51 = vld [vmem:[#allocation2 + $0xc38] sm:$0xff] }
 0xc34   : > { %8022 = vmatprep.subr.bf16.mxu1 %v8021_v55  ;;  %v6002_v55 = vld [vmem:[#allocation2 + $0xfa8] sm:$0xff]  ;;  %v8039_v60 = vpack.c.bf16 %v5999_v54, %v5997_v15  ;;  %v7929_v15 = vpack.c.bf16 %v5813_v51, %v5811_v50  ;;  %v5810_v54 = vld [vmem:[#allocation2 + $0xc20] sm:$0xff]  ;;  %v5840_v50 = vld [vmem:[#allocation2 + $0xd10] sm:$0xff] }
 0xc35   : > { %7828 = vmatpush1.bf16.msra.mxu0 %v7827_v58  ;;  %v5568_v58 = vld [vmem:[#allocation2 + $0x980] sm:$0xff]  ;;  %v8041_v63 = vpack.c.bf16 %v6004_v57, %v6002_v55  ;;  %v5815_v55 = vld [vmem:[#allocation2 + $0xc48] sm:$0xff]  ;;  %v5817_v57 = vld [vmem:[#allocation2 + $0xc58] sm:$0xff] }
 0xc36   : > { %7830 = vmatprep.subr.bf16.mxu0 %v7829_v61  ;;  %v5573_v61 = vld [vmem:[#allocation2 + $0x9a8] sm:$0xff]  ;;  %v7847_v2 = vpack.c.bf16 %v5570_v59, %v5568_v58  ;;  %v7933_v58 = vpack.c.bf16 %v5817_v57, %v5815_v55  ;;  %v5814_v59 = vld [vmem:[#allocation2 + $0xc40] sm:$0xff]  ;;  %v5844_v55 = vld [vmem:[#allocation2 + $0xd30] sm:$0xff] }
 0xc37   : > { %8024 = vmatpush1.bf16.msra.mxu1 %v8023_v0  ;;  %v6001_v0 = vld [vmem:[#allocation2 + $0xfa0] sm:$0xff]  ;;  %v7849_v6 = vpack.c.bf16 %v5575_v62, %v5573_v61  ;;  %v5819_v61 = vld [vmem:[#allocation2 + $0xc68] sm:$0xff]  ;;  %v5821_v62 = vld [vmem:[#allocation2 + $0xc78] sm:$0xff] }
 0xc38   : > { %8026 = vmatprep.subr.bf16.mxu1 %v8025_v3  ;;  %v6006_v3 = vld [vmem:[#allocation2 + $0xfc8] sm:$0xff]  ;;  %v8043_v4 = vpack.c.bf16 %v6003_v27, %v6001_v0  ;;  %v7937_v0 = vpack.c.bf16 %v5821_v62, %v5819_v61  ;;  %v5818_v27 = vld [vmem:[#allocation2 + $0xc60] sm:$0xff]  ;;  %v5848_v61 = vld [vmem:[#allocation2 + $0xd50] sm:$0xff] }
 0xc39   : > { %7832 = vmatpush1.bf16.msra.mxu0 %v7831_v42  ;;  %v5572_v42 = vld [vmem:[#allocation2 + $0x9a0] sm:$0xff]  ;;  %v8045_v12 = vpack.c.bf16 %v6008_v5, %v6006_v3  ;;  %v5823_v3 = vld [vmem:[#allocation2 + $0xc88] sm:$0xff]  ;;  %v5825_v5 = vld [vmem:[#allocation2 + $0xc98] sm:$0xff] }
 0xc3a   : > { %7834 = vmatprep.subr.bf16.mxu0 %v7833_v9  ;;  %v5577_v9 = vld [vmem:[#allocation2 + $0x9c8] sm:$0xff]  ;;  %v7851_v35 = vpack.c.bf16 %v5574_v7, %v5572_v42  ;;  %v7941_v42 = vpack.c.bf16 %v5825_v5, %v5823_v3  ;;  %v5822_v7 = vld [vmem:[#allocation2 + $0xc80] sm:$0xff]  ;;  %v5852_v3 = vld [vmem:[#allocation2 + $0xd70] sm:$0xff] }
 0xc3b   : > { %8028 = vmatpush1.bf16.msra.mxu1 %v8027_v14  ;;  %v6005_v14 = vld [vmem:[#allocation2 + $0xfc0] sm:$0xff]  ;;  %v7853_v40 = vpack.c.bf16 %v5579_v10, %v5577_v9  ;;  %v5827_v9 = vld [vmem:[#allocation2 + $0xca8] sm:$0xff]  ;;  %v5829_v10 = vld [vmem:[#allocation2 + $0xcb8] sm:$0xff] }
 0xc3c   : > { %8030 = vmatprep.subr.bf16.mxu1 %v8029_v29  ;;  %v6010_v29 = vld [vmem:[#allocation2 + $0xfe8] sm:$0xff]  ;;  %v8047_v19 = vpack.c.bf16 %v6007_v56, %v6005_v14  ;;  %v7945_v14 = vpack.c.bf16 %v5829_v10, %v5827_v9  ;;  %v5826_v56 = vld [vmem:[#allocation2 + $0xca0] sm:$0xff]  ;;  %v5856_v10 = vld [vmem:[#allocation2 + $0xd90] sm:$0xff] }
 0xc3d   : > { %7836 = vmatpush1.bf16.msra.mxu0 %v7835_v17  ;;  %v5576_v17 = vld [vmem:[#allocation2 + $0x9c0] sm:$0xff]  ;;  %v8049_v22 = vpack.c.bf16 %v6012_v16, %v6010_v29  ;;  %v5831_v29 = vld [vmem:[#allocation2 + $0xcc8] sm:$0xff]  ;;  %v5833_v16 = vld [vmem:[#allocation2 + $0xcd8] sm:$0xff] }
 0xc3e   : > { %7838 = vmatprep.subr.bf16.mxu0 %v7837_v20  ;;  %v5581_v20 = vld [vmem:[#allocation2 + $0x9e8] sm:$0xff]  ;;  %v7855_v26 = vpack.c.bf16 %v5578_v18, %v5576_v17  ;;  %v5854_v9 = vld [vmem:[#allocation2 + $0xd80] sm:$0xff] }
 0xc3f   : > { %8032 = vmatpush1.bf16.msra.mxu1 %v8031_v23  ;;  %v6009_v23 = vld [vmem:[#allocation2 + $0xfe0] sm:$0xff]  ;;  %v5839_v34 = vld [vmem:[#allocation2 + $0xd08] sm:$0xff] }
 0xc40   : > { %8034 = vmatprep.subr.bf16.mxu1 %v8033_v28  ;;  %v7857_v28 = vpack.c.bf16 %v5583_v21, %v5581_v20  ;;  %v7949_v20 = vpack.c.bf16 %v5833_v16, %v5831_v29  ;;  %v5830_v21 = vld [vmem:[#allocation2 + $0xcc0] sm:$0xff]  ;;  %v5843_v51 = vld [vmem:[#allocation2 + $0xd28] sm:$0xff]  ;;  %v5860_v16 = vld [vmem:[#allocation2 + $0xdb0] sm:$0xff] }
 0xc41   : > { %7840 = vmatpush1.bf16.msra.mxu0 %v7839_v32  ;;  %v8051_v32 = vpack.c.bf16 %v6011_v24, %v6009_v23  ;;  %v5835_v24 = vld [vmem:[#allocation2 + $0xce8] sm:$0xff]  ;;  %v5858_v29 = vld [vmem:[#allocation2 + $0xda0] sm:$0xff] }
 0xc42   : > { %7842 = vmatprep.subr.bf16.mxu0 %v7841_v37  ;;  %v7859_v37 = vpack.c.bf16 %v5582_v30, %v5580_v44  ;;  %v5847_v57 = vld [vmem:[#allocation2 + $0xd48] sm:$0xff] }
 0xc43   : > { %8036 = vmatpush1.bf16.msra.mxu1 %v8035_v48  ;;  %v5808_v48 = vld [vmem:[#allocation2 + $0xc10] sm:$0xff]  ;;  %v5851_v62 = vld [vmem:[#allocation2 + $0xd68] sm:$0xff] }
 0xc44   : > { %8038 = vmatprep.subr.bf16.mxu1 %v8037_v52  ;;  %v7927_v52 = vpack.c.bf16 %v5808_v48, %v5806_v39  ;;  %v5838_v48 = vld [vmem:[#allocation2 + $0xd00] sm:$0xff]  ;;  %v5855_v5 = vld [vmem:[#allocation2 + $0xd88] sm:$0xff] }
 0xc45   : > { %7844 = vmatpush1.bf16.msra.mxu0 %v7843_v13  ;;  %v5812_v13 = vld [vmem:[#allocation2 + $0xc30] sm:$0xff] }
 0xc46   : > { %7846 = vmatprep.subr.bf16.mxu0 %v7845_v8  ;;  %v7931_v8 = vpack.c.bf16 %v5812_v13, %v5810_v54  ;;  %v5842_v13 = vld [vmem:[#allocation2 + $0xd20] sm:$0xff] }
 0xc47   : > { %8040 = vmatpush1.bf16.msra.mxu1 %v8039_v60  ;;  %v5816_v60 = vld [vmem:[#allocation2 + $0xc50] sm:$0xff] }
 0xc48   : > { %8042 = vmatprep.subr.bf16.mxu1 %v8041_v63  ;;  %v7935_v63 = vpack.c.bf16 %v5816_v60, %v5814_v59  ;;  %v5846_v60 = vld [vmem:[#allocation2 + $0xd40] sm:$0xff] }
 0xc49   : > { %7848 = vmatpush1.bf16.msra.mxu0 %v7847_v2  ;;  %v5820_v2 = vld [vmem:[#allocation2 + $0xc70] sm:$0xff] }
 0xc4a   : > { %7850 = vmatprep.subr.bf16.mxu0 %v7849_v6  ;;  %v7939_v6 = vpack.c.bf16 %v5820_v2, %v5818_v27  ;;  %v5850_v2 = vld [vmem:[#allocation2 + $0xd60] sm:$0xff] }
 0xc4b   : > { %8044 = vmatpush1.bf16.msra.mxu1 %v8043_v4  ;;  %v5824_v4 = vld [vmem:[#allocation2 + $0xc90] sm:$0xff] }
 0xc4c   : > { %8046 = vmatprep.subr.bf16.mxu1 %v8045_v12  ;;  %v7943_v12 = vpack.c.bf16 %v5824_v4, %v5822_v7  ;;  %v8891_v7 = vld [vmem:[%s9042_s23] sm:$0xff] }
 0xc4d   : > { %7852 = vmatpush1.bf16.msra.mxu0 %v7851_v35  ;;  %v5828_v35 = vld [vmem:[#allocation2 + $0xcb0] sm:$0xff] }
 0xc4e   : > { %7854 = vmatprep.subr.bf16.mxu0 %v7853_v40  ;;  %v7947_v17 = vpack.c.bf16 %v5828_v35, %v5826_v56  ;;  %v7975_v56 = vpack.c.bf16 %v5856_v10, %v5854_v9  ;;  %v6113_v9 = vld [vmem:[#allocation2 + $0x10a8] sm:$0xff]  ;;  %v6115_v10 = vld [vmem:[#allocation2 + $0x10b8] sm:$0xff] }
 0xc4f   : > { %8048 = vmatpush1.bf16.msra.mxu1 %v8047_v19 }
 0xc50   : > { %8050 = vmatprep.subr.bf16.mxu1 %v8049_v22  ;;  %v5832_v22 = vld [vmem:[#allocation2 + $0xcd0] sm:$0xff] }
 0xc51   : > { %7856 = vmatpush1.bf16.msra.mxu0 %v7855_v26  ;;  %v5837_v26 = vld [vmem:[#allocation2 + $0xcf8] sm:$0xff]  ;;  %v7951_v44 = vpack.c.bf16 %v5832_v22, %v5830_v21  ;;  %v5862_v22 = vld [vmem:[#allocation2 + $0xdc0] sm:$0xff] }
 0xc52   : > { %7858 = vmatprep.subr.bf16.mxu0 %v7857_v28  ;;  %v7953_v30 = vpack.c.bf16 %v5837_v26, %v5835_v24  ;;  %v5867_v24 = vld [vmem:[#allocation2 + $0xde8] sm:$0xff]  ;;  %v5869_v26 = vld [vmem:[#allocation2 + $0xdf8] sm:$0xff] }
 0xc53   : > { %8052 = vmatpush1.bf16.msra.mxu1 %v8051_v32  ;;  %v5834_v32 = vld [vmem:[#allocation2 + $0xce0] sm:$0xff] }
 0xc55   : > { %7860 = vmatpush1.bf16.msra.mxu0 %v7859_v37  ;;  %v5841_v37 = vld [vmem:[#allocation2 + $0xd18] sm:$0xff] }
 0xc56   : > { %6078 = vmatmul.mubr.f32.vlgmr.msra.gmra.mrb[40].mxu1 %v8860_v36  ;;  %7926 = vmatprep.subr.bf16.mxu0 %v7925_v38  ;;  %v7955_v38 = vpack.c.bf16 %v5836_v33, %v5834_v32  ;;  %v7957_v39 = vpack.c.bf16 %v5841_v37, %v5839_v34  ;;  %v5868_v32 = vld [vmem:[#allocation2 + $0xdf0] sm:$0xff]  ;;  %v6093_v33 = vld [vmem:[#allocation2 + $0x1008] sm:$0xff]  ;;  %v6095_v34 = vld [vmem:[#allocation2 + $0x1018] sm:$0xff] }
 0xc58   : > { %5649 = vmatmul.mubr.f32.vlgmr.msra.gmra.mrb[24].mxu0 %v8860_v36 }
 0xc59   : > { %7928 = vmatpush1.bf16.msra.mxu0 %v7927_v52  ;;  %5934 = vmatprep.mubr.f32.mxu0 %v8862_v47  ;;  %v5845_v52 = vld [vmem:[#allocation2 + $0xd38] sm:$0xff] }
 0xc5a   : > { %7930 = vmatprep.subr.bf16.mxu0 %v7929_v15  ;;  %v7959_v15 = vpack.c.bf16 %v5840_v50, %v5838_v48  ;;  %v7961_v54 = vpack.c.bf16 %v5845_v52, %v5843_v51  ;;  %v6094_v48 = vld [vmem:[#allocation2 + $0x1010] sm:$0xff]  ;;  %v6097_v50 = vld [vmem:[#allocation2 + $0x1028] sm:$0xff]  ;;  %v6099_v51 = vld [vmem:[#allocation2 + $0x1038] sm:$0xff] }
 0xc5d   : > { %7932 = vmatpush1.bf16.msra.mxu0 %v7931_v8  ;;  %v5849_v8 = vld [vmem:[#allocation2 + $0xd58] sm:$0xff] }
 0xc5e   : > { %7934 = vmatprep.subr.bf16.mxu0 %v7933_v58  ;;  %v7963_v58 = vpack.c.bf16 %v5844_v55, %v5842_v13  ;;  %v7965_v59 = vpack.c.bf16 %v5849_v8, %v5847_v57  ;;  %v6098_v13 = vld [vmem:[#allocation2 + $0x1030] sm:$0xff]  ;;  %v6101_v55 = vld [vmem:[#allocation2 + $0x1048] sm:$0xff]  ;;  %v6103_v57 = vld [vmem:[#allocation2 + $0x1058] sm:$0xff] }
 0xc61   : > { %7936 = vmatpush1.bf16.msra.mxu0 %v7935_v63  ;;  %v5853_v63 = vld [vmem:[#allocation2 + $0xd78] sm:$0xff] }
 0xc62   : > { %7938 = vmatprep.subr.bf16.mxu0 %v7937_v0  ;;  %v7967_v0 = vpack.c.bf16 %v5848_v61, %v5846_v60  ;;  %v7969_v27 = vpack.c.bf16 %v5853_v63, %v5851_v62  ;;  %v6102_v60 = vld [vmem:[#allocation2 + $0x1050] sm:$0xff]  ;;  %v6105_v61 = vld [vmem:[#allocation2 + $0x1068] sm:$0xff]  ;;  %v6107_v62 = vld [vmem:[#allocation2 + $0x1078] sm:$0xff] }
 0xc65   : > { %7940 = vmatpush1.bf16.msra.mxu0 %v7939_v6  ;;  %v5857_v6 = vld [vmem:[#allocation2 + $0xd98] sm:$0xff] }
 0xc66   : > { %7942 = vmatprep.subr.bf16.mxu0 %v7941_v42  ;;  %v7971_v42 = vpack.c.bf16 %v5852_v3, %v5850_v2  ;;  %v7973_v4 = vpack.c.bf16 %v5857_v6, %v5855_v5  ;;  %v6106_v2 = vld [vmem:[#allocation2 + $0x1070] sm:$0xff]  ;;  %v6109_v3 = vld [vmem:[#allocation2 + $0x1088] sm:$0xff]  ;;  %v6111_v5 = vld [vmem:[#allocation2 + $0x1098] sm:$0xff] }
 0xc69   : > { %7944 = vmatpush1.bf16.msra.mxu0 %v7943_v12  ;;  %v8884_v40 = vpop.f32.mrb[34].mxu1  ;;  %v5859_v12 = vld [vmem:[#allocation2 + $0xda8] sm:$0xff] }
 0xc6a   : > { %v4829_v18 = vpop.f32.mrb[18].mxu0  ;;  %v8886_v19 = vpop.f32.mrb[35].mxu1  ;;  %7946 = vmatprep.subr.bf16.mxu0 %v7945_v14  ;;  %v5861_v14 = vld [vmem:[#allocation2 + $0xdb8] sm:$0xff] }
 0xc6b   : > { %v4831_v23 = vpop.f32.mrb[19].mxu0  ;;  %v7977_v35 = vpack.c.bf16 %v5861_v14, %v5859_v12  ;;  %v8073_v14 = vpack.c.bf16 %v6115_v10, %v6113_v9  ;;  %v6140_v9 = vld [vmem:[#allocation2 + $0x1180] sm:$0xff]  ;;  %v6142_v10 = vld [vmem:[#allocation2 + $0x1190] sm:$0xff] }
 0xc6c   : > { %v4834_v28 = vadd.f32 %v4831_v23, %v4829_v18  ;;  %v5865_v18 = vld [vmem:[#allocation2 + $0xdd8] sm:$0xff]  ;;  %v5864_v23 = vld [vmem:[#allocation2 + $0xdd0] sm:$0xff] }
 0xc6d   : > { %7948 = vmatpush1.bf16.msra.mxu0 %v7947_v17  ;;  %v5863_v17 = vld [vmem:[#allocation2 + $0xdc8] sm:$0xff] }
 0xc6e   : > { %4835 = vadd.xlane.f32.xlu0 %v4834_v28  ;;  %7950 = vmatprep.subr.bf16.mxu0 %v7949_v20  ;;  %v7979_v20 = vpack.c.bf16 %v5860_v16, %v5858_v29  ;;  %v7981_v21 = vpack.c.bf16 %v5865_v18, %v5863_v17  ;;  %v7983_v28 = vpack.c.bf16 %v5864_v23, %v5862_v22  ;;  %v6117_v29 = vld [vmem:[#allocation2 + $0x10c8] sm:$0xff]  ;;  %v6119_v16 = vld [vmem:[#allocation2 + $0x10d8] sm:$0xff]  ;;  %v6116_v22 = vld [vmem:[#allocation2 + $0x10c0] sm:$0xff] }
 0xc6f   : > { %v6118_v23 = vld [vmem:[#allocation2 + $0x10d0] sm:$0xff] }
 0xc71   : > { %7952 = vmatpush1.bf16.msra.mxu0 %v7951_v44  ;;  %v7985_v44 = vpack.c.bf16 %v5869_v26, %v5867_v24  ;;  %v6121_v26 = vld [vmem:[#allocation2 + $0x10e8] sm:$0xff] }
 0xc72   : > { %7954 = vmatprep.subr.bf16.mxu0 %v7953_v30  ;;  %v5866_v30 = vld [vmem:[#allocation2 + $0xde0] sm:$0xff] }
 0xc73   : > { %v7987_v37 = vpack.c.bf16 %v5868_v32, %v5866_v30  ;;  %v8079_v30 = vpack.c.bf16 %v6118_v23, %v6116_v22 }
 0xc75   : > { %7956 = vmatpush1.bf16.msra.mxu0 %v7955_v38  ;;  %v8053_v38 = vpack.c.bf16 %v6095_v34, %v6093_v33  ;;  %v6120_v33 = vld [vmem:[#allocation2 + $0x10e0] sm:$0xff]  ;;  %v6122_v34 = vld [vmem:[#allocation2 + $0x10f0] sm:$0xff] }
 0xc76   : > { %7958 = vmatprep.subr.bf16.mxu0 %v7957_v39  ;;  %v6092_v39 = vld [vmem:[#allocation2 + $0x1000] sm:$0xff] }
 0xc77   : > { %v8055_v52 = vpack.c.bf16 %v6094_v48, %v6092_v39  ;;  %v8083_v39 = vpack.c.bf16 %v6122_v34, %v6120_v33 }
 0xc79   : > { %7960 = vmatpush1.bf16.msra.mxu0 %v7959_v15  ;;  %v8057_v15 = vpack.c.bf16 %v6099_v51, %v6097_v50  ;;  %v6124_v50 = vld [vmem:[#allocation2 + $0x1100] sm:$0xff]  ;;  %v6126_v51 = vld [vmem:[#allocation2 + $0x1110] sm:$0xff] }
 0xc7a   : > { %7962 = vmatprep.subr.bf16.mxu0 %v7961_v54  ;;  %v6096_v54 = vld [vmem:[#allocation2 + $0x1020] sm:$0xff] }
 0xc7b   : > { %v8059_v8 = vpack.c.bf16 %v6098_v13, %v6096_v54  ;;  %v8087_v54 = vpack.c.bf16 %v6126_v51, %v6124_v50 }
 0xc7d   : > { %7964 = vmatpush1.bf16.msra.mxu0 %v7963_v58  ;;  %v8061_v58 = vpack.c.bf16 %v6103_v57, %v6101_v55  ;;  %v6128_v55 = vld [vmem:[#allocation2 + $0x1120] sm:$0xff]  ;;  %v6130_v57 = vld [vmem:[#allocation2 + $0x1130] sm:$0xff] }
 0xc7e   : > { %7966 = vmatprep.subr.bf16.mxu0 %v7965_v59  ;;  %v6100_v59 = vld [vmem:[#allocation2 + $0x1040] sm:$0xff] }
 0xc7f   : > { %v8063_v63 = vpack.c.bf16 %v6102_v60, %v6100_v59  ;;  %v8091_v59 = vpack.c.bf16 %v6130_v57, %v6128_v55  ;;  %v8920_v55 = vld [vmem:[%s9094_s7] sm:$0xff] }
 0xc80   : > { %v4852_v57 = vld [vmem:[%s9095_s5] sm:$0xff]  ;;  %vm4864_vm6 = vcmp.gt.f32.partialorder %v8920_v55, 0.0 }
 0xc81   : > { %7968 = vmatpush1.bf16.msra.mxu0 %v7967_v0  ;;  %v8065_v0 = vpack.c.bf16 %v6107_v62, %v6105_v61  ;;  %v6132_v61 = vld [vmem:[#allocation2 + $0x1140] sm:$0xff]  ;;  %v6134_v62 = vld [vmem:[#allocation2 + $0x1150] sm:$0xff] }
 0xc82   : > { %7970 = vmatprep.subr.bf16.mxu0 %v7969_v27  ;;  %v6104_v27 = vld [vmem:[#allocation2 + $0x1060] sm:$0xff] }
 0xc83   : > { %v8067_v6 = vpack.c.bf16 %v6106_v2, %v6104_v27  ;;  %v8095_v27 = vpack.c.bf16 %v6134_v62, %v6132_v61 }
 0xc84   : > { %4893 = vrot.lane.b32.xlu0 %v8891_v7, %s8370_s0 }
 0xc85   : > { %7972 = vmatpush1.bf16.msra.mxu0 %v7971_v42  ;;  %v8069_v42 = vpack.c.bf16 %v6111_v5, %v6109_v3  ;;  %v6136_v3 = vld [vmem:[#allocation2 + $0x1160] sm:$0xff]  ;;  %v6138_v5 = vld [vmem:[#allocation2 + $0x1170] sm:$0xff] }
 0xc86   : > { %7974 = vmatprep.subr.bf16.mxu0 %v7973_v4  ;;  %v6110_v4 = vld [vmem:[#allocation2 + $0x1090] sm:$0xff] }
 0xc89   : > { %7976 = vmatpush1.bf16.msra.mxu0 %v7975_v56  ;;  %v6112_v56 = vld [vmem:[#allocation2 + $0x10a0] sm:$0xff] }
 0xc8a   : > { %7978 = vmatprep.subr.bf16.mxu0 %v7977_v35  ;;  %v6114_v35 = vld [vmem:[#allocation2 + $0x10b0] sm:$0xff] }
 0xc8b   : > { %v8075_v18 = vpack.c.bf16 %v6114_v35, %v6112_v56  ;;  %v8103_v56 = vpack.c.bf16 %v6142_v10, %v6140_v9 }
 0xc8d   : > { %7980 = vmatpush1.bf16.msra.mxu0 %v7979_v20 }
 0xc8e   : > { %7982 = vmatprep.subr.bf16.mxu0 %v7981_v21  ;;  %v8077_v21 = vpack.c.bf16 %v6119_v16, %v6117_v29  ;;  %v6144_v29 = vld [vmem:[#allocation2 + $0x11a0] sm:$0xff]  ;;  %v6146_v16 = vld [vmem:[#allocation2 + $0x11b0] sm:$0xff] }
 0xc8f   : > { %v8107_v22 = vpack.c.bf16 %v6146_v16, %v6144_v29 }
 0xc91   : > { %7984 = vmatpush1.bf16.msra.mxu0 %v7983_v28  ;;  %v6123_v28 = vld [vmem:[#allocation2 + $0x10f8] sm:$0xff] }
 0xc92   : > { %7986 = vmatprep.subr.bf16.mxu0 %v7985_v44  ;;  %v8081_v32 = vpack.c.bf16 %v6123_v28, %v6121_v26  ;;  %v6148_v26 = vld [vmem:[#allocation2 + $0x11c0] sm:$0xff]  ;;  %v6150_v28 = vld [vmem:[#allocation2 + $0x11d0] sm:$0xff] }
 0xc93   : > { %v8111_v33 = vpack.c.bf16 %v6150_v28, %v6148_v26 }
 0xc95   : > { %7988 = vmatpush1.bf16.msra.mxu0 %v7987_v37  ;;  %v6125_v37 = vld [vmem:[#allocation2 + $0x1108] sm:$0xff] }
 0xc96   : > { %8054 = vmatprep.subr.bf16.mxu0 %v8053_v38  ;;  %v6127_v38 = vld [vmem:[#allocation2 + $0x1118] sm:$0xff] }
 0xc97   : > { %v8085_v48 = vpack.c.bf16 %v6127_v38, %v6125_v37  ;;  %v6152_v37 = vld [vmem:[#allocation2 + $0x11e0] sm:$0xff]  ;;  %v6154_v38 = vld [vmem:[#allocation2 + $0x11f0] sm:$0xff] }
 0xc98   : > { %5935 = vmatmul.mubr.f32.vlgmr.msra.gmra.mrb[26].mxu0 %v8860_v36 }
 0xc99   : > { %8056 = vmatpush1.bf16.msra.mxu0 %v8055_v52  ;;  %6220 = vmatprep.mubr.f32.mxu0 %v8862_v47  ;;  %v6108_v47 = vld [vmem:[#allocation2 + $0x1080] sm:$0xff]  ;;  %v6129_v52 = vld [vmem:[#allocation2 + $0x1128] sm:$0xff] }
 0xc9a   : > { %8058 = vmatprep.subr.bf16.mxu0 %v8057_v15  ;;  %v8071_v12 = vpack.c.bf16 %v6110_v4, %v6108_v47  ;;  %v6131_v15 = vld [vmem:[#allocation2 + $0x1138] sm:$0xff]  ;;  %v8099_v47 = vpack.c.bf16 %v6138_v5, %v6136_v3 }
 0xc9b   : > { %v8089_v13 = vpack.c.bf16 %v6131_v15, %v6129_v52  ;;  %v4838_v15 = vld [vmem:[%s9041_s22] sm:$0xff] }
 0xc9d   : > { %8060 = vmatpush1.bf16.msra.mxu0 %v8059_v8  ;;  %v6133_v8 = vld [vmem:[#allocation2 + $0x1148] sm:$0xff] }
 0xc9e   : > { %8062 = vmatprep.subr.bf16.mxu0 %v8061_v58  ;;  %v6135_v58 = vld [vmem:[#allocation2 + $0x1158] sm:$0xff] }
 0xc9f   : > { %v8093_v60 = vpack.c.bf16 %v6135_v58, %v6133_v8 }
 0xca1   : > { %8064 = vmatpush1.bf16.msra.mxu0 %v8063_v63  ;;  %v6137_v63 = vld [vmem:[#allocation2 + $0x1168] sm:$0xff] }
 0xca2   : > { %8066 = vmatprep.subr.bf16.mxu0 %v8065_v0  ;;  %v6139_v0 = vld [vmem:[#allocation2 + $0x1178] sm:$0xff] }
 0xca3   : > { %v8097_v2 = vpack.c.bf16 %v6139_v0, %v6137_v63  ;;  %v8934_v0 = vld [vmem:[%s9096_s9] sm:$0xff] }
 0xca5   : > { %8068 = vmatpush1.bf16.msra.mxu0 %v8067_v6  ;;  %v6141_v6 = vld [vmem:[#allocation2 + $0x1188] sm:$0xff] }
 0xca6   : > { %8070 = vmatprep.subr.bf16.mxu0 %v8069_v42  ;;  %v6143_v42 = vld [vmem:[#allocation2 + $0x1198] sm:$0xff] }
 0xca7   : > { %v8101_v4 = vpack.c.bf16 %v6143_v42, %v6141_v6  ;;  %v4757_v42 = vpop.xlane.xlu1 %4756 }
 0xca8   : > { %v4758_v9 = vmul.f32 0.00390625, %v4757_v42 }
 0xca9   : > { %v8897_v17 = vpop.f32.mrb[36].mxu1  ;;  %8072 = vmatpush1.bf16.msra.mxu0 %v8071_v12  ;;  %v6145_v12 = vld [vmem:[#allocation2 + $0x11a8] sm:$0xff] }
 0xcaa   : > { %v8899_v20 = vpop.f32.mrb[37].mxu1  ;;  %8074 = vmatprep.subr.bf16.mxu0 %v8073_v14  ;;  %v6147_v14 = vld [vmem:[#allocation2 + $0x11b8] sm:$0xff] }
 0xcab   : > { %v8901_v24 = vpop.f32.mrb[20].mxu0  ;;  %v8105_v35 = vpack.c.bf16 %v6147_v14, %v6145_v12 }
 0xcac   : > { %v8903_v44 = vpop.f32.mrb[21].mxu0 }
 0xcad   : > { %8076 = vmatpush1.bf16.msra.mxu0 %v8075_v18  ;;  %v6149_v18 = vld [vmem:[#allocation2 + $0x11c8] sm:$0xff] }
 0xcae   : > { %8078 = vmatprep.subr.bf16.mxu0 %v8077_v21  ;;  %v6151_v21 = vld [vmem:[#allocation2 + $0x11d8] sm:$0xff] }
 0xcaf   : > { %v8109_v23 = vpack.c.bf16 %v6151_v21, %v6149_v18 }
 0xcb1   : > { %8080 = vmatpush1.bf16.msra.mxu0 %v8079_v30  ;;  %v6153_v30 = vld [vmem:[#allocation2 + $0x11e8] sm:$0xff] }
 0xcb2   : > { %8082 = vmatprep.subr.bf16.mxu0 %v8081_v32  ;;  %v6155_v32 = vld [vmem:[#allocation2 + $0x11f8] sm:$0xff] }
 0xcb3   : > { %v8113_v34 = vpack.c.bf16 %v6155_v32, %v6153_v30 }
 0xcb5   : > { %8084 = vmatpush1.bf16.msra.mxu0 %v8083_v39  ;;  %v8115_v39 = vpack.c.bf16 %v6154_v38, %v6152_v37 }
 0xcb6   : > { %8086 = vmatprep.subr.bf16.mxu0 %v8085_v48 }
 0xcb9   : > { %8088 = vmatpush1.bf16.msra.mxu0 %v8087_v54 }
 0xcba   : > { %8090 = vmatprep.subr.bf16.mxu0 %v8089_v13 }
 0xcbd   : > { %8092 = vmatpush1.bf16.msra.mxu0 %v8091_v59 }
 0xcbe   : > { %8094 = vmatprep.subr.bf16.mxu0 %v8093_v60 }
 0xcc1   : > { %8096 = vmatpush1.bf16.msra.mxu0 %v8095_v27 }
 0xcc2   : > { %8098 = vmatprep.subr.bf16.mxu0 %v8097_v2 }
 0xcc5   : > { %8100 = vmatpush1.bf16.msra.mxu0 %v8099_v47 }
 0xcc6   : > { %8102 = vmatprep.subr.bf16.mxu0 %v8101_v4 }
 0xcc9   : > { %8104 = vmatpush1.bf16.msra.mxu0 %v8103_v56 }
 0xcca   : > { %8106 = vmatprep.subr.bf16.mxu0 %v8105_v35 }
 0xccd   : > { %8108 = vmatpush1.bf16.msra.mxu0 %v8107_v22 }
 0xcce   : > { %8110 = vmatprep.subr.bf16.mxu0 %v8109_v23 }
 0xcd1   : > { %8112 = vmatpush1.bf16.msra.mxu0 %v8111_v33 }
 0xcd2   : > { %8114 = vmatprep.subr.bf16.mxu0 %v8113_v34 }
 0xcd5   : > { %8116 = vmatpush1.bf16.msra.mxu0 %v8115_v39 }
 0xcd8   : > { %6221 = vmatmul.mubr.f32.vlgmr.msra.gmra.mrb[28].mxu0 %v8860_v36 }
 0xce9   : > { %v8906_v48 = vpop.f32.mrb[38].mxu1 }
 0xcea   : > { %v8908_v50 = vpop.f32.mrb[39].mxu1 }
 0xceb   : > { %v8910_v51 = vpop.f32.mrb[22].mxu0 }
 0xcec   : > { %v8912_v52 = vpop.f32.mrb[23].mxu0 }
 0xcfb   : > { %v4836_v54 = vpop.xlane.xlu0 %4835 }
 0xcfc   : > { %v4837_v13 = vmul.f32 0.00390625, %v4836_v54 }
 0xcfe   : > { %v4839_v36 = vadd.f32 %v4838_v15, %v4837_v13 }
 0xcff   : > { %v4894_v21 = vpop.permute.xlu0 %4893 }
 0xd00   : > { %4888 = vrot.lane.b32.xlu1 %v4839_v36, %s8370_s0  ;;  %v4841_v8 = vmul.f32 %v8920_v55, %v4839_v36 }
 0xd02   : > { %v4843_v58 = vmul.f32 %v8891_v7, %v4841_v8  ;;  %v4853_v59 = vmul.f32 %v4852_v57, %v4841_v8 }
 0xd04   : > { %v4845_v60 = vsel %vm4844_vm4, %v4843_v58, 0.0  ;;  %v4854_v61 = vsel %vm4844_vm4, %v4853_v59, 0.0  ;;  %4906 = vrot.lane.b32.xlu1 %v4852_v57, %s8370_s0  ;;  %s6380_s0 = sshll.u32 %s9101_s30, 4 }
 0xd05   : > { %v4846_v62 = vrot.slane %v4845_v60, 4  ;;  %v4855_v63 = vrot.slane %v4854_v61, 4  ;;  %s887_s27 = scalar_lea.vmem %s9098_s26, %s6380_s0 }
 0xd07   : > { %v4847_v27 = vadd.f32 %v4846_v62, %v4845_v60  ;;  %v4856_v2 = vadd.f32 %v4855_v63, %v4854_v61 }
 0xd08   : > { %5227 = vperm.xlu1 %8204, %v8934_v0  }
 0xd09   : > { %v4848_v3 = vrot.slane %v4847_v27, 2  ;;  %v4857_v7 = vrot.slane %v4856_v2, 2 }
 0xd0b   : > { %v4849_v5 = vadd.f32 %v4848_v3, %v4847_v27  ;;  %v4858_v6 = vadd.f32 %v4857_v7, %v4856_v2 }
 0xd0c   : > { %8206 = vset.pattern.permute.xlu1 %v8364_v25 }
 0xd0d   : > { %v4850_v47 = vrot.slane %v4849_v5, 1  ;;  %v4859_v4 = vrot.slane %v4858_v6, 1  ;;  %5513 = vperm.xlu1 %8206, %v8934_v0  }
 0xd0f   : > { %v4851_v10 = vadd.f32 %v4850_v47, %v4849_v5  ;;  %v4860_v14 = vadd.f32 %v4859_v4, %v4858_v6 }
 0xd11   : > { %v4861_v12 = vmul.f32 %v4851_v10, %v4758_v9  ;;  %8207 = vset.pattern.permute.xlu1 %v8366_v41 }
 0xd12   : > { %5656 = vperm.xlu1 %8207, %v8934_v0  }
 0xd13   : > { %v8941_v56 = vadd.f32 %v4861_v12, %v4860_v14 }
 0xd16   : > { %8209 = vset.pattern.permute.xlu1 %v8367_v43  ;;  %v6235_v43 = vld [vmem:[%s9097_s24] sm:$0xff] }
 0xd17   : > { %5942 = vperm.xlu1 %8209, %v8934_v0  }
 0xd1b   : > { %8210 = vset.pattern.permute.xlu1 %v8368_v31 }
 0xd1c   : > { %6085 = vperm.xlu1 %8210, %v8934_v0  }
 0xd20   : > { %8212 = vset.pattern.permute.xlu1 %v8361_v1 }
 0xd21   : > { %6238 = vperm.xlu1 %8212, %v6235_v43  }
 0xd29   : > { %v8948_v25 = vpop.f32.mrb[40].mxu1 }
 0xd2a   : > { %v8950_v35 = vpop.f32.mrb[41].mxu1 }
 0xd2b   : > { %v8952_v29 = vpop.f32.mrb[24].mxu0 }
 0xd2c   : > { %v8954_v41 = vpop.f32.mrb[25].mxu0 }
 0xd6b   : > { %v8959_v16 = vpop.f32.mrb[26].mxu0 }
 0xd6c   : > { %v8961_v31 = vpop.f32.mrb[27].mxu0 }
 0xd72   : > { %v4889_v18 = vpop.permute.xlu1 %4888 }
 0xd73   : > { %v4891_v22 = vmul.f32 %v4889_v18, %v8920_v55 }
 0xd75   : > { %v4896_v23 = vmul.f32 %v4894_v21, %v4891_v22 }
 0xd76   : > { %v4907_v26 = vpop.permute.xlu1 %4906 }
 0xd77   : > { %v4898_v28 = vsel %vm4897_vm5, %v4896_v23, 0.0  ;;  %v4909_v30 = vmul.f32 %v4907_v26, %v4891_v22 }
 0xd78   : > { %v4899_v32 = vrot.slane %v4898_v28, 4 }
 0xd79   : > { %v4910_v33 = vsel %vm4897_vm5, %v4909_v30, 0.0 }
 0xd7a   : > { %v4900_v34 = vadd.f32 %v4899_v32, %v4898_v28  ;;  %v4911_v37 = vrot.slane %v4910_v33, 4  ;;  %v4863_v32 = vmul.f32 0.70710677, %v8941_v56 }
 0xd7c   : > { %v4901_v38 = vrot.slane %v4900_v34, 2  ;;  %v4912_v39 = vadd.f32 %v4911_v37, %v4910_v33  ;;  %v4865_v33 = vsel %vm4864_vm6, %v4863_v32, -1e+30 }
 0xd7e   : > { %v4902_v15 = vadd.f32 %v4901_v38, %v4900_v34  ;;  %v4913_v54 = vrot.slane %v4912_v39, 2  ;;  %v4866_v34 = vsel %vm4844_vm4, %v4865_v33, -inf }
 0xd80   : > { %v4903_v13 = vrot.slane %v4902_v15, 1  ;;  %v4914_v36 = vadd.f32 %v4913_v54, %v4912_v39 }
 0xd82   : > { %v4904_v57 = vadd.f32 %v4903_v13, %v4902_v15  ;;  %v4915_v8 = vrot.slane %v4914_v36, 1 }
 0xd84   : > { %v4917_v58 = vmul.f32 %v4904_v57, %v4758_v9  ;;  %v4916_v59 = vadd.f32 %v4915_v8, %v4914_v36 }
 0xd86   : > { %v4918_v60 = vadd.f32 %v4917_v58, %v4916_v59 }
 0xd88   : > { %v4919_v61 = vmul.f32 0.70710677, %v4918_v60 }
 0xd8a   : > { %v4920_v62 = vsel %vm4864_vm6, %v4919_v61, -1e+30 }
 0xd8b   : > { %v4921_v63 = vsel %vm4897_vm5, %v4920_v62, -inf }
 0xd8c   : > { %v4922_v27 = vrot.slane %v4921_v63, 4 }
 0xd8e   : > { %v4923_v2 = vmax.f32 %v4921_v63, %v4922_v27  ;;  %v5228_v27 = vpop.permute.xlu1 %5227 }
 0xd8f   : > { %v5230_v55 = vmul.f32 %v5228_v27, %v8884_v40 }
 0xd90   : > { %v4924_v3 = vrot.slane %v4923_v2, 2 }
 0xd92   : > { %v4925_v7 = vmax.f32 %v4923_v2, %v4924_v3  ;;  %v5514_v2 = vpop.permute.xlu1 %5513 }
 0xd94   : > { %v4926_v5 = vrot.slane %v4925_v7, 1 }
 0xd96   : > { %v4927_v6 = vmax.f32 %v4925_v7, %v4926_v5  ;;  %v5231_v7 = vmul.f32 %v5228_v27, %v8886_v19  ;;  %v5657_v5 = vpop.permute.xlu1 %5656 }
 0xd97   : > { %v5659_v19 = vmul.f32 %v5657_v5, %v8952_v29 }
 0xd98   : > { %v4928_v42 = vsub.f32 %v4920_v62, %v4927_v6 }
 0xd9a   : > { %v4929_v47 = vmul.f32 1.442695, %v4928_v42 }
 0xd9c   : > { %8243 = vpow2.f32 %v4929_v47 }
 0xda6   : > { %v8244_v4 = vpop.eup %8243 }
 0xda7   : > { %v4931_v9 = vsel %vm4864_vm6, %v8244_v4, 0.0 }
 0xda8   : > { %v4932_v10 = vsel %vm4897_vm5, %v4931_v9, 0.0 }
 0xda9   : > { %v4933_v12 = vrot.slane %v4932_v10, 4 }
 0xdab   : > { %v8973_v14 = vpop.f32.mrb[28].mxu0  ;;  %v4934_v43 = vadd.f32 %v4933_v12, %v4932_v10 }
 0xdac   : > { %v8975_v18 = vpop.f32.mrb[29].mxu0 }
 0xdad   : > { %v4935_v21 = vrot.slane %v4934_v43, 2 }
 0xdaf   : > { %v4936_v22 = vadd.f32 %v4935_v21, %v4934_v43  ;;  %v5943_v43 = vpop.permute.xlu1 %5942  ;;  %v5516_v21 = vmul.f32 %v5514_v2, %v8897_v17 }
 0xdb0   : > { %v5945_v17 = vmul.f32 %v5943_v43, %v8959_v16 }
 0xdb1   : > { %v4937_v23 = vrot.slane %v4936_v22, 1 }
 0xdb3   : > { %v4938_v26 = vadd.f32 %v4937_v23, %v4936_v22  ;;  %v5517_v22 = vmul.f32 %v5514_v2, %v8899_v20  ;;  %v5946_v20 = vmul.f32 %v5943_v43, %v8961_v31 }
 0xdb5   : > { %8245 = vrcp.f32 %v4938_v26 }
 0xdbf   : > { %v8246_v28 = vpop.eup %8245 }
 0xdc0   : > { %v4940_v30 = vmul.f32 %v8246_v28, %v4931_v9 }
 0xdc2   : > { %4942 = vrot.lane.b32.xlu0 %v4940_v30, %s8371_s3 }
 0xdc6   : > { %5084 = vperm.xlu0 %8203, %v8934_v0  }
 0xdca   : > { %8205 = vset.pattern.permute.xlu0 %v8363_v11  ;;  %v4867_v11 = vrot.slane %v4866_v34, 4 }
 0xdcb   : > { %5370 = vperm.xlu0 %8205, %v8934_v0  }
 0xdcc   : > { %v4868_v37 = vmax.f32 %v4866_v34, %v4867_v11 }
 0xdce   : > { %v4869_v38 = vrot.slane %v4868_v37, 2 }
 0xdcf   : > { %8208 = vset.pattern.permute.xlu0 %v8365_v49 }
 0xdd0   : > { %5799 = vperm.xlu0 %8208, %v8934_v0   ;;  %v4870_v39 = vmax.f32 %v4868_v37, %v4869_v38 }
 0xdd2   : > { %v4871_v49 = vrot.slane %v4870_v39, 1 }
 0xdd4   : > { %8211 = vset.pattern.permute.xlu0 %v8369_v53  ;;  %v4872_v15 = vmax.f32 %v4870_v39, %v4871_v49 }
 0xdd5   : > { %6228 = vperm.xlu0 %8211, %v8934_v0  }
 0xdd6   : > { %v4873_v54 = vsub.f32 %v4865_v33, %v4872_v15  ;;  %v6086_v33 = vpop.permute.xlu1 %6085 }
 0xdd7   : > { %v6089_v37 = vmul.f32 %v6086_v33, %v8950_v35 }
 0xdd8   : > { %v4874_v13 = vmul.f32 1.442695, %v4873_v54 }
 0xdd9   : > { %8213 = vset.pattern.permute.xlu0 %v8361_v1 }
 0xdda   : > { %8247 = vpow2.f32 %v4874_v13  ;;  %v6239_v13 = vpop.permute.xlu1 %6238 }
 0xde4   : > { %v8248_v56 = vpop.eup %8247 }
 0xde5   : > { %v4876_v53 = vsel %vm4864_vm6, %v8248_v56, 0.0 }
 0xde6   : > { %v4877_v36 = vsel %vm4844_vm4, %v4876_v53, 0.0 }
 0xde7   : > { %v4878_v0 = vrot.slane %v4877_v36, 4 }
 0xde9   : > { %v4879_v57 = vadd.f32 %v4878_v0, %v4877_v36 }
 0xdeb   : > { %v4880_v8 = vrot.slane %v4879_v57, 2 }
 0xded   : > { %v4881_v58 = vadd.f32 %v4880_v8, %v4879_v57 }
 0xdef   : > { %v4882_v1 = vrot.slane %v4881_v58, 1 }
 0xdf1   : > { %v4883_v59 = vadd.f32 %v4882_v1, %v4881_v58 }
 0xdf3   : > { %8249 = vrcp.f32 %v4883_v59 }
 0xdfd   : > { %v8250_v60 = vpop.eup %8249 }
 0xdfe   : > { %v4885_v61 = vmul.f32 %v8250_v60, %v4876_v53 }
 0xe34   : > { %v4943_v62 = vpop.permute.xlu0 %4942 }
 0xe35   : > { %v4945_v63 = vadd.f32 %v4943_v62, %v4885_v61 }
 0xe37   : > { %6245 = vperm.xlu1 %8212, %v4945_v63  }
 0xe45   : > { %v5085_v3 = vpop.permute.xlu0 %5084 }
 0xe46   : > { %v5087_v6 = vmul.f32 %v5085_v3, %v8901_v24  ;;  %v5088_v42 = vmul.f32 %v5085_v3, %v8903_v44  ;;  %v5660_v24 = vmul.f32 %v5657_v5, %v8954_v41  ;;  %v6088_v41 = vmul.f32 %v6086_v33, %v8948_v25 }
 0xe48   : > { %v5232_v47 = vadd.f32 %v5230_v55, %v5087_v6  ;;  %v5233_v4 = vadd.f32 %v5231_v7, %v5088_v42 }
 0xe4a   : > { %v5371_v9 = vpop.permute.xlu0 %5370 }
 0xe4b   : > { %v5373_v10 = vmul.f32 %v5371_v9, %v8910_v51  ;;  %v5374_v12 = vmul.f32 %v5371_v9, %v8912_v52 }
 0xe4d   : > { %v5375_v40 = vadd.f32 %v5373_v10, %v5232_v47  ;;  %v5376_v23 = vadd.f32 %v5374_v12, %v5233_v4 }
 0xe4f   : > { %v5518_v26 = vadd.f32 %v5516_v21, %v5375_v40  ;;  %v5519_v44 = vadd.f32 %v5517_v22, %v5376_v23  ;;  %v5800_v28 = vpop.permute.xlu0 %5799 }
 0xe50   : > { %v5802_v30 = vmul.f32 %v5800_v28, %v8906_v48  ;;  %v5803_v51 = vmul.f32 %v5800_v28, %v8908_v50 }
 0xe51   : > { %v5661_v32 = vadd.f32 %v5659_v19, %v5518_v26  ;;  %v5662_v52 = vadd.f32 %v5660_v24, %v5519_v44 }
 0xe53   : > { %v5804_v34 = vadd.f32 %v5802_v30, %v5661_v32  ;;  %v5805_v11 = vadd.f32 %v5803_v51, %v5662_v52 }
 0xe54   : > { %v6229_v29 = vpop.permute.xlu0 %6228 }
 0xe55   : > { %v5947_v38 = vadd.f32 %v5945_v17, %v5804_v34  ;;  %v5948_v39 = vadd.f32 %v5946_v20, %v5805_v11  ;;  %v6231_v50 = vmul.f32 %v6229_v29, %v8973_v14  ;;  %v6232_v15 = vmul.f32 %v6229_v29, %v8975_v18 }
 0xe57   : > { %v6090_v48 = vadd.f32 %v6088_v41, %v5947_v38  ;;  %v6091_v49 = vadd.f32 %v6089_v37, %v5948_v39 }
 0xe59   : > { %v6233_v54 = vadd.f32 %v6231_v50, %v6090_v48  ;;  %v6234_v16 = vadd.f32 %v6232_v15, %v6091_v49 }
 0xe5b   : > { %v6241_v31 = vadd.f32 %v6239_v13, %v6233_v54  ;;  %v6242_v56 = vadd.f32 %v6239_v13, %v6234_v16 }
 0xeb6   : > { %v6246_v53 = vpop.permute.xlu1 %6245 }
 0xeb7   : > { %v6248_v36 = vmul.f32 %v6246_v53, %v6241_v31  ;;  %v6249_v0 = vmul.f32 %v6246_v53, %v6242_v56 }
 0xeb9   : > { %v6250_v25 = vadd.f32 %v6248_v36, %v8845_v45  ;;  %v6251_v35 = vadd.f32 %v6249_v0, %v8848_v46 }
 0xebb   : > { %6252 = vst [vmem:[%s887_s27] sm:$0xff] %v6250_v25  ;;  %6253 = vst [vmem:[%s887_s27 + $0x8] sm:$0xff] %v6251_v35 }
 0xebc PF: > { %s9099_s7 = sld [smem:[#allocation9_spill]] }
 0xec2   : > { %s40_s8 = sadd.s32 1, %s9099_s7  }
 0xec3   : > { %p37_p5 = scmp.ge.s32.totalorder %s40_s8, 4  }
 0xec5   :  { %39 = sbr.rel (!%p37_p5) target bundleno = 21 (0x15), region = 191 }
 0xecc   :  { %6275 = vsyncpa [#allocation3], 1 }
 0xecd   :  { %6277 = vsyncpa [#allocation3 + $0x1], 1 }
 0xece   :  { %6278 = vsyncpa [#allocation5], 1 }

</bundles_post_ra>
